<compile_context>
chip_gen: v7x
topology: tpu7x:2x2x1
jax: 0.10.0
libtpu: 0.0.40
codegen_flags: <defaults>
</compile_context>

<pallas_src>
import functools

import jax
import jax.numpy as jnp
from jax.experimental import pallas as pl
from jax.experimental.pallas import tpu as pltpu

_SQRT2 = 1.4142135623730951

# Per-layer stacked weights handed to the kernel (leading axis = layer index).
_LAYER_KEYS = ("wqkv", "bqkv", "wo", "bo", "w1", "b1", "w2", "b2",
               "wa1", "ba1", "wa2", "ba2")
_N_LAYER_REFS = len(_LAYER_KEYS)
_N_HEAD_REFS = 6


# ----------------------------- in-kernel helpers -----------------------------

def _gelu(x):
    # exact (erf-based) GELU, matching torch nn.GELU(approximate='none')
    return 0.5 * x * (1.0 + jax.lax.erf(x / _SQRT2))


def _center_norm(x, eps=1e-5):
    """LayerNorm WITHOUT gamma/beta (those are folded into the following matmul)."""
    m = jnp.mean(x, axis=-1, keepdims=True)
    c = x - m
    v = jnp.mean(c * c, axis=-1, keepdims=True)
    return c * jax.lax.rsqrt(v + eps)


def _layer_norm(x, gamma, beta, eps=1e-5):
    m = jnp.mean(x, axis=-1, keepdims=True)
    c = x - m
    v = jnp.mean(c * c, axis=-1, keepdims=True)
    return c * jax.lax.rsqrt(v + eps) * gamma + beta


def _transformer_layer(x2, eb, lrefs, l, B, S, H):
    """One Pre-LN Graphormer layer on flattened rows.  x2: (B*S, D), eb: (B, S, S)."""
    (wqkv, bqkv, wo, bo, w1, b1, w2, b2, wa1, ba1, wa2, ba2) = lrefs
    D = x2.shape[-1]
    hd = D // H
    scale = float(hd) ** -0.5

    # --- Pre-LN multi-head self-attention with edge bias ---
    # norm1 gamma/beta already folded into wqkv/bqkv (wrapper); only normalize here.
    xn = _center_norm(x2)                                             # (B*S, D)
    qkv = jnp.dot(xn, wqkv[l],
                  preferred_element_type=jnp.float32) + bqkv[l]       # (B*S, 3D)
    qkv3 = qkv.reshape(B, S, 3 * D)

    ctx_heads = []
    for h in range(H):                                                # static, H=4
        q = qkv3[:, :, h * hd:(h + 1) * hd]                           # (B, S, hd)
        k = qkv3[:, :, D + h * hd:D + (h + 1) * hd]
        v = qkv3[:, :, 2 * D + h * hd:2 * D + (h + 1) * hd]
        s = jnp.einsum('bqe,bke->bqk', q, k,
                       preferred_element_type=jnp.float32) * scale    # (B, S, S)
        s = s + eb
        s = s - jnp.max(s, axis=-1, keepdims=True)
        p = jnp.exp(s)
        p = p / jnp.sum(p, axis=-1, keepdims=True)                    # exact division
        ctx_heads.append(jnp.einsum('bqk,bke->bqe', p, v,
                                    preferred_element_type=jnp.float32))
    # Heads lane-contiguous -> (B*S, D); matches torch transpose(1,2).view(B,S,E).
    ctx = jnp.concatenate(ctx_heads, axis=-1).reshape(B * S, D)
    attn = jnp.dot(ctx, wo[l], preferred_element_type=jnp.float32) + bo[l]
    x2 = x2 + attn                                                    # dropout1: identity

    # --- Pre-LN FFN + parallel adapter (x + ffn + adapter(ffn)) ---
    # norm2 gamma/beta already folded into w1/b1 (wrapper).
    xn = _center_norm(x2)
    h1 = _gelu(jnp.dot(xn, w1[l], preferred_element_type=jnp.float32) + b1[l])
    ffn = jnp.dot(h1, w2[l], preferred_element_type=jnp.float32) + b2[l]
    a = _gelu(jnp.dot(ffn, wa1[l], preferred_element_type=jnp.float32) + ba1[l])
    a = jnp.dot(a, wa2[l], preferred_element_type=jnp.float32) + ba2[l]
    return x2 + ffn + a                                               # dropout2: identity


# --------------------------------- fused kernel --------------------------------

def _fused_forward_kernel(*refs, num_heads, num_layers):
    out_ref = refs[-1]
    it = iter(refs[:-1])
    coords_ref = next(it)
    x_ref = next(it)

    H = num_heads
    coords = coords_ref[...]                                          # (B, S, C)
    B, S, _ = coords.shape

    # ---- Graphormer edge bias ----
    # dist^2 = |c_i|^2 + |c_j|^2 - 2 c_i.c_j ; one MXU matmul (inner), everything
    # else on the VPU/XLU: |c_i|^2 via lane reduce, |c_j|^2 via the diagonal of
    # `inner` (iota mask + sublane reduce) so no transposes / ones-matmuls needed.
    inner = jnp.einsum('bsc,btc->bst', coords, coords,
                       preferred_element_type=jnp.float32)            # (B, S, S)
    r_col = jnp.sum(coords * coords, axis=-1, keepdims=True)          # (B, S, 1)
    ii = jax.lax.broadcasted_iota(jnp.int32, (S, S), 0)
    jj = jax.lax.broadcasted_iota(jnp.int32, (S, S), 1)
    diag_mask = (ii == jj).astype(jnp.float32)                        # (S, S)
    r_row = jnp.sum(inner * diag_mask, axis=1, keepdims=True)         # (B, 1, S)
    dist = jnp.sqrt(jnp.maximum(r_col + r_row - 2.0 * inner, 0.0))
    norm = jnp.mean(dist, axis=2, keepdims=True)
    norm = jnp.mean(norm, axis=1, keepdims=True)                      # (B, 1, 1)
    eb = -dist / (norm + 1e-6)                                        # (B, S, S)

    # ---- hierarchical transformer stages (batch folded into sublane rows) ----
    x3 = x_ref[...]                                                   # (B, S, D0)
    x2 = x3.reshape(B * S, x3.shape[-1])
    for si, n_layers in enumerate(num_layers):
        if si > 0:                                                    # inter-stage Linear+GELU
            wproj_ref = next(it)
            bproj_ref = next(it)
            x2 = _gelu(jnp.dot(x2, wproj_ref[...],
                               preferred_element_type=jnp.float32) + bproj_ref[...])
        lrefs = [next(it) for _ in range(_N_LAYER_REFS)]
        for l in range(n_layers):                                     # static unrolled
            x2 = _transformer_layer(x2, eb, lrefs, l, B, S, H)

    # ---- attention pooling + output LayerNorm + classifier (batched over B) ----
    wpool_ref, bpool_ref, og_ref, obeta_ref, wout_ref, bout_ref = (
        [next(it) for _ in range(_N_HEAD_REFS)])
    assert not list(it)                                               # trace-time sanity

    D = x2.shape[-1]
    x3 = x2.reshape(B, S, D)
    wpool_row = wpool_ref[...].reshape(1, 1, D)
    logits = jnp.sum(x3 * wpool_row, axis=-1, keepdims=True)          # (B, S, 1)
    logits = logits + bpool_ref[...]
    logits = logits - jnp.max(logits, axis=1, keepdims=True)
    w = jnp.exp(logits)
    w = w / jnp.sum(w, axis=1, keepdims=True)                         # exact division
    pooled = jnp.sum(x3 * w, axis=1)                                  # (B, D)
    pooled = _layer_norm(pooled, og_ref[...], obeta_ref[...])
    out_ref[...] = (jnp.dot(pooled, wout_ref[...],
                            preferred_element_type=jnp.float32) + bout_ref[...])


# ------------------------------ pallas wrapper ---------------------------------

def _prep_layer_stack(layers):
    """Fuse QKV, fold LN gamma/beta into the following matmuls, stack over layers.

    One-time weight transform (constant-folded under jit since params are closed
    over); NOT a per-call input scaling.  Layouts stay lane-dense: (L,D,3D) QKV,
    (L,D,D) wo, (L,D,4D) w1.
    """
    prepped = {k: [] for k in _LAYER_KEYS}
    for lp in layers:
        g1, be1 = lp["ln1_g"][0], lp["ln1_b"][0]                      # (D,)
        wqkv = jnp.concatenate([lp["wq"], lp["wk"], lp["wv"]], axis=1)  # (D, 3D)
        bqkv = jnp.concatenate([lp["bq"], lp["bk"], lp["bv"]], axis=1)  # (1, 3D)
        wqkv_f = g1[:, None] * wqkv                                   # fold norm1 gamma
        bqkv_f = bqkv + be1[None, :] @ wqkv                           # fold norm1 beta
        g2, be2 = lp["ln2_g"][0], lp["ln2_b"][0]
        w1_f = g2[:, None] * lp["w1"]                                 # fold norm2 gamma
        b1_f = lp["b1"] + be2[None, :] @ lp["w1"]                     # fold norm2 beta
        vals = dict(wqkv=wqkv_f, bqkv=bqkv_f, wo=lp["wo"], bo=lp["bo"],
                    w1=w1_f, b1=b1_f, w2=lp["w2"], b2=lp["b2"],
                    wa1=lp["wa1"], ba1=lp["ba1"], wa2=lp["wa2"], ba2=lp["ba2"])
        for k in _LAYER_KEYS:
            prepped[k].append(vals[k])
    return [jnp.stack(prepped[k], axis=0) for k in _LAYER_KEYS]


def pallas_fused_forward(coords, x, params, cfg):
    B, S, _ = coords.shape
    H = cfg["num_heads"]
    NF = cfg["num_formations"]

    inputs = [coords, x]
    for si, st in enumerate(params["stages"]):
        if si > 0:
            inputs.extend(st["proj"])
        inputs.extend(_prep_layer_stack(st["layers"]))
    hp = params["head"]
    inputs.extend([hp["wp"], hp["bp"], hp["ln_g"], hp["ln_b"], hp["wo"], hp["bo"]])

    kernel = functools.partial(_fused_forward_kernel,
                               num_heads=H,
                               num_layers=tuple(cfg["num_layers"]))
    vmem_spec = pl.BlockSpec(memory_space=pltpu.MemorySpace.VMEM)
    return pl.pallas_call(
        kernel,
        out_shape=jax.ShapeDtypeStruct((B, NF), jnp.float32),
        in_specs=[vmem_spec] * len(inputs),
        out_specs=vmem_spec,
    )(*inputs)


# ------------------------------- parameters -----------------------------------

CFG = dict(
    num_formations=8,
    class_vocab_size=10,
    class_embed_dim=16,
    coord_dim=2,
    direction_dim=1,
    stage_dims=[64, 32],
    num_heads=4,
    num_layers=[2, 2],
    adapter_dim=16,
    max_len=32,
    ffn_ratio=4,
)


def init_params(key, cfg):
    keys = iter(jax.random.split(key, 1024))

    def rnd(*shape, scale=0.05):
        return scale * jax.random.normal(next(keys), shape, jnp.float32)

    def zeros(*shape):
        return jnp.zeros(shape, jnp.float32)

    def ones(*shape):
        return jnp.ones(shape, jnp.float32)

    initial_dim = cfg["stage_dims"][0]
    base = initial_dim // 4
    rem = initial_dim % 4
    dim_coord, dim_dir, dim_class, dim_rel = base + rem, base, base, base

    p = {}
    p["coord_fc"] = (rnd(cfg["coord_dim"], dim_coord), rnd(1, dim_coord))
    p["dir_fc"] = (rnd(cfg["direction_dim"], dim_dir), rnd(1, dim_dir))
    p["class_emb"] = rnd(cfg["class_vocab_size"], cfg["class_embed_dim"])
    p["class_fc"] = (rnd(cfg["class_embed_dim"], dim_class), rnd(1, dim_class))
    p["rel_fc"] = (rnd(cfg["coord_dim"], dim_rel), rnd(1, dim_rel))
    p["pos_emb"] = rnd(1, cfg["max_len"], initial_dim)      # learnable positional emb

    stages = []
    cur = initial_dim
    for i, d in enumerate(cfg["stage_dims"]):
        ff = cfg["ffn_ratio"] * d
        st = {"proj": None}
        if i > 0:
            st["proj"] = (rnd(cur, d), rnd(1, d))
        layers = []
        for _ in range(cfg["num_layers"][i]):
            layers.append(dict(
                ln1_g=ones(1, d), ln1_b=zeros(1, d),
                wq=rnd(d, d), bq=zeros(1, d),
                wk=rnd(d, d), bk=zeros(1, d),
                wv=rnd(d, d), bv=zeros(1, d),
                wo=rnd(d, d), bo=zeros(1, d),
                ln2_g=ones(1, d), ln2_b=zeros(1, d),
                w1=rnd(d, ff), b1=zeros(1, ff),
                w2=rnd(ff, d), b2=zeros(1, d),
                wa1=rnd(d, cfg["adapter_dim"]), ba1=zeros(1, cfg["adapter_dim"]),
                wa2=rnd(cfg["adapter_dim"], d), ba2=zeros(1, d),
            ))
        st["layers"] = layers
        stages.append(st)
        cur = d
    p["stages"] = stages

    dl = cfg["stage_dims"][-1]
    p["head"] = dict(
        wp=rnd(1, dl), bp=zeros(1, 1),              # pooling_weights_fc (D -> 1), row form
        ln_g=ones(1, dl), ln_b=zeros(1, dl),        # output_norm
        wo=rnd(dl, cfg["num_formations"]), bo=zeros(1, cfg["num_formations"]),
    )
    return p


# --------------------------------- forward ------------------------------------

def forward(params, cfg, coords, class_tokens, directions):
    """coords: [B,S,2] f32, class_tokens: [B,S] int32, directions: [B,S,1] f32.
    key_padding_mask is None (all positions valid)."""
    B, S, _ = coords.shape
    gelu = lambda v: jax.nn.gelu(v, approximate=False)

    # --- input feature fusion (tiny glue, plain JAX) ---
    # TODO(synk): embedding gather + these 4 tiny input Linears stay in XLA glue;
    # doing the gather in-kernel would need a one-hot matmul for no measurable gain.
    wc, bc = params["coord_fc"]
    coord_emb = gelu(coords @ wc + bc)
    wd, bd = params["dir_fc"]
    dir_emb = gelu(directions @ wd + bd)
    cls = params["class_emb"][class_tokens]                    # embedding gather
    wcl, bcl = params["class_fc"]
    class_emb = gelu(cls @ wcl + bcl)
    center = jnp.mean(coords, axis=1, keepdims=True)
    wr, br = params["rel_fc"]
    rel_emb = gelu((coords - center) @ wr + br)
    fused = jnp.concatenate([coord_emb, dir_emb, class_emb, rel_emb], axis=-1)
    x = fused + params["pos_emb"][:, :S, :]                    # learnable pos emb

    # --- everything else: one fused Pallas kernel ---
    return pallas_fused_forward(coords, x, params, cfg)


# ----------------------------------- main --------------------------------------

if __name__ == "__main__":
    cfg = CFG
    key = jax.random.PRNGKey(0)
    kp, kc, kt, kd = jax.random.split(key, 4)
    params = init_params(kp, cfg)

    B, S = 2, 8
    coords = jax.random.normal(kc, (B, S, cfg["coord_dim"]), jnp.float32)
    class_tokens = jax.random.randint(kt, (B, S), 0, cfg["class_vocab_size"])
    directions = jax.random.normal(kd, (B, S, cfg["direction_dim"]), jnp.float32)

    fwd = jax.jit(lambda c, t, d: forward(params, cfg, c, t, d))
    out = fwd(coords, class_tokens, directions)
    jax.block_until_ready(out)
    assert out.shape == (B, cfg["num_formations"]), out.shape
    assert bool(jnp.all(jnp.isfinite(out)))
    print("KERNEL_OK")
</pallas_src>

<mosaic_0001>
module attributes {stable_mosaic.version = 11 : i64} {
  func.func @_fused_forward_kernel(%arg0: memref<2x8x2xf32, #tpu.memory_space<vmem>>, %arg1: memref<2x8x64xf32, #tpu.memory_space<vmem>>, %arg2: memref<2x64x192xf32, #tpu.memory_space<vmem>>, %arg3: memref<2x1x192xf32, #tpu.memory_space<vmem>>, %arg4: memref<2x64x64xf32, #tpu.memory_space<vmem>>, %arg5: memref<2x1x64xf32, #tpu.memory_space<vmem>>, %arg6: memref<2x64x256xf32, #tpu.memory_space<vmem>>, %arg7: memref<2x1x256xf32, #tpu.memory_space<vmem>>, %arg8: memref<2x256x64xf32, #tpu.memory_space<vmem>>, %arg9: memref<2x1x64xf32, #tpu.memory_space<vmem>>, %arg10: memref<2x64x16xf32, #tpu.memory_space<vmem>>, %arg11: memref<2x1x16xf32, #tpu.memory_space<vmem>>, %arg12: memref<2x16x64xf32, #tpu.memory_space<vmem>>, %arg13: memref<2x1x64xf32, #tpu.memory_space<vmem>>, %arg14: memref<64x32xf32, #tpu.memory_space<vmem>>, %arg15: memref<1x32xf32, #tpu.memory_space<vmem>>, %arg16: memref<2x32x96xf32, #tpu.memory_space<vmem>>, %arg17: memref<2x1x96xf32, #tpu.memory_space<vmem>>, %arg18: memref<2x32x32xf32, #tpu.memory_space<vmem>>, %arg19: memref<2x1x32xf32, #tpu.memory_space<vmem>>, %arg20: memref<2x32x128xf32, #tpu.memory_space<vmem>>, %arg21: memref<2x1x128xf32, #tpu.memory_space<vmem>>, %arg22: memref<2x128x32xf32, #tpu.memory_space<vmem>>, %arg23: memref<2x1x32xf32, #tpu.memory_space<vmem>>, %arg24: memref<2x32x16xf32, #tpu.memory_space<vmem>>, %arg25: memref<2x1x16xf32, #tpu.memory_space<vmem>>, %arg26: memref<2x16x32xf32, #tpu.memory_space<vmem>>, %arg27: memref<2x1x32xf32, #tpu.memory_space<vmem>>, %arg28: memref<1x32xf32, #tpu.memory_space<vmem>>, %arg29: memref<1x1xf32, #tpu.memory_space<vmem>>, %arg30: memref<1x32xf32, #tpu.memory_space<vmem>>, %arg31: memref<1x32xf32, #tpu.memory_space<vmem>>, %arg32: memref<32x8xf32, #tpu.memory_space<vmem>>, %arg33: memref<1x8xf32, #tpu.memory_space<vmem>>, %arg34: memref<2x8xf32, #tpu.memory_space<vmem>>) attributes {dimension_semantics = [], scalar_prefetch = 0 : i64, scratch_operands = 0 : i64, tpu.core_type = #tpu.core_type<tc>} {
    %c0 = arith.constant 0 : index
    %c0_0 = arith.constant 0 : index
    %c0_1 = arith.constant 0 : index
    %0 = vector.load %arg0[%c0, %c0_0, %c0_1] : memref<2x8x2xf32, #tpu.memory_space<vmem>>, vector<2x8x2xf32>
    "tpu.trace_start"() <{level = 10 : i32, message = "bsc,btc->bst"}> : () -> ()
    %cst = arith.constant dense<0.000000e+00> : vector<2x8x8xf32>
    %1 = tpu.matmul %0, %0, %cst {dimension_numbers = #tpu.dot_dimension_numbers<[2], [2], [1], [1], [0, 0, 0, 1, 1, 1], [0], [0]>} : vector<2x8x2xf32>, vector<2x8x2xf32>, vector<2x8x8xf32> -> vector<2x8x8xf32>
    "tpu.trace_stop"() : () -> ()
    %2 = arith.mulf %0, %0 : vector<2x8x2xf32>
    %cst_2 = arith.constant dense<0.000000e+00> : vector<2x8xf32>
    %3 = vector.multi_reduction <add>, %2, %cst_2 [2] : vector<2x8x2xf32> to vector<2x8xf32>
    %4 = vector.shape_cast %3 : vector<2x8xf32> to vector<2x8x1xf32>
    %5 = tpu.iota {dimensions = array<i32: 0>} : vector<8x8xi32>
    %6 = tpu.iota {dimensions = array<i32: 1>} : vector<8x8xi32>
    %7 = arith.cmpi eq, %5, %6 : vector<8x8xi32>
    %8 = arith.extui %7 : vector<8x8xi1> to vector<8x8xi32>
    %9 = arith.sitofp %8 : vector<8x8xi32> to vector<8x8xf32>
    %10 = vector.shape_cast %9 : vector<8x8xf32> to vector<1x8x8xf32>
    %11 = vector.broadcast %10 : vector<1x8x8xf32> to vector<2x8x8xf32>
    %12 = arith.mulf %1, %11 : vector<2x8x8xf32>
    %cst_3 = arith.constant dense<0.000000e+00> : vector<2x8xf32>
    %13 = vector.multi_reduction <add>, %12, %cst_3 [1] : vector<2x8x8xf32> to vector<2x8xf32>
    %14 = vector.shape_cast %13 : vector<2x8xf32> to vector<2x1x8xf32>
    %15 = vector.broadcast %4 : vector<2x8x1xf32> to vector<2x8x8xf32>
    %16 = vector.broadcast %14 : vector<2x1x8xf32> to vector<2x8x8xf32>
    %17 = arith.addf %15, %16 : vector<2x8x8xf32>
    %cst_4 = arith.constant 2.000000e+00 : f32
    %18 = vector.broadcast %cst_4 : f32 to vector<2x8x8xf32>
    %19 = arith.mulf %18, %1 : vector<2x8x8xf32>
    %20 = arith.subf %17, %19 : vector<2x8x8xf32>
    %cst_5 = arith.constant 0.000000e+00 : f32
    %21 = vector.broadcast %cst_5 : f32 to vector<2x8x8xf32>
    %22 = arith.maximumf %20, %21 : vector<2x8x8xf32>
    %23 = math.sqrt %22 : vector<2x8x8xf32>
    %cst_6 = arith.constant dense<0.000000e+00> : vector<2x8xf32>
    %24 = vector.multi_reduction <add>, %23, %cst_6 [2] : vector<2x8x8xf32> to vector<2x8xf32>
    %25 = vector.shape_cast %24 : vector<2x8xf32> to vector<2x8x1xf32>
    %cst_7 = arith.constant 8.000000e+00 : f32
    %26 = vector.broadcast %cst_7 : f32 to vector<2x8x1xf32>
    %27 = arith.divf %25, %26 : vector<2x8x1xf32>
    %cst_8 = arith.constant dense<0.000000e+00> : vector<2x1xf32>
    %28 = vector.multi_reduction <add>, %27, %cst_8 [1] : vector<2x8x1xf32> to vector<2x1xf32>
    %29 = vector.shape_cast %28 : vector<2x1xf32> to vector<2x1x1xf32>
    %cst_9 = arith.constant 8.000000e+00 : f32
    %30 = vector.broadcast %cst_9 : f32 to vector<2x1x1xf32>
    %31 = arith.divf %29, %30 : vector<2x1x1xf32>
    %cst_10 = arith.constant 0.000000e+00 : f32
    %32 = vector.broadcast %cst_10 : f32 to vector<2x8x8xf32>
    %33 = arith.subf %32, %23 : vector<2x8x8xf32>
    %cst_11 = arith.constant 9.99999997E-7 : f32
    %34 = vector.broadcast %cst_11 : f32 to vector<2x1x1xf32>
    %35 = arith.addf %31, %34 : vector<2x1x1xf32>
    %36 = vector.broadcast %35 : vector<2x1x1xf32> to vector<2x8x8xf32>
    %37 = arith.divf %33, %36 : vector<2x8x8xf32>
    %c0_12 = arith.constant 0 : index
    %c0_13 = arith.constant 0 : index
    %c0_14 = arith.constant 0 : index
    %38 = vector.load %arg1[%c0_12, %c0_13, %c0_14] : memref<2x8x64xf32, #tpu.memory_space<vmem>>, vector<2x8x64xf32>
    %39 = vector.shape_cast %38 : vector<2x8x64xf32> to vector<16x64xf32>
    %cst_15 = arith.constant dense<0.000000e+00> : vector<16xf32>
    %40 = vector.multi_reduction <add>, %39, %cst_15 [1] : vector<16x64xf32> to vector<16xf32>
    %41 = vector.shape_cast %40 : vector<16xf32> to vector<16x1xf32>
    %cst_16 = arith.constant 6.400000e+01 : f32
    %42 = vector.broadcast %cst_16 : f32 to vector<16x1xf32>
    %43 = arith.divf %41, %42 : vector<16x1xf32>
    %44 = vector.broadcast %43 : vector<16x1xf32> to vector<16x64xf32>
    %45 = arith.subf %39, %44 : vector<16x64xf32>
    %46 = arith.mulf %45, %45 : vector<16x64xf32>
    %cst_17 = arith.constant dense<0.000000e+00> : vector<16xf32>
    %47 = vector.multi_reduction <add>, %46, %cst_17 [1] : vector<16x64xf32> to vector<16xf32>
    %48 = vector.shape_cast %47 : vector<16xf32> to vector<16x1xf32>
    %cst_18 = arith.constant 6.400000e+01 : f32
    %49 = vector.broadcast %cst_18 : f32 to vector<16x1xf32>
    %50 = arith.divf %48, %49 : vector<16x1xf32>
    %cst_19 = arith.constant 9.99999974E-6 : f32
    %51 = vector.broadcast %cst_19 : f32 to vector<16x1xf32>
    %52 = arith.addf %50, %51 : vector<16x1xf32>
    %53 = math.rsqrt %52 : vector<16x1xf32>
    %54 = vector.broadcast %53 : vector<16x1xf32> to vector<16x64xf32>
    %55 = arith.mulf %45, %54 : vector<16x64xf32>
    %c0_20 = arith.constant 0 : index
    %c0_21 = arith.constant 0 : index
    %c0_22 = arith.constant 0 : index
    %56 = vector.load %arg2[%c0_20, %c0_21, %c0_22] : memref<2x64x192xf32, #tpu.memory_space<vmem>>, vector<1x64x192xf32>
    %57 = vector.shape_cast %56 : vector<1x64x192xf32> to vector<64x192xf32>
    %cst_23 = arith.constant dense<0.000000e+00> : vector<16x192xf32>
    %58 = tpu.matmul %55, %57, %cst_23 {dimension_numbers = #tpu.dot_dimension_numbers<[1], [0], [0], [1], [0, 0, 1, 1], [], []>} : vector<16x64xf32>, vector<64x192xf32>, vector<16x192xf32> -> vector<16x192xf32>
    %c0_24 = arith.constant 0 : index
    %c0_25 = arith.constant 0 : index
    %c0_26 = arith.constant 0 : index
    %59 = vector.load %arg3[%c0_24, %c0_25, %c0_26] : memref<2x1x192xf32, #tpu.memory_space<vmem>>, vector<1x1x192xf32>
    %60 = vector.shape_cast %59 : vector<1x1x192xf32> to vector<1x192xf32>
    %61 = vector.broadcast %60 : vector<1x192xf32> to vector<16x192xf32>
    %62 = arith.addf %58, %61 : vector<16x192xf32>
    %63 = vector.shape_cast %62 : vector<16x192xf32> to vector<2x8x192xf32>
    %64 = vector.extract_strided_slice %63 {offsets = [0, 0, 0], sizes = [2, 8, 16], strides = [1, 1, 1]} : vector<2x8x192xf32> to vector<2x8x16xf32>
    %65 = vector.extract_strided_slice %63 {offsets = [0, 0, 64], sizes = [2, 8, 16], strides = [1, 1, 1]} : vector<2x8x192xf32> to vector<2x8x16xf32>
    %66 = vector.extract_strided_slice %63 {offsets = [0, 0, 128], sizes = [2, 8, 16], strides = [1, 1, 1]} : vector<2x8x192xf32> to vector<2x8x16xf32>
    "tpu.trace_start"() <{level = 10 : i32, message = "bqe,bke->bqk"}> : () -> ()
    %cst_27 = arith.constant dense<0.000000e+00> : vector<2x8x8xf32>
    %67 = tpu.matmul %64, %65, %cst_27 {dimension_numbers = #tpu.dot_dimension_numbers<[2], [2], [1], [1], [0, 0, 0, 1, 1, 1], [0], [0]>} : vector<2x8x16xf32>, vector<2x8x16xf32>, vector<2x8x8xf32> -> vector<2x8x8xf32>
    "tpu.trace_stop"() : () -> ()
    %cst_28 = arith.constant 2.500000e-01 : f32
    %68 = vector.broadcast %cst_28 : f32 to vector<2x8x8xf32>
    %69 = arith.mulf %67, %68 : vector<2x8x8xf32>
    %70 = arith.addf %69, %37 : vector<2x8x8xf32>
    %cst_29 = arith.constant dense<0xFF800000> : vector<2x8xf32>
    %71 = vector.multi_reduction <maximumf>, %70, %cst_29 [2] : vector<2x8x8xf32> to vector<2x8xf32>
    %72 = vector.shape_cast %71 : vector<2x8xf32> to vector<2x8x1xf32>
    %73 = vector.broadcast %72 : vector<2x8x1xf32> to vector<2x8x8xf32>
    %74 = arith.subf %70, %73 : vector<2x8x8xf32>
    %75 = math.exp %74 : vector<2x8x8xf32>
    %cst_30 = arith.constant dense<0.000000e+00> : vector<2x8xf32>
    %76 = vector.multi_reduction <add>, %75, %cst_30 [2] : vector<2x8x8xf32> to vector<2x8xf32>
    %77 = vector.shape_cast %76 : vector<2x8xf32> to vector<2x8x1xf32>
    %78 = vector.broadcast %77 : vector<2x8x1xf32> to vector<2x8x8xf32>
    %79 = arith.divf %75, %78 : vector<2x8x8xf32>
    "tpu.trace_start"() <{level = 10 : i32, message = "bqk,bke->bqe"}> : () -> ()
    %cst_31 = arith.constant dense<0.000000e+00> : vector<2x8x16xf32>
    %80 = tpu.matmul %79, %66, %cst_31 {dimension_numbers = #tpu.dot_dimension_numbers<[2], [1], [1], [2], [0, 0, 0, 1, 1, 2], [0], [0]>} : vector<2x8x8xf32>, vector<2x8x16xf32>, vector<2x8x16xf32> -> vector<2x8x16xf32>
    "tpu.trace_stop"() : () -> ()
    %81 = vector.extract_strided_slice %63 {offsets = [0, 0, 16], sizes = [2, 8, 16], strides = [1, 1, 1]} : vector<2x8x192xf32> to vector<2x8x16xf32>
    %82 = vector.extract_strided_slice %63 {offsets = [0, 0, 80], sizes = [2, 8, 16], strides = [1, 1, 1]} : vector<2x8x192xf32> to vector<2x8x16xf32>
    %83 = vector.extract_strided_slice %63 {offsets = [0, 0, 144], sizes = [2, 8, 16], strides = [1, 1, 1]} : vector<2x8x192xf32> to vector<2x8x16xf32>
    "tpu.trace_start"() <{level = 10 : i32, message = "bqe,bke->bqk"}> : () -> ()
    %cst_32 = arith.constant dense<0.000000e+00> : vector<2x8x8xf32>
    %84 = tpu.matmul %81, %82, %cst_32 {dimension_numbers = #tpu.dot_dimension_numbers<[2], [2], [1], [1], [0, 0, 0, 1, 1, 1], [0], [0]>} : vector<2x8x16xf32>, vector<2x8x16xf32>, vector<2x8x8xf32> -> vector<2x8x8xf32>
    "tpu.trace_stop"() : () -> ()
    %cst_33 = arith.constant 2.500000e-01 : f32
    %85 = vector.broadcast %cst_33 : f32 to vector<2x8x8xf32>
    %86 = arith.mulf %84, %85 : vector<2x8x8xf32>
    %87 = arith.addf %86, %37 : vector<2x8x8xf32>
    %cst_34 = arith.constant dense<0xFF800000> : vector<2x8xf32>
    %88 = vector.multi_reduction <maximumf>, %87, %cst_34 [2] : vector<2x8x8xf32> to vector<2x8xf32>
    %89 = vector.shape_cast %88 : vector<2x8xf32> to vector<2x8x1xf32>
    %90 = vector.broadcast %89 : vector<2x8x1xf32> to vector<2x8x8xf32>
    %91 = arith.subf %87, %90 : vector<2x8x8xf32>
    %92 = math.exp %91 : vector<2x8x8xf32>
    %cst_35 = arith.constant dense<0.000000e+00> : vector<2x8xf32>
    %93 = vector.multi_reduction <add>, %92, %cst_35 [2] : vector<2x8x8xf32> to vector<2x8xf32>
    %94 = vector.shape_cast %93 : vector<2x8xf32> to vector<2x8x1xf32>
    %95 = vector.broadcast %94 : vector<2x8x1xf32> to vector<2x8x8xf32>
    %96 = arith.divf %92, %95 : vector<2x8x8xf32>
    "tpu.trace_start"() <{level = 10 : i32, message = "bqk,bke->bqe"}> : () -> ()
    %cst_36 = arith.constant dense<0.000000e+00> : vector<2x8x16xf32>
    %97 = tpu.matmul %96, %83, %cst_36 {dimension_numbers = #tpu.dot_dimension_numbers<[2], [1], [1], [2], [0, 0, 0, 1, 1, 2], [0], [0]>} : vector<2x8x8xf32>, vector<2x8x16xf32>, vector<2x8x16xf32> -> vector<2x8x16xf32>
    "tpu.trace_stop"() : () -> ()
    %98 = vector.extract_strided_slice %63 {offsets = [0, 0, 32], sizes = [2, 8, 16], strides = [1, 1, 1]} : vector<2x8x192xf32> to vector<2x8x16xf32>
    %99 = vector.extract_strided_slice %63 {offsets = [0, 0, 96], sizes = [2, 8, 16], strides = [1, 1, 1]} : vector<2x8x192xf32> to vector<2x8x16xf32>
    %100 = vector.extract_strided_slice %63 {offsets = [0, 0, 160], sizes = [2, 8, 16], strides = [1, 1, 1]} : vector<2x8x192xf32> to vector<2x8x16xf32>
    "tpu.trace_start"() <{level = 10 : i32, message = "bqe,bke->bqk"}> : () -> ()
    %cst_37 = arith.constant dense<0.000000e+00> : vector<2x8x8xf32>
    %101 = tpu.matmul %98, %99, %cst_37 {dimension_numbers = #tpu.dot_dimension_numbers<[2], [2], [1], [1], [0, 0, 0, 1, 1, 1], [0], [0]>} : vector<2x8x16xf32>, vector<2x8x16xf32>, vector<2x8x8xf32> -> vector<2x8x8xf32>
    "tpu.trace_stop"() : () -> ()
    %cst_38 = arith.constant 2.500000e-01 : f32
    %102 = vector.broadcast %cst_38 : f32 to vector<2x8x8xf32>
    %103 = arith.mulf %101, %102 : vector<2x8x8xf32>
    %104 = arith.addf %103, %37 : vector<2x8x8xf32>
    %cst_39 = arith.constant dense<0xFF800000> : vector<2x8xf32>
    %105 = vector.multi_reduction <maximumf>, %104, %cst_39 [2] : vector<2x8x8xf32> to vector<2x8xf32>
    %106 = vector.shape_cast %105 : vector<2x8xf32> to vector<2x8x1xf32>
    %107 = vector.broadcast %106 : vector<2x8x1xf32> to vector<2x8x8xf32>
    %108 = arith.subf %104, %107 : vector<2x8x8xf32>
    %109 = math.exp %108 : vector<2x8x8xf32>
    %cst_40 = arith.constant dense<0.000000e+00> : vector<2x8xf32>
    %110 = vector.multi_reduction <add>, %109, %cst_40 [2] : vector<2x8x8xf32> to vector<2x8xf32>
    %111 = vector.shape_cast %110 : vector<2x8xf32> to vector<2x8x1xf32>
    %112 = vector.broadcast %111 : vector<2x8x1xf32> to vector<2x8x8xf32>
    %113 = arith.divf %109, %112 : vector<2x8x8xf32>
    "tpu.trace_start"() <{level = 10 : i32, message = "bqk,bke->bqe"}> : () -> ()
    %cst_41 = arith.constant dense<0.000000e+00> : vector<2x8x16xf32>
    %114 = tpu.matmul %113, %100, %cst_41 {dimension_numbers = #tpu.dot_dimension_numbers<[2], [1], [1], [2], [0, 0, 0, 1, 1, 2], [0], [0]>} : vector<2x8x8xf32>, vector<2x8x16xf32>, vector<2x8x16xf32> -> vector<2x8x16xf32>
    "tpu.trace_stop"() : () -> ()
    %115 = vector.extract_strided_slice %63 {offsets = [0, 0, 48], sizes = [2, 8, 16], strides = [1, 1, 1]} : vector<2x8x192xf32> to vector<2x8x16xf32>
    %116 = vector.extract_strided_slice %63 {offsets = [0, 0, 112], sizes = [2, 8, 16], strides = [1, 1, 1]} : vector<2x8x192xf32> to vector<2x8x16xf32>
    %117 = vector.extract_strided_slice %63 {offsets = [0, 0, 176], sizes = [2, 8, 16], strides = [1, 1, 1]} : vector<2x8x192xf32> to vector<2x8x16xf32>
    "tpu.trace_start"() <{level = 10 : i32, message = "bqe,bke->bqk"}> : () -> ()
    %cst_42 = arith.constant dense<0.000000e+00> : vector<2x8x8xf32>
    %118 = tpu.matmul %115, %116, %cst_42 {dimension_numbers = #tpu.dot_dimension_numbers<[2], [2], [1], [1], [0, 0, 0, 1, 1, 1], [0], [0]>} : vector<2x8x16xf32>, vector<2x8x16xf32>, vector<2x8x8xf32> -> vector<2x8x8xf32>
    "tpu.trace_stop"() : () -> ()
    %cst_43 = arith.constant 2.500000e-01 : f32
    %119 = vector.broadcast %cst_43 : f32 to vector<2x8x8xf32>
    %120 = arith.mulf %118, %119 : vector<2x8x8xf32>
    %121 = arith.addf %120, %37 : vector<2x8x8xf32>
    %cst_44 = arith.constant dense<0xFF800000> : vector<2x8xf32>
    %122 = vector.multi_reduction <maximumf>, %121, %cst_44 [2] : vector<2x8x8xf32> to vector<2x8xf32>
    %123 = vector.shape_cast %122 : vector<2x8xf32> to vector<2x8x1xf32>
    %124 = vector.broadcast %123 : vector<2x8x1xf32> to vector<2x8x8xf32>
    %125 = arith.subf %121, %124 : vector<2x8x8xf32>
    %126 = math.exp %125 : vector<2x8x8xf32>
    %cst_45 = arith.constant dense<0.000000e+00> : vector<2x8xf32>
    %127 = vector.multi_reduction <add>, %126, %cst_45 [2] : vector<2x8x8xf32> to vector<2x8xf32>
    %128 = vector.shape_cast %127 : vector<2x8xf32> to vector<2x8x1xf32>
    %129 = vector.broadcast %128 : vector<2x8x1xf32> to vector<2x8x8xf32>
    %130 = arith.divf %126, %129 : vector<2x8x8xf32>
    "tpu.trace_start"() <{level = 10 : i32, message = "bqk,bke->bqe"}> : () -> ()
    %cst_46 = arith.constant dense<0.000000e+00> : vector<2x8x16xf32>
    %131 = tpu.matmul %130, %117, %cst_46 {dimension_numbers = #tpu.dot_dimension_numbers<[2], [1], [1], [2], [0, 0, 0, 1, 1, 2], [0], [0]>} : vector<2x8x8xf32>, vector<2x8x16xf32>, vector<2x8x16xf32> -> vector<2x8x16xf32>
    "tpu.trace_stop"() : () -> ()
    %132 = tpu.concatenate %80, %97, %114, %131 in 2 : vector<2x8x16xf32>, vector<2x8x16xf32>, vector<2x8x16xf32>, vector<2x8x16xf32> -> vector<2x8x64xf32>
    %133 = vector.shape_cast %132 : vector<2x8x64xf32> to vector<16x64xf32>
    %c0_47 = arith.constant 0 : index
    %c0_48 = arith.constant 0 : index
    %c0_49 = arith.constant 0 : index
    %134 = vector.load %arg4[%c0_47, %c0_48, %c0_49] : memref<2x64x64xf32, #tpu.memory_space<vmem>>, vector<1x64x64xf32>
    %135 = vector.shape_cast %134 : vector<1x64x64xf32> to vector<64x64xf32>
    %cst_50 = arith.constant dense<0.000000e+00> : vector<16x64xf32>
    %136 = tpu.matmul %133, %135, %cst_50 {dimension_numbers = #tpu.dot_dimension_numbers<[1], [0], [0], [1], [0, 0, 1, 1], [], []>} : vector<16x64xf32>, vector<64x64xf32>, vector<16x64xf32> -> vector<16x64xf32>
    %c0_51 = arith.constant 0 : index
    %c0_52 = arith.constant 0 : index
    %c0_53 = arith.constant 0 : index
    %137 = vector.load %arg5[%c0_51, %c0_52, %c0_53] : memref<2x1x64xf32, #tpu.memory_space<vmem>>, vector<1x1x64xf32>
    %138 = vector.shape_cast %137 : vector<1x1x64xf32> to vector<1x64xf32>
    %139 = vector.broadcast %138 : vector<1x64xf32> to vector<16x64xf32>
    %140 = arith.addf %136, %139 : vector<16x64xf32>
    %141 = arith.addf %39, %140 : vector<16x64xf32>
    %cst_54 = arith.constant dense<0.000000e+00> : vector<16xf32>
    %142 = vector.multi_reduction <add>, %141, %cst_54 [1] : vector<16x64xf32> to vector<16xf32>
    %143 = vector.shape_cast %142 : vector<16xf32> to vector<16x1xf32>
    %cst_55 = arith.constant 6.400000e+01 : f32
    %144 = vector.broadcast %cst_55 : f32 to vector<16x1xf32>
    %145 = arith.divf %143, %144 : vector<16x1xf32>
    %146 = vector.broadcast %145 : vector<16x1xf32> to vector<16x64xf32>
    %147 = arith.subf %141, %146 : vector<16x64xf32>
    %148 = arith.mulf %147, %147 : vector<16x64xf32>
    %cst_56 = arith.constant dense<0.000000e+00> : vector<16xf32>
    %149 = vector.multi_reduction <add>, %148, %cst_56 [1] : vector<16x64xf32> to vector<16xf32>
    %150 = vector.shape_cast %149 : vector<16xf32> to vector<16x1xf32>
    %cst_57 = arith.constant 6.400000e+01 : f32
    %151 = vector.broadcast %cst_57 : f32 to vector<16x1xf32>
    %152 = arith.divf %150, %151 : vector<16x1xf32>
    %cst_58 = arith.constant 9.99999974E-6 : f32
    %153 = vector.broadcast %cst_58 : f32 to vector<16x1xf32>
    %154 = arith.addf %152, %153 : vector<16x1xf32>
    %155 = math.rsqrt %154 : vector<16x1xf32>
    %156 = vector.broadcast %155 : vector<16x1xf32> to vector<16x64xf32>
    %157 = arith.mulf %147, %156 : vector<16x64xf32>
    %c0_59 = arith.constant 0 : index
    %c0_60 = arith.constant 0 : index
    %c0_61 = arith.constant 0 : index
    %158 = vector.load %arg6[%c0_59, %c0_60, %c0_61] : memref<2x64x256xf32, #tpu.memory_space<vmem>>, vector<1x64x256xf32>
    %159 = vector.shape_cast %158 : vector<1x64x256xf32> to vector<64x256xf32>
    %cst_62 = arith.constant dense<0.000000e+00> : vector<16x256xf32>
    %160 = tpu.matmul %157, %159, %cst_62 {dimension_numbers = #tpu.dot_dimension_numbers<[1], [0], [0], [1], [0, 0, 1, 1], [], []>} : vector<16x64xf32>, vector<64x256xf32>, vector<16x256xf32> -> vector<16x256xf32>
    %c0_63 = arith.constant 0 : index
    %c0_64 = arith.constant 0 : index
    %c0_65 = arith.constant 0 : index
    %161 = vector.load %arg7[%c0_63, %c0_64, %c0_65] : memref<2x1x256xf32, #tpu.memory_space<vmem>>, vector<1x1x256xf32>
    %162 = vector.shape_cast %161 : vector<1x1x256xf32> to vector<1x256xf32>
    %163 = vector.broadcast %162 : vector<1x256xf32> to vector<16x256xf32>
    %164 = arith.addf %160, %163 : vector<16x256xf32>
    %cst_66 = arith.constant 5.000000e-01 : f32
    %165 = vector.broadcast %cst_66 : f32 to vector<16x256xf32>
    %166 = arith.mulf %165, %164 : vector<16x256xf32>
    %cst_67 = arith.constant 1.41421354 : f32
    %167 = vector.broadcast %cst_67 : f32 to vector<16x256xf32>
    %168 = arith.divf %164, %167 : vector<16x256xf32>
    %169 = math.erf %168 : vector<16x256xf32>
    %cst_68 = arith.constant 1.000000e+00 : f32
    %170 = vector.broadcast %cst_68 : f32 to vector<16x256xf32>
    %171 = arith.addf %170, %169 : vector<16x256xf32>
    %172 = arith.mulf %166, %171 : vector<16x256xf32>
    %c0_69 = arith.constant 0 : index
    %c0_70 = arith.constant 0 : index
    %c0_71 = arith.constant 0 : index
    %173 = vector.load %arg8[%c0_69, %c0_70, %c0_71] : memref<2x256x64xf32, #tpu.memory_space<vmem>>, vector<1x256x64xf32>
    %174 = vector.shape_cast %173 : vector<1x256x64xf32> to vector<256x64xf32>
    %cst_72 = arith.constant dense<0.000000e+00> : vector<16x64xf32>
    %175 = tpu.matmul %172, %174, %cst_72 {dimension_numbers = #tpu.dot_dimension_numbers<[1], [0], [0], [1], [0, 0, 1, 1], [], []>} : vector<16x256xf32>, vector<256x64xf32>, vector<16x64xf32> -> vector<16x64xf32>
    %c0_73 = arith.constant 0 : index
    %c0_74 = arith.constant 0 : index
    %c0_75 = arith.constant 0 : index
    %176 = vector.load %arg9[%c0_73, %c0_74, %c0_75] : memref<2x1x64xf32, #tpu.memory_space<vmem>>, vector<1x1x64xf32>
    %177 = vector.shape_cast %176 : vector<1x1x64xf32> to vector<1x64xf32>
    %178 = vector.broadcast %177 : vector<1x64xf32> to vector<16x64xf32>
    %179 = arith.addf %175, %178 : vector<16x64xf32>
    %c0_76 = arith.constant 0 : index
    %c0_77 = arith.constant 0 : index
    %c0_78 = arith.constant 0 : index
    %180 = vector.load %arg10[%c0_76, %c0_77, %c0_78] : memref<2x64x16xf32, #tpu.memory_space<vmem>>, vector<1x64x16xf32>
    %181 = vector.shape_cast %180 : vector<1x64x16xf32> to vector<64x16xf32>
    %cst_79 = arith.constant dense<0.000000e+00> : vector<16x16xf32>
    %182 = tpu.matmul %179, %181, %cst_79 {dimension_numbers = #tpu.dot_dimension_numbers<[1], [0], [0], [1], [0, 0, 1, 1], [], []>} : vector<16x64xf32>, vector<64x16xf32>, vector<16x16xf32> -> vector<16x16xf32>
    %c0_80 = arith.constant 0 : index
    %c0_81 = arith.constant 0 : index
    %c0_82 = arith.constant 0 : index
    %183 = vector.load %arg11[%c0_80, %c0_81, %c0_82] : memref<2x1x16xf32, #tpu.memory_space<vmem>>, vector<1x1x16xf32>
    %184 = vector.shape_cast %183 : vector<1x1x16xf32> to vector<1x16xf32>
    %185 = vector.broadcast %184 : vector<1x16xf32> to vector<16x16xf32>
    %186 = arith.addf %182, %185 : vector<16x16xf32>
    %cst_83 = arith.constant 5.000000e-01 : f32
    %187 = vector.broadcast %cst_83 : f32 to vector<16x16xf32>
    %188 = arith.mulf %187, %186 : vector<16x16xf32>
    %cst_84 = arith.constant 1.41421354 : f32
    %189 = vector.broadcast %cst_84 : f32 to vector<16x16xf32>
    %190 = arith.divf %186, %189 : vector<16x16xf32>
    %191 = math.erf %190 : vector<16x16xf32>
    %cst_85 = arith.constant 1.000000e+00 : f32
    %192 = vector.broadcast %cst_85 : f32 to vector<16x16xf32>
    %193 = arith.addf %192, %191 : vector<16x16xf32>
    %194 = arith.mulf %188, %193 : vector<16x16xf32>
    %c0_86 = arith.constant 0 : index
    %c0_87 = arith.constant 0 : index
    %c0_88 = arith.constant 0 : index
    %195 = vector.load %arg12[%c0_86, %c0_87, %c0_88] : memref<2x16x64xf32, #tpu.memory_space<vmem>>, vector<1x16x64xf32>
    %196 = vector.shape_cast %195 : vector<1x16x64xf32> to vector<16x64xf32>
    %cst_89 = arith.constant dense<0.000000e+00> : vector<16x64xf32>
    %197 = tpu.matmul %194, %196, %cst_89 {dimension_numbers = #tpu.dot_dimension_numbers<[1], [0], [0], [1], [0, 0, 1, 1], [], []>} : vector<16x16xf32>, vector<16x64xf32>, vector<16x64xf32> -> vector<16x64xf32>
    %c0_90 = arith.constant 0 : index
    %c0_91 = arith.constant 0 : index
    %c0_92 = arith.constant 0 : index
    %198 = vector.load %arg13[%c0_90, %c0_91, %c0_92] : memref<2x1x64xf32, #tpu.memory_space<vmem>>, vector<1x1x64xf32>
    %199 = vector.shape_cast %198 : vector<1x1x64xf32> to vector<1x64xf32>
    %200 = vector.broadcast %199 : vector<1x64xf32> to vector<16x64xf32>
    %201 = arith.addf %197, %200 : vector<16x64xf32>
    %202 = arith.addf %141, %179 : vector<16x64xf32>
    %203 = arith.addf %202, %201 : vector<16x64xf32>
    %cst_93 = arith.constant dense<0.000000e+00> : vector<16xf32>
    %204 = vector.multi_reduction <add>, %203, %cst_93 [1] : vector<16x64xf32> to vector<16xf32>
    %205 = vector.shape_cast %204 : vector<16xf32> to vector<16x1xf32>
    %cst_94 = arith.constant 6.400000e+01 : f32
    %206 = vector.broadcast %cst_94 : f32 to vector<16x1xf32>
    %207 = arith.divf %205, %206 : vector<16x1xf32>
    %208 = vector.broadcast %207 : vector<16x1xf32> to vector<16x64xf32>
    %209 = arith.subf %203, %208 : vector<16x64xf32>
    %210 = arith.mulf %209, %209 : vector<16x64xf32>
    %cst_95 = arith.constant dense<0.000000e+00> : vector<16xf32>
    %211 = vector.multi_reduction <add>, %210, %cst_95 [1] : vector<16x64xf32> to vector<16xf32>
    %212 = vector.shape_cast %211 : vector<16xf32> to vector<16x1xf32>
    %cst_96 = arith.constant 6.400000e+01 : f32
    %213 = vector.broadcast %cst_96 : f32 to vector<16x1xf32>
    %214 = arith.divf %212, %213 : vector<16x1xf32>
    %cst_97 = arith.constant 9.99999974E-6 : f32
    %215 = vector.broadcast %cst_97 : f32 to vector<16x1xf32>
    %216 = arith.addf %214, %215 : vector<16x1xf32>
    %217 = math.rsqrt %216 : vector<16x1xf32>
    %218 = vector.broadcast %217 : vector<16x1xf32> to vector<16x64xf32>
    %219 = arith.mulf %209, %218 : vector<16x64xf32>
    %c1 = arith.constant 1 : index
    %c0_98 = arith.constant 0 : index
    %c0_99 = arith.constant 0 : index
    %220 = vector.load %arg2[%c1, %c0_98, %c0_99] : memref<2x64x192xf32, #tpu.memory_space<vmem>>, vector<1x64x192xf32>
    %221 = vector.shape_cast %220 : vector<1x64x192xf32> to vector<64x192xf32>
    %cst_100 = arith.constant dense<0.000000e+00> : vector<16x192xf32>
    %222 = tpu.matmul %219, %221, %cst_100 {dimension_numbers = #tpu.dot_dimension_numbers<[1], [0], [0], [1], [0, 0, 1, 1], [], []>} : vector<16x64xf32>, vector<64x192xf32>, vector<16x192xf32> -> vector<16x192xf32>
    %c1_101 = arith.constant 1 : index
    %c0_102 = arith.constant 0 : index
    %c0_103 = arith.constant 0 : index
    %223 = vector.load %arg3[%c1_101, %c0_102, %c0_103] : memref<2x1x192xf32, #tpu.memory_space<vmem>>, vector<1x1x192xf32>
    %224 = vector.shape_cast %223 : vector<1x1x192xf32> to vector<1x192xf32>
    %225 = vector.broadcast %224 : vector<1x192xf32> to vector<16x192xf32>
    %226 = arith.addf %222, %225 : vector<16x192xf32>
    %227 = vector.shape_cast %226 : vector<16x192xf32> to vector<2x8x192xf32>
    %228 = vector.extract_strided_slice %227 {offsets = [0, 0, 0], sizes = [2, 8, 16], strides = [1, 1, 1]} : vector<2x8x192xf32> to vector<2x8x16xf32>
    %229 = vector.extract_strided_slice %227 {offsets = [0, 0, 64], sizes = [2, 8, 16], strides = [1, 1, 1]} : vector<2x8x192xf32> to vector<2x8x16xf32>
    %230 = vector.extract_strided_slice %227 {offsets = [0, 0, 128], sizes = [2, 8, 16], strides = [1, 1, 1]} : vector<2x8x192xf32> to vector<2x8x16xf32>
    "tpu.trace_start"() <{level = 10 : i32, message = "bqe,bke->bqk"}> : () -> ()
    %cst_104 = arith.constant dense<0.000000e+00> : vector<2x8x8xf32>
    %231 = tpu.matmul %228, %229, %cst_104 {dimension_numbers = #tpu.dot_dimension_numbers<[2], [2], [1], [1], [0, 0, 0, 1, 1, 1], [0], [0]>} : vector<2x8x16xf32>, vector<2x8x16xf32>, vector<2x8x8xf32> -> vector<2x8x8xf32>
    "tpu.trace_stop"() : () -> ()
    %cst_105 = arith.constant 2.500000e-01 : f32
    %232 = vector.broadcast %cst_105 : f32 to vector<2x8x8xf32>
    %233 = arith.mulf %231, %232 : vector<2x8x8xf32>
    %234 = arith.addf %233, %37 : vector<2x8x8xf32>
    %cst_106 = arith.constant dense<0xFF800000> : vector<2x8xf32>
    %235 = vector.multi_reduction <maximumf>, %234, %cst_106 [2] : vector<2x8x8xf32> to vector<2x8xf32>
    %236 = vector.shape_cast %235 : vector<2x8xf32> to vector<2x8x1xf32>
    %237 = vector.broadcast %236 : vector<2x8x1xf32> to vector<2x8x8xf32>
    %238 = arith.subf %234, %237 : vector<2x8x8xf32>
    %239 = math.exp %238 : vector<2x8x8xf32>
    %cst_107 = arith.constant dense<0.000000e+00> : vector<2x8xf32>
    %240 = vector.multi_reduction <add>, %239, %cst_107 [2] : vector<2x8x8xf32> to vector<2x8xf32>
    %241 = vector.shape_cast %240 : vector<2x8xf32> to vector<2x8x1xf32>
    %242 = vector.broadcast %241 : vector<2x8x1xf32> to vector<2x8x8xf32>
    %243 = arith.divf %239, %242 : vector<2x8x8xf32>
    "tpu.trace_start"() <{level = 10 : i32, message = "bqk,bke->bqe"}> : () -> ()
    %cst_108 = arith.constant dense<0.000000e+00> : vector<2x8x16xf32>
    %244 = tpu.matmul %243, %230, %cst_108 {dimension_numbers = #tpu.dot_dimension_numbers<[2], [1], [1], [2], [0, 0, 0, 1, 1, 2], [0], [0]>} : vector<2x8x8xf32>, vector<2x8x16xf32>, vector<2x8x16xf32> -> vector<2x8x16xf32>
    "tpu.trace_stop"() : () -> ()
    %245 = vector.extract_strided_slice %227 {offsets = [0, 0, 16], sizes = [2, 8, 16], strides = [1, 1, 1]} : vector<2x8x192xf32> to vector<2x8x16xf32>
    %246 = vector.extract_strided_slice %227 {offsets = [0, 0, 80], sizes = [2, 8, 16], strides = [1, 1, 1]} : vector<2x8x192xf32> to vector<2x8x16xf32>
    %247 = vector.extract_strided_slice %227 {offsets = [0, 0, 144], sizes = [2, 8, 16], strides = [1, 1, 1]} : vector<2x8x192xf32> to vector<2x8x16xf32>
    "tpu.trace_start"() <{level = 10 : i32, message = "bqe,bke->bqk"}> : () -> ()
    %cst_109 = arith.constant dense<0.000000e+00> : vector<2x8x8xf32>
    %248 = tpu.matmul %245, %246, %cst_109 {dimension_numbers = #tpu.dot_dimension_numbers<[2], [2], [1], [1], [0, 0, 0, 1, 1, 1], [0], [0]>} : vector<2x8x16xf32>, vector<2x8x16xf32>, vector<2x8x8xf32> -> vector<2x8x8xf32>
    "tpu.trace_stop"() : () -> ()
    %cst_110 = arith.constant 2.500000e-01 : f32
    %249 = vector.broadcast %cst_110 : f32 to vector<2x8x8xf32>
    %250 = arith.mulf %248, %249 : vector<2x8x8xf32>
    %251 = arith.addf %250, %37 : vector<2x8x8xf32>
    %cst_111 = arith.constant dense<0xFF800000> : vector<2x8xf32>
    %252 = vector.multi_reduction <maximumf>, %251, %cst_111 [2] : vector<2x8x8xf32> to vector<2x8xf32>
    %253 = vector.shape_cast %252 : vector<2x8xf32> to vector<2x8x1xf32>
    %254 = vector.broadcast %253 : vector<2x8x1xf32> to vector<2x8x8xf32>
    %255 = arith.subf %251, %254 : vector<2x8x8xf32>
    %256 = math.exp %255 : vector<2x8x8xf32>
    %cst_112 = arith.constant dense<0.000000e+00> : vector<2x8xf32>
    %257 = vector.multi_reduction <add>, %256, %cst_112 [2] : vector<2x8x8xf32> to vector<2x8xf32>
    %258 = vector.shape_cast %257 : vector<2x8xf32> to vector<2x8x1xf32>
    %259 = vector.broadcast %258 : vector<2x8x1xf32> to vector<2x8x8xf32>
    %260 = arith.divf %256, %259 : vector<2x8x8xf32>
    "tpu.trace_start"() <{level = 10 : i32, message = "bqk,bke->bqe"}> : () -> ()
    %cst_113 = arith.constant dense<0.000000e+00> : vector<2x8x16xf32>
    %261 = tpu.matmul %260, %247, %cst_113 {dimension_numbers = #tpu.dot_dimension_numbers<[2], [1], [1], [2], [0, 0, 0, 1, 1, 2], [0], [0]>} : vector<2x8x8xf32>, vector<2x8x16xf32>, vector<2x8x16xf32> -> vector<2x8x16xf32>
    "tpu.trace_stop"() : () -> ()
    %262 = vector.extract_strided_slice %227 {offsets = [0, 0, 32], sizes = [2, 8, 16], strides = [1, 1, 1]} : vector<2x8x192xf32> to vector<2x8x16xf32>
    %263 = vector.extract_strided_slice %227 {offsets = [0, 0, 96], sizes = [2, 8, 16], strides = [1, 1, 1]} : vector<2x8x192xf32> to vector<2x8x16xf32>
    %264 = vector.extract_strided_slice %227 {offsets = [0, 0, 160], sizes = [2, 8, 16], strides = [1, 1, 1]} : vector<2x8x192xf32> to vector<2x8x16xf32>
    "tpu.trace_start"() <{level = 10 : i32, message = "bqe,bke->bqk"}> : () -> ()
    %cst_114 = arith.constant dense<0.000000e+00> : vector<2x8x8xf32>
    %265 = tpu.matmul %262, %263, %cst_114 {dimension_numbers = #tpu.dot_dimension_numbers<[2], [2], [1], [1], [0, 0, 0, 1, 1, 1], [0], [0]>} : vector<2x8x16xf32>, vector<2x8x16xf32>, vector<2x8x8xf32> -> vector<2x8x8xf32>
    "tpu.trace_stop"() : () -> ()
    %cst_115 = arith.constant 2.500000e-01 : f32
    %266 = vector.broadcast %cst_115 : f32 to vector<2x8x8xf32>
    %267 = arith.mulf %265, %266 : vector<2x8x8xf32>
    %268 = arith.addf %267, %37 : vector<2x8x8xf32>
    %cst_116 = arith.constant dense<0xFF800000> : vector<2x8xf32>
    %269 = vector.multi_reduction <maximumf>, %268, %cst_116 [2] : vector<2x8x8xf32> to vector<2x8xf32>
    %270 = vector.shape_cast %269 : vector<2x8xf32> to vector<2x8x1xf32>
    %271 = vector.broadcast %270 : vector<2x8x1xf32> to vector<2x8x8xf32>
    %272 = arith.subf %268, %271 : vector<2x8x8xf32>
    %273 = math.exp %272 : vector<2x8x8xf32>
    %cst_117 = arith.constant dense<0.000000e+00> : vector<2x8xf32>
    %274 = vector.multi_reduction <add>, %273, %cst_117 [2] : vector<2x8x8xf32> to vector<2x8xf32>
    %275 = vector.shape_cast %274 : vector<2x8xf32> to vector<2x8x1xf32>
    %276 = vector.broadcast %275 : vector<2x8x1xf32> to vector<2x8x8xf32>
    %277 = arith.divf %273, %276 : vector<2x8x8xf32>
    "tpu.trace_start"() <{level = 10 : i32, message = "bqk,bke->bqe"}> : () -> ()
    %cst_118 = arith.constant dense<0.000000e+00> : vector<2x8x16xf32>
    %278 = tpu.matmul %277, %264, %cst_118 {dimension_numbers = #tpu.dot_dimension_numbers<[2], [1], [1], [2], [0, 0, 0, 1, 1, 2], [0], [0]>} : vector<2x8x8xf32>, vector<2x8x16xf32>, vector<2x8x16xf32> -> vector<2x8x16xf32>
    "tpu.trace_stop"() : () -> ()
    %279 = vector.extract_strided_slice %227 {offsets = [0, 0, 48], sizes = [2, 8, 16], strides = [1, 1, 1]} : vector<2x8x192xf32> to vector<2x8x16xf32>
    %280 = vector.extract_strided_slice %227 {offsets = [0, 0, 112], sizes = [2, 8, 16], strides = [1, 1, 1]} : vector<2x8x192xf32> to vector<2x8x16xf32>
    %281 = vector.extract_strided_slice %227 {offsets = [0, 0, 176], sizes = [2, 8, 16], strides = [1, 1, 1]} : vector<2x8x192xf32> to vector<2x8x16xf32>
    "tpu.trace_start"() <{level = 10 : i32, message = "bqe,bke->bqk"}> : () -> ()
    %cst_119 = arith.constant dense<0.000000e+00> : vector<2x8x8xf32>
    %282 = tpu.matmul %279, %280, %cst_119 {dimension_numbers = #tpu.dot_dimension_numbers<[2], [2], [1], [1], [0, 0, 0, 1, 1, 1], [0], [0]>} : vector<2x8x16xf32>, vector<2x8x16xf32>, vector<2x8x8xf32> -> vector<2x8x8xf32>
    "tpu.trace_stop"() : () -> ()
    %cst_120 = arith.constant 2.500000e-01 : f32
    %283 = vector.broadcast %cst_120 : f32 to vector<2x8x8xf32>
    %284 = arith.mulf %282, %283 : vector<2x8x8xf32>
    %285 = arith.addf %284, %37 : vector<2x8x8xf32>
    %cst_121 = arith.constant dense<0xFF800000> : vector<2x8xf32>
    %286 = vector.multi_reduction <maximumf>, %285, %cst_121 [2] : vector<2x8x8xf32> to vector<2x8xf32>
    %287 = vector.shape_cast %286 : vector<2x8xf32> to vector<2x8x1xf32>
    %288 = vector.broadcast %287 : vector<2x8x1xf32> to vector<2x8x8xf32>
    %289 = arith.subf %285, %288 : vector<2x8x8xf32>
    %290 = math.exp %289 : vector<2x8x8xf32>
    %cst_122 = arith.constant dense<0.000000e+00> : vector<2x8xf32>
    %291 = vector.multi_reduction <add>, %290, %cst_122 [2] : vector<2x8x8xf32> to vector<2x8xf32>
    %292 = vector.shape_cast %291 : vector<2x8xf32> to vector<2x8x1xf32>
    %293 = vector.broadcast %292 : vector<2x8x1xf32> to vector<2x8x8xf32>
    %294 = arith.divf %290, %293 : vector<2x8x8xf32>
    "tpu.trace_start"() <{level = 10 : i32, message = "bqk,bke->bqe"}> : () -> ()
    %cst_123 = arith.constant dense<0.000000e+00> : vector<2x8x16xf32>
    %295 = tpu.matmul %294, %281, %cst_123 {dimension_numbers = #tpu.dot_dimension_numbers<[2], [1], [1], [2], [0, 0, 0, 1, 1, 2], [0], [0]>} : vector<2x8x8xf32>, vector<2x8x16xf32>, vector<2x8x16xf32> -> vector<2x8x16xf32>
    "tpu.trace_stop"() : () -> ()
    %296 = tpu.concatenate %244, %261, %278, %295 in 2 : vector<2x8x16xf32>, vector<2x8x16xf32>, vector<2x8x16xf32>, vector<2x8x16xf32> -> vector<2x8x64xf32>
    %297 = vector.shape_cast %296 : vector<2x8x64xf32> to vector<16x64xf32>
    %c1_124 = arith.constant 1 : index
    %c0_125 = arith.constant 0 : index
    %c0_126 = arith.constant 0 : index
    %298 = vector.load %arg4[%c1_124, %c0_125, %c0_126] : memref<2x64x64xf32, #tpu.memory_space<vmem>>, vector<1x64x64xf32>
    %299 = vector.shape_cast %298 : vector<1x64x64xf32> to vector<64x64xf32>
    %cst_127 = arith.constant dense<0.000000e+00> : vector<16x64xf32>
    %300 = tpu.matmul %297, %299, %cst_127 {dimension_numbers = #tpu.dot_dimension_numbers<[1], [0], [0], [1], [0, 0, 1, 1], [], []>} : vector<16x64xf32>, vector<64x64xf32>, vector<16x64xf32> -> vector<16x64xf32>
    %c1_128 = arith.constant 1 : index
    %c0_129 = arith.constant 0 : index
    %c0_130 = arith.constant 0 : index
    %301 = vector.load %arg5[%c1_128, %c0_129, %c0_130] : memref<2x1x64xf32, #tpu.memory_space<vmem>>, vector<1x1x64xf32>
    %302 = vector.shape_cast %301 : vector<1x1x64xf32> to vector<1x64xf32>
    %303 = vector.broadcast %302 : vector<1x64xf32> to vector<16x64xf32>
    %304 = arith.addf %300, %303 : vector<16x64xf32>
    %305 = arith.addf %203, %304 : vector<16x64xf32>
    %cst_131 = arith.constant dense<0.000000e+00> : vector<16xf32>
    %306 = vector.multi_reduction <add>, %305, %cst_131 [1] : vector<16x64xf32> to vector<16xf32>
    %307 = vector.shape_cast %306 : vector<16xf32> to vector<16x1xf32>
    %cst_132 = arith.constant 6.400000e+01 : f32
    %308 = vector.broadcast %cst_132 : f32 to vector<16x1xf32>
    %309 = arith.divf %307, %308 : vector<16x1xf32>
    %310 = vector.broadcast %309 : vector<16x1xf32> to vector<16x64xf32>
    %311 = arith.subf %305, %310 : vector<16x64xf32>
    %312 = arith.mulf %311, %311 : vector<16x64xf32>
    %cst_133 = arith.constant dense<0.000000e+00> : vector<16xf32>
    %313 = vector.multi_reduction <add>, %312, %cst_133 [1] : vector<16x64xf32> to vector<16xf32>
    %314 = vector.shape_cast %313 : vector<16xf32> to vector<16x1xf32>
    %cst_134 = arith.constant 6.400000e+01 : f32
    %315 = vector.broadcast %cst_134 : f32 to vector<16x1xf32>
    %316 = arith.divf %314, %315 : vector<16x1xf32>
    %cst_135 = arith.constant 9.99999974E-6 : f32
    %317 = vector.broadcast %cst_135 : f32 to vector<16x1xf32>
    %318 = arith.addf %316, %317 : vector<16x1xf32>
    %319 = math.rsqrt %318 : vector<16x1xf32>
    %320 = vector.broadcast %319 : vector<16x1xf32> to vector<16x64xf32>
    %321 = arith.mulf %311, %320 : vector<16x64xf32>
    %c1_136 = arith.constant 1 : index
    %c0_137 = arith.constant 0 : index
    %c0_138 = arith.constant 0 : index
    %322 = vector.load %arg6[%c1_136, %c0_137, %c0_138] : memref<2x64x256xf32, #tpu.memory_space<vmem>>, vector<1x64x256xf32>
    %323 = vector.shape_cast %322 : vector<1x64x256xf32> to vector<64x256xf32>
    %cst_139 = arith.constant dense<0.000000e+00> : vector<16x256xf32>
    %324 = tpu.matmul %321, %323, %cst_139 {dimension_numbers = #tpu.dot_dimension_numbers<[1], [0], [0], [1], [0, 0, 1, 1], [], []>} : vector<16x64xf32>, vector<64x256xf32>, vector<16x256xf32> -> vector<16x256xf32>
    %c1_140 = arith.constant 1 : index
    %c0_141 = arith.constant 0 : index
    %c0_142 = arith.constant 0 : index
    %325 = vector.load %arg7[%c1_140, %c0_141, %c0_142] : memref<2x1x256xf32, #tpu.memory_space<vmem>>, vector<1x1x256xf32>
    %326 = vector.shape_cast %325 : vector<1x1x256xf32> to vector<1x256xf32>
    %327 = vector.broadcast %326 : vector<1x256xf32> to vector<16x256xf32>
    %328 = arith.addf %324, %327 : vector<16x256xf32>
    %cst_143 = arith.constant 5.000000e-01 : f32
    %329 = vector.broadcast %cst_143 : f32 to vector<16x256xf32>
    %330 = arith.mulf %329, %328 : vector<16x256xf32>
    %cst_144 = arith.constant 1.41421354 : f32
    %331 = vector.broadcast %cst_144 : f32 to vector<16x256xf32>
    %332 = arith.divf %328, %331 : vector<16x256xf32>
    %333 = math.erf %332 : vector<16x256xf32>
    %cst_145 = arith.constant 1.000000e+00 : f32
    %334 = vector.broadcast %cst_145 : f32 to vector<16x256xf32>
    %335 = arith.addf %334, %333 : vector<16x256xf32>
    %336 = arith.mulf %330, %335 : vector<16x256xf32>
    %c1_146 = arith.constant 1 : index
    %c0_147 = arith.constant 0 : index
    %c0_148 = arith.constant 0 : index
    %337 = vector.load %arg8[%c1_146, %c0_147, %c0_148] : memref<2x256x64xf32, #tpu.memory_space<vmem>>, vector<1x256x64xf32>
    %338 = vector.shape_cast %337 : vector<1x256x64xf32> to vector<256x64xf32>
    %cst_149 = arith.constant dense<0.000000e+00> : vector<16x64xf32>
    %339 = tpu.matmul %336, %338, %cst_149 {dimension_numbers = #tpu.dot_dimension_numbers<[1], [0], [0], [1], [0, 0, 1, 1], [], []>} : vector<16x256xf32>, vector<256x64xf32>, vector<16x64xf32> -> vector<16x64xf32>
    %c1_150 = arith.constant 1 : index
    %c0_151 = arith.constant 0 : index
    %c0_152 = arith.constant 0 : index
    %340 = vector.load %arg9[%c1_150, %c0_151, %c0_152] : memref<2x1x64xf32, #tpu.memory_space<vmem>>, vector<1x1x64xf32>
    %341 = vector.shape_cast %340 : vector<1x1x64xf32> to vector<1x64xf32>
    %342 = vector.broadcast %341 : vector<1x64xf32> to vector<16x64xf32>
    %343 = arith.addf %339, %342 : vector<16x64xf32>
    %c1_153 = arith.constant 1 : index
    %c0_154 = arith.constant 0 : index
    %c0_155 = arith.constant 0 : index
    %344 = vector.load %arg10[%c1_153, %c0_154, %c0_155] : memref<2x64x16xf32, #tpu.memory_space<vmem>>, vector<1x64x16xf32>
    %345 = vector.shape_cast %344 : vector<1x64x16xf32> to vector<64x16xf32>
    %cst_156 = arith.constant dense<0.000000e+00> : vector<16x16xf32>
    %346 = tpu.matmul %343, %345, %cst_156 {dimension_numbers = #tpu.dot_dimension_numbers<[1], [0], [0], [1], [0, 0, 1, 1], [], []>} : vector<16x64xf32>, vector<64x16xf32>, vector<16x16xf32> -> vector<16x16xf32>
    %c1_157 = arith.constant 1 : index
    %c0_158 = arith.constant 0 : index
    %c0_159 = arith.constant 0 : index
    %347 = vector.load %arg11[%c1_157, %c0_158, %c0_159] : memref<2x1x16xf32, #tpu.memory_space<vmem>>, vector<1x1x16xf32>
    %348 = vector.shape_cast %347 : vector<1x1x16xf32> to vector<1x16xf32>
    %349 = vector.broadcast %348 : vector<1x16xf32> to vector<16x16xf32>
    %350 = arith.addf %346, %349 : vector<16x16xf32>
    %cst_160 = arith.constant 5.000000e-01 : f32
    %351 = vector.broadcast %cst_160 : f32 to vector<16x16xf32>
    %352 = arith.mulf %351, %350 : vector<16x16xf32>
    %cst_161 = arith.constant 1.41421354 : f32
    %353 = vector.broadcast %cst_161 : f32 to vector<16x16xf32>
    %354 = arith.divf %350, %353 : vector<16x16xf32>
    %355 = math.erf %354 : vector<16x16xf32>
    %cst_162 = arith.constant 1.000000e+00 : f32
    %356 = vector.broadcast %cst_162 : f32 to vector<16x16xf32>
    %357 = arith.addf %356, %355 : vector<16x16xf32>
    %358 = arith.mulf %352, %357 : vector<16x16xf32>
    %c1_163 = arith.constant 1 : index
    %c0_164 = arith.constant 0 : index
    %c0_165 = arith.constant 0 : index
    %359 = vector.load %arg12[%c1_163, %c0_164, %c0_165] : memref<2x16x64xf32, #tpu.memory_space<vmem>>, vector<1x16x64xf32>
    %360 = vector.shape_cast %359 : vector<1x16x64xf32> to vector<16x64xf32>
    %cst_166 = arith.constant dense<0.000000e+00> : vector<16x64xf32>
    %361 = tpu.matmul %358, %360, %cst_166 {dimension_numbers = #tpu.dot_dimension_numbers<[1], [0], [0], [1], [0, 0, 1, 1], [], []>} : vector<16x16xf32>, vector<16x64xf32>, vector<16x64xf32> -> vector<16x64xf32>
    %c1_167 = arith.constant 1 : index
    %c0_168 = arith.constant 0 : index
    %c0_169 = arith.constant 0 : index
    %362 = vector.load %arg13[%c1_167, %c0_168, %c0_169] : memref<2x1x64xf32, #tpu.memory_space<vmem>>, vector<1x1x64xf32>
    %363 = vector.shape_cast %362 : vector<1x1x64xf32> to vector<1x64xf32>
    %364 = vector.broadcast %363 : vector<1x64xf32> to vector<16x64xf32>
    %365 = arith.addf %361, %364 : vector<16x64xf32>
    %366 = arith.addf %305, %343 : vector<16x64xf32>
    %367 = arith.addf %366, %365 : vector<16x64xf32>
    %c0_170 = arith.constant 0 : index
    %c0_171 = arith.constant 0 : index
    %368 = vector.load %arg14[%c0_170, %c0_171] : memref<64x32xf32, #tpu.memory_space<vmem>>, vector<64x32xf32>
    %cst_172 = arith.constant dense<0.000000e+00> : vector<16x32xf32>
    %369 = tpu.matmul %367, %368, %cst_172 {dimension_numbers = #tpu.dot_dimension_numbers<[1], [0], [0], [1], [0, 0, 1, 1], [], []>} : vector<16x64xf32>, vector<64x32xf32>, vector<16x32xf32> -> vector<16x32xf32>
    %c0_173 = arith.constant 0 : index
    %c0_174 = arith.constant 0 : index
    %370 = vector.load %arg15[%c0_173, %c0_174] : memref<1x32xf32, #tpu.memory_space<vmem>>, vector<1x32xf32>
    %371 = vector.broadcast %370 : vector<1x32xf32> to vector<16x32xf32>
    %372 = arith.addf %369, %371 : vector<16x32xf32>
    %cst_175 = arith.constant 5.000000e-01 : f32
    %373 = vector.broadcast %cst_175 : f32 to vector<16x32xf32>
    %374 = arith.mulf %373, %372 : vector<16x32xf32>
    %cst_176 = arith.constant 1.41421354 : f32
    %375 = vector.broadcast %cst_176 : f32 to vector<16x32xf32>
    %376 = arith.divf %372, %375 : vector<16x32xf32>
    %377 = math.erf %376 : vector<16x32xf32>
    %cst_177 = arith.constant 1.000000e+00 : f32
    %378 = vector.broadcast %cst_177 : f32 to vector<16x32xf32>
    %379 = arith.addf %378, %377 : vector<16x32xf32>
    %380 = arith.mulf %374, %379 : vector<16x32xf32>
    %cst_178 = arith.constant dense<0.000000e+00> : vector<16xf32>
    %381 = vector.multi_reduction <add>, %380, %cst_178 [1] : vector<16x32xf32> to vector<16xf32>
    %382 = vector.shape_cast %381 : vector<16xf32> to vector<16x1xf32>
    %cst_179 = arith.constant 3.200000e+01 : f32
    %383 = vector.broadcast %cst_179 : f32 to vector<16x1xf32>
    %384 = arith.divf %382, %383 : vector<16x1xf32>
    %385 = vector.broadcast %384 : vector<16x1xf32> to vector<16x32xf32>
    %386 = arith.subf %380, %385 : vector<16x32xf32>
    %387 = arith.mulf %386, %386 : vector<16x32xf32>
    %cst_180 = arith.constant dense<0.000000e+00> : vector<16xf32>
    %388 = vector.multi_reduction <add>, %387, %cst_180 [1] : vector<16x32xf32> to vector<16xf32>
    %389 = vector.shape_cast %388 : vector<16xf32> to vector<16x1xf32>
    %cst_181 = arith.constant 3.200000e+01 : f32
    %390 = vector.broadcast %cst_181 : f32 to vector<16x1xf32>
    %391 = arith.divf %389, %390 : vector<16x1xf32>
    %cst_182 = arith.constant 9.99999974E-6 : f32
    %392 = vector.broadcast %cst_182 : f32 to vector<16x1xf32>
    %393 = arith.addf %391, %392 : vector<16x1xf32>
    %394 = math.rsqrt %393 : vector<16x1xf32>
    %395 = vector.broadcast %394 : vector<16x1xf32> to vector<16x32xf32>
    %396 = arith.mulf %386, %395 : vector<16x32xf32>
    %c0_183 = arith.constant 0 : index
    %c0_184 = arith.constant 0 : index
    %c0_185 = arith.constant 0 : index
    %397 = vector.load %arg16[%c0_183, %c0_184, %c0_185] : memref<2x32x96xf32, #tpu.memory_space<vmem>>, vector<1x32x96xf32>
    %398 = vector.shape_cast %397 : vector<1x32x96xf32> to vector<32x96xf32>
    %cst_186 = arith.constant dense<0.000000e+00> : vector<16x96xf32>
    %399 = tpu.matmul %396, %398, %cst_186 {dimension_numbers = #tpu.dot_dimension_numbers<[1], [0], [0], [1], [0, 0, 1, 1], [], []>} : vector<16x32xf32>, vector<32x96xf32>, vector<16x96xf32> -> vector<16x96xf32>
    %c0_187 = arith.constant 0 : index
    %c0_188 = arith.constant 0 : index
    %c0_189 = arith.constant 0 : index
    %400 = vector.load %arg17[%c0_187, %c0_188, %c0_189] : memref<2x1x96xf32, #tpu.memory_space<vmem>>, vector<1x1x96xf32>
    %401 = vector.shape_cast %400 : vector<1x1x96xf32> to vector<1x96xf32>
    %402 = vector.broadcast %401 : vector<1x96xf32> to vector<16x96xf32>
    %403 = arith.addf %399, %402 : vector<16x96xf32>
    %404 = vector.shape_cast %403 : vector<16x96xf32> to vector<2x8x96xf32>
    %405 = vector.extract_strided_slice %404 {offsets = [0, 0, 0], sizes = [2, 8, 8], strides = [1, 1, 1]} : vector<2x8x96xf32> to vector<2x8x8xf32>
    %406 = vector.extract_strided_slice %404 {offsets = [0, 0, 32], sizes = [2, 8, 8], strides = [1, 1, 1]} : vector<2x8x96xf32> to vector<2x8x8xf32>
    %407 = vector.extract_strided_slice %404 {offsets = [0, 0, 64], sizes = [2, 8, 8], strides = [1, 1, 1]} : vector<2x8x96xf32> to vector<2x8x8xf32>
    "tpu.trace_start"() <{level = 10 : i32, message = "bqe,bke->bqk"}> : () -> ()
    %cst_190 = arith.constant dense<0.000000e+00> : vector<2x8x8xf32>
    %408 = tpu.matmul %405, %406, %cst_190 {dimension_numbers = #tpu.dot_dimension_numbers<[2], [2], [1], [1], [0, 0, 0, 1, 1, 1], [0], [0]>} : vector<2x8x8xf32>, vector<2x8x8xf32>, vector<2x8x8xf32> -> vector<2x8x8xf32>
    "tpu.trace_stop"() : () -> ()
    %cst_191 = arith.constant 0.353553385 : f32
    %409 = vector.broadcast %cst_191 : f32 to vector<2x8x8xf32>
    %410 = arith.mulf %408, %409 : vector<2x8x8xf32>
    %411 = arith.addf %410, %37 : vector<2x8x8xf32>
    %cst_192 = arith.constant dense<0xFF800000> : vector<2x8xf32>
    %412 = vector.multi_reduction <maximumf>, %411, %cst_192 [2] : vector<2x8x8xf32> to vector<2x8xf32>
    %413 = vector.shape_cast %412 : vector<2x8xf32> to vector<2x8x1xf32>
    %414 = vector.broadcast %413 : vector<2x8x1xf32> to vector<2x8x8xf32>
    %415 = arith.subf %411, %414 : vector<2x8x8xf32>
    %416 = math.exp %415 : vector<2x8x8xf32>
    %cst_193 = arith.constant dense<0.000000e+00> : vector<2x8xf32>
    %417 = vector.multi_reduction <add>, %416, %cst_193 [2] : vector<2x8x8xf32> to vector<2x8xf32>
    %418 = vector.shape_cast %417 : vector<2x8xf32> to vector<2x8x1xf32>
    %419 = vector.broadcast %418 : vector<2x8x1xf32> to vector<2x8x8xf32>
    %420 = arith.divf %416, %419 : vector<2x8x8xf32>
    "tpu.trace_start"() <{level = 10 : i32, message = "bqk,bke->bqe"}> : () -> ()
    %cst_194 = arith.constant dense<0.000000e+00> : vector<2x8x8xf32>
    %421 = tpu.matmul %420, %407, %cst_194 {dimension_numbers = #tpu.dot_dimension_numbers<[2], [1], [1], [2], [0, 0, 0, 1, 1, 2], [0], [0]>} : vector<2x8x8xf32>, vector<2x8x8xf32>, vector<2x8x8xf32> -> vector<2x8x8xf32>
    "tpu.trace_stop"() : () -> ()
    %422 = vector.extract_strided_slice %404 {offsets = [0, 0, 8], sizes = [2, 8, 8], strides = [1, 1, 1]} : vector<2x8x96xf32> to vector<2x8x8xf32>
    %423 = vector.extract_strided_slice %404 {offsets = [0, 0, 40], sizes = [2, 8, 8], strides = [1, 1, 1]} : vector<2x8x96xf32> to vector<2x8x8xf32>
    %424 = vector.extract_strided_slice %404 {offsets = [0, 0, 72], sizes = [2, 8, 8], strides = [1, 1, 1]} : vector<2x8x96xf32> to vector<2x8x8xf32>
    "tpu.trace_start"() <{level = 10 : i32, message = "bqe,bke->bqk"}> : () -> ()
    %cst_195 = arith.constant dense<0.000000e+00> : vector<2x8x8xf32>
    %425 = tpu.matmul %422, %423, %cst_195 {dimension_numbers = #tpu.dot_dimension_numbers<[2], [2], [1], [1], [0, 0, 0, 1, 1, 1], [0], [0]>} : vector<2x8x8xf32>, vector<2x8x8xf32>, vector<2x8x8xf32> -> vector<2x8x8xf32>
    "tpu.trace_stop"() : () -> ()
    %cst_196 = arith.constant 0.353553385 : f32
    %426 = vector.broadcast %cst_196 : f32 to vector<2x8x8xf32>
    %427 = arith.mulf %425, %426 : vector<2x8x8xf32>
    %428 = arith.addf %427, %37 : vector<2x8x8xf32>
    %cst_197 = arith.constant dense<0xFF800000> : vector<2x8xf32>
    %429 = vector.multi_reduction <maximumf>, %428, %cst_197 [2] : vector<2x8x8xf32> to vector<2x8xf32>
    %430 = vector.shape_cast %429 : vector<2x8xf32> to vector<2x8x1xf32>
    %431 = vector.broadcast %430 : vector<2x8x1xf32> to vector<2x8x8xf32>
    %432 = arith.subf %428, %431 : vector<2x8x8xf32>
    %433 = math.exp %432 : vector<2x8x8xf32>
    %cst_198 = arith.constant dense<0.000000e+00> : vector<2x8xf32>
    %434 = vector.multi_reduction <add>, %433, %cst_198 [2] : vector<2x8x8xf32> to vector<2x8xf32>
    %435 = vector.shape_cast %434 : vector<2x8xf32> to vector<2x8x1xf32>
    %436 = vector.broadcast %435 : vector<2x8x1xf32> to vector<2x8x8xf32>
    %437 = arith.divf %433, %436 : vector<2x8x8xf32>
    "tpu.trace_start"() <{level = 10 : i32, message = "bqk,bke->bqe"}> : () -> ()
    %cst_199 = arith.constant dense<0.000000e+00> : vector<2x8x8xf32>
    %438 = tpu.matmul %437, %424, %cst_199 {dimension_numbers = #tpu.dot_dimension_numbers<[2], [1], [1], [2], [0, 0, 0, 1, 1, 2], [0], [0]>} : vector<2x8x8xf32>, vector<2x8x8xf32>, vector<2x8x8xf32> -> vector<2x8x8xf32>
    "tpu.trace_stop"() : () -> ()
    %439 = vector.extract_strided_slice %404 {offsets = [0, 0, 16], sizes = [2, 8, 8], strides = [1, 1, 1]} : vector<2x8x96xf32> to vector<2x8x8xf32>
    %440 = vector.extract_strided_slice %404 {offsets = [0, 0, 48], sizes = [2, 8, 8], strides = [1, 1, 1]} : vector<2x8x96xf32> to vector<2x8x8xf32>
    %441 = vector.extract_strided_slice %404 {offsets = [0, 0, 80], sizes = [2, 8, 8], strides = [1, 1, 1]} : vector<2x8x96xf32> to vector<2x8x8xf32>
    "tpu.trace_start"() <{level = 10 : i32, message = "bqe,bke->bqk"}> : () -> ()
    %cst_200 = arith.constant dense<0.000000e+00> : vector<2x8x8xf32>
    %442 = tpu.matmul %439, %440, %cst_200 {dimension_numbers = #tpu.dot_dimension_numbers<[2], [2], [1], [1], [0, 0, 0, 1, 1, 1], [0], [0]>} : vector<2x8x8xf32>, vector<2x8x8xf32>, vector<2x8x8xf32> -> vector<2x8x8xf32>
    "tpu.trace_stop"() : () -> ()
    %cst_201 = arith.constant 0.353553385 : f32
    %443 = vector.broadcast %cst_201 : f32 to vector<2x8x8xf32>
    %444 = arith.mulf %442, %443 : vector<2x8x8xf32>
    %445 = arith.addf %444, %37 : vector<2x8x8xf32>
    %cst_202 = arith.constant dense<0xFF800000> : vector<2x8xf32>
    %446 = vector.multi_reduction <maximumf>, %445, %cst_202 [2] : vector<2x8x8xf32> to vector<2x8xf32>
    %447 = vector.shape_cast %446 : vector<2x8xf32> to vector<2x8x1xf32>
    %448 = vector.broadcast %447 : vector<2x8x1xf32> to vector<2x8x8xf32>
    %449 = arith.subf %445, %448 : vector<2x8x8xf32>
    %450 = math.exp %449 : vector<2x8x8xf32>
    %cst_203 = arith.constant dense<0.000000e+00> : vector<2x8xf32>
    %451 = vector.multi_reduction <add>, %450, %cst_203 [2] : vector<2x8x8xf32> to vector<2x8xf32>
    %452 = vector.shape_cast %451 : vector<2x8xf32> to vector<2x8x1xf32>
    %453 = vector.broadcast %452 : vector<2x8x1xf32> to vector<2x8x8xf32>
    %454 = arith.divf %450, %453 : vector<2x8x8xf32>
    "tpu.trace_start"() <{level = 10 : i32, message = "bqk,bke->bqe"}> : () -> ()
    %cst_204 = arith.constant dense<0.000000e+00> : vector<2x8x8xf32>
    %455 = tpu.matmul %454, %441, %cst_204 {dimension_numbers = #tpu.dot_dimension_numbers<[2], [1], [1], [2], [0, 0, 0, 1, 1, 2], [0], [0]>} : vector<2x8x8xf32>, vector<2x8x8xf32>, vector<2x8x8xf32> -> vector<2x8x8xf32>
    "tpu.trace_stop"() : () -> ()
    %456 = vector.extract_strided_slice %404 {offsets = [0, 0, 24], sizes = [2, 8, 8], strides = [1, 1, 1]} : vector<2x8x96xf32> to vector<2x8x8xf32>
    %457 = vector.extract_strided_slice %404 {offsets = [0, 0, 56], sizes = [2, 8, 8], strides = [1, 1, 1]} : vector<2x8x96xf32> to vector<2x8x8xf32>
    %458 = vector.extract_strided_slice %404 {offsets = [0, 0, 88], sizes = [2, 8, 8], strides = [1, 1, 1]} : vector<2x8x96xf32> to vector<2x8x8xf32>
    "tpu.trace_start"() <{level = 10 : i32, message = "bqe,bke->bqk"}> : () -> ()
    %cst_205 = arith.constant dense<0.000000e+00> : vector<2x8x8xf32>
    %459 = tpu.matmul %456, %457, %cst_205 {dimension_numbers = #tpu.dot_dimension_numbers<[2], [2], [1], [1], [0, 0, 0, 1, 1, 1], [0], [0]>} : vector<2x8x8xf32>, vector<2x8x8xf32>, vector<2x8x8xf32> -> vector<2x8x8xf32>
    "tpu.trace_stop"() : () -> ()
    %cst_206 = arith.constant 0.353553385 : f32
    %460 = vector.broadcast %cst_206 : f32 to vector<2x8x8xf32>
    %461 = arith.mulf %459, %460 : vector<2x8x8xf32>
    %462 = arith.addf %461, %37 : vector<2x8x8xf32>
    %cst_207 = arith.constant dense<0xFF800000> : vector<2x8xf32>
    %463 = vector.multi_reduction <maximumf>, %462, %cst_207 [2] : vector<2x8x8xf32> to vector<2x8xf32>
    %464 = vector.shape_cast %463 : vector<2x8xf32> to vector<2x8x1xf32>
    %465 = vector.broadcast %464 : vector<2x8x1xf32> to vector<2x8x8xf32>
    %466 = arith.subf %462, %465 : vector<2x8x8xf32>
    %467 = math.exp %466 : vector<2x8x8xf32>
    %cst_208 = arith.constant dense<0.000000e+00> : vector<2x8xf32>
    %468 = vector.multi_reduction <add>, %467, %cst_208 [2] : vector<2x8x8xf32> to vector<2x8xf32>
    %469 = vector.shape_cast %468 : vector<2x8xf32> to vector<2x8x1xf32>
    %470 = vector.broadcast %469 : vector<2x8x1xf32> to vector<2x8x8xf32>
    %471 = arith.divf %467, %470 : vector<2x8x8xf32>
    "tpu.trace_start"() <{level = 10 : i32, message = "bqk,bke->bqe"}> : () -> ()
    %cst_209 = arith.constant dense<0.000000e+00> : vector<2x8x8xf32>
    %472 = tpu.matmul %471, %458, %cst_209 {dimension_numbers = #tpu.dot_dimension_numbers<[2], [1], [1], [2], [0, 0, 0, 1, 1, 2], [0], [0]>} : vector<2x8x8xf32>, vector<2x8x8xf32>, vector<2x8x8xf32> -> vector<2x8x8xf32>
    "tpu.trace_stop"() : () -> ()
    %473 = tpu.concatenate %421, %438, %455, %472 in 2 : vector<2x8x8xf32>, vector<2x8x8xf32>, vector<2x8x8xf32>, vector<2x8x8xf32> -> vector<2x8x32xf32>
    %474 = vector.shape_cast %473 : vector<2x8x32xf32> to vector<16x32xf32>
    %c0_210 = arith.constant 0 : index
    %c0_211 = arith.constant 0 : index
    %c0_212 = arith.constant 0 : index
    %475 = vector.load %arg18[%c0_210, %c0_211, %c0_212] : memref<2x32x32xf32, #tpu.memory_space<vmem>>, vector<1x32x32xf32>
    %476 = vector.shape_cast %475 : vector<1x32x32xf32> to vector<32x32xf32>
    %cst_213 = arith.constant dense<0.000000e+00> : vector<16x32xf32>
    %477 = tpu.matmul %474, %476, %cst_213 {dimension_numbers = #tpu.dot_dimension_numbers<[1], [0], [0], [1], [0, 0, 1, 1], [], []>} : vector<16x32xf32>, vector<32x32xf32>, vector<16x32xf32> -> vector<16x32xf32>
    %c0_214 = arith.constant 0 : index
    %c0_215 = arith.constant 0 : index
    %c0_216 = arith.constant 0 : index
    %478 = vector.load %arg19[%c0_214, %c0_215, %c0_216] : memref<2x1x32xf32, #tpu.memory_space<vmem>>, vector<1x1x32xf32>
    %479 = vector.shape_cast %478 : vector<1x1x32xf32> to vector<1x32xf32>
    %480 = vector.broadcast %479 : vector<1x32xf32> to vector<16x32xf32>
    %481 = arith.addf %477, %480 : vector<16x32xf32>
    %482 = arith.addf %380, %481 : vector<16x32xf32>
    %cst_217 = arith.constant dense<0.000000e+00> : vector<16xf32>
    %483 = vector.multi_reduction <add>, %482, %cst_217 [1] : vector<16x32xf32> to vector<16xf32>
    %484 = vector.shape_cast %483 : vector<16xf32> to vector<16x1xf32>
    %cst_218 = arith.constant 3.200000e+01 : f32
    %485 = vector.broadcast %cst_218 : f32 to vector<16x1xf32>
    %486 = arith.divf %484, %485 : vector<16x1xf32>
    %487 = vector.broadcast %486 : vector<16x1xf32> to vector<16x32xf32>
    %488 = arith.subf %482, %487 : vector<16x32xf32>
    %489 = arith.mulf %488, %488 : vector<16x32xf32>
    %cst_219 = arith.constant dense<0.000000e+00> : vector<16xf32>
    %490 = vector.multi_reduction <add>, %489, %cst_219 [1] : vector<16x32xf32> to vector<16xf32>
    %491 = vector.shape_cast %490 : vector<16xf32> to vector<16x1xf32>
    %cst_220 = arith.constant 3.200000e+01 : f32
    %492 = vector.broadcast %cst_220 : f32 to vector<16x1xf32>
    %493 = arith.divf %491, %492 : vector<16x1xf32>
    %cst_221 = arith.constant 9.99999974E-6 : f32
    %494 = vector.broadcast %cst_221 : f32 to vector<16x1xf32>
    %495 = arith.addf %493, %494 : vector<16x1xf32>
    %496 = math.rsqrt %495 : vector<16x1xf32>
    %497 = vector.broadcast %496 : vector<16x1xf32> to vector<16x32xf32>
    %498 = arith.mulf %488, %497 : vector<16x32xf32>
    %c0_222 = arith.constant 0 : index
    %c0_223 = arith.constant 0 : index
    %c0_224 = arith.constant 0 : index
    %499 = vector.load %arg20[%c0_222, %c0_223, %c0_224] : memref<2x32x128xf32, #tpu.memory_space<vmem>>, vector<1x32x128xf32>
    %500 = vector.shape_cast %499 : vector<1x32x128xf32> to vector<32x128xf32>
    %cst_225 = arith.constant dense<0.000000e+00> : vector<16x128xf32>
    %501 = tpu.matmul %498, %500, %cst_225 {dimension_numbers = #tpu.dot_dimension_numbers<[1], [0], [0], [1], [0, 0, 1, 1], [], []>} : vector<16x32xf32>, vector<32x128xf32>, vector<16x128xf32> -> vector<16x128xf32>
    %c0_226 = arith.constant 0 : index
    %c0_227 = arith.constant 0 : index
    %c0_228 = arith.constant 0 : index
    %502 = vector.load %arg21[%c0_226, %c0_227, %c0_228] : memref<2x1x128xf32, #tpu.memory_space<vmem>>, vector<1x1x128xf32>
    %503 = vector.shape_cast %502 : vector<1x1x128xf32> to vector<1x128xf32>
    %504 = vector.broadcast %503 : vector<1x128xf32> to vector<16x128xf32>
    %505 = arith.addf %501, %504 : vector<16x128xf32>
    %cst_229 = arith.constant 5.000000e-01 : f32
    %506 = vector.broadcast %cst_229 : f32 to vector<16x128xf32>
    %507 = arith.mulf %506, %505 : vector<16x128xf32>
    %cst_230 = arith.constant 1.41421354 : f32
    %508 = vector.broadcast %cst_230 : f32 to vector<16x128xf32>
    %509 = arith.divf %505, %508 : vector<16x128xf32>
    %510 = math.erf %509 : vector<16x128xf32>
    %cst_231 = arith.constant 1.000000e+00 : f32
    %511 = vector.broadcast %cst_231 : f32 to vector<16x128xf32>
    %512 = arith.addf %511, %510 : vector<16x128xf32>
    %513 = arith.mulf %507, %512 : vector<16x128xf32>
    %c0_232 = arith.constant 0 : index
    %c0_233 = arith.constant 0 : index
    %c0_234 = arith.constant 0 : index
    %514 = vector.load %arg22[%c0_232, %c0_233, %c0_234] : memref<2x128x32xf32, #tpu.memory_space<vmem>>, vector<1x128x32xf32>
    %515 = vector.shape_cast %514 : vector<1x128x32xf32> to vector<128x32xf32>
    %cst_235 = arith.constant dense<0.000000e+00> : vector<16x32xf32>
    %516 = tpu.matmul %513, %515, %cst_235 {dimension_numbers = #tpu.dot_dimension_numbers<[1], [0], [0], [1], [0, 0, 1, 1], [], []>} : vector<16x128xf32>, vector<128x32xf32>, vector<16x32xf32> -> vector<16x32xf32>
    %c0_236 = arith.constant 0 : index
    %c0_237 = arith.constant 0 : index
    %c0_238 = arith.constant 0 : index
    %517 = vector.load %arg23[%c0_236, %c0_237, %c0_238] : memref<2x1x32xf32, #tpu.memory_space<vmem>>, vector<1x1x32xf32>
    %518 = vector.shape_cast %517 : vector<1x1x32xf32> to vector<1x32xf32>
    %519 = vector.broadcast %518 : vector<1x32xf32> to vector<16x32xf32>
    %520 = arith.addf %516, %519 : vector<16x32xf32>
    %c0_239 = arith.constant 0 : index
    %c0_240 = arith.constant 0 : index
    %c0_241 = arith.constant 0 : index
    %521 = vector.load %arg24[%c0_239, %c0_240, %c0_241] : memref<2x32x16xf32, #tpu.memory_space<vmem>>, vector<1x32x16xf32>
    %522 = vector.shape_cast %521 : vector<1x32x16xf32> to vector<32x16xf32>
    %cst_242 = arith.constant dense<0.000000e+00> : vector<16x16xf32>
    %523 = tpu.matmul %520, %522, %cst_242 {dimension_numbers = #tpu.dot_dimension_numbers<[1], [0], [0], [1], [0, 0, 1, 1], [], []>} : vector<16x32xf32>, vector<32x16xf32>, vector<16x16xf32> -> vector<16x16xf32>
    %c0_243 = arith.constant 0 : index
    %c0_244 = arith.constant 0 : index
    %c0_245 = arith.constant 0 : index
    %524 = vector.load %arg25[%c0_243, %c0_244, %c0_245] : memref<2x1x16xf32, #tpu.memory_space<vmem>>, vector<1x1x16xf32>
    %525 = vector.shape_cast %524 : vector<1x1x16xf32> to vector<1x16xf32>
    %526 = vector.broadcast %525 : vector<1x16xf32> to vector<16x16xf32>
    %527 = arith.addf %523, %526 : vector<16x16xf32>
    %cst_246 = arith.constant 5.000000e-01 : f32
    %528 = vector.broadcast %cst_246 : f32 to vector<16x16xf32>
    %529 = arith.mulf %528, %527 : vector<16x16xf32>
    %cst_247 = arith.constant 1.41421354 : f32
    %530 = vector.broadcast %cst_247 : f32 to vector<16x16xf32>
    %531 = arith.divf %527, %530 : vector<16x16xf32>
    %532 = math.erf %531 : vector<16x16xf32>
    %cst_248 = arith.constant 1.000000e+00 : f32
    %533 = vector.broadcast %cst_248 : f32 to vector<16x16xf32>
    %534 = arith.addf %533, %532 : vector<16x16xf32>
    %535 = arith.mulf %529, %534 : vector<16x16xf32>
    %c0_249 = arith.constant 0 : index
    %c0_250 = arith.constant 0 : index
    %c0_251 = arith.constant 0 : index
    %536 = vector.load %arg26[%c0_249, %c0_250, %c0_251] : memref<2x16x32xf32, #tpu.memory_space<vmem>>, vector<1x16x32xf32>
    %537 = vector.shape_cast %536 : vector<1x16x32xf32> to vector<16x32xf32>
    %cst_252 = arith.constant dense<0.000000e+00> : vector<16x32xf32>
    %538 = tpu.matmul %535, %537, %cst_252 {dimension_numbers = #tpu.dot_dimension_numbers<[1], [0], [0], [1], [0, 0, 1, 1], [], []>} : vector<16x16xf32>, vector<16x32xf32>, vector<16x32xf32> -> vector<16x32xf32>
    %c0_253 = arith.constant 0 : index
    %c0_254 = arith.constant 0 : index
    %c0_255 = arith.constant 0 : index
    %539 = vector.load %arg27[%c0_253, %c0_254, %c0_255] : memref<2x1x32xf32, #tpu.memory_space<vmem>>, vector<1x1x32xf32>
    %540 = vector.shape_cast %539 : vector<1x1x32xf32> to vector<1x32xf32>
    %541 = vector.broadcast %540 : vector<1x32xf32> to vector<16x32xf32>
    %542 = arith.addf %538, %541 : vector<16x32xf32>
    %543 = arith.addf %482, %520 : vector<16x32xf32>
    %544 = arith.addf %543, %542 : vector<16x32xf32>
    %cst_256 = arith.constant dense<0.000000e+00> : vector<16xf32>
    %545 = vector.multi_reduction <add>, %544, %cst_256 [1] : vector<16x32xf32> to vector<16xf32>
    %546 = vector.shape_cast %545 : vector<16xf32> to vector<16x1xf32>
    %cst_257 = arith.constant 3.200000e+01 : f32
    %547 = vector.broadcast %cst_257 : f32 to vector<16x1xf32>
    %548 = arith.divf %546, %547 : vector<16x1xf32>
    %549 = vector.broadcast %548 : vector<16x1xf32> to vector<16x32xf32>
    %550 = arith.subf %544, %549 : vector<16x32xf32>
    %551 = arith.mulf %550, %550 : vector<16x32xf32>
    %cst_258 = arith.constant dense<0.000000e+00> : vector<16xf32>
    %552 = vector.multi_reduction <add>, %551, %cst_258 [1] : vector<16x32xf32> to vector<16xf32>
    %553 = vector.shape_cast %552 : vector<16xf32> to vector<16x1xf32>
    %cst_259 = arith.constant 3.200000e+01 : f32
    %554 = vector.broadcast %cst_259 : f32 to vector<16x1xf32>
    %555 = arith.divf %553, %554 : vector<16x1xf32>
    %cst_260 = arith.constant 9.99999974E-6 : f32
    %556 = vector.broadcast %cst_260 : f32 to vector<16x1xf32>
    %557 = arith.addf %555, %556 : vector<16x1xf32>
    %558 = math.rsqrt %557 : vector<16x1xf32>
    %559 = vector.broadcast %558 : vector<16x1xf32> to vector<16x32xf32>
    %560 = arith.mulf %550, %559 : vector<16x32xf32>
    %c1_261 = arith.constant 1 : index
    %c0_262 = arith.constant 0 : index
    %c0_263 = arith.constant 0 : index
    %561 = vector.load %arg16[%c1_261, %c0_262, %c0_263] : memref<2x32x96xf32, #tpu.memory_space<vmem>>, vector<1x32x96xf32>
    %562 = vector.shape_cast %561 : vector<1x32x96xf32> to vector<32x96xf32>
    %cst_264 = arith.constant dense<0.000000e+00> : vector<16x96xf32>
    %563 = tpu.matmul %560, %562, %cst_264 {dimension_numbers = #tpu.dot_dimension_numbers<[1], [0], [0], [1], [0, 0, 1, 1], [], []>} : vector<16x32xf32>, vector<32x96xf32>, vector<16x96xf32> -> vector<16x96xf32>
    %c1_265 = arith.constant 1 : index
    %c0_266 = arith.constant 0 : index
    %c0_267 = arith.constant 0 : index
    %564 = vector.load %arg17[%c1_265, %c0_266, %c0_267] : memref<2x1x96xf32, #tpu.memory_space<vmem>>, vector<1x1x96xf32>
    %565 = vector.shape_cast %564 : vector<1x1x96xf32> to vector<1x96xf32>
    %566 = vector.broadcast %565 : vector<1x96xf32> to vector<16x96xf32>
    %567 = arith.addf %563, %566 : vector<16x96xf32>
    %568 = vector.shape_cast %567 : vector<16x96xf32> to vector<2x8x96xf32>
    %569 = vector.extract_strided_slice %568 {offsets = [0, 0, 0], sizes = [2, 8, 8], strides = [1, 1, 1]} : vector<2x8x96xf32> to vector<2x8x8xf32>
    %570 = vector.extract_strided_slice %568 {offsets = [0, 0, 32], sizes = [2, 8, 8], strides = [1, 1, 1]} : vector<2x8x96xf32> to vector<2x8x8xf32>
    %571 = vector.extract_strided_slice %568 {offsets = [0, 0, 64], sizes = [2, 8, 8], strides = [1, 1, 1]} : vector<2x8x96xf32> to vector<2x8x8xf32>
    "tpu.trace_start"() <{level = 10 : i32, message = "bqe,bke->bqk"}> : () -> ()
    %cst_268 = arith.constant dense<0.000000e+00> : vector<2x8x8xf32>
    %572 = tpu.matmul %569, %570, %cst_268 {dimension_numbers = #tpu.dot_dimension_numbers<[2], [2], [1], [1], [0, 0, 0, 1, 1, 1], [0], [0]>} : vector<2x8x8xf32>, vector<2x8x8xf32>, vector<2x8x8xf32> -> vector<2x8x8xf32>
    "tpu.trace_stop"() : () -> ()
    %cst_269 = arith.constant 0.353553385 : f32
    %573 = vector.broadcast %cst_269 : f32 to vector<2x8x8xf32>
    %574 = arith.mulf %572, %573 : vector<2x8x8xf32>
    %575 = arith.addf %574, %37 : vector<2x8x8xf32>
    %cst_270 = arith.constant dense<0xFF800000> : vector<2x8xf32>
    %576 = vector.multi_reduction <maximumf>, %575, %cst_270 [2] : vector<2x8x8xf32> to vector<2x8xf32>
    %577 = vector.shape_cast %576 : vector<2x8xf32> to vector<2x8x1xf32>
    %578 = vector.broadcast %577 : vector<2x8x1xf32> to vector<2x8x8xf32>
    %579 = arith.subf %575, %578 : vector<2x8x8xf32>
    %580 = math.exp %579 : vector<2x8x8xf32>
    %cst_271 = arith.constant dense<0.000000e+00> : vector<2x8xf32>
    %581 = vector.multi_reduction <add>, %580, %cst_271 [2] : vector<2x8x8xf32> to vector<2x8xf32>
    %582 = vector.shape_cast %581 : vector<2x8xf32> to vector<2x8x1xf32>
    %583 = vector.broadcast %582 : vector<2x8x1xf32> to vector<2x8x8xf32>
    %584 = arith.divf %580, %583 : vector<2x8x8xf32>
    "tpu.trace_start"() <{level = 10 : i32, message = "bqk,bke->bqe"}> : () -> ()
    %cst_272 = arith.constant dense<0.000000e+00> : vector<2x8x8xf32>
    %585 = tpu.matmul %584, %571, %cst_272 {dimension_numbers = #tpu.dot_dimension_numbers<[2], [1], [1], [2], [0, 0, 0, 1, 1, 2], [0], [0]>} : vector<2x8x8xf32>, vector<2x8x8xf32>, vector<2x8x8xf32> -> vector<2x8x8xf32>
    "tpu.trace_stop"() : () -> ()
    %586 = vector.extract_strided_slice %568 {offsets = [0, 0, 8], sizes = [2, 8, 8], strides = [1, 1, 1]} : vector<2x8x96xf32> to vector<2x8x8xf32>
    %587 = vector.extract_strided_slice %568 {offsets = [0, 0, 40], sizes = [2, 8, 8], strides = [1, 1, 1]} : vector<2x8x96xf32> to vector<2x8x8xf32>
    %588 = vector.extract_strided_slice %568 {offsets = [0, 0, 72], sizes = [2, 8, 8], strides = [1, 1, 1]} : vector<2x8x96xf32> to vector<2x8x8xf32>
    "tpu.trace_start"() <{level = 10 : i32, message = "bqe,bke->bqk"}> : () -> ()
    %cst_273 = arith.constant dense<0.000000e+00> : vector<2x8x8xf32>
    %589 = tpu.matmul %586, %587, %cst_273 {dimension_numbers = #tpu.dot_dimension_numbers<[2], [2], [1], [1], [0, 0, 0, 1, 1, 1], [0], [0]>} : vector<2x8x8xf32>, vector<2x8x8xf32>, vector<2x8x8xf32> -> vector<2x8x8xf32>
    "tpu.trace_stop"() : () -> ()
    %cst_274 = arith.constant 0.353553385 : f32
    %590 = vector.broadcast %cst_274 : f32 to vector<2x8x8xf32>
    %591 = arith.mulf %589, %590 : vector<2x8x8xf32>
    %592 = arith.addf %591, %37 : vector<2x8x8xf32>
    %cst_275 = arith.constant dense<0xFF800000> : vector<2x8xf32>
    %593 = vector.multi_reduction <maximumf>, %592, %cst_275 [2] : vector<2x8x8xf32> to vector<2x8xf32>
    %594 = vector.shape_cast %593 : vector<2x8xf32> to vector<2x8x1xf32>
    %595 = vector.broadcast %594 : vector<2x8x1xf32> to vector<2x8x8xf32>
    %596 = arith.subf %592, %595 : vector<2x8x8xf32>
    %597 = math.exp %596 : vector<2x8x8xf32>
    %cst_276 = arith.constant dense<0.000000e+00> : vector<2x8xf32>
    %598 = vector.multi_reduction <add>, %597, %cst_276 [2] : vector<2x8x8xf32> to vector<2x8xf32>
    %599 = vector.shape_cast %598 : vector<2x8xf32> to vector<2x8x1xf32>
    %600 = vector.broadcast %599 : vector<2x8x1xf32> to vector<2x8x8xf32>
    %601 = arith.divf %597, %600 : vector<2x8x8xf32>
    "tpu.trace_start"() <{level = 10 : i32, message = "bqk,bke->bqe"}> : () -> ()
    %cst_277 = arith.constant dense<0.000000e+00> : vector<2x8x8xf32>
    %602 = tpu.matmul %601, %588, %cst_277 {dimension_numbers = #tpu.dot_dimension_numbers<[2], [1], [1], [2], [0, 0, 0, 1, 1, 2], [0], [0]>} : vector<2x8x8xf32>, vector<2x8x8xf32>, vector<2x8x8xf32> -> vector<2x8x8xf32>
    "tpu.trace_stop"() : () -> ()
    %603 = vector.extract_strided_slice %568 {offsets = [0, 0, 16], sizes = [2, 8, 8], strides = [1, 1, 1]} : vector<2x8x96xf32> to vector<2x8x8xf32>
    %604 = vector.extract_strided_slice %568 {offsets = [0, 0, 48], sizes = [2, 8, 8], strides = [1, 1, 1]} : vector<2x8x96xf32> to vector<2x8x8xf32>
    %605 = vector.extract_strided_slice %568 {offsets = [0, 0, 80], sizes = [2, 8, 8], strides = [1, 1, 1]} : vector<2x8x96xf32> to vector<2x8x8xf32>
    "tpu.trace_start"() <{level = 10 : i32, message = "bqe,bke->bqk"}> : () -> ()
    %cst_278 = arith.constant dense<0.000000e+00> : vector<2x8x8xf32>
    %606 = tpu.matmul %603, %604, %cst_278 {dimension_numbers = #tpu.dot_dimension_numbers<[2], [2], [1], [1], [0, 0, 0, 1, 1, 1], [0], [0]>} : vector<2x8x8xf32>, vector<2x8x8xf32>, vector<2x8x8xf32> -> vector<2x8x8xf32>
    "tpu.trace_stop"() : () -> ()
    %cst_279 = arith.constant 0.353553385 : f32
    %607 = vector.broadcast %cst_279 : f32 to vector<2x8x8xf32>
    %608 = arith.mulf %606, %607 : vector<2x8x8xf32>
    %609 = arith.addf %608, %37 : vector<2x8x8xf32>
    %cst_280 = arith.constant dense<0xFF800000> : vector<2x8xf32>
    %610 = vector.multi_reduction <maximumf>, %609, %cst_280 [2] : vector<2x8x8xf32> to vector<2x8xf32>
    %611 = vector.shape_cast %610 : vector<2x8xf32> to vector<2x8x1xf32>
    %612 = vector.broadcast %611 : vector<2x8x1xf32> to vector<2x8x8xf32>
    %613 = arith.subf %609, %612 : vector<2x8x8xf32>
    %614 = math.exp %613 : vector<2x8x8xf32>
    %cst_281 = arith.constant dense<0.000000e+00> : vector<2x8xf32>
    %615 = vector.multi_reduction <add>, %614, %cst_281 [2] : vector<2x8x8xf32> to vector<2x8xf32>
    %616 = vector.shape_cast %615 : vector<2x8xf32> to vector<2x8x1xf32>
    %617 = vector.broadcast %616 : vector<2x8x1xf32> to vector<2x8x8xf32>
    %618 = arith.divf %614, %617 : vector<2x8x8xf32>
    "tpu.trace_start"() <{level = 10 : i32, message = "bqk,bke->bqe"}> : () -> ()
    %cst_282 = arith.constant dense<0.000000e+00> : vector<2x8x8xf32>
    %619 = tpu.matmul %618, %605, %cst_282 {dimension_numbers = #tpu.dot_dimension_numbers<[2], [1], [1], [2], [0, 0, 0, 1, 1, 2], [0], [0]>} : vector<2x8x8xf32>, vector<2x8x8xf32>, vector<2x8x8xf32> -> vector<2x8x8xf32>
    "tpu.trace_stop"() : () -> ()
    %620 = vector.extract_strided_slice %568 {offsets = [0, 0, 24], sizes = [2, 8, 8], strides = [1, 1, 1]} : vector<2x8x96xf32> to vector<2x8x8xf32>
    %621 = vector.extract_strided_slice %568 {offsets = [0, 0, 56], sizes = [2, 8, 8], strides = [1, 1, 1]} : vector<2x8x96xf32> to vector<2x8x8xf32>
    %622 = vector.extract_strided_slice %568 {offsets = [0, 0, 88], sizes = [2, 8, 8], strides = [1, 1, 1]} : vector<2x8x96xf32> to vector<2x8x8xf32>
    "tpu.trace_start"() <{level = 10 : i32, message = "bqe,bke->bqk"}> : () -> ()
    %cst_283 = arith.constant dense<0.000000e+00> : vector<2x8x8xf32>
    %623 = tpu.matmul %620, %621, %cst_283 {dimension_numbers = #tpu.dot_dimension_numbers<[2], [2], [1], [1], [0, 0, 0, 1, 1, 1], [0], [0]>} : vector<2x8x8xf32>, vector<2x8x8xf32>, vector<2x8x8xf32> -> vector<2x8x8xf32>
    "tpu.trace_stop"() : () -> ()
    %cst_284 = arith.constant 0.353553385 : f32
    %624 = vector.broadcast %cst_284 : f32 to vector<2x8x8xf32>
    %625 = arith.mulf %623, %624 : vector<2x8x8xf32>
    %626 = arith.addf %625, %37 : vector<2x8x8xf32>
    %cst_285 = arith.constant dense<0xFF800000> : vector<2x8xf32>
    %627 = vector.multi_reduction <maximumf>, %626, %cst_285 [2] : vector<2x8x8xf32> to vector<2x8xf32>
    %628 = vector.shape_cast %627 : vector<2x8xf32> to vector<2x8x1xf32>
    %629 = vector.broadcast %628 : vector<2x8x1xf32> to vector<2x8x8xf32>
    %630 = arith.subf %626, %629 : vector<2x8x8xf32>
    %631 = math.exp %630 : vector<2x8x8xf32>
    %cst_286 = arith.constant dense<0.000000e+00> : vector<2x8xf32>
    %632 = vector.multi_reduction <add>, %631, %cst_286 [2] : vector<2x8x8xf32> to vector<2x8xf32>
    %633 = vector.shape_cast %632 : vector<2x8xf32> to vector<2x8x1xf32>
    %634 = vector.broadcast %633 : vector<2x8x1xf32> to vector<2x8x8xf32>
    %635 = arith.divf %631, %634 : vector<2x8x8xf32>
    "tpu.trace_start"() <{level = 10 : i32, message = "bqk,bke->bqe"}> : () -> ()
    %cst_287 = arith.constant dense<0.000000e+00> : vector<2x8x8xf32>
    %636 = tpu.matmul %635, %622, %cst_287 {dimension_numbers = #tpu.dot_dimension_numbers<[2], [1], [1], [2], [0, 0, 0, 1, 1, 2], [0], [0]>} : vector<2x8x8xf32>, vector<2x8x8xf32>, vector<2x8x8xf32> -> vector<2x8x8xf32>
    "tpu.trace_stop"() : () -> ()
    %637 = tpu.concatenate %585, %602, %619, %636 in 2 : vector<2x8x8xf32>, vector<2x8x8xf32>, vector<2x8x8xf32>, vector<2x8x8xf32> -> vector<2x8x32xf32>
    %638 = vector.shape_cast %637 : vector<2x8x32xf32> to vector<16x32xf32>
    %c1_288 = arith.constant 1 : index
    %c0_289 = arith.constant 0 : index
    %c0_290 = arith.constant 0 : index
    %639 = vector.load %arg18[%c1_288, %c0_289, %c0_290] : memref<2x32x32xf32, #tpu.memory_space<vmem>>, vector<1x32x32xf32>
    %640 = vector.shape_cast %639 : vector<1x32x32xf32> to vector<32x32xf32>
    %cst_291 = arith.constant dense<0.000000e+00> : vector<16x32xf32>
    %641 = tpu.matmul %638, %640, %cst_291 {dimension_numbers = #tpu.dot_dimension_numbers<[1], [0], [0], [1], [0, 0, 1, 1], [], []>} : vector<16x32xf32>, vector<32x32xf32>, vector<16x32xf32> -> vector<16x32xf32>
    %c1_292 = arith.constant 1 : index
    %c0_293 = arith.constant 0 : index
    %c0_294 = arith.constant 0 : index
    %642 = vector.load %arg19[%c1_292, %c0_293, %c0_294] : memref<2x1x32xf32, #tpu.memory_space<vmem>>, vector<1x1x32xf32>
    %643 = vector.shape_cast %642 : vector<1x1x32xf32> to vector<1x32xf32>
    %644 = vector.broadcast %643 : vector<1x32xf32> to vector<16x32xf32>
    %645 = arith.addf %641, %644 : vector<16x32xf32>
    %646 = arith.addf %544, %645 : vector<16x32xf32>
    %cst_295 = arith.constant dense<0.000000e+00> : vector<16xf32>
    %647 = vector.multi_reduction <add>, %646, %cst_295 [1] : vector<16x32xf32> to vector<16xf32>
    %648 = vector.shape_cast %647 : vector<16xf32> to vector<16x1xf32>
    %cst_296 = arith.constant 3.200000e+01 : f32
    %649 = vector.broadcast %cst_296 : f32 to vector<16x1xf32>
    %650 = arith.divf %648, %649 : vector<16x1xf32>
    %651 = vector.broadcast %650 : vector<16x1xf32> to vector<16x32xf32>
    %652 = arith.subf %646, %651 : vector<16x32xf32>
    %653 = arith.mulf %652, %652 : vector<16x32xf32>
    %cst_297 = arith.constant dense<0.000000e+00> : vector<16xf32>
    %654 = vector.multi_reduction <add>, %653, %cst_297 [1] : vector<16x32xf32> to vector<16xf32>
    %655 = vector.shape_cast %654 : vector<16xf32> to vector<16x1xf32>
    %cst_298 = arith.constant 3.200000e+01 : f32
    %656 = vector.broadcast %cst_298 : f32 to vector<16x1xf32>
    %657 = arith.divf %655, %656 : vector<16x1xf32>
    %cst_299 = arith.constant 9.99999974E-6 : f32
    %658 = vector.broadcast %cst_299 : f32 to vector<16x1xf32>
    %659 = arith.addf %657, %658 : vector<16x1xf32>
    %660 = math.rsqrt %659 : vector<16x1xf32>
    %661 = vector.broadcast %660 : vector<16x1xf32> to vector<16x32xf32>
    %662 = arith.mulf %652, %661 : vector<16x32xf32>
    %c1_300 = arith.constant 1 : index
    %c0_301 = arith.constant 0 : index
    %c0_302 = arith.constant 0 : index
    %663 = vector.load %arg20[%c1_300, %c0_301, %c0_302] : memref<2x32x128xf32, #tpu.memory_space<vmem>>, vector<1x32x128xf32>
    %664 = vector.shape_cast %663 : vector<1x32x128xf32> to vector<32x128xf32>
    %cst_303 = arith.constant dense<0.000000e+00> : vector<16x128xf32>
    %665 = tpu.matmul %662, %664, %cst_303 {dimension_numbers = #tpu.dot_dimension_numbers<[1], [0], [0], [1], [0, 0, 1, 1], [], []>} : vector<16x32xf32>, vector<32x128xf32>, vector<16x128xf32> -> vector<16x128xf32>
    %c1_304 = arith.constant 1 : index
    %c0_305 = arith.constant 0 : index
    %c0_306 = arith.constant 0 : index
    %666 = vector.load %arg21[%c1_304, %c0_305, %c0_306] : memref<2x1x128xf32, #tpu.memory_space<vmem>>, vector<1x1x128xf32>
    %667 = vector.shape_cast %666 : vector<1x1x128xf32> to vector<1x128xf32>
    %668 = vector.broadcast %667 : vector<1x128xf32> to vector<16x128xf32>
    %669 = arith.addf %665, %668 : vector<16x128xf32>
    %cst_307 = arith.constant 5.000000e-01 : f32
    %670 = vector.broadcast %cst_307 : f32 to vector<16x128xf32>
    %671 = arith.mulf %670, %669 : vector<16x128xf32>
    %cst_308 = arith.constant 1.41421354 : f32
    %672 = vector.broadcast %cst_308 : f32 to vector<16x128xf32>
    %673 = arith.divf %669, %672 : vector<16x128xf32>
    %674 = math.erf %673 : vector<16x128xf32>
    %cst_309 = arith.constant 1.000000e+00 : f32
    %675 = vector.broadcast %cst_309 : f32 to vector<16x128xf32>
    %676 = arith.addf %675, %674 : vector<16x128xf32>
    %677 = arith.mulf %671, %676 : vector<16x128xf32>
    %c1_310 = arith.constant 1 : index
    %c0_311 = arith.constant 0 : index
    %c0_312 = arith.constant 0 : index
    %678 = vector.load %arg22[%c1_310, %c0_311, %c0_312] : memref<2x128x32xf32, #tpu.memory_space<vmem>>, vector<1x128x32xf32>
    %679 = vector.shape_cast %678 : vector<1x128x32xf32> to vector<128x32xf32>
    %cst_313 = arith.constant dense<0.000000e+00> : vector<16x32xf32>
    %680 = tpu.matmul %677, %679, %cst_313 {dimension_numbers = #tpu.dot_dimension_numbers<[1], [0], [0], [1], [0, 0, 1, 1], [], []>} : vector<16x128xf32>, vector<128x32xf32>, vector<16x32xf32> -> vector<16x32xf32>
    %c1_314 = arith.constant 1 : index
    %c0_315 = arith.constant 0 : index
    %c0_316 = arith.constant 0 : index
    %681 = vector.load %arg23[%c1_314, %c0_315, %c0_316] : memref<2x1x32xf32, #tpu.memory_space<vmem>>, vector<1x1x32xf32>
    %682 = vector.shape_cast %681 : vector<1x1x32xf32> to vector<1x32xf32>
    %683 = vector.broadcast %682 : vector<1x32xf32> to vector<16x32xf32>
    %684 = arith.addf %680, %683 : vector<16x32xf32>
    %c1_317 = arith.constant 1 : index
    %c0_318 = arith.constant 0 : index
    %c0_319 = arith.constant 0 : index
    %685 = vector.load %arg24[%c1_317, %c0_318, %c0_319] : memref<2x32x16xf32, #tpu.memory_space<vmem>>, vector<1x32x16xf32>
    %686 = vector.shape_cast %685 : vector<1x32x16xf32> to vector<32x16xf32>
    %cst_320 = arith.constant dense<0.000000e+00> : vector<16x16xf32>
    %687 = tpu.matmul %684, %686, %cst_320 {dimension_numbers = #tpu.dot_dimension_numbers<[1], [0], [0], [1], [0, 0, 1, 1], [], []>} : vector<16x32xf32>, vector<32x16xf32>, vector<16x16xf32> -> vector<16x16xf32>
    %c1_321 = arith.constant 1 : index
    %c0_322 = arith.constant 0 : index
    %c0_323 = arith.constant 0 : index
    %688 = vector.load %arg25[%c1_321, %c0_322, %c0_323] : memref<2x1x16xf32, #tpu.memory_space<vmem>>, vector<1x1x16xf32>
    %689 = vector.shape_cast %688 : vector<1x1x16xf32> to vector<1x16xf32>
    %690 = vector.broadcast %689 : vector<1x16xf32> to vector<16x16xf32>
    %691 = arith.addf %687, %690 : vector<16x16xf32>
    %cst_324 = arith.constant 5.000000e-01 : f32
    %692 = vector.broadcast %cst_324 : f32 to vector<16x16xf32>
    %693 = arith.mulf %692, %691 : vector<16x16xf32>
    %cst_325 = arith.constant 1.41421354 : f32
    %694 = vector.broadcast %cst_325 : f32 to vector<16x16xf32>
    %695 = arith.divf %691, %694 : vector<16x16xf32>
    %696 = math.erf %695 : vector<16x16xf32>
    %cst_326 = arith.constant 1.000000e+00 : f32
    %697 = vector.broadcast %cst_326 : f32 to vector<16x16xf32>
    %698 = arith.addf %697, %696 : vector<16x16xf32>
    %699 = arith.mulf %693, %698 : vector<16x16xf32>
    %c1_327 = arith.constant 1 : index
    %c0_328 = arith.constant 0 : index
    %c0_329 = arith.constant 0 : index
    %700 = vector.load %arg26[%c1_327, %c0_328, %c0_329] : memref<2x16x32xf32, #tpu.memory_space<vmem>>, vector<1x16x32xf32>
    %701 = vector.shape_cast %700 : vector<1x16x32xf32> to vector<16x32xf32>
    %cst_330 = arith.constant dense<0.000000e+00> : vector<16x32xf32>
    %702 = tpu.matmul %699, %701, %cst_330 {dimension_numbers = #tpu.dot_dimension_numbers<[1], [0], [0], [1], [0, 0, 1, 1], [], []>} : vector<16x16xf32>, vector<16x32xf32>, vector<16x32xf32> -> vector<16x32xf32>
    %c1_331 = arith.constant 1 : index
    %c0_332 = arith.constant 0 : index
    %c0_333 = arith.constant 0 : index
    %703 = vector.load %arg27[%c1_331, %c0_332, %c0_333] : memref<2x1x32xf32, #tpu.memory_space<vmem>>, vector<1x1x32xf32>
    %704 = vector.shape_cast %703 : vector<1x1x32xf32> to vector<1x32xf32>
    %705 = vector.broadcast %704 : vector<1x32xf32> to vector<16x32xf32>
    %706 = arith.addf %702, %705 : vector<16x32xf32>
    %707 = arith.addf %646, %684 : vector<16x32xf32>
    %708 = arith.addf %707, %706 : vector<16x32xf32>
    %709 = vector.shape_cast %708 : vector<16x32xf32> to vector<2x8x32xf32>
    %c0_334 = arith.constant 0 : index
    %c0_335 = arith.constant 0 : index
    %710 = vector.load %arg28[%c0_334, %c0_335] : memref<1x32xf32, #tpu.memory_space<vmem>>, vector<1x32xf32>
    %711 = vector.shape_cast %710 : vector<1x32xf32> to vector<1x1x32xf32>
    %712 = vector.broadcast %711 : vector<1x1x32xf32> to vector<2x8x32xf32>
    %713 = arith.mulf %709, %712 : vector<2x8x32xf32>
    %cst_336 = arith.constant dense<0.000000e+00> : vector<2x8xf32>
    %714 = vector.multi_reduction <add>, %713, %cst_336 [2] : vector<2x8x32xf32> to vector<2x8xf32>
    %715 = vector.shape_cast %714 : vector<2x8xf32> to vector<2x8x1xf32>
    %c0_337 = arith.constant 0 : index
    %c0_338 = arith.constant 0 : index
    %716 = vector.load %arg29[%c0_337, %c0_338] : memref<1x1xf32, #tpu.memory_space<vmem>>, vector<1x1xf32>
    %717 = vector.shape_cast %716 : vector<1x1xf32> to vector<1x1x1xf32>
    %718 = vector.broadcast %717 : vector<1x1x1xf32> to vector<2x8x1xf32>
    %719 = arith.addf %715, %718 : vector<2x8x1xf32>
    %cst_339 = arith.constant dense<0xFF800000> : vector<2x1xf32>
    %720 = vector.multi_reduction <maximumf>, %719, %cst_339 [1] : vector<2x8x1xf32> to vector<2x1xf32>
    %721 = vector.shape_cast %720 : vector<2x1xf32> to vector<2x1x1xf32>
    %722 = vector.broadcast %721 : vector<2x1x1xf32> to vector<2x8x1xf32>
    %723 = arith.subf %719, %722 : vector<2x8x1xf32>
    %724 = math.exp %723 : vector<2x8x1xf32>
    %cst_340 = arith.constant dense<0.000000e+00> : vector<2x1xf32>
    %725 = vector.multi_reduction <add>, %724, %cst_340 [1] : vector<2x8x1xf32> to vector<2x1xf32>
    %726 = vector.shape_cast %725 : vector<2x1xf32> to vector<2x1x1xf32>
    %727 = vector.broadcast %726 : vector<2x1x1xf32> to vector<2x8x1xf32>
    %728 = arith.divf %724, %727 : vector<2x8x1xf32>
    %729 = vector.broadcast %728 : vector<2x8x1xf32> to vector<2x8x32xf32>
    %730 = arith.mulf %709, %729 : vector<2x8x32xf32>
    %cst_341 = arith.constant dense<0.000000e+00> : vector<2x32xf32>
    %731 = vector.multi_reduction <add>, %730, %cst_341 [1] : vector<2x8x32xf32> to vector<2x32xf32>
    %c0_342 = arith.constant 0 : index
    %c0_343 = arith.constant 0 : index
    %732 = vector.load %arg30[%c0_342, %c0_343] : memref<1x32xf32, #tpu.memory_space<vmem>>, vector<1x32xf32>
    %c0_344 = arith.constant 0 : index
    %c0_345 = arith.constant 0 : index
    %733 = vector.load %arg31[%c0_344, %c0_345] : memref<1x32xf32, #tpu.memory_space<vmem>>, vector<1x32xf32>
    %cst_346 = arith.constant dense<0.000000e+00> : vector<2xf32>
    %734 = vector.multi_reduction <add>, %731, %cst_346 [1] : vector<2x32xf32> to vector<2xf32>
    %735 = vector.shape_cast %734 : vector<2xf32> to vector<2x1xf32>
    %cst_347 = arith.constant 3.200000e+01 : f32
    %736 = vector.broadcast %cst_347 : f32 to vector<2x1xf32>
    %737 = arith.divf %735, %736 : vector<2x1xf32>
    %738 = vector.broadcast %737 : vector<2x1xf32> to vector<2x32xf32>
    %739 = arith.subf %731, %738 : vector<2x32xf32>
    %740 = arith.mulf %739, %739 : vector<2x32xf32>
    %cst_348 = arith.constant dense<0.000000e+00> : vector<2xf32>
    %741 = vector.multi_reduction <add>, %740, %cst_348 [1] : vector<2x32xf32> to vector<2xf32>
    %742 = vector.shape_cast %741 : vector<2xf32> to vector<2x1xf32>
    %cst_349 = arith.constant 3.200000e+01 : f32
    %743 = vector.broadcast %cst_349 : f32 to vector<2x1xf32>
    %744 = arith.divf %742, %743 : vector<2x1xf32>
    %cst_350 = arith.constant 9.99999974E-6 : f32
    %745 = vector.broadcast %cst_350 : f32 to vector<2x1xf32>
    %746 = arith.addf %744, %745 : vector<2x1xf32>
    %747 = math.rsqrt %746 : vector<2x1xf32>
    %748 = vector.broadcast %747 : vector<2x1xf32> to vector<2x32xf32>
    %749 = arith.mulf %739, %748 : vector<2x32xf32>
    %750 = vector.broadcast %732 : vector<1x32xf32> to vector<2x32xf32>
    %751 = arith.mulf %749, %750 : vector<2x32xf32>
    %752 = vector.broadcast %733 : vector<1x32xf32> to vector<2x32xf32>
    %753 = arith.addf %751, %752 : vector<2x32xf32>
    %c0_351 = arith.constant 0 : index
    %c0_352 = arith.constant 0 : index
    %754 = vector.load %arg32[%c0_351, %c0_352] : memref<32x8xf32, #tpu.memory_space<vmem>>, vector<32x8xf32>
    %cst_353 = arith.constant dense<0.000000e+00> : vector<2x8xf32>
    %755 = tpu.matmul %753, %754, %cst_353 {dimension_numbers = #tpu.dot_dimension_numbers<[1], [0], [0], [1], [0, 0, 1, 1], [], []>} : vector<2x32xf32>, vector<32x8xf32>, vector<2x8xf32> -> vector<2x8xf32>
    %c0_354 = arith.constant 0 : index
    %c0_355 = arith.constant 0 : index
    %756 = vector.load %arg33[%c0_354, %c0_355] : memref<1x8xf32, #tpu.memory_space<vmem>>, vector<1x8xf32>
    %757 = vector.broadcast %756 : vector<1x8xf32> to vector<2x8xf32>
    %758 = arith.addf %755, %757 : vector<2x8xf32>
    %c0_356 = arith.constant 0 : index
    %c0_357 = arith.constant 0 : index
    %759 = vector.load %arg34[%c0_356, %c0_357] : memref<2x8xf32, #tpu.memory_space<vmem>>, vector<2x8xf32>
    tpu.vector_store %arg34[%c0_356, %c0_357], %758 {strides = array<i32>} : memref<2x8xf32, #tpu.memory_space<vmem>>, vector<2x8xf32>,
    return
  }
}

</mosaic_0001>

<bundles_post_ra>
// kernel: _lambda_.1
= control target key start
LH: loop header
LB: loop body
LE: loop exit
PB: predicated region body
PF: predicated region fallthrough
CT: control target
= control target key end

     0   :  { %s11182_s6 = smov 1   ;;  %s11183_s10 = smov 2   ;;  %s12649_s0 = inlined_call_operand.smem [shape: u32[35], index: -1, kind: input, shape index: {}] }
   0x1   :  { %s11254_s5 = sld [smem:[%s12649_s0]]   ;;  %s11184_s14 = smov 3  }
   0x2   :  { %s11259_s9 = sld [smem:[%s12649_s0 + %s11182_s6]]   ;;  %s11185_s18 = smov 4  }
   0x3   :  { %s11264_s13 = sld [smem:[%s12649_s0 + %s11183_s10]]   ;;  %s11186_s22 = smov 5  }
   0x4   :  { %s11269_s17 = sld [smem:[%s12649_s0 + %s11184_s14]]   ;;  %s11187_s26 = smov 6  }
   0x5   :  { %s11274_s21 = sld [smem:[%s12649_s0 + %s11185_s18]]   ;;  %s11188_s30 = smov 7  }
   0x6   :  { %s11279_s25 = sld [smem:[%s12649_s0 + %s11186_s22]]   ;;  %s11189_s4 = smov 8  }
   0x7   :  { %s11284_s29 = sld [smem:[%s12649_s0 + %s11187_s26]]   ;;  %s11190_s10 = smov 9  }
   0x8   :  { %s11289_s3 = sld [smem:[%s12649_s0 + %s11188_s30]]   ;;  %s11191_s15 = smov 10  }
   0x9   :  { %s11294_s8 = sld [smem:[%s12649_s0 + %s11189_s4]]   ;;  %s11192_s20 = smov 11  }
   0xa   :  { %s11299_s14 = sld [smem:[%s12649_s0 + %s11190_s10]]   ;;  %s11193_s26 = smov 12  }
   0xb   :  { %s11304_s19 = sld [smem:[%s12649_s0 + %s11191_s15]]   ;;  %s11194_s1 = smov 13  }
   0xc   :  { %12666 = sst [smem:[#allocation25_spill]] %s11279_s25  ;;  %s11195_s7 = smov 14  }
   0xd   :  { %12667 = sst [smem:[#allocation26_spill]] %s11284_s29  ;;  %s11196_s15 = smov 15  }
   0xe   :  { %12668 = sst [smem:[#allocation27_spill]] %s11289_s3  ;;  %s11197_s22 = smov 16  }
   0xf   :  { %12669 = sst [smem:[#allocation28_spill]] %s11294_s8  ;;  %s11198_s28 = smov 17  }
  0x10   :  { %12670 = sst [smem:[#allocation29_spill]] %s11299_s14  ;;  %s11211_s10 = smov 30  }
  0x11   :  { %12671 = sst [smem:[#allocation30_spill]] %s11304_s19  ;;  %s11212_s16 = smov 31  }
  0x12   :  { %s11309_s24 = sld [smem:[%s12649_s0 + %s11192_s20]]   ;;  %s11213_s23 = smov 32  }
  0x13   :  { %s11314_s30 = sld [smem:[%s12649_s0 + %s11193_s26]]  }
  0x14   :  { %s11319_s6 = sld [smem:[%s12649_s0 + %s11194_s1]]   ;;  %s11214_s1 = smov 33  }
  0x15   :  { %s11324_s12 = sld [smem:[%s12649_s0 + %s11195_s7]]   ;;  %s11199_s7 = smov 18  }
  0x16   :  { %s11329_s20 = sld [smem:[%s12649_s0 + %s11196_s15]]   ;;  %s11200_s15 = smov 19  }
  0x17   :  { %s11334_s27 = sld [smem:[%s12649_s0 + %s11197_s22]]   ;;  %s11201_s22 = smov 20  }
  0x18   :  { %12672 = sst [smem:[#allocation31_spill]] %s11309_s24 }
  0x19   :  { %s11339_s4 = sld [smem:[%s12649_s0 + %s11198_s28]]   ;;  %s11202_s28 = smov 21  }
  0x1a   :  { %12673 = sst [smem:[#allocation32_spill]] %s11319_s6 }
  0x1b   :  { %12674 = sst [smem:[#allocation33_spill]] %s11324_s12 }
  0x1c   :  { %s11344_s12 = sld [smem:[%s12649_s0 + %s11199_s7]]   ;;  %s11203_s7 = smov 22  }
  0x1d   :  { %s11349_s6 = sld [smem:[%s12649_s0 + %s11200_s15]]   ;;  %s11204_s15 = smov 23  }
  0x1e   :  { %s11354_s24 = sld [smem:[%s12649_s0 + %s11201_s22]]   ;;  %s11205_s22 = smov 24  }
  0x1f   :  { %12675 = sst [smem:[#allocation34_spill]] %s11339_s4 }
  0x20   :  { %s11359_s4 = sld [smem:[%s12649_s0 + %s11202_s28]]   ;;  %s11206_s28 = smov 25  }
  0x21   :  { %s11364_s14 = sld [smem:[%s12649_s0 + %s11203_s7]]   ;;  %s11207_s7 = smov 26  }
  0x22   :  { %s11374_s3 = sld [smem:[%s12649_s0 + %s11205_s22]]   ;;  %s11209_s22 = smov 28  }
  0x23   :  { %12676 = sst [smem:[#allocation35_spill]] %s11349_s6 }
  0x24   :  { %s11369_s6 = sld [smem:[%s12649_s0 + %s11204_s15]]   ;;  %s11208_s15 = smov 27  }
  0x25   :  { %s11394_s19 = sld [smem:[%s12649_s0 + %s11209_s22]]  }
  0x26   :  { %12677 = sst [smem:[#allocation36_spill]] %s11359_s4 }
  0x27   :  { %12678 = sst [smem:[#allocation37_spill]] %s11364_s14 }
  0x28   :  { %s11379_s4 = sld [smem:[%s12649_s0 + %s11206_s28]]   ;;  %s11210_s28 = smov 29  }
  0x29   :  { %s11384_s14 = sld [smem:[%s12649_s0 + %s11207_s7]]  }
  0x2a   :  { %12679 = sst [smem:[#allocation38_spill]] %s11369_s6 }
  0x2b   :  { %s11389_s6 = sld [smem:[%s12649_s0 + %s11208_s15]]  }
  0x2c   :  { %s11402_s8 = sld [smem:[%s12649_s0 + %s11211_s10]]   ;;  %s11215_s10 = smov 34  }
  0x2d   :  { %s11412_s29 = sld [smem:[%s12649_s0 + %s11213_s23]]  }
  0x2e   :  { %12680 = sst [smem:[#allocation39_spill]] %s11379_s4 }
  0x2f   :  { %s9043_s4 = sld [smem:[%s12649_s0 + %s11210_s28]]  }
  0x30   :  { %s11417_s25 = sld [smem:[%s12649_s0 + %s11214_s1]]  }
  0x31   :  { %12681 = sst [smem:[#allocation40_spill]] %s11389_s6 }
  0x32   :  { %12682 = sst [smem:[#allocation41_spill]] %s11402_s8 }
  0x33   :  { %s11407_s6 = sld [smem:[%s12649_s0 + %s11212_s16]]  }
  0x34   :  { %s11422_s8 = sld [smem:[%s12649_s0 + %s11215_s10]]  }
  0x35   :  { %v74_v0 = vstv %s9043_s4 }
  0x36   :  { %75 = vst [vmem:[#allocation2] sm:$0x1] %v74_v0 }
  0x37   :  { %76 = vsyncpa [#allocation4], 0 }
  0x38   :  { %77 = vsyncpa [#allocation7], 0 }
  0x39   :  { %78 = vsyncpa [#allocation10], 0 }
  0x3a   :  { %79 = vsyncpa [#allocation13], 0 }
  0x3b   :  { %80 = vsyncpa [#allocation16], 0 }
  0x3c   :  { %81 = vsyncpa [#allocation5], 0  ;;  %s11216_s16 = smov [#allocation6]   ;;  %s11217_s18 = smov [#allocation9]  }
  0x3d   :  { %s121_s15 = sshll.u32 %s11216_s16, 4  ;;  %s147_s23 = sshll.u32 %s11217_s18, 4  ;;  %s122_s15 = int_to_ptr.vmem [resolvable:$true] %s121_s15  ;;  %s11424_s23 = int_to_ptr.vmem [resolvable:$true] %s147_s23 }
  0x3e   :  { %s10950_s0 = scalar_lea.hbm %s11314_s30, 512 }
  0x3f   :  { %p10951_p0 = scmp.ne.s32.totalorder %s11314_s30, %s10950_s0  ;;  %p10954_p1 = scmp.lt.u32.totalorder %s10950_s0, %s11314_s30 }
  0x41   :  { %p10956_p2 = pnand %p10954_p1, %p10951_p0 }
  0x43   :  { %10959 = shalt.err (!%p10956_p2)
}
  0x44   :  { %s10960_s4 = scalar_lea.vmem %s122_s15, 512  ;;  %p10965_p4 = scmp.lt.s32.totalorder %s122_s15, %s122_s15 }
  0x45   :  { %p10961_p3 = scmp.ne.s32.totalorder %s122_s15, %s10960_s4  ;;  %p10966_p5 = scmp.lt.s32.totalorder %s10960_s4, %s10960_s4 }
  0x47   :  { %p10967_p6 = por %p10966_p5, %p10965_p4 }
  0x49   :  { %p10968_p7 = pnand %p10967_p6, %p10961_p3 }
  0x4b   :  { %10971 = shalt.err (!%p10968_p7)
}
  0x4c   :  { %s11218_s22 = smov 128   ;;  %s11219_s26 = smov 8  }
  0x4d   :  { %127 = dma.hbm_to_vmem [thread:$0]  %s11314_s30, 512, %s122_s15, [#allocation7], %s11218_s22, %s11218_s22, %s11219_s26  }
  0x4e   :  { %s10972_s1 = scalar_lea.hbm %s11334_s27, 1024 }
  0x4f   :  { %p10973_p8 = scmp.ne.s32.totalorder %s11334_s27, %s10972_s1  ;;  %p10976_p9 = scmp.lt.u32.totalorder %s10972_s1, %s11334_s27 }
  0x51   :  { %p10978_p10 = pnand %p10976_p9, %p10973_p8 }
  0x53   :  { %10981 = shalt.err (!%p10978_p10)
}
  0x54   :  { %s10982_s28 = scalar_lea.vmem %s11424_s23, 1024  ;;  %p10987_p12 = scmp.lt.s32.totalorder %s11424_s23, %s11424_s23 }
  0x55   :  { %p10983_p11 = scmp.ne.s32.totalorder %s11424_s23, %s10982_s28  ;;  %p10988_p13 = scmp.lt.s32.totalorder %s10982_s28, %s10982_s28 }
  0x57   :  { %p10989_p0 = por %p10988_p13, %p10987_p12 }
  0x59   :  { %p10990_p1 = pnand %p10989_p0, %p10983_p11 }
  0x5b   :  { %10993 = shalt.err (!%p10990_p1)
}
  0x5c   :  { %153 = dma.hbm_to_vmem [thread:$0]  %s11334_s27, 1024, %s11424_s23, [#allocation10], %s11218_s22, %s11218_s22, %s11219_s26  }
  0x5d   :  { %s11220_s30 = smov [#allocation12]   ;;  %s11221_s10 = smov [#allocation15]  }
  0x5e   :  { %s175_s2 = sshll.u32 %s11220_s30, 4  ;;  %s207_s7 = sshll.u32 %s11221_s10, 4  ;;  %s176_s2 = int_to_ptr.vmem [resolvable:$true] %s175_s2  ;;  %s11445_s7 = int_to_ptr.vmem [resolvable:$true] %s207_s7 }
  0x5f   :  { %s10994_s11 = scalar_lea.hbm %s11354_s24, 1024 }
  0x60   :  { %p10995_p2 = scmp.ne.s32.totalorder %s11354_s24, %s10994_s11  ;;  %p10998_p3 = scmp.lt.u32.totalorder %s10994_s11, %s11354_s24 }
  0x62   :  { %p11000_p4 = pnand %p10998_p3, %p10995_p2 }
  0x64   :  { %11003 = shalt.err (!%p11000_p4)
}
  0x65   :  { %s11004_s16 = scalar_lea.vmem %s176_s2, 1024  ;;  %p11009_p6 = scmp.lt.s32.totalorder %s176_s2, %s176_s2 }
  0x66   :  { %p11005_p5 = scmp.ne.s32.totalorder %s176_s2, %s11004_s16  ;;  %p11010_p7 = scmp.lt.s32.totalorder %s11004_s16, %s11004_s16 }
  0x68   :  { %p11011_p8 = por %p11010_p7, %p11009_p6 }
  0x6a   :  { %p11012_p9 = pnand %p11011_p8, %p11005_p5 }
  0x6c   :  { %11015 = shalt.err (!%p11012_p9)
}
  0x6d   :  { %181 = dma.hbm_to_vmem [thread:$0]  %s11354_s24, 1024, %s176_s2, [#allocation13], %s11218_s22, %s11218_s22, %s11219_s26  }
  0x6e   :  { %s11016_s27 = scalar_lea.hbm %s11384_s14, 512 }
  0x6f   :  { %p11017_p10 = scmp.ne.s32.totalorder %s11384_s14, %s11016_s27  ;;  %p11020_p11 = scmp.lt.u32.totalorder %s11016_s27, %s11384_s14 }
  0x71   :  { %p11022_p12 = pnand %p11020_p11, %p11017_p10 }
  0x73   :  { %11025 = shalt.err (!%p11022_p12)
}
  0x74   :  { %s11026_s15 = scalar_lea.vmem %s11445_s7, 512  ;;  %p11031_p0 = scmp.lt.s32.totalorder %s11445_s7, %s11445_s7 }
  0x75   :  { %p11027_p13 = scmp.ne.s32.totalorder %s11445_s7, %s11026_s15  ;;  %p11032_p1 = scmp.lt.s32.totalorder %s11026_s15, %s11026_s15 }
  0x77   :  { %p11033_p2 = por %p11032_p1, %p11031_p0 }
  0x79   :  { %p11034_p3 = pnand %p11033_p2, %p11027_p13 }
  0x7b   :  { %11037 = shalt.err (!%p11034_p3)
}
  0x7c   :  { %213 = dma.hbm_to_vmem [thread:$0]  %s11384_s14, 512, %s11445_s7, [#allocation16], %s11218_s22, %s11218_s22, %s11219_s26  }
  0x7d   :  { %s11222_s24 = smov [#allocation3]   ;;  %s11223_s23 = smov [#allocation8]  }
  0x7e   :  { %s95_s18 = sshll.u32 %s11222_s24, 4  ;;  %s138_s0 = sshll.u32 %s11223_s23, 4  ;;  %s96_s18 = int_to_ptr.vmem [resolvable:$true] %s95_s18  ;;  %s139_s0 = int_to_ptr.vmem [resolvable:$true] %s138_s0 }
  0x7f   :  { %s11038_s4 = scalar_lea.hbm %s11274_s21, 2048 }
  0x80   :  { %p11039_p4 = scmp.ne.s32.totalorder %s11274_s21, %s11038_s4  ;;  %p11042_p5 = scmp.lt.u32.totalorder %s11038_s4, %s11274_s21 }
  0x82   :  { %p11044_p6 = pnand %p11042_p5, %p11039_p4 }
  0x84   :  { %11047 = shalt.err (!%p11044_p6)
}
  0x85   :  { %s11048_s1 = scalar_lea.vmem %s96_s18, 2048  ;;  %p11053_p8 = scmp.lt.s32.totalorder %s96_s18, %s96_s18 }
  0x86   :  { %p11049_p7 = scmp.ne.s32.totalorder %s96_s18, %s11048_s1  ;;  %p11054_p9 = scmp.lt.s32.totalorder %s11048_s1, %s11048_s1 }
  0x88   :  { %p11055_p10 = por %p11054_p9, %p11053_p8 }
  0x8a   :  { %p11056_p11 = pnand %p11055_p10, %p11049_p7 }
  0x8c   :  { %11059 = shalt.err (!%p11056_p11)
}
  0x8d   :  { %101 = dma.hbm_to_vmem [thread:$0]  %s11274_s21, 2048, %s96_s18, [#allocation4], %s11218_s22, %s11218_s22, %s11219_s26  }
  0x8e   :  { %s11060_s14 = scalar_lea.hbm %s11329_s20, 16 }
  0x8f   :  { %p11061_p12 = scmp.ne.s32.totalorder %s11329_s20, %s11060_s14  ;;  %p11064_p13 = scmp.lt.u32.totalorder %s11060_s14, %s11329_s20 }
  0x91   :  { %p11066_p0 = pnand %p11064_p13, %p11061_p12 }
  0x93   :  { %11069 = shalt.err (!%p11066_p0)
}
  0x94   :  { %s11070_s28 = scalar_lea.vmem %s139_s0, 16  ;;  %s11074_s30 = scalar_lea.vmem %s139_s0, 32 }
  0x95   :  { %p11071_p1 = scmp.ne.s32.totalorder %s139_s0, %s11070_s28  ;;  %p11075_p2 = scmp.lt.s32.totalorder %s139_s0, %s139_s0 }
  0x96   :  { %p11076_p3 = scmp.lt.s32.totalorder %s11074_s30, %s11070_s28 }
  0x98   :  { %p11077_p4 = por %p11076_p3, %p11075_p2 }
  0x9a   :  { %p11078_p5 = pnand %p11077_p4, %p11071_p1 }
  0x9c   :  { %11081 = shalt.err (!%p11078_p5)
}
  0x9d   :  { %141 = dma.hbm_to_vmem [thread:$0]  %s11329_s20, 16, %s139_s0, [#allocation7]  }
  0x9e   :  { %s11224_s2 = smov [#allocation11]   ;;  %s11225_s10 = smov [#allocation14]  }
  0x9f   :  { %s161_s21 = sshll.u32 %s11224_s2, 4  ;;  %s193_s7 = sshll.u32 %s11225_s10, 4  ;;  %s162_s21 = int_to_ptr.vmem [resolvable:$true] %s161_s21  ;;  %s11477_s7 = int_to_ptr.vmem [resolvable:$true] %s193_s7 }
  0xa0   :  { %s11082_s11 = scalar_lea.hbm %s11344_s12, 1024 }
  0xa1   :  { %p11083_p6 = scmp.ne.s32.totalorder %s11344_s12, %s11082_s11  ;;  %p11086_p7 = scmp.lt.u32.totalorder %s11082_s11, %s11344_s12 }
  0xa3   :  { %p11088_p8 = pnand %p11086_p7, %p11083_p6 }
  0xa5   :  { %11091 = shalt.err (!%p11088_p8)
}
  0xa6   :  { %s11092_s16 = scalar_lea.vmem %s162_s21, 1024  ;;  %p11097_p10 = scmp.lt.s32.totalorder %s162_s21, %s162_s21 }
  0xa7   :  { %p11093_p9 = scmp.ne.s32.totalorder %s162_s21, %s11092_s16  ;;  %p11098_p11 = scmp.lt.s32.totalorder %s11092_s16, %s11092_s16 }
  0xa9   :  { %p11099_p12 = por %p11098_p11, %p11097_p10 }
  0xab   :  { %p11100_p13 = pnand %p11099_p12, %p11093_p9 }
  0xad   :  { %11103 = shalt.err (!%p11100_p13)
}
  0xae   :  { %167 = dma.hbm_to_vmem [thread:$0]  %s11344_s12, 1024, %s162_s21, [#allocation10], %s11218_s22, %s11218_s22, %s11219_s26  }
  0xaf   :  { %s11104_s20 = scalar_lea.hbm %s11374_s3, 1024 }
  0xb0   :  { %p11105_p0 = scmp.ne.s32.totalorder %s11374_s3, %s11104_s20  ;;  %p11108_p1 = scmp.lt.u32.totalorder %s11104_s20, %s11374_s3 }
  0xb2   :  { %p11110_p2 = pnand %p11108_p1, %p11105_p0 }
  0xb4   :  { %11113 = shalt.err (!%p11110_p2)
}
  0xb5   :  { %s11114_s27 = scalar_lea.vmem %s11477_s7, 1024  ;;  %p11119_p4 = scmp.lt.s32.totalorder %s11477_s7, %s11477_s7 }
  0xb6   :  { %p11115_p3 = scmp.ne.s32.totalorder %s11477_s7, %s11114_s27  ;;  %p11120_p5 = scmp.lt.s32.totalorder %s11114_s27, %s11114_s27 }
  0xb8   :  { %p11121_p6 = por %p11120_p5, %p11119_p4 }
  0xba   :  { %p11122_p7 = pnand %p11121_p6, %p11115_p3 }
  0xbc   :  { %11125 = shalt.err (!%p11122_p7)
}
  0xbd   :  { %199 = dma.hbm_to_vmem [thread:$0]  %s11374_s3, 1024, %s11477_s7, [#allocation13], %s11218_s22, %s11218_s22, %s11219_s26  }
  0xbe   :  { %s11226_s12 = smov [#allocation17]   ;;  %s11126_s24 = scalar_lea.hbm %s11394_s19, 16 }
  0xbf   :  { %s222_s15 = sshll.u32 %s11226_s12, 4  ;;  %p11127_p8 = scmp.ne.s32.totalorder %s11394_s19, %s11126_s24  ;;  %s223_s15 = int_to_ptr.vmem [resolvable:$true] %s222_s15 }
  0xc0   :  { %p11130_p9 = scmp.lt.u32.totalorder %s11126_s24, %s11394_s19 }
  0xc2   :  { %p11132_p10 = pnand %p11130_p9, %p11127_p8 }
  0xc4   :  { %11135 = shalt.err (!%p11132_p10)
}
  0xc5   :  { %s11136_s18 = scalar_lea.vmem %s223_s15, 16  ;;  %s11140_s23 = scalar_lea.vmem %s223_s15, 32 }
  0xc6   :  { %p11137_p11 = scmp.ne.s32.totalorder %s223_s15, %s11136_s18  ;;  %p11141_p12 = scmp.lt.s32.totalorder %s223_s15, %s223_s15 }
  0xc7   :  { %p11142_p13 = scmp.lt.s32.totalorder %s11140_s23, %s11136_s18 }
  0xc9   :  { %p11143_p0 = por %p11142_p13, %p11141_p12 }
  0xcb   :  { %p11144_p1 = pnand %p11143_p0, %p11137_p11 }
  0xcd   :  { %11147 = shalt.err (!%p11144_p1)
}
  0xce   :  { %225 = dma.hbm_to_vmem [thread:$0]  %s11394_s19, 16, %s223_s15, [#allocation16]  }
  0xcf   :  { %11170 = dma.done.wait [#allocation4], 2048  }
  0xd0   :  { %11171 = vsyncadd [#allocation4], 4294965248 }
  0xd1   :  { %11172 = dma.done.wait [#allocation7], 528  }
  0xd2   :  { %11173 = vsyncadd [#allocation7], 4294966768 }
  0xd3   :  { %11174 = dma.done.wait [#allocation10], 2048  }
  0xd4   :  { %11175 = vsyncadd [#allocation10], 4294965248 }
  0xd5   :  { %11176 = dma.done.wait [#allocation13], 2048  }
  0xd6   :  { %11177 = vsyncadd [#allocation13], 4294965248 }
  0xd7   :  { %11178 = dma.done.wait [#allocation16], 528  }
  0xd8   :  { %11179 = vsyncadd [#allocation16], 4294966768  ;;  %vm499_vm0 = vcmask 523264   ;;  %v11503_v1 = vld [vmem:[%s11259_s9] sm:$0xff]  ;;  %v11506_v2 = vld [vmem:[%s11259_s9 + $0x8] sm:$0xff]  ;;  %v11227_v38 = vmov 0.0   ;;  %v420_v52 = vlaneseq }
  0xd9   :  { %v500_v3 = vsel %vm499_vm0, %v11503_v1, 0.0  ;;  %v503_v4 = vsel %vm499_vm0, %v11506_v2, 0.0  ;;  %v528_v15 = vld [vmem:[%s11264_s13 + $0x8] sm:$0xff]  ;;  %v530_v16 = vld [vmem:[%s11264_s13 + $0x18] sm:$0xff]  ;;  %v527_v18 = vld [vmem:[%s11264_s13] sm:$0xff]  ;;  %625 = vmatprep.mubr.f32.mxu0 %v11227_v38  ;;  %9682 = vmatprep.subr.mxu1 %v11227_v38  ;;  %vm265_vm1 = vcmask 15360  }
  0xda   :  { %501 = vadd.xlane.f32.xlu0 %v500_v3  ;;  %v10304_v17 = vpack.c.bf16 %v530_v16, %v528_v15  ;;  %v529_v19 = vld [vmem:[%s11264_s13 + $0x10] sm:$0xff]  ;;  %v532_v21 = vld [vmem:[%s11264_s13 + $0x28] sm:$0xff]  ;;  %v534_v22 = vld [vmem:[%s11264_s13 + $0x38] sm:$0xff]  ;;  %vm11228_vm2 = vmmov 0   ;;  %v421_v53 = vshrl.u32 %v420_v52, 7  ;;  %vm641_vm3 = vcmask 130048  }
  0xdb   :  { %v10306_v20 = vpack.c.bf16 %v529_v19, %v527_v18  ;;  %v10308_v23 = vpack.c.bf16 %v534_v22, %v532_v21  ;;  %v531_v24 = vld [vmem:[%s11264_s13 + $0x20] sm:$0xff]  ;;  %v533_v25 = vld [vmem:[%s11264_s13 + $0x30] sm:$0xff]  ;;  %v536_v27 = vld [vmem:[%s11264_s13 + $0x48] sm:$0xff]  ;;  %9684 = vmatprep.mubr.msk.f32.mxu1 %vm11228_vm2, %v11227_v38  ;;  %v423_v15 = vand.u32 127, %v420_v52  ;;  %vm429_vm5 = vcmask 64512   ;;  %s11230_s9 = smov 48  }
  0xdc   :  { %10305 = vmatprep.subr.bf16.mxu0 %v10304_v17  ;;  %v10310_v26 = vpack.c.bf16 %v533_v25, %v531_v24  ;;  %v538_v28 = vld [vmem:[%s11264_s13 + $0x58] sm:$0xff]  ;;  %v535_v30 = vld [vmem:[%s11264_s13 + $0x40] sm:$0xff]  ;;  %v537_v31 = vld [vmem:[%s11264_s13 + $0x50] sm:$0xff]  ;;  %v11564_v54 = vsub.s32 0, %v421_v53  ;;  %v11568_v60 = vsub.s32 1, %v421_v53  ;;  %s11231_s3 = smov 112  }
  0xdd   :  { %10307 = vmatpush1.bf16.msra.mxu0 %v10306_v20  ;;  %v10312_v29 = vpack.c.bf16 %v538_v28, %v536_v27  ;;  %v10314_v32 = vpack.c.bf16 %v537_v31, %v535_v30  ;;  %v540_v33 = vld [vmem:[%s11264_s13 + $0x68] sm:$0xff]  ;;  %v542_v34 = vld [vmem:[%s11264_s13 + $0x78] sm:$0xff]  ;;  %v539_v35 = vld [vmem:[%s11264_s13 + $0x60] sm:$0xff]  ;;  %vm424_vm4 = vcmp.eq.s32.totalorder %v421_v53, %v423_v15  ;;  %s11232_s19 = smov 32   ;;  %s11233_s22 = smov 96   ;;  %vm1995_vm10 = vcmask 261120  }
  0xde   :  { %504 = vadd.xlane.f32.xlu0 %v503_v4  ;;  %10309 = vmatprep.subr.bf16.mxu0 %v10308_v23  ;;  %v10316_v36 = vpack.c.bf16 %v542_v34, %v540_v33  ;;  %v541_v37 = vld [vmem:[%s11264_s13 + $0x70] sm:$0xff]  ;;  %v263_v40 = vld [vmem:[%s11254_s5] sm:$0xff]  ;;  %v264_v41 = vld [vmem:[%s11254_s5 + $0x8] sm:$0xff]  ;;  %s11229_s5 = smov 64   ;;  %v9053_v16 = vsel %vm424_vm4, 1.0, %v11227_v38  ;;  %s11234_s0 = smov 16  }
  0xdf   :  { %v10318_v39 = vpack.c.bf16 %v541_v37, %v539_v35  ;;  %9683 = vmatpush3.xpose.msk.msra.mxu1 %vm265_vm1, %v263_v40  ;;  %v543_v55 = vld [vmem:[%s11269_s17] sm:$0x3]  ;;  %s11235_s4 = smov 80   ;;  %s12683_s1 = sld [smem:[#allocation25_spill]]  ;;  %vm1998_vm11 = vcmask 392192   ;;  %vm6236_vm12 = vcmask 195584  }
  0xe0   :  { %9687 = vmatprep.subr.mxu1 %v11227_v38  ;;  %v548_v56 = vrot.slane %v543_v55, %v11564_v54  ;;  %v552_v3 = vrot.slane %v543_v55, %v11568_v60  ;;  %s12684_s14 = sld [smem:[#allocation26_spill]]  ;;  %s12685_s28 = sld [smem:[#allocation28_spill]]  ;;  %vm8789_vm13 = vcmask 7168   ;;  %vm8858_vm14 = vcmask 1041409  }
  0xe1   :  { %10311 = vmatpush1.bf16.msra.mxu0 %v10310_v26  ;;  %s12686_s30 = sld [smem:[#allocation30_spill]]  ;;  %s12687_s2 = sld [smem:[#allocation27_spill]]  ;;  %vm8861_vm15 = vcmask 254976  }
  0xe2   :  { %10313 = vmatprep.subr.bf16.mxu0 %v10312_v29  ;;  %9685 = vmatmul.mubr.msk.f32.vlgmr.msra.gmra.mrb[0].mxu1 %vm265_vm1, %v263_v40  ;;  %s12688_s21 = sld [smem:[#allocation29_spill]]  ;;  %s12689_s10 = sld [smem:[#allocation31_spill]] }
  0xe3   :  { %9688 = vmatpush3.xpose.msk.msra.mxu1 %vm265_vm1, %v264_v41  ;;  %9689 = vmatprep.mubr.msk.f32.mxu1 %vm11228_vm2, %v11227_v38  ;;  %s12690_s7 = sld [smem:[#allocation32_spill]]  ;;  %s11236_s11 = smov 88  }
  0xe4   :  { %9692 = vmatprep.subr.mxu1 %v11227_v38  ;;  %s11237_s16 = smov 120   ;;  %s11238_s20 = smov 56  }
  0xe5   :  { %10315 = vmatpush1.bf16.msra.mxu0 %v10314_v32  ;;  %s11239_s27 = smov 72   ;;  %s11240_s12 = smov 104  }
  0xe6   :  { %10317 = vmatprep.subr.bf16.mxu0 %v10316_v36  ;;  %9690 = vmatmul.mubr.msk.f32.vlgmr.msra.gmra.mrb[2].mxu1 %vm265_vm1, %v264_v41  ;;  %s11241_s15 = smov 40   ;;  %s11242_s24 = smov 24  }
  0xe7   :  { %9694 = vmatprep.mubr.msk.f32.mxu1 %vm11228_vm2, %v11227_v38  ;;  %s12693_s18 = sld [smem:[#allocation35_spill]]  ;;  %s12694_s23 = sld [smem:[#allocation37_spill]] }
  0xe9   :  { %10319 = vmatpush1.bf16.msra.mxu0 %v10318_v39 }
  0xea   :  { %9717 = vmatprep.subr.mxu0 %v11227_v38 }
 0x167   :  { %v502_v5 = vpop.xlane.xlu0 %501 }
 0x168   :  { %v507_v6 = vmul.f32 0.015625, %v502_v5 }
 0x16a   :  { %v11513_v7 = vsub.f32 %v11503_v1, %v507_v6 }
 0x16b   :  { %v505_v8 = vpop.xlane.xlu0 %504 }
 0x16c   :  { %v508_v9 = vmul.f32 0.015625, %v505_v8  ;;  %v511_v10 = vmul.f32 %v11513_v7, %v11513_v7  ;;  %v413_v8 = vmul.f32 %v264_v41, %v264_v41 }
 0x16e   :  { %v11518_v11 = vsub.f32 %v11506_v2, %v508_v9  ;;  %v513_v12 = vsel %vm499_vm0, %v511_v10, 0.0  ;;  %v417_v9 = vsel %vm265_vm1, %v413_v8, 0.0  ;;  %v412_v10 = vmul.f32 %v263_v40, %v263_v40 }
 0x16f   :  { %514 = vadd.xlane.f32.xlu1 %v513_v12 }
 0x170   :  { %v512_v13 = vmul.f32 %v11518_v11, %v11518_v11 }
 0x172   :  { %v516_v14 = vsel %vm499_vm0, %v512_v13, 0.0 }
 0x173   :  { %517 = vadd.xlane.f32.xlu1 %v516_v14 }
 0x1b5   :  { %v335_v57 = vpop.f32.mrb[0].mxu1 }
 0x1b6   :  { %v9686_v58 = vpop.f32.mrb[1].mxu1  ;;  %v427_v20 = vmul.f32 %v9053_v16, %v335_v57  ;;  %v446_v40 = vmul.f32 2.0, %v335_v57 }
 0x1b8   :  { %v430_v22 = vsel %vm429_vm5, %v427_v20, 0.0 }
 0x1b9   :  { %v408_v61 = vpop.f32.mrb[2].mxu1  ;;  %v431_v24 = vrot.slane %v430_v22, 4 }
 0x1ba   :  { %v9691_v0 = vpop.f32.mrb[3].mxu1  ;;  %v428_v17 = vmul.f32 %v9053_v16, %v408_v61  ;;  %v447_v32 = vmul.f32 2.0, %v408_v61 }
 0x1bb   :  { %v432_v26 = vadd.f32 %v431_v24, %v430_v22 }
 0x1bc   :  { %v437_v18 = vsel %vm429_vm5, %v428_v17, 0.0 }
 0x1bd   :  { %v438_v19 = vrot.slane %v437_v18, 4  ;;  %v433_v28 = vrot.slane %v432_v26, 2 }
 0x1bf   :  { %v439_v21 = vadd.f32 %v438_v19, %v437_v18  ;;  %v434_v31 = vadd.f32 %v433_v28, %v432_v26 }
 0x1c1   :  { %v440_v23 = vrot.slane %v439_v21, 2  ;;  %v435_v35 = vrot.slane %v434_v31, 1 }
 0x1c3   :  { %v441_v25 = vadd.f32 %v440_v23, %v439_v21  ;;  %v436_v37 = vadd.f32 %v435_v35, %v434_v31 }
 0x1c5   :  { %v442_v27 = vrot.slane %v441_v25, 1 }
 0x1c7   :  { %v443_v29 = vadd.f32 %v442_v27, %v441_v25 }
 0x1fc   :  { %v515_v42 = vpop.xlane.xlu1 %514 }
 0x1fd   :  { %v519_v43 = vmul.f32 0.015625, %v515_v42 }
 0x1ff   :  { %v521_v44 = vadd.f32 1e-05, %v519_v43 }
 0x200   :  { %v518_v45 = vpop.xlane.xlu1 %517 }
 0x201   :  { %10728 = vrsqrt.f32 %v521_v44  ;;  %v520_v46 = vmul.f32 0.015625, %v518_v45 }
 0x203   :  { %v522_v47 = vadd.f32 1e-05, %v520_v46 }
 0x205   :  { %10730 = vrsqrt.f32 %v522_v47 }
 0x20b   :  { %v10729_v48 = vpop.eup %10728 }
 0x20c   :  { %v525_v49 = vmul.f32 %v10729_v48, %v11513_v7 }
 0x20e   :  { %9054 = vmatmul.mubr.msk.f32.vlgmr.msra.gmra.mrb[0].mxu0 %vm499_vm0, %v525_v49 }
 0x20f   :  { %v10731_v50 = vpop.eup %10730  ;;  %631 = vmatprep.mubr.f32.mxu0 %v11227_v38 }
 0x210   :  { %v526_v51 = vmul.f32 %v10731_v50, %v11518_v11  ;;  %v414_v11 = vsel %vm265_vm1, %v412_v10, 0.0 }
 0x212   :  { %9055 = vmatmul.mubr.msk.f32.gmra.mrb[2].mxu0 %vm499_vm0, %v526_v51 }
 0x213   :  { %9719 = vmatprep.mubr.msk.f32.mxu0 %vm11228_vm2, %v11227_v38 }
 0x2e1   :  { %v627_v59 = vpop.f32.mrb[0].mxu0 }
 0x2e2   :  { %v11570_v62 = vadd.f32 %v627_v59, %v548_v56  ;;  %v629_v63 = vpop.f32.mrb[1].mxu0 }
 0x2e3   :  { %v11591_v14 = vadd.f32 %v629_v63, %v552_v3 }
 0x2e4   :  { %639 = vrot.lane.b32.xlu0 %v11570_v62, %s11229_s5 }
 0x2e5   :  { %v633_v4 = vpop.f32.mrb[2].mxu0 }
 0x2e6   :  { %v11575_v5 = vadd.f32 %v633_v4, %v548_v56  ;;  %v635_v6 = vpop.f32.mrb[3].mxu0 }
 0x2e7   :  { %v11577_v7 = vadd.f32 %v635_v6, %v552_v3 }
 0x2e8   :  { %717 = vrot.lane.b32.xlu1 %v11575_v5, %s11229_s5 }
 0x303   :  { %418 = vadd.xlane.f32.xlu0 %v417_v9 }
 0x30c   :  { %415 = vadd.xlane.f32.xlu1 %v414_v11 }
 0x356   :  { %v640_v12 = vpop.permute.xlu0 %639 }
 0x357   :  { %9693 = vmatpush3.xpose.msk.msra.mxu1 %vm641_vm3, %v640_v12 }
 0x358   :  { %9697 = vmatprep.subr.mxu1 %v11227_v38 }
 0x35a   :  { %v718_v13 = vpop.permute.xlu1 %717  ;;  %9695 = vmatmul.mubr.msk.f32.vlgmr.msra.gmra.mrb[4].mxu1 %vm641_vm3, %v11570_v62 }
 0x35b   :  { %9698 = vmatpush3.xpose.msk.msra.mxu1 %vm641_vm3, %v718_v13  ;;  %9699 = vmatprep.mubr.msk.f32.mxu1 %vm11228_vm2, %v11227_v38 }
 0x35c   :  { %9702 = vmatprep.subr.mxu1 %v11227_v38 }
 0x35e   :  { %9700 = vmatmul.mubr.msk.f32.vlgmr.msra.gmra.mrb[6].mxu1 %vm641_vm3, %v11575_v5 }
 0x35f   :  { %9703 = vmatpush3.msra.mxu1 %v11591_v14  ;;  %9704 = vmatprep.mubr.msk.f32.mxu1 %vm11228_vm2, %v11227_v38 }
 0x360   :  { %9707 = vmatprep.subr.mxu1 %v11227_v38 }
 0x390   :  { %v419_v30 = vpop.xlane.xlu0 %418 }
 0x391   :  { %v445_v33 = vadd.f32 %v443_v29, %v419_v30 }
 0x393   :  { %v449_v34 = vsub.f32 %v445_v33, %v447_v32 }
 0x395   :  { %v451_v36 = vmax.f32 %v449_v34, 0.0 }
 0x397   :  { %10732 = vrsqrt.f32 %v451_v36  ;;  %vm461_vm6 = vcmp.eq.f32.partialorder %v451_v36, inf  ;;  %v464_v46 = vand.u32 2147483648, %v451_v36  ;;  %vm463_vm7 = vcmp.eq.f32.partialorder %v451_v36, 0.0 }
 0x399   :  { %v416_v39 = vpop.xlane.xlu1 %415 }
 0x39a   :  { %v444_v41 = vadd.f32 %v436_v37, %v416_v39 }
 0x39c   :  { %v448_v42 = vsub.f32 %v444_v41, %v446_v40 }
 0x39e   :  { %v450_v43 = vmax.f32 %v448_v42, 0.0 }
 0x3a0   :  { %10734 = vrsqrt.f32 %v450_v43  ;;  %vm454_vm8 = vcmp.eq.f32.partialorder %v450_v43, inf  ;;  %v457_v52 = vand.u32 2147483648, %v450_v43  ;;  %vm456_vm9 = vcmp.eq.f32.partialorder %v450_v43, 0.0 }
 0x3a1   :  { %v10733_v44 = vpop.eup %10732 }
 0x3a2   :  { %v460_v45 = vmul.f32 %v10733_v44, %v451_v36 }
 0x3a4   :  { %v462_v47 = vsel %vm461_vm6, %v451_v36, %v460_v45 }
 0x3a5   :  { %v465_v48 = vsel %vm463_vm7, %v464_v46, %v462_v47 }
 0x3a6   :  { %v469_v49 = vsel %vm429_vm5, %v465_v48, 0.0  ;;  %v490_v24 = vsub.f32 0.0, %v465_v48 }
 0x3a7   :  { %470 = vadd.xlane.f32.xlu1 %v469_v49 }
 0x3aa   :  { %v10735_v50 = vpop.eup %10734 }
 0x3ab   :  { %v453_v51 = vmul.f32 %v10735_v50, %v450_v43 }
 0x3ad   :  { %v455_v53 = vsel %vm454_vm8, %v450_v43, %v453_v51 }
 0x3ae   :  { %v458_v55 = vsel %vm456_vm9, %v457_v52, %v455_v53 }
 0x3af   :  { %v466_v56 = vsel %vm429_vm5, %v458_v55, 0.0  ;;  %v489_v30 = vsub.f32 0.0, %v458_v55 }
 0x3b0   :  { %467 = vadd.xlane.f32.xlu0 %v466_v56 }
 0x42d   :  { %v712_v57 = vpop.f32.mrb[4].mxu1 }
 0x42e   :  { %v9696_v58 = vpop.f32.mrb[5].mxu1  ;;  %v793_v32 = vmul.f32 0.25, %v712_v57 }
 0x431   :  { %v789_v59 = vpop.f32.mrb[6].mxu1 }
 0x432   :  { %v9701_v61 = vpop.f32.mrb[7].mxu1  ;;  %v794_v26 = vmul.f32 0.25, %v789_v59 }
 0x434   :  { %v471_v63 = vpop.xlane.xlu1 %470 }
 0x435   :  { %v474_v0 = vmul.f32 0.125, %v471_v63 }
 0x437   :  { %v481_v3 = vrot.slane %v474_v0, 4 }
 0x439   :  { %v482_v4 = vadd.f32 %v481_v3, %v474_v0 }
 0x43b   :  { %v483_v6 = vrot.slane %v482_v4, 2 }
 0x43d   :  { %v484_v8 = vadd.f32 %v483_v6, %v482_v4  ;;  %v468_v9 = vpop.xlane.xlu0 %467 }
 0x43e   :  { %v473_v10 = vmul.f32 0.125, %v468_v9 }
 0x43f   :  { %v485_v11 = vrot.slane %v484_v8, 1 }
 0x440   :  { %v475_v12 = vrot.slane %v473_v10, 4 }
 0x441   :  { %v486_v13 = vadd.f32 %v485_v11, %v484_v8 }
 0x442   :  { %v476_v15 = vadd.f32 %v475_v12, %v473_v10 }
 0x443   :  { %v488_v16 = vmul.f32 0.125, %v486_v13 }
 0x444   :  { %v477_v17 = vrot.slane %v476_v15, 2 }
 0x445   :  { %v492_v18 = vadd.f32 1e-06, %v488_v16 }
 0x446   :  { %v478_v19 = vadd.f32 %v477_v17, %v476_v15 }
 0x447   :  { %10736 = vrcp.f32 %v492_v18 }
 0x448   :  { %v479_v20 = vrot.slane %v478_v19, 1 }
 0x44a   :  { %v480_v21 = vadd.f32 %v479_v20, %v478_v19 }
 0x44c   :  { %v487_v22 = vmul.f32 0.125, %v480_v21 }
 0x44e   :  { %v491_v23 = vadd.f32 1e-06, %v487_v22 }
 0x450   :  { %10738 = vrcp.f32 %v491_v23 }
 0x451   :  { %v10737_v25 = vpop.eup %10736 }
 0x452   :  { %v11604_v27 = vmul.f32 %v10737_v25, %v490_v24 }
 0x454   :  { %v796_v28 = vadd.f32 %v794_v26, %v11604_v27 }
 0x456   :  { %v800_v29 = vsel %vm429_vm5, %v796_v28, -inf }
 0x457   :  { %801 = vmax.xlane.f32.xlu1 %v800_v29 }
 0x45a   :  { %v10739_v31 = vpop.eup %10738 }
 0x45b   :  { %v11608_v33 = vmul.f32 %v10739_v31, %v489_v30 }
 0x45d   :  { %v795_v34 = vadd.f32 %v793_v32, %v11608_v33 }
 0x45f   :  { %v797_v35 = vsel %vm429_vm5, %v795_v34, -inf }
 0x460   :  { %798 = vmax.xlane.f32.xlu0 %v797_v35 }
 0x468   :  { %1045 = vrot.lane.b32.xlu1 %v11575_v5, %s11230_s9 }
 0x46c   :  { %965 = vrot.lane.b32.xlu1 %v11570_v62, %s11231_s3 }
 0x4e4   :  { %v802_v36 = vpop.xlane.xlu1 %801 }
 0x4e5   :  { %v804_v37 = vsub.f32 %v796_v28, %v802_v36 }
 0x4e7   :  { %v807_v39 = vmul.f32 1.442695, %v804_v37 }
 0x4e8   :  { %v1046_v40 = vpop.permute.xlu1 %1045 }
 0x4e9   :  { %10740 = vpow2.f32 %v807_v39  ;;  %9718 = vmatpush3.xpose.msk.msra.mxu0 %vm641_vm3, %v1046_v40 }
 0x4ea   :  { %9727 = vmatprep.subr.mxu0 %v11227_v38 }
 0x4ec   :  { %v966_v48 = vpop.permute.xlu1 %965 }
 0x4ed   :  { %v799_v41 = vpop.xlane.xlu0 %798 }
 0x4ee   :  { %v803_v42 = vsub.f32 %v795_v34, %v799_v41 }
 0x4f0   :  { %v805_v43 = vmul.f32 1.442695, %v803_v42 }
 0x4f2   :  { %10742 = vpow2.f32 %v805_v43 }
 0x4f3   :  { %v10741_v44 = vpop.eup %10740 }
 0x4f4   :  { %v812_v45 = vsel %vm429_vm5, %v10741_v44, 0.0 }
 0x4f5   :  { %813 = vadd.xlane.f32.xlu1 %v812_v45 }
 0x4fc   :  { %v10743_v46 = vpop.eup %10742 }
 0x4fd   :  { %v809_v47 = vsel %vm429_vm5, %v10743_v46, 0.0 }
 0x4fe   :  { %810 = vadd.xlane.f32.xlu0 %v809_v47 }
 0x506   :  { %1043 = vrot.lane.b32.xlu1 %v11575_v5, %s11231_s3 }
 0x514   :  { %967 = vrot.lane.b32.xlu0 %v11570_v62, %s11230_s9 }
 0x582   :  { %v814_v49 = vpop.xlane.xlu1 %813 }
 0x586   :  { %v1044_v50 = vpop.permute.xlu1 %1043 }
 0x587   :  { %9720 = vmatmul.mubr.msk.f32.vlgmr.msra.gmra.mrb[4].mxu0 %vm641_vm3, %v1044_v50 }
 0x588   :  { %9729 = vmatprep.mubr.msk.f32.mxu0 %vm11228_vm2, %v11227_v38 }
 0x58b   :  { %v811_v51 = vpop.xlane.xlu0 %810 }
 0x58c   :  { %10744 = vrcp.f32 %v811_v51 }
 0x58d   :  { %10746 = vrcp.f32 %v814_v49 }
 0x58f   :  { %v968_v57 = vpop.permute.xlu0 %967 }
 0x596   :  { %v10745_v52 = vpop.eup %10744 }
 0x597   :  { %v816_v53 = vmul.f32 %v10745_v52, %v10743_v46  ;;  %v10747_v55 = vpop.eup %10746 }
 0x598   :  { %v818_v56 = vmul.f32 %v10747_v55, %v10741_v44 }
 0x599   :  { %9705 = vmatmul.mubr.msk.f32.vlgmr.msra.gmra.mrb[8].mxu1 %vm429_vm5, %v816_v53 }
 0x59a   :  { %9708 = vmatpush3.msra.mxu1 %v11577_v7  ;;  %9709 = vmatprep.mubr.msk.f32.mxu1 %vm11228_vm2, %v11227_v38 }
 0x59b   :  { %9712 = vmatprep.subr.mxu1 %v11227_v38 }
 0x59d   :  { %9710 = vmatmul.mubr.msk.f32.vlgmr.msra.gmra.mrb[10].mxu1 %vm429_vm5, %v818_v56 }
 0x59e   :  { %9714 = vmatprep.mubr.msk.f32.mxu1 %vm11228_vm2, %v11227_v38 }
 0x5a1   :  { %9713 = vmatpush3.xpose.msk.msra.mxu1 %vm641_vm3, %v968_v57 }
 0x5a2   :  { %9722 = vmatprep.subr.mxu1 %v11227_v38 }
 0x5a4   :  { %9715 = vmatmul.mubr.msk.f32.vlgmr.msra.gmra.mrb[12].mxu1 %vm641_vm3, %v966_v48 }
 0x5a5   :  { %9724 = vmatprep.mubr.msk.f32.mxu1 %vm11228_vm2, %v11227_v38 }
 0x65a   :  { %v1117_v58 = vpop.f32.mrb[4].mxu0 }
 0x65b   :  { %v1122_v59 = vmul.f32 0.25, %v1117_v58  ;;  %v9721_v61 = vpop.f32.mrb[5].mxu0 }
 0x65d   :  { %v1124_v63 = vadd.f32 %v1122_v59, %v11604_v27 }
 0x65f   :  { %v1128_v0 = vsel %vm429_vm5, %v1124_v63, -inf }
 0x660   :  { %1129 = vmax.xlane.f32.xlu1 %v1128_v0 }
 0x66c   :  { %v11642_v3 = vpop.f32.mrb[8].mxu1 }
 0x66d   :  { %v9706_v4 = vpop.f32.mrb[9].mxu1 }
 0x670   :  { %v11644_v6 = vpop.f32.mrb[10].mxu1 }
 0x671   :  { %1225 = vrot.lane.b32.xlu1 %v11577_v7, %s11231_s3  ;;  %v9711_v8 = vpop.f32.mrb[11].mxu1 }
 0x675   :  { %1303 = vrot.lane.b32.xlu1 %v11570_v62, %s11232_s19 }
 0x677   :  { %v1039_v9 = vpop.f32.mrb[12].mxu1 }
 0x678   :  { %v1121_v10 = vmul.f32 0.25, %v1039_v9  ;;  %v9716_v11 = vpop.f32.mrb[13].mxu1 }
 0x679   :  { %1381 = vrot.lane.b32.xlu1 %v11575_v5, %s11232_s19 }
 0x67a   :  { %v1123_v12 = vadd.f32 %v1121_v10, %v11608_v33 }
 0x67c   :  { %v1125_v13 = vsel %vm429_vm5, %v1123_v12, -inf }
 0x67d   :  { %1126 = vmax.xlane.f32.xlu0 %v1125_v13  ;;  %1379 = vrot.lane.b32.xlu1 %v11575_v5, %s11233_s22 }
 0x6ed   :  { %v1130_v15 = vpop.xlane.xlu1 %1129 }
 0x6ee   :  { %v1132_v16 = vsub.f32 %v1124_v63, %v1130_v15 }
 0x6f0   :  { %v1135_v17 = vmul.f32 1.442695, %v1132_v16 }
 0x6f1   :  { %v1226_v18 = vpop.permute.xlu1 %1225 }
 0x6f2   :  { %10748 = vpow2.f32 %v1135_v17  ;;  %9728 = vmatpush3.msra.mxu0 %v1226_v18 }
 0x6f3   :  { %9737 = vmatprep.subr.mxu0 %v11227_v38 }
 0x6f5   :  { %v1304_v29 = vpop.permute.xlu1 %1303 }
 0x6f9   :  { %v1382_v31 = vpop.permute.xlu1 %1381 }
 0x6fc   :  { %v10749_v19 = vpop.eup %10748 }
 0x6fd   :  { %v1140_v20 = vsel %vm429_vm5, %v10749_v19, 0.0  ;;  %v1380_v34 = vpop.permute.xlu1 %1379 }
 0x6fe   :  { %1141 = vadd.xlane.f32.xlu0 %v1140_v20 }
 0x70a   :  { %v1127_v21 = vpop.xlane.xlu0 %1126 }
 0x70b   :  { %v1131_v22 = vsub.f32 %v1123_v12, %v1127_v21 }
 0x70d   :  { %v1133_v23 = vmul.f32 1.442695, %v1131_v22 }
 0x70f   :  { %10750 = vpow2.f32 %v1133_v23 }
 0x714   :  { %1148 = vrot.lane.b32.xlu0 %v11591_v14, %s11231_s3 }
 0x719   :  { %v10751_v24 = vpop.eup %10750 }
 0x71a   :  { %v1137_v25 = vsel %vm429_vm5, %v10751_v24, 0.0 }
 0x733   :  { %1138 = vadd.xlane.f32.xlu0 %v1137_v25 }
 0x749   :  { %1301 = vrot.lane.b32.xlu0 %v11570_v62, %s11233_s22 }
 0x78b   :  { %v1142_v26 = vpop.xlane.xlu0 %1141 }
 0x78c   :  { %10752 = vrcp.f32 %v1142_v26 }
 0x78f   :  { %v1149_v28 = vpop.permute.xlu0 %1148 }
 0x790   :  { %9723 = vmatpush3.msra.mxu1 %v1149_v28 }
 0x791   :  { %9732 = vmatprep.subr.mxu1 %v11227_v38 }
 0x796   :  { %v10753_v30 = vpop.eup %10752 }
 0x797   :  { %v1146_v32 = vmul.f32 %v10753_v30, %v10749_v19 }
 0x799   :  { %9730 = vmatmul.mubr.msk.f32.vlgmr.msra.gmra.mrb[6].mxu0 %vm429_vm5, %v1146_v32 }
 0x79a   :  { %9738 = vmatpush3.xpose.msk.msra.mxu0 %vm641_vm3, %v1382_v31  ;;  %9739 = vmatprep.mubr.msk.f32.mxu0 %vm11228_vm2, %v11227_v38 }
 0x79b   :  { %9747 = vmatprep.subr.mxu0 %v11227_v38 }
 0x79d   :  { %9740 = vmatmul.mubr.msk.f32.vlgmr.msra.gmra.mrb[8].mxu0 %vm641_vm3, %v1380_v34 }
 0x79e   :  { %9749 = vmatprep.mubr.msk.f32.mxu0 %vm11228_vm2, %v11227_v38 }
 0x7c0   :  { %v1139_v35 = vpop.xlane.xlu0 %1138 }
 0x7c1   :  { %10754 = vrcp.f32 %v1139_v35 }
 0x7c4   :  { %v1302_v39 = vpop.permute.xlu0 %1301 }
 0x7cb   :  { %v10755_v36 = vpop.eup %10754 }
 0x7cc   :  { %v1144_v37 = vmul.f32 %v10755_v36, %v10751_v24 }
 0x7ce   :  { %9725 = vmatmul.mubr.msk.f32.vlgmr.msra.gmra.mrb[14].mxu1 %vm429_vm5, %v1144_v37 }
 0x7cf   :  { %9733 = vmatpush3.xpose.msk.msra.mxu1 %vm641_vm3, %v1304_v29  ;;  %9734 = vmatprep.mubr.msk.f32.mxu1 %vm11228_vm2, %v11227_v38 }
 0x7d0   :  { %9742 = vmatprep.subr.mxu1 %v11227_v38 }
 0x7d2   :  { %9735 = vmatmul.mubr.msk.f32.vlgmr.msra.gmra.mrb[16].mxu1 %vm641_vm3, %v1302_v39 }
 0x7d3   :  { %9744 = vmatprep.mubr.msk.f32.mxu1 %vm11228_vm2, %v11227_v38 }
 0x86c   :  { %v11680_v40 = vpop.f32.mrb[6].mxu0 }
 0x86d   :  { %v9731_v41 = vpop.f32.mrb[7].mxu0 }
 0x870   :  { %v1453_v42 = vpop.f32.mrb[8].mxu0 }
 0x871   :  { %v1458_v43 = vmul.f32 0.25, %v1453_v42  ;;  %v9741_v44 = vpop.f32.mrb[9].mxu0 }
 0x873   :  { %v1460_v45 = vadd.f32 %v1458_v43, %v11604_v27 }
 0x875   :  { %v1464_v46 = vsel %vm429_vm5, %v1460_v45, -inf }
 0x876   :  { %1465 = vmax.xlane.f32.xlu1 %v1464_v46 }
 0x887   :  { %1559 = vrot.lane.b32.xlu1 %v11577_v7, %s11233_s22 }
 0x88b   :  { %1637 = vrot.lane.b32.xlu1 %v11570_v62, %s11234_s0 }
 0x88f   :  { %1715 = vrot.lane.b32.xlu1 %v11575_v5, %s11234_s0 }
 0x893   :  { %1713 = vrot.lane.b32.xlu1 %v11575_v5, %s11235_s4 }
 0x8a1   :  { %v1220_v47 = vpop.f32.mrb[14].mxu1 }
 0x8a2   :  { %v9726_v48 = vpop.f32.mrb[15].mxu1 }
 0x8a5   :  { %v1375_v49 = vpop.f32.mrb[16].mxu1 }
 0x8a6   :  { %v1457_v50 = vmul.f32 0.25, %v1375_v49  ;;  %v9736_v51 = vpop.f32.mrb[17].mxu1 }
 0x8a8   :  { %v1459_v52 = vadd.f32 %v1457_v50, %v11608_v33 }
 0x8aa   :  { %v1461_v53 = vsel %vm429_vm5, %v1459_v52, -inf }
 0x8ab   :  { %1462 = vmax.xlane.f32.xlu0 %v1461_v53 }
 0x903   :  { %v1466_v55 = vpop.xlane.xlu1 %1465 }
 0x904   :  { %v1468_v56 = vsub.f32 %v1460_v45, %v1466_v55  ;;  %v2001_v55 = vld [vmem:[#allocation3] sm:$0xff] }
 0x906   :  { %v1471_v57 = vmul.f32 1.442695, %v1468_v56  ;;  %v2003_v56 = vld [vmem:[#allocation3 + $0x10] sm:$0xff] }
 0x907   :  { %v1560_v58 = vpop.permute.xlu1 %1559 }
 0x908   :  { %10756 = vpow2.f32 %v1471_v57  ;;  %9748 = vmatpush3.msra.mxu0 %v1560_v58  ;;  %v2004_v58 = vld [vmem:[#allocation3 + $0x18] sm:$0xff] }
 0x909   :  { %9757 = vmatprep.subr.mxu0 %v11227_v38 }
 0x90b   :  { %v1638_v11 = vpop.permute.xlu1 %1637 }
 0x90f   :  { %v1716_v13 = vpop.permute.xlu1 %1715 }
 0x912   :  { %v10757_v59 = vpop.eup %10756 }
 0x913   :  { %v1476_v5 = vsel %vm429_vm5, %v10757_v59, 0.0 }
 0x914   :  { %1477 = vadd.xlane.f32.xlu0 %v1476_v5  ;;  %v2005_v5 = vld [vmem:[#allocation3 + $0x20] sm:$0xff] }
 0x92a   :  { %1483 = vrot.lane.b32.xlu0 %v11591_v14, %s11233_s22 }
 0x938   :  { %v1463_v61 = vpop.xlane.xlu0 %1462 }
 0x939   :  { %v1467_v63 = vsub.f32 %v1459_v52, %v1463_v61  ;;  %v2006_v61 = vld [vmem:[#allocation3 + $0x28] sm:$0xff] }
 0x93b   :  { %v1469_v0 = vmul.f32 1.442695, %v1467_v63  ;;  %v10328_v63 = vpack.c.bf16 %v2006_v61, %v2005_v5  ;;  %v2140_v61 = vld [vmem:[%s12684_s14 + $0x78] sm:$0xff] }
 0x93d   :  { %10758 = vpow2.f32 %v1469_v0  ;;  %v2007_v0 = vld [vmem:[#allocation3 + $0x30] sm:$0xff] }
 0x947   :  { %v10759_v4 = vpop.eup %10758 }
 0x948   :  { %v1473_v8 = vsel %vm429_vm5, %v10759_v4, 0.0 }
 0x949   :  { %1474 = vadd.xlane.f32.xlu0 %v1473_v8 }
 0x95f   :  { %1635 = vrot.lane.b32.xlu0 %v11570_v62, %s11235_s4  ;;  %v1714_v62 = vpop.permute.xlu1 %1713 }
 0x9a1   :  { %v1478_v9 = vpop.xlane.xlu0 %1477 }
 0x9a2   :  { %10760 = vrcp.f32 %v1478_v9 }
 0x9a5   :  { %v1484_v10 = vpop.permute.xlu0 %1483 }
 0x9a6   :  { %9743 = vmatpush3.msra.mxu1 %v1484_v10 }
 0x9a7   :  { %9752 = vmatprep.subr.mxu1 %v11227_v38 }
 0x9ac   :  { %v10761_v12 = vpop.eup %10760 }
 0x9ad   :  { %v1482_v15 = vmul.f32 %v10761_v12, %v10757_v59  ;;  %v10324_v59 = vpack.c.bf16 %v2004_v58, %v2003_v56  ;;  %v2135_v58 = vld [vmem:[%s12684_s14 + $0x50] sm:$0xff] }
 0x9af   :  { %9750 = vmatmul.mubr.msk.f32.vlgmr.msra.gmra.mrb[10].mxu0 %vm429_vm5, %v1482_v15 }
 0x9b0   :  { %9758 = vmatpush3.xpose.msk.msra.mxu0 %vm641_vm3, %v1716_v13  ;;  %9759 = vmatprep.mubr.msk.f32.mxu0 %vm11228_vm2, %v11227_v38 }
 0x9b1   :  { %9767 = vmatprep.subr.mxu0 %v11227_v38 }
 0x9b3   :  { %9760 = vmatmul.mubr.msk.f32.vlgmr.msra.gmra.mrb[12].mxu0 %vm641_vm3, %v1714_v62 }
 0x9b4   :  { %9769 = vmatprep.mubr.msk.f32.mxu0 %vm11228_vm2, %v11227_v38 }
 0x9d6   :  { %v1475_v16 = vpop.xlane.xlu0 %1474 }
 0x9d7   :  { %10762 = vrcp.f32 %v1475_v16 }
 0x9da   :  { %v1636_v19 = vpop.permute.xlu0 %1635 }
 0x9e1   :  { %v10763_v17 = vpop.eup %10762 }
 0x9e2   :  { %v1480_v18 = vmul.f32 %v10763_v17, %v10759_v4  ;;  %v2008_v4 = vld [vmem:[#allocation3 + $0x38] sm:$0xff] }
 0x9e3   :  { %v10332_v8 = vpack.c.bf16 %v2008_v4, %v2007_v0  ;;  %v2139_v0 = vld [vmem:[%s12684_s14 + $0x70] sm:$0xff] }
 0x9e4   :  { %9745 = vmatmul.mubr.msk.f32.vlgmr.msra.gmra.mrb[18].mxu1 %vm429_vm5, %v1480_v18 }
 0x9e5   :  { %9753 = vmatpush3.xpose.msk.msra.mxu1 %vm641_vm3, %v1638_v11  ;;  %9754 = vmatprep.mubr.msk.f32.mxu1 %vm11228_vm2, %v11227_v38 }
 0x9e6   :  { %9762 = vmatprep.subr.mxu1 %v11227_v38 }
 0x9e8   :  { %9755 = vmatmul.mubr.msk.f32.vlgmr.msra.gmra.mrb[20].mxu1 %vm641_vm3, %v1636_v19 }
 0x9e9   :  { %9764 = vmatprep.mubr.msk.f32.mxu1 %vm11228_vm2, %v11227_v38 }
 0xa82   :  { %v1631_v20 = vpop.f32.mrb[10].mxu0 }
 0xa83   :  { %v9751_v21 = vpop.f32.mrb[11].mxu0 }
 0xa86   :  { %v1787_v22 = vpop.f32.mrb[12].mxu0 }
 0xa87   :  { %v1792_v23 = vmul.f32 0.25, %v1787_v22  ;;  %v9761_v24 = vpop.f32.mrb[13].mxu0 }
 0xa89   :  { %v1794_v25 = vadd.f32 %v1792_v23, %v11604_v27 }
 0xa8b   :  { %v1798_v26 = vsel %vm429_vm5, %v1794_v25, -inf }
 0xa8c   :  { %1799 = vmax.xlane.f32.xlu1 %v1798_v26 }
 0xa9d   :  { %1893 = vrot.lane.b32.xlu1 %v11577_v7, %s11235_s4 }
 0xaa1   :  { %1971 = vrot.lane.b32.xlu1 %v1220_v47, %s11234_s0 }
 0xaa5   :  { %1973 = vrot.lane.b32.xlu1 %v11680_v40, %s11234_s0 }
 0xaa9   :  { %1981 = vrot.lane.b32.xlu1 %v1631_v20, %s11232_s19 }
 0xab7   :  { %v1555_v28 = vpop.f32.mrb[18].mxu1 }
 0xab8   :  { %v9746_v29 = vpop.f32.mrb[19].mxu1 }
 0xabb   :  { %v1709_v30 = vpop.f32.mrb[20].mxu1 }
 0xabc   :  { %v1791_v31 = vmul.f32 0.25, %v1709_v30  ;;  %v9756_v32 = vpop.f32.mrb[21].mxu1 }
 0xabe   :  { %v1793_v34 = vadd.f32 %v1791_v31, %v11608_v33 }
 0xac0   :  { %v1795_v35 = vsel %vm429_vm5, %v1793_v34, -inf }
 0xac1   :  { %1796 = vmax.xlane.f32.xlu0 %v1795_v35 }
 0xb19   :  { %v1800_v36 = vpop.xlane.xlu1 %1799 }
 0xb1a   :  { %v1802_v37 = vsub.f32 %v1794_v25, %v1800_v36  ;;  %v9080_v25 = vld [vmem:[%s12683_s1] ss:$0 sm:$0xff] }
 0xb1c   :  { %v1805_v7 = vmul.f32 1.442695, %v1802_v37 }
 0xb1d   :  { %v1894_v39 = vpop.permute.xlu1 %1893 }
 0xb1e   :  { %10764 = vpow2.f32 %v1805_v7  ;;  %9768 = vmatpush3.msra.mxu0 %v1894_v39 }
 0xb21   :  { %v1972_v13 = vpop.permute.xlu1 %1971 }
 0xb22   :  { %v1993_v17 = vsel %vm641_vm3, %v11642_v3, %v1972_v13  ;;  %v2258_v13 = vld [vmem:[%s12685_s28 + $0x8] sm:$0xff] }
 0xb25   :  { %v1974_v15 = vpop.permute.xlu1 %1973 }
 0xb26   :  { %v1994_v19 = vsel %vm641_vm3, %v11644_v6, %v1974_v15  ;;  %v2275_v15 = vld [vmem:[%s12685_s28 + $0x90] sm:$0xff] }
 0xb28   :  { %v10765_v41 = vpop.eup %10764 }
 0xb29   :  { %v1810_v40 = vsel %vm429_vm5, %v10765_v41, 0.0  ;;  %v1982_v62 = vpop.permute.xlu1 %1981 }
 0xb2a   :  { %1811 = vadd.xlane.f32.xlu0 %v1810_v40  ;;  %v1997_v22 = vsel %vm1995_vm10, %v1994_v19, %v1982_v62  ;;  %v2276_v62 = vld [vmem:[%s12685_s28 + $0x98] sm:$0xff] }
 0xb2b   :  { %v2260_v19 = vld [vmem:[%s12685_s28 + $0x18] sm:$0xff] }
 0xb4e   :  { %v1797_v42 = vpop.xlane.xlu0 %1796 }
 0xb4f   :  { %v1801_v43 = vsub.f32 %v1793_v34, %v1797_v42  ;;  %v2126_v42 = vld [vmem:[%s12684_s14 + $0x8] sm:$0xff] }
 0xb51   :  { %v1803_v44 = vmul.f32 1.442695, %v1801_v43  ;;  %v2128_v43 = vld [vmem:[%s12684_s14 + $0x18] sm:$0xff] }
 0xb53   :  { %10766 = vpow2.f32 %v1803_v44  ;;  %v10336_v44 = vpack.c.bf16 %v2128_v43, %v2126_v42  ;;  %v2263_v42 = vld [vmem:[%s12685_s28 + $0x30] sm:$0xff]  ;;  %v2264_v43 = vld [vmem:[%s12685_s28 + $0x38] sm:$0xff] }
 0xb55   :  { %10337 = vmatprep.subr.bf16.mxu0 %v10336_v44  ;;  %v2281_v44 = vld [vmem:[%s12685_s28 + $0xc0] sm:$0xff] }
 0xb5d   :  { %v10767_v45 = vpop.eup %10766 }
 0xb5e   :  { %v1807_v46 = vsel %vm429_vm5, %v10767_v45, 0.0 }
 0xb5f   :  { %1808 = vadd.xlane.f32.xlu0 %v1807_v46  ;;  %v2127_v46 = vld [vmem:[%s12684_s14 + $0x10] sm:$0xff] }
 0xb75   :  { %1817 = vrot.lane.b32.xlu0 %v11591_v14, %s11235_s4  ;;  %v2002_v14 = vld [vmem:[#allocation3 + $0x8] sm:$0xff] }
 0xb76   :  { %v10320_v57 = vpack.c.bf16 %v2002_v14, %v2001_v55  ;;  %v2134_v55 = vld [vmem:[%s12684_s14 + $0x48] sm:$0xff]  ;;  %v2136_v14 = vld [vmem:[%s12684_s14 + $0x58] sm:$0xff] }
 0xb77   :  { %v10344_v56 = vpack.c.bf16 %v2136_v14, %v2134_v55  ;;  %v2285_v14 = vld [vmem:[%s12685_s28 + $0xe0] sm:$0xff] }
 0xb79   :  { %1979 = vrot.lane.b32.xlu0 %v1555_v28, %s11232_s19 }
 0xbb7   :  { %v1812_v47 = vpop.xlane.xlu0 %1811 }
 0xbb8   :  { %10768 = vrcp.f32 %v1812_v47 }
 0xbc2   :  { %v10769_v48 = vpop.eup %10768 }
 0xbc3   :  { %v1816_v49 = vmul.f32 %v10769_v48, %v10765_v41  ;;  %v2130_v48 = vld [vmem:[%s12684_s14 + $0x28] sm:$0xff] }
 0xbc5   :  { %9770 = vmatmul.mubr.msk.f32.vlgmr.msra.gmra.mrb[14].mxu0 %vm429_vm5, %v1816_v49  ;;  %v2132_v49 = vld [vmem:[%s12684_s14 + $0x38] sm:$0xff] }
 0xbc6   :  { %2223 = vmatprep.mubr.f32.mxu0 %v11227_v38 }
 0xbec   :  { %v1809_v50 = vpop.xlane.xlu0 %1808 }
 0xbed   :  { %10770 = vrcp.f32 %v1809_v50  ;;  %v10340_v50 = vpack.c.bf16 %v2132_v49, %v2130_v48  ;;  %v2283_v49 = vld [vmem:[%s12685_s28 + $0xd0] sm:$0xff] }
 0xbf0   :  { %v1818_v51 = vpop.permute.xlu0 %1817 }
 0xbf1   :  { %9763 = vmatpush3.msra.mxu1 %v1818_v51  ;;  %v2129_v51 = vld [vmem:[%s12684_s14 + $0x20] sm:$0xff] }
 0xbf2   :  { %10321 = vmatprep.subr.bf16.mxu1 %v10320_v57 }
 0xbf4   :  { %v1980_v16 = vpop.permute.xlu0 %1979 }
 0xbf5   :  { %v1996_v20 = vsel %vm1995_vm10, %v1993_v17, %v1980_v16  ;;  %v10356_v17 = vpack.c.bf16 %v2276_v62, %v2275_v15  ;;  %v2374_v15 = vld [vmem:[%s12686_s30 + $0x18] sm:$0xff] }
 0xbf7   :  { %v10771_v52 = vpop.eup %10770 }
 0xbf8   :  { %v1814_v53 = vmul.f32 %v10771_v52, %v10767_v45  ;;  %v2125_v45 = vld [vmem:[%s12684_s14] sm:$0xff]  ;;  %v2131_v52 = vld [vmem:[%s12684_s14 + $0x30] sm:$0xff] }
 0xbf9   :  { %v10338_v47 = vpack.c.bf16 %v2127_v46, %v2125_v45  ;;  %v2282_v45 = vld [vmem:[%s12685_s28 + $0xc8] sm:$0xff] }
 0xbfa   :  { %9765 = vmatmul.mubr.msk.f32.vlgmr.msra.gmra.mrb[22].mxu1 %vm429_vm5, %v1814_v53  ;;  %v10342_v53 = vpack.c.bf16 %v2131_v52, %v2129_v51  ;;  %v10368_v46 = vpack.c.bf16 %v2282_v45, %v2281_v44  ;;  %v2267_v52 = vld [vmem:[%s12685_s28 + $0x50] sm:$0xff] }
 0xbfb   :  { %10323 = vmatpush3.bf16.msra.mxu1 %v10320_v57  ;;  %10339 = vmatpush1.bf16.msra.mxu0 %v10338_v47  ;;  %v2133_v57 = vld [vmem:[%s12684_s14 + $0x40] sm:$0xff]  ;;  %v2266_v47 = vld [vmem:[%s12685_s28 + $0x48] sm:$0xff] }
 0xbfc   :  { %10325 = vmatprep.subr.bf16.mxu1 %v10324_v59  ;;  %10341 = vmatprep.subr.bf16.mxu0 %v10340_v50  ;;  %v10346_v5 = vpack.c.bf16 %v2135_v58, %v2133_v57  ;;  %v2284_v50 = vld [vmem:[%s12685_s28 + $0xd8] sm:$0xff]  ;;  %v2269_v58 = vld [vmem:[%s12685_s28 + $0x60] sm:$0xff] }
 0xbfd   :  { %v10372_v51 = vpack.c.bf16 %v2284_v50, %v2283_v49  ;;  %v2377_v50 = vld [vmem:[%s12686_s30 + $0x30] sm:$0xff] }
 0xbff   :  { %10327 = vmatpush3.bf16.msra.mxu1 %v10324_v59  ;;  %10343 = vmatpush1.bf16.msra.mxu0 %v10342_v53  ;;  %v2138_v59 = vld [vmem:[%s12684_s14 + $0x68] sm:$0xff]  ;;  %v2268_v53 = vld [vmem:[%s12685_s28 + $0x58] sm:$0xff] }
 0xc00   :  { %10329 = vmatprep.subr.bf16.mxu1 %v10328_v63  ;;  %10345 = vmatprep.subr.bf16.mxu0 %v10344_v56  ;;  %v10348_v4 = vpack.c.bf16 %v2140_v61, %v2138_v59  ;;  %v10374_v55 = vpack.c.bf16 %v2268_v53, %v2267_v52  ;;  %v2286_v56 = vld [vmem:[%s12685_s28 + $0xe8] sm:$0xff]  ;;  %v2287_v61 = vld [vmem:[%s12685_s28 + $0xf0] sm:$0xff] }
 0xc01   :  { %v10376_v57 = vpack.c.bf16 %v2286_v56, %v2285_v14  ;;  %v2270_v59 = vld [vmem:[%s12685_s28 + $0x68] sm:$0xff] }
 0xc03   :  { %10331 = vmatpush3.bf16.msra.mxu1 %v10328_v63  ;;  %v2137_v63 = vld [vmem:[%s12684_s14 + $0x60] sm:$0xff]  ;;  %10347 = vmatpush1.bf16.msra.mxu0 %v10346_v5  ;;  %v10378_v5 = vpack.c.bf16 %v2270_v59, %v2269_v58 }
 0xc04   :  { %10333 = vmatprep.subr.bf16.mxu1 %v10332_v8  ;;  %10349 = vmatprep.subr.bf16.mxu0 %v10348_v4  ;;  %v2271_v4 = vld [vmem:[%s12685_s28 + $0x70] sm:$0xff] }
 0xc07   :  { %10335 = vmatpush3.bf16.msra.mxu1 %v10332_v8  ;;  %v10350_v8 = vpack.c.bf16 %v2139_v0, %v2137_v63  ;;  %v2288_v63 = vld [vmem:[%s12685_s28 + $0xf8] sm:$0xff] }
 0xc08   :  { %v10380_v0 = vpack.c.bf16 %v2288_v63, %v2287_v61  ;;  %v2477_v63 = vld [vmem:[#allocation6] sm:$0xff] }
 0xc09   :  { %10351 = vmatpush1.bf16.msra.mxu0 %v10350_v8  ;;  %v2272_v8 = vld [vmem:[%s12685_s28 + $0x78] sm:$0xff] }
 0xc98   :  { %v1965_v9 = vpop.f32.mrb[14].mxu0 }
 0xc99   :  { %1989 = vrot.lane.b32.xlu1 %v1965_v9, %s11230_s9  ;;  %v9771_v10 = vpop.f32.mrb[15].mxu0  ;;  %v2273_v9 = vld [vmem:[%s12685_s28 + $0x80] sm:$0xff] }
 0xc9a   :  { %v2274_v10 = vld [vmem:[%s12685_s28 + $0x88] sm:$0xff] }
 0xccd   :  { %v1889_v11 = vpop.f32.mrb[22].mxu1 }
 0xcce   :  { %1987 = vrot.lane.b32.xlu0 %v1889_v11, %s11230_s9  ;;  %v9766_v12 = vpop.f32.mrb[23].mxu1  ;;  %v2257_v11 = vld [vmem:[%s12685_s28] sm:$0xff] }
 0xccf   :  { %v10352_v12 = vpack.c.bf16 %v2274_v10, %v2273_v9  ;;  %v10354_v16 = vpack.c.bf16 %v2258_v13, %v2257_v11  ;;  %v10382_v9 = vpack.c.bf16 %v2272_v8, %v2271_v4  ;;  %v2371_v10 = vld [vmem:[%s12686_s30] sm:$0xff]  ;;  %v2372_v11 = vld [vmem:[%s12686_s30 + $0x8] sm:$0xff] }
 0xcd0   :  { %v10384_v13 = vpack.c.bf16 %v2372_v11, %v2371_v10  ;;  %v9086_v8 = vld [vmem:[%s12689_s10] ss:$0 sm:$0xff] }
 0xcd1   :  { %10353 = vmatprep.subr.bf16.mxu1 %v10352_v12  ;;  %v2373_v12 = vld [vmem:[%s12686_s30 + $0x10] sm:$0xff] }
 0xcd2   :  { %v10388_v62 = vpack.c.bf16 %v2374_v15, %v2373_v12  ;;  %10385 = vmatprep.subr.bf16.mxu0 %v10384_v13 }
 0xd0b   :  { %v1990_v18 = vpop.permute.xlu1 %1989 }
 0xd0c   :  { %v2000_v24 = vsel %vm1998_vm11, %v1997_v22, %v1990_v18  ;;  %v2259_v18 = vld [vmem:[%s12685_s28 + $0x10] sm:$0xff] }
 0xd0d   :  { %v10358_v22 = vpack.c.bf16 %v2260_v19, %v2259_v18 }
 0xd40   :  { %v1988_v21 = vpop.permute.xlu0 %1987 }
 0xd41   :  { %v1999_v23 = vsel %vm1998_vm11, %v1996_v20, %v1988_v21  ;;  %v2277_v20 = vld [vmem:[%s12685_s28 + $0xa0] sm:$0xff]  ;;  %v2278_v21 = vld [vmem:[%s12685_s28 + $0xa8] sm:$0xff] }
 0xd42   :  { %9788 = vmatprep.mubr.msk.f32.mxu1 %vm499_vm0, %v1999_v23  ;;  %v10360_v23 = vpack.c.bf16 %v2278_v21, %v2277_v20 }
 0xd43   :  { %9789 = vmatmul.mubr.msk.f32.vlgmr.msra.gmra.mrb[24].mxu1 %vm499_vm0, %v2000_v24  ;;  %v2261_v24 = vld [vmem:[%s12685_s28 + $0x20] sm:$0xff] }
 0xd44   :  { %10355 = vmatpush3.bf16.msra.mxu1 %v10354_v16  ;;  %v2141_v16 = vld [vmem:[%s12687_s2] sm:$0x3] }
 0xd45   :  { %10357 = vmatprep.subr.bf16.mxu1 %v10356_v17  ;;  %v2146_v17 = vrot.slane %v2141_v16, %v11564_v54  ;;  %v2150_v18 = vrot.slane %v2141_v16, %v11568_v60 }
 0xd48   :  { %10359 = vmatpush3.bf16.msra.mxu1 %v10358_v22 }
 0xd49   :  { %10361 = vmatprep.subr.bf16.mxu1 %v10360_v23 }
 0xe16   :  { %v9790_v3 = vpop.f32.mrb[24].mxu1 }
 0xe17   :  { %v2094_v26 = vadd.f32 %v9790_v3, %v9080_v25  ;;  %v2088_v28 = vpop.f32.mrb[25].mxu1 }
 0xe18   :  { %v2089_v29 = vadd.f32 %v9080_v25, %v2088_v28  ;;  %v2262_v25 = vld [vmem:[%s12685_s28 + $0x28] sm:$0xff] }
 0xe19   :  { %v11750_v6 = vadd.f32 %v2094_v26, %v11506_v2  ;;  %v10362_v3 = vpack.c.bf16 %v2262_v25, %v2261_v24 }
 0xe1a   :  { %v11753_v30 = vadd.f32 %v2089_v29, %v11503_v1 }
 0xe1b   :  { %v2102_v31 = vsel %vm499_vm0, %v11750_v6, 0.0  ;;  %10363 = vmatpush3.bf16.msra.mxu1 %v10362_v3 }
 0xe1c   :  { %2103 = vadd.xlane.f32.xlu1 %v2102_v31  ;;  %v2099_v32 = vsel %vm499_vm0, %v11753_v30, 0.0 }
 0xe1d   :  { %2100 = vadd.xlane.f32.xlu0 %v2099_v32 }
 0xea9   :  { %v2104_v34 = vpop.xlane.xlu1 %2103 }
 0xeaa   :  { %v2106_v35 = vmul.f32 0.015625, %v2104_v34  ;;  %v2101_v36 = vpop.xlane.xlu0 %2100 }
 0xeab   :  { %v2105_v2 = vmul.f32 0.015625, %v2101_v36 }
 0xeac   :  { %v11760_v37 = vsub.f32 %v11750_v6, %v2106_v35 }
 0xead   :  { %v11763_v1 = vsub.f32 %v11753_v30, %v2105_v2 }
 0xeae   :  { %v2110_v41 = vmul.f32 %v11760_v37, %v11760_v37 }
 0xeaf   :  { %v2109_v7 = vmul.f32 %v11763_v1, %v11763_v1 }
 0xeb0   :  { %v2114_v40 = vsel %vm499_vm0, %v2110_v41, 0.0  ;;  %v2280_v41 = vld [vmem:[%s12685_s28 + $0xb8] sm:$0xff] }
 0xeb1   :  { %v2111_v39 = vsel %vm499_vm0, %v2109_v7, 0.0 }
 0xeb2   :  { %2112 = vadd.xlane.f32.xlu0 %v2111_v39  ;;  %v2279_v39 = vld [vmem:[%s12685_s28 + $0xb0] sm:$0xff] }
 0xeb6   :  { %2115 = vadd.xlane.f32.xlu0 %v2114_v40  ;;  %v10364_v40 = vpack.c.bf16 %v2280_v41, %v2279_v39 }
 0xeb8   :  { %10365 = vmatprep.subr.bf16.mxu1 %v10364_v40 }
 0xf3f   :  { %v2113_v26 = vpop.xlane.xlu0 %2112 }
 0xf40   :  { %v2117_v28 = vmul.f32 0.015625, %v2113_v26 }
 0xf42   :  { %v2119_v29 = vadd.f32 1e-05, %v2117_v28 }
 0xf43   :  { %v2116_v31 = vpop.xlane.xlu0 %2115 }
 0xf44   :  { %10772 = vrsqrt.f32 %v2119_v29  ;;  %v2118_v32 = vmul.f32 0.015625, %v2116_v31 }
 0xf46   :  { %v2120_v34 = vadd.f32 1e-05, %v2118_v32 }
 0xf48   :  { %10774 = vrsqrt.f32 %v2120_v34 }
 0xf4e   :  { %v10773_v35 = vpop.eup %10772 }
 0xf4f   :  { %v2123_v36 = vmul.f32 %v10773_v35, %v11763_v1  ;;  %v10366_v1 = vpack.c.bf16 %v2264_v43, %v2263_v42 }
 0xf51   :  { %9083 = vmatmul.mubr.msk.f32.vlgmr.msra.gmra.mrb[16].mxu0 %vm499_vm0, %v2123_v36  ;;  %10367 = vmatpush3.bf16.msra.mxu1 %v10366_v1 }
 0xf52   :  { %v10775_v2 = vpop.eup %10774  ;;  %2229 = vmatprep.mubr.f32.mxu0 %v11227_v38  ;;  %10369 = vmatprep.subr.bf16.mxu1 %v10368_v46 }
 0xf53   :  { %v2124_v7 = vmul.f32 %v10775_v2, %v11760_v37  ;;  %v2265_v37 = vld [vmem:[%s12685_s28 + $0x40] sm:$0xff]  ;;  %10387 = vmatpush3.bf16.msra.mxu0 %v10384_v13 }
 0xf54   :  { %v10370_v48 = vpack.c.bf16 %v2266_v47, %v2265_v37  ;;  %10389 = vmatprep.subr.bf16.mxu0 %v10388_v62  ;;  %v2375_v47 = vld [vmem:[%s12686_s30 + $0x20] sm:$0xff] }
 0xf55   :  { %9084 = vmatmul.mubr.msk.f32.gmra.mrb[18].mxu0 %vm499_vm0, %v2124_v7 }
 0xf56   :  { %10371 = vmatpush3.bf16.msra.mxu1 %v10370_v48  ;;  %v2376_v48 = vld [vmem:[%s12686_s30 + $0x28] sm:$0xff] }
 0xf57   :  { %10373 = vmatprep.subr.bf16.mxu1 %v10372_v51  ;;  %10391 = vmatpush3.bf16.msra.mxu0 %v10388_v62  ;;  %v10392_v49 = vpack.c.bf16 %v2376_v48, %v2375_v47  ;;  %v2378_v51 = vld [vmem:[%s12686_s30 + $0x38] sm:$0xff]  ;;  %v9097_v48 = vld [vmem:[%s11264_s13 + $0xa8] sm:$0xff] }
 0xf58   :  { %v10396_v52 = vpack.c.bf16 %v2378_v51, %v2377_v50  ;;  %v9096_v51 = vld [vmem:[%s11264_s13 + $0xa0] sm:$0xff] }
 0xf59   :  { %10393 = vmatprep.subr.bf16.mxu0 %v10392_v49 }
 0xf5a   :  { %10375 = vmatpush3.bf16.msra.mxu1 %v10374_v55  ;;  %v9085_v55 = vld [vmem:[%s12688_s21] ss:$0 sm:$0xff] }
 0xf5b   :  { %10377 = vmatprep.subr.bf16.mxu1 %v10376_v57  ;;  %10395 = vmatpush3.bf16.msra.mxu0 %v10392_v49  ;;  %v9099_v49 = vld [vmem:[%s11264_s13 + $0xb8] sm:$0xff] }
 0xf5c   :  { %10397 = vmatprep.subr.bf16.mxu0 %v10396_v52  ;;  %v10408_v50 = vpack.c.bf16 %v9099_v49, %v9097_v48 }
 0xf5e   :  { %10379 = vmatpush3.bf16.msra.mxu1 %v10378_v5 }
 0xf5f   :  { %10381 = vmatprep.subr.bf16.mxu1 %v10380_v0  ;;  %10399 = vmatpush3.bf16.msra.mxu0 %v10396_v52  ;;  %v2478_v0 = vld [vmem:[#allocation6 + $0x8] sm:$0xff] }
 0xf60   :  { %v10400_v4 = vpack.c.bf16 %v2478_v0, %v2477_v63  ;;  %v9098_v52 = vld [vmem:[%s11264_s13 + $0xb0] sm:$0xff]  ;;  %v9104_v0 = vld [vmem:[%s11264_s13 + $0xe0] sm:$0xff] }
 0xf62   :  { %10383 = vmatpush3.bf16.msra.mxu1 %v10382_v9  ;;  %10401 = vmatprep.subr.bf16.mxu0 %v10400_v4 }
 0xf63   :  { %9817 = vmatprep.subr.mxu1 %v11227_v38 }
0x1024   :  { %v2225_v19 = vpop.f32.mrb[16].mxu0 }
0x1025   :  { %v2226_v20 = vadd.f32 %v2225_v19, %v2146_v17  ;;  %v2227_v21 = vpop.f32.mrb[17].mxu0 }
0x1026   :  { %v2228_v22 = vadd.f32 %v2227_v21, %v2150_v18 }
0x1027   :  { %v2241_v23 = vmul.f32 0.70710677, %v2226_v20  ;;  %v2236_v7 = vmul.f32 0.5, %v2226_v20 }
0x1028   :  { %v2242_v24 = vmul.f32 0.70710677, %v2228_v22  ;;  %v2231_v25 = vpop.f32.mrb[18].mxu0  ;;  %v2237_v36 = vmul.f32 0.5, %v2228_v22 }
0x1029   :  { %10776 = verf.f32 %v2241_v23  ;;  %v2232_v3 = vadd.f32 %v2231_v25, %v2146_v17  ;;  %v2233_v26 = vpop.f32.mrb[19].mxu0  ;;  %v9089_v23 = vld [vmem:[%s12690_s7] ss:$0 sm:$0xff] }
0x102a   :  { %10778 = verf.f32 %v2242_v24  ;;  %v2234_v28 = vadd.f32 %v2233_v26, %v2150_v18 }
0x102b   :  { %v2243_v29 = vmul.f32 0.70710677, %v2232_v3  ;;  %v2238_v45 = vmul.f32 0.5, %v2232_v3 }
0x102c   :  { %v2244_v31 = vmul.f32 0.70710677, %v2234_v28  ;;  %v2239_v1 = vmul.f32 0.5, %v2234_v28 }
0x102d   :  { %10780 = verf.f32 %v2243_v29 }
0x102e   :  { %10782 = verf.f32 %v2244_v31 }
0x1033   :  { %v10777_v32 = vpop.eup %10776 }
0x1034   :  { %v10779_v34 = vpop.eup %10778  ;;  %v2249_v35 = vadd.f32 1.0, %v10777_v32 }
0x1035   :  { %v2250_v2 = vadd.f32 1.0, %v10779_v34 }
0x1036   :  { %v2253_v42 = vmul.f32 %v2249_v35, %v2236_v7 }
0x1037   :  { %v10781_v39 = vpop.eup %10780  ;;  %v2254_v41 = vmul.f32 %v2250_v2, %v2237_v36 }
0x1038   :  { %v10783_v40 = vpop.eup %10782  ;;  %v2251_v43 = vadd.f32 1.0, %v10781_v39 }
0x1039   :  { %v2252_v44 = vadd.f32 1.0, %v10783_v40  ;;  %2360 = vmatprep.mubr.f32.mxu1 %v2254_v41 }
0x103a   :  { %2361 = vmatmul.mubr.f32.vlgmr.msra.gmra.mrb[26].mxu1 %v2253_v42  ;;  %v2255_v37 = vmul.f32 %v2251_v43, %v2238_v45 }
0x103b   :  { %v2256_v46 = vmul.f32 %v2252_v44, %v2239_v1  ;;  %v9093_v1 = vld [vmem:[%s11264_s13 + $0x88] sm:$0xff]  ;;  %v9095_v44 = vld [vmem:[%s11264_s13 + $0x98] sm:$0xff] }
0x103c   :  { %v10404_v45 = vpack.c.bf16 %v9095_v44, %v9093_v1 }
0x103d   :  { %2365 = vmatprep.mubr.f32.mxu1 %v2256_v46  ;;  %v9092_v46 = vld [vmem:[%s11264_s13 + $0x80] sm:$0xff] }
0x103e   :  { %2366 = vmatmul.mubr.f32.gmra.mrb[28].mxu1 %v2255_v37  ;;  %v9094_v37 = vld [vmem:[%s11264_s13 + $0x90] sm:$0xff] }
0x103f   :  { %9819 = vmatprep.mubr.msk.f32.mxu1 %vm11228_vm2, %v11227_v38  ;;  %v10406_v47 = vpack.c.bf16 %v9094_v37, %v9092_v46 }
0x110d   :  { %v9397_v53 = vpop.f32.mrb[26].mxu1 }
0x110e   :  { %v9398_v14 = vpop.f32.mrb[27].mxu1 }
0x110f   :  { %v9399_v56 = vadd.f32 %v9398_v14, %v9397_v53  ;;  %v9101_v53 = vld [vmem:[%s11264_s13 + $0xc8] sm:$0xff]  ;;  %v9103_v14 = vld [vmem:[%s11264_s13 + $0xd8] sm:$0xff] }
0x1111   :  { %v2363_v57 = vadd.f32 %v9399_v56, %v9085_v55  ;;  %v9400_v58 = vpop.f32.mrb[28].mxu1  ;;  %v9100_v56 = vld [vmem:[%s11264_s13 + $0xc0] sm:$0xff] }
0x1112   :  { %v9401_v59 = vpop.f32.mrb[29].mxu1 }
0x1113   :  { %v9402_v5 = vadd.f32 %v9401_v59, %v9400_v58  ;;  %9807 = vmatprep.mubr.msk.f32.mxu0 %vm499_vm0, %v2363_v57  ;;  %v2567_v29 = vadd.f32 %v2363_v57, %v11753_v30  ;;  %v9102_v57 = vld [vmem:[%s11264_s13 + $0xd0] sm:$0xff]  ;;  %v10412_v58 = vpack.c.bf16 %v9103_v14, %v9101_v53  ;;  %v9105_v59 = vld [vmem:[%s11264_s13 + $0xe8] sm:$0xff] }
0x1115   :  { %v2368_v61 = vadd.f32 %v9402_v5, %v9085_v55  ;;  %v10410_v55 = vpack.c.bf16 %v9098_v52, %v9096_v51  ;;  %v9107_v5 = vld [vmem:[%s11264_s13 + $0xf8] sm:$0xff] }
0x1116   :  { %v10416_v63 = vpack.c.bf16 %v9107_v5, %v9105_v59 }
0x1117   :  { %9808 = vmatmul.mubr.msk.f32.vlgmr.msra.gmra.mrb[20].mxu0 %vm499_vm0, %v2368_v61  ;;  %v2568_v3 = vadd.f32 %v2368_v61, %v11750_v6  ;;  %v10414_v61 = vpack.c.bf16 %v9102_v57, %v9100_v56 }
0x1118   :  { %10403 = vmatpush3.bf16.msra.mxu0 %v10400_v4  ;;  %v9106_v4 = vld [vmem:[%s11264_s13 + $0xf0] sm:$0xff]  ;;  %s12691_s13 = sld [smem:[#allocation33_spill]] }
0x1119   :  { %10405 = vmatprep.subr.bf16.mxu0 %v10404_v45 }
0x11ea   :  { %v9809_v9 = vpop.f32.mrb[20].mxu0 }
0x11eb   :  { %v2464_v10 = vadd.f32 %v9809_v9, %v9086_v8  ;;  %v2458_v11 = vpop.f32.mrb[21].mxu0 }
0x11ec   :  { %v2459_v12 = vadd.f32 %v9086_v8, %v2458_v11  ;;  %v10418_v8 = vpack.c.bf16 %v9106_v4, %v9104_v0 }
0x11ed   :  { %v2470_v13 = vmul.f32 0.70710677, %v2464_v10  ;;  %v2468_v20 = vmul.f32 0.5, %v2464_v10 }
0x11ee   :  { %v2469_v15 = vmul.f32 0.70710677, %v2459_v12  ;;  %v2467_v18 = vmul.f32 0.5, %v2459_v12 }
0x11ef   :  { %10784 = verf.f32 %v2470_v13 }
0x11f0   :  { %10786 = verf.f32 %v2469_v15 }
0x11f9   :  { %v10785_v62 = vpop.eup %10784 }
0x11fa   :  { %v10787_v16 = vpop.eup %10786  ;;  %v2474_v17 = vadd.f32 1.0, %v10785_v62 }
0x11fb   :  { %v2473_v19 = vadd.f32 1.0, %v10787_v16 }
0x11fc   :  { %v2476_v22 = vmul.f32 %v2474_v17, %v2468_v20 }
0x11fd   :  { %v2475_v21 = vmul.f32 %v2473_v19, %v2467_v18  ;;  %v9108_v19 = vld [vmem:[%s11269_s17 + $0x2] sm:$0x3]  ;;  %s12692_s17 = sld [smem:[#allocation34_spill]] }
0x11fe   :  { %v2620_v20 = vrot.slane %v9108_v19, %v11564_v54 }
0x11ff   :  { %9814 = vmatprep.mubr.msk.f32.mxu0 %vm641_vm3, %v2475_v21  ;;  %v2624_v21 = vrot.slane %v9108_v19, %v11568_v60 }
0x1200   :  { %9815 = vmatmul.mubr.msk.f32.vlgmr.msra.gmra.mrb[22].mxu0 %vm641_vm3, %v2476_v22 }
0x1201   :  { %2697 = vmatprep.mubr.f32.mxu0 %v11227_v38  ;;  %10407 = vmatpush1.bf16.msra.mxu0 %v10406_v47 }
0x1202   :  { %10409 = vmatprep.subr.bf16.mxu0 %v10408_v50 }
0x1205   :  { %10411 = vmatpush1.bf16.msra.mxu0 %v10410_v55 }
0x1206   :  { %10413 = vmatprep.subr.bf16.mxu0 %v10412_v58 }
0x1209   :  { %10415 = vmatpush1.bf16.msra.mxu0 %v10414_v61 }
0x120a   :  { %10417 = vmatprep.subr.bf16.mxu0 %v10416_v63 }
0x120d   :  { %10419 = vmatpush1.bf16.msra.mxu0 %v10418_v8 }
0x120e   :  { %9827 = vmatprep.subr.mxu0 %v11227_v38 }
0x12d3   :  { %v9816_v24 = vpop.f32.mrb[22].mxu0 }
0x12d4   :  { %v2564_v25 = vadd.f32 %v9816_v24, %v9089_v23  ;;  %v2558_v26 = vpop.f32.mrb[23].mxu0 }
0x12d5   :  { %v2559_v28 = vadd.f32 %v9089_v23, %v2558_v26 }
0x12d6   :  { %v11848_v31 = vadd.f32 %v2568_v3, %v2564_v25 }
0x12d7   :  { %v11850_v32 = vadd.f32 %v2567_v29, %v2559_v28 }
0x12d8   :  { %v2574_v34 = vsel %vm499_vm0, %v11848_v31, 0.0 }
0x12d9   :  { %2575 = vadd.xlane.f32.xlu1 %v2574_v34  ;;  %v2571_v35 = vsel %vm499_vm0, %v11850_v32, 0.0 }
0x12da   :  { %2572 = vadd.xlane.f32.xlu0 %v2571_v35 }
0x1366   :  { %v2576_v6 = vpop.xlane.xlu1 %2575 }
0x1367   :  { %v2578_v36 = vmul.f32 0.015625, %v2576_v6  ;;  %v2573_v2 = vpop.xlane.xlu0 %2572 }
0x1368   :  { %v2577_v30 = vmul.f32 0.015625, %v2573_v2 }
0x1369   :  { %v2580_v7 = vsub.f32 %v11848_v31, %v2578_v36 }
0x136a   :  { %v2579_v39 = vsub.f32 %v11850_v32, %v2577_v30 }
0x136b   :  { %v2582_v41 = vmul.f32 %v2580_v7, %v2580_v7 }
0x136c   :  { %v2581_v40 = vmul.f32 %v2579_v39, %v2579_v39 }
0x136d   :  { %v2586_v42 = vsel %vm499_vm0, %v2582_v41, 0.0 }
0x136e   :  { %2587 = vadd.xlane.f32.xlu1 %v2586_v42  ;;  %v2583_v43 = vsel %vm499_vm0, %v2581_v40, 0.0 }
0x136f   :  { %2584 = vadd.xlane.f32.xlu0 %v2583_v43 }
0x13fb   :  { %v2588_v9 = vpop.xlane.xlu1 %2587 }
0x13fc   :  { %v2590_v10 = vmul.f32 0.015625, %v2588_v9  ;;  %v2585_v11 = vpop.xlane.xlu0 %2584 }
0x13fd   :  { %v2589_v12 = vmul.f32 0.015625, %v2585_v11 }
0x13fe   :  { %v2592_v13 = vadd.f32 1e-05, %v2590_v10 }
0x13ff   :  { %v2591_v15 = vadd.f32 1e-05, %v2589_v12 }
0x1401   :  { %10788 = vrsqrt.f32 %v2591_v15 }
0x1402   :  { %10790 = vrsqrt.f32 %v2592_v13 }
0x140b   :  { %v10789_v62 = vpop.eup %10788 }
0x140c   :  { %v2595_v16 = vmul.f32 %v10789_v62, %v2579_v39  ;;  %v10791_v17 = vpop.eup %10790 }
0x140d   :  { %v2596_v18 = vmul.f32 %v10791_v17, %v2580_v7 }
0x140e   :  { %9109 = vmatmul.mubr.msk.f32.vlgmr.msra.gmra.mrb[24].mxu0 %vm499_vm0, %v2595_v16 }
0x140f   :  { %2703 = vmatprep.mubr.f32.mxu0 %v11227_v38 }
0x1412   :  { %9110 = vmatmul.mubr.msk.f32.gmra.mrb[26].mxu0 %vm499_vm0, %v2596_v18 }
0x1413   :  { %9829 = vmatprep.mubr.msk.f32.mxu0 %vm11228_vm2, %v11227_v38 }
0x14e1   :  { %v2699_v22 = vpop.f32.mrb[24].mxu0 }
0x14e2   :  { %v11885_v23 = vadd.f32 %v2699_v22, %v2620_v20  ;;  %v2701_v24 = vpop.f32.mrb[25].mxu0 }
0x14e3   :  { %v11887_v25 = vadd.f32 %v2701_v24, %v2624_v21 }
0x14e4   :  { %2711 = vrot.lane.b32.xlu0 %v11885_v23, %s11229_s5 }
0x14e5   :  { %v2705_v3 = vpop.f32.mrb[26].mxu0  ;;  %9828 = vmatpush3.msra.mxu0 %v11887_v25 }
0x14e6   :  { %v11892_v26 = vadd.f32 %v2705_v3, %v2620_v20  ;;  %v2707_v28 = vpop.f32.mrb[27].mxu0  ;;  %9837 = vmatprep.subr.mxu0 %v11227_v38 }
0x14e7   :  { %v11895_v29 = vadd.f32 %v2707_v28, %v2624_v21 }
0x14e8   :  { %2788 = vrot.lane.b32.xlu1 %v11892_v26, %s11229_s5 }
0x1556   :  { %v2712_v34 = vpop.permute.xlu0 %2711 }
0x1557   :  { %9818 = vmatpush3.xpose.msk.msra.mxu1 %vm641_vm3, %v2712_v34 }
0x1558   :  { %9822 = vmatprep.subr.mxu1 %v11227_v38 }
0x155a   :  { %v2789_v35 = vpop.permute.xlu1 %2788  ;;  %9820 = vmatmul.mubr.msk.f32.vlgmr.msra.gmra.mrb[30].mxu1 %vm641_vm3, %v11885_v23 }
0x155b   :  { %9823 = vmatpush3.xpose.msk.msra.mxu1 %vm641_vm3, %v2789_v35  ;;  %9824 = vmatprep.mubr.msk.f32.mxu1 %vm11228_vm2, %v11227_v38 }
0x155c   :  { %9832 = vmatprep.subr.mxu1 %v11227_v38 }
0x155e   :  { %9825 = vmatmul.mubr.msk.f32.vlgmr.msra.gmra.mrb[32].mxu1 %vm641_vm3, %v11892_v26 }
0x155f   :  { %9833 = vmatpush3.msra.mxu1 %v11895_v29  ;;  %9834 = vmatprep.mubr.msk.f32.mxu1 %vm11228_vm2, %v11227_v38 }
0x1560   :  { %9842 = vmatprep.subr.mxu1 %v11227_v38 }
0x162d   :  { %v2783_v6 = vpop.f32.mrb[30].mxu1 }
0x162e   :  { %v2864_v36 = vmul.f32 0.25, %v2783_v6  ;;  %v9821_v2 = vpop.f32.mrb[31].mxu1 }
0x1630   :  { %v2866_v30 = vadd.f32 %v2864_v36, %v11608_v33 }
0x1631   :  { %v2860_v7 = vpop.f32.mrb[32].mxu1 }
0x1632   :  { %v2865_v39 = vmul.f32 0.25, %v2860_v7  ;;  %v9826_v41 = vpop.f32.mrb[33].mxu1  ;;  %v2868_v40 = vsel %vm429_vm5, %v2866_v30, -inf }
0x1633   :  { %2869 = vmax.xlane.f32.xlu1 %v2868_v40 }
0x1634   :  { %v2867_v42 = vadd.f32 %v2865_v39, %v11604_v27 }
0x1636   :  { %v2871_v43 = vsel %vm429_vm5, %v2867_v42, -inf }
0x1637   :  { %2872 = vmax.xlane.f32.xlu0 %v2871_v43 }
0x1644   :  { %3116 = vrot.lane.b32.xlu1 %v11892_v26, %s11230_s9 }
0x1648   :  { %3036 = vrot.lane.b32.xlu1 %v11885_v23, %s11231_s3 }
0x16c0   :  { %v2870_v1 = vpop.xlane.xlu1 %2869 }
0x16c1   :  { %v2874_v44 = vsub.f32 %v2866_v30, %v2870_v1 }
0x16c3   :  { %v2876_v45 = vmul.f32 1.442695, %v2874_v44 }
0x16c4   :  { %v2873_v46 = vpop.xlane.xlu0 %2872  ;;  %v3117_v52 = vpop.permute.xlu1 %3116 }
0x16c5   :  { %10792 = vpow2.f32 %v2876_v45  ;;  %v2875_v37 = vsub.f32 %v2867_v42, %v2873_v46 }
0x16c7   :  { %v2878_v47 = vmul.f32 1.442695, %v2875_v37 }
0x16c8   :  { %v3037_v53 = vpop.permute.xlu1 %3036 }
0x16c9   :  { %10794 = vpow2.f32 %v2878_v47 }
0x16cf   :  { %v10793_v48 = vpop.eup %10792 }
0x16d0   :  { %v2880_v49 = vsel %vm429_vm5, %v10793_v48, 0.0 }
0x16d1   :  { %2881 = vadd.xlane.f32.xlu0 %v2880_v49 }
0x16d3   :  { %v10795_v50 = vpop.eup %10794 }
0x16d4   :  { %v2883_v51 = vsel %vm429_vm5, %v10795_v50, 0.0 }
0x16d5   :  { %2884 = vadd.xlane.f32.xlu1 %v2883_v51 }
0x16e6   :  { %3114 = vrot.lane.b32.xlu1 %v11892_v26, %s11231_s3 }
0x16e7   :  { %3038 = vrot.lane.b32.xlu0 %v11885_v23, %s11230_s9 }
0x175e   :  { %v2882_v55 = vpop.xlane.xlu0 %2881 }
0x175f   :  { %10796 = vrcp.f32 %v2882_v55 }
0x1762   :  { %v2885_v14 = vpop.xlane.xlu1 %2884  ;;  %v3039_v58 = vpop.permute.xlu0 %3038 }
0x1763   :  { %10798 = vrcp.f32 %v2885_v14 }
0x1766   :  { %v3115_v61 = vpop.permute.xlu1 %3114 }
0x1769   :  { %v10797_v56 = vpop.eup %10796 }
0x176a   :  { %v2887_v57 = vmul.f32 %v10797_v56, %v10793_v48 }
0x176c   :  { %9830 = vmatmul.mubr.msk.f32.vlgmr.msra.gmra.mrb[28].mxu0 %vm429_vm5, %v2887_v57 }
0x176d   :  { %v10799_v59 = vpop.eup %10798  ;;  %9838 = vmatpush3.xpose.msk.msra.mxu0 %vm641_vm3, %v3039_v58  ;;  %9839 = vmatprep.mubr.msk.f32.mxu0 %vm11228_vm2, %v11227_v38 }
0x176e   :  { %v2889_v5 = vmul.f32 %v10799_v59, %v10795_v50  ;;  %9847 = vmatprep.subr.mxu0 %v11227_v38 }
0x1770   :  { %9835 = vmatmul.mubr.msk.f32.vlgmr.msra.gmra.mrb[34].mxu1 %vm429_vm5, %v2889_v5  ;;  %9840 = vmatmul.mubr.msk.f32.vlgmr.msra.gmra.mrb[30].mxu0 %vm641_vm3, %v3037_v53 }
0x1771   :  { %9843 = vmatpush3.xpose.msk.msra.mxu1 %vm641_vm3, %v3117_v52  ;;  %9844 = vmatprep.mubr.msk.f32.mxu1 %vm11228_vm2, %v11227_v38 }
0x1772   :  { %9852 = vmatprep.subr.mxu1 %v11227_v38  ;;  %9849 = vmatprep.mubr.msk.f32.mxu0 %vm11228_vm2, %v11227_v38 }
0x1774   :  { %9845 = vmatmul.mubr.msk.f32.vlgmr.msra.gmra.mrb[36].mxu1 %vm641_vm3, %v3115_v61 }
0x1775   :  { %9854 = vmatprep.mubr.msk.f32.mxu1 %vm11228_vm2, %v11227_v38 }
0x183f   :  { %v11943_v63 = vpop.f32.mrb[28].mxu0 }
0x1840   :  { %v9831_v0 = vpop.f32.mrb[29].mxu0 }
0x1843   :  { %v11945_v4 = vpop.f32.mrb[34].mxu1  ;;  %v3110_v8 = vpop.f32.mrb[30].mxu0 }
0x1844   :  { %v3192_v9 = vmul.f32 0.25, %v3110_v8  ;;  %v9836_v10 = vpop.f32.mrb[35].mxu1  ;;  %v9841_v11 = vpop.f32.mrb[31].mxu0 }
0x1846   :  { %v3194_v12 = vadd.f32 %v3192_v9, %v11608_v33 }
0x1847   :  { %v3188_v13 = vpop.f32.mrb[36].mxu1 }
0x1848   :  { %v3193_v15 = vmul.f32 0.25, %v3188_v13  ;;  %v9846_v62 = vpop.f32.mrb[37].mxu1  ;;  %v3196_v16 = vsel %vm429_vm5, %v3194_v12, -inf }
0x1849   :  { %3197 = vmax.xlane.f32.xlu0 %v3196_v16 }
0x184a   :  { %v3195_v17 = vadd.f32 %v3193_v15, %v11604_v27 }
0x184c   :  { %v3199_v18 = vsel %vm429_vm5, %v3195_v17, -inf }
0x184d   :  { %3200 = vmax.xlane.f32.xlu1 %v3199_v18 }
0x185e   :  { %3296 = vrot.lane.b32.xlu1 %v11895_v29, %s11231_s3 }
0x185f   :  { %3219 = vrot.lane.b32.xlu0 %v11887_v25, %s11231_s3 }
0x1862   :  { %3374 = vrot.lane.b32.xlu1 %v11885_v23, %s11232_s19 }
0x1866   :  { %3452 = vrot.lane.b32.xlu1 %v11892_v26, %s11232_s19 }
0x186a   :  { %3450 = vrot.lane.b32.xlu1 %v11892_v26, %s11233_s22 }
0x18d6   :  { %v3198_v19 = vpop.xlane.xlu0 %3197 }
0x18d7   :  { %v3202_v20 = vsub.f32 %v3194_v12, %v3198_v19 }
0x18d9   :  { %v3204_v21 = vmul.f32 1.442695, %v3202_v20 }
0x18da   :  { %v3220_v22 = vpop.permute.xlu0 %3219  ;;  %v3201_v24 = vpop.xlane.xlu1 %3200 }
0x18db   :  { %10800 = vpow2.f32 %v3204_v21  ;;  %v3203_v3 = vsub.f32 %v3195_v17, %v3201_v24  ;;  %9848 = vmatpush3.msra.mxu0 %v3220_v22 }
0x18dc   :  { %9857 = vmatprep.subr.mxu0 %v11227_v38 }
0x18dd   :  { %v3206_v28 = vmul.f32 1.442695, %v3203_v3 }
0x18de   :  { %v3297_v34 = vpop.permute.xlu1 %3296 }
0x18df   :  { %10802 = vpow2.f32 %v3206_v28  ;;  %9853 = vmatpush3.msra.mxu1 %v3297_v34 }
0x18e0   :  { %9862 = vmatprep.subr.mxu1 %v11227_v38 }
0x18e2   :  { %v3375_v39 = vpop.permute.xlu1 %3374 }
0x18e5   :  { %v10801_v35 = vpop.eup %10800 }
0x18e6   :  { %v3208_v6 = vsel %vm429_vm5, %v10801_v35, 0.0  ;;  %v3453_v43 = vpop.permute.xlu1 %3452 }
0x18e7   :  { %3209 = vadd.xlane.f32.xlu0 %v3208_v6 }
0x18e9   :  { %v10803_v36 = vpop.eup %10802 }
0x18ea   :  { %v3211_v2 = vsel %vm429_vm5, %v10803_v36, 0.0  ;;  %v3451_v45 = vpop.permute.xlu1 %3450 }
0x18eb   :  { %3212 = vadd.xlane.f32.xlu0 %v3211_v2 }
0x1901   :  { %3372 = vrot.lane.b32.xlu0 %v11885_v23, %s11233_s22 }
0x1974   :  { %v3210_v30 = vpop.xlane.xlu0 %3209 }
0x1975   :  { %10804 = vrcp.f32 %v3210_v30 }
0x1978   :  { %v3213_v7 = vpop.xlane.xlu0 %3212 }
0x1979   :  { %10806 = vrcp.f32 %v3213_v7 }
0x197c   :  { %v3373_v44 = vpop.permute.xlu0 %3372 }
0x197f   :  { %v10805_v41 = vpop.eup %10804 }
0x1980   :  { %v3215_v40 = vmul.f32 %v10805_v41, %v10801_v35 }
0x1982   :  { %9850 = vmatmul.mubr.msk.f32.vlgmr.msra.gmra.mrb[32].mxu0 %vm429_vm5, %v3215_v40 }
0x1983   :  { %v10807_v42 = vpop.eup %10806  ;;  %9858 = vmatpush3.xpose.msk.msra.mxu0 %vm641_vm3, %v3375_v39  ;;  %9859 = vmatprep.mubr.msk.f32.mxu0 %vm11228_vm2, %v11227_v38 }
0x1984   :  { %v3217_v1 = vmul.f32 %v10807_v42, %v10803_v36  ;;  %9867 = vmatprep.subr.mxu0 %v11227_v38 }
0x1986   :  { %9855 = vmatmul.mubr.msk.f32.vlgmr.msra.gmra.mrb[38].mxu1 %vm429_vm5, %v3217_v1  ;;  %9860 = vmatmul.mubr.msk.f32.vlgmr.msra.gmra.mrb[34].mxu0 %vm641_vm3, %v3373_v44 }
0x1987   :  { %9863 = vmatpush3.xpose.msk.msra.mxu1 %vm641_vm3, %v3453_v43  ;;  %9864 = vmatprep.mubr.msk.f32.mxu1 %vm11228_vm2, %v11227_v38 }
0x1988   :  { %9872 = vmatprep.subr.mxu1 %v11227_v38  ;;  %9869 = vmatprep.mubr.msk.f32.mxu0 %vm11228_vm2, %v11227_v38 }
0x198a   :  { %9865 = vmatmul.mubr.msk.f32.vlgmr.msra.gmra.mrb[40].mxu1 %vm641_vm3, %v3451_v45 }
0x198b   :  { %9874 = vmatprep.mubr.msk.f32.mxu1 %vm11228_vm2, %v11227_v38 }
0x1a55   :  { %v11983_v46 = vpop.f32.mrb[32].mxu0 }
0x1a56   :  { %v9851_v37 = vpop.f32.mrb[33].mxu0 }
0x1a59   :  { %v11985_v47 = vpop.f32.mrb[38].mxu1  ;;  %v3446_v48 = vpop.f32.mrb[34].mxu0 }
0x1a5a   :  { %v3528_v49 = vmul.f32 0.25, %v3446_v48  ;;  %v9856_v50 = vpop.f32.mrb[39].mxu1  ;;  %v9861_v51 = vpop.f32.mrb[35].mxu0 }
0x1a5c   :  { %v3530_v52 = vadd.f32 %v3528_v49, %v11608_v33 }
0x1a5d   :  { %v3524_v53 = vpop.f32.mrb[40].mxu1 }
0x1a5e   :  { %v3529_v55 = vmul.f32 0.25, %v3524_v53  ;;  %v9866_v14 = vpop.f32.mrb[41].mxu1  ;;  %v3532_v56 = vsel %vm429_vm5, %v3530_v52, -inf }
0x1a5f   :  { %3533 = vmax.xlane.f32.xlu0 %v3532_v56 }
0x1a60   :  { %v3531_v57 = vadd.f32 %v3529_v55, %v11604_v27 }
0x1a62   :  { %v3535_v58 = vsel %vm429_vm5, %v3531_v57, -inf }
0x1a63   :  { %3536 = vmax.xlane.f32.xlu1 %v3535_v58 }
0x1a74   :  { %3630 = vrot.lane.b32.xlu1 %v11895_v29, %s11233_s22 }
0x1a75   :  { %3554 = vrot.lane.b32.xlu0 %v11887_v25, %s11233_s22 }
0x1a78   :  { %3708 = vrot.lane.b32.xlu1 %v11885_v23, %s11234_s0 }
0x1a7c   :  { %3786 = vrot.lane.b32.xlu1 %v11892_v26, %s11234_s0 }
0x1a80   :  { %3784 = vrot.lane.b32.xlu1 %v11892_v26, %s11235_s4 }
0x1aec   :  { %v3534_v59 = vpop.xlane.xlu0 %3533 }
0x1aed   :  { %v3538_v5 = vsub.f32 %v3530_v52, %v3534_v59  ;;  %v4071_v59 = vld [vmem:[#allocation3 + $0x40] sm:$0xff] }
0x1aef   :  { %v3540_v61 = vmul.f32 1.442695, %v3538_v5  ;;  %v4073_v5 = vld [vmem:[#allocation3 + $0x50] sm:$0xff] }
0x1af0   :  { %v3555_v0 = vpop.permute.xlu0 %3554  ;;  %v3537_v8 = vpop.xlane.xlu1 %3536 }
0x1af1   :  { %10808 = vpow2.f32 %v3540_v61  ;;  %v3539_v9 = vsub.f32 %v3531_v57, %v3537_v8  ;;  %9868 = vmatpush3.msra.mxu0 %v3555_v0  ;;  %v4074_v0 = vld [vmem:[#allocation3 + $0x58] sm:$0xff] }
0x1af2   :  { %9877 = vmatprep.subr.mxu0 %v11227_v38  ;;  %v10424_v8 = vpack.c.bf16 %v4074_v0, %v4073_v5  ;;  %v9149_v0 = vld [vmem:[%s12684_s14 + $0xd0] sm:$0xff] }
0x1af3   :  { %v3542_v10 = vmul.f32 1.442695, %v3539_v9  ;;  %v4075_v9 = vld [vmem:[#allocation3 + $0x60] sm:$0xff] }
0x1af4   :  { %v3631_v11 = vpop.permute.xlu1 %3630 }
0x1af5   :  { %10810 = vpow2.f32 %v3542_v10  ;;  %9873 = vmatpush3.msra.mxu1 %v3631_v11  ;;  %v4076_v10 = vld [vmem:[#allocation3 + $0x68] sm:$0xff] }
0x1af6   :  { %9882 = vmatprep.subr.mxu1 %v11227_v38  ;;  %v10428_v11 = vpack.c.bf16 %v4076_v10, %v4075_v9  ;;  %v9154_v10 = vld [vmem:[%s12684_s14 + $0xf8] sm:$0xff] }
0x1af8   :  { %v3709_v17 = vpop.permute.xlu1 %3708 }
0x1afb   :  { %v10809_v12 = vpop.eup %10808 }
0x1afc   :  { %v3544_v13 = vsel %vm429_vm5, %v10809_v12, 0.0  ;;  %v3787_v21 = vpop.permute.xlu1 %3786 }
0x1afd   :  { %3545 = vadd.xlane.f32.xlu0 %v3544_v13  ;;  %v4078_v13 = vld [vmem:[#allocation3 + $0x78] sm:$0xff] }
0x1aff   :  { %v10811_v26 = vpop.eup %10810 }
0x1b00   :  { %v3547_v15 = vsel %vm429_vm5, %v10811_v26, 0.0  ;;  %v3785_v24 = vpop.permute.xlu1 %3784 }
0x1b01   :  { %3548 = vadd.xlane.f32.xlu0 %v3547_v15 }
0x1b17   :  { %3706 = vrot.lane.b32.xlu0 %v11885_v23, %s11235_s4 }
0x1b8a   :  { %v3546_v62 = vpop.xlane.xlu0 %3545 }
0x1b8b   :  { %10812 = vrcp.f32 %v3546_v62 }
0x1b8e   :  { %v3549_v16 = vpop.xlane.xlu0 %3548 }
0x1b8f   :  { %10814 = vrcp.f32 %v3549_v16 }
0x1b92   :  { %v3707_v23 = vpop.permute.xlu0 %3706 }
0x1b95   :  { %v10813_v18 = vpop.eup %10812 }
0x1b96   :  { %v3551_v19 = vmul.f32 %v10813_v18, %v10809_v12  ;;  %v4077_v12 = vld [vmem:[#allocation3 + $0x70] sm:$0xff] }
0x1b98   :  { %9870 = vmatmul.mubr.msk.f32.vlgmr.msra.gmra.mrb[36].mxu0 %vm429_vm5, %v3551_v19 }
0x1b99   :  { %v10815_v20 = vpop.eup %10814  ;;  %9878 = vmatpush3.xpose.msk.msra.mxu0 %vm641_vm3, %v3709_v17  ;;  %9879 = vmatprep.mubr.msk.f32.mxu0 %vm11228_vm2, %v11227_v38 }
0x1b9a   :  { %v3553_v22 = vmul.f32 %v10815_v20, %v10811_v26  ;;  %9887 = vmatprep.subr.mxu0 %v11227_v38  ;;  %v10432_v26 = vpack.c.bf16 %v4078_v13, %v4077_v12  ;;  %v9153_v12 = vld [vmem:[%s12684_s14 + $0xf0] sm:$0xff] }
0x1b9c   :  { %9875 = vmatmul.mubr.msk.f32.vlgmr.msra.gmra.mrb[42].mxu1 %vm429_vm5, %v3553_v22  ;;  %9880 = vmatmul.mubr.msk.f32.vlgmr.msra.gmra.mrb[38].mxu0 %vm641_vm3, %v3707_v23 }
0x1b9d   :  { %9883 = vmatpush3.xpose.msk.msra.mxu1 %vm641_vm3, %v3787_v21  ;;  %9884 = vmatprep.mubr.msk.f32.mxu1 %vm11228_vm2, %v11227_v38 }
0x1b9e   :  { %9892 = vmatprep.subr.mxu1 %v11227_v38  ;;  %9889 = vmatprep.mubr.msk.f32.mxu0 %vm11228_vm2, %v11227_v38 }
0x1ba0   :  { %9885 = vmatmul.mubr.msk.f32.vlgmr.msra.gmra.mrb[44].mxu1 %vm641_vm3, %v3785_v24 }
0x1ba1   :  { %9894 = vmatprep.mubr.msk.f32.mxu1 %vm11228_vm2, %v11227_v38 }
0x1c6b   :  { %v3626_v3 = vpop.f32.mrb[36].mxu0 }
0x1c6c   :  { %v9871_v28 = vpop.f32.mrb[37].mxu0 }
0x1c6f   :  { %v3702_v34 = vpop.f32.mrb[42].mxu1  ;;  %v3780_v35 = vpop.f32.mrb[38].mxu0 }
0x1c70   :  { %v3862_v6 = vmul.f32 0.25, %v3780_v35  ;;  %v9876_v36 = vpop.f32.mrb[43].mxu1  ;;  %v9881_v2 = vpop.f32.mrb[39].mxu0 }
0x1c71   :  { %v9136_v36 = vld [vmem:[%s12683_s1 + $0x1] ss:$0 sm:$0xff]  ;;  %s12696_s1 = sld [smem:[#allocation38_spill]] }
0x1c72   :  { %v3864_v30 = vadd.f32 %v3862_v6, %v11608_v33 }
0x1c73   :  { %v3858_v7 = vpop.f32.mrb[44].mxu1 }
0x1c74   :  { %v3863_v39 = vmul.f32 0.25, %v3858_v7  ;;  %v9886_v41 = vpop.f32.mrb[45].mxu1  ;;  %v3866_v40 = vsel %vm429_vm5, %v3864_v30, -inf }
0x1c75   :  { %3867 = vmax.xlane.f32.xlu0 %v3866_v40 }
0x1c76   :  { %v3865_v42 = vadd.f32 %v3863_v39, %v11604_v27 }
0x1c78   :  { %v3869_v43 = vsel %vm429_vm5, %v3865_v42, -inf }
0x1c79   :  { %3870 = vmax.xlane.f32.xlu1 %v3869_v43 }
0x1c8a   :  { %3964 = vrot.lane.b32.xlu1 %v11895_v29, %s11235_s4 }
0x1c8e   :  { %4042 = vrot.lane.b32.xlu1 %v11983_v46, %s11234_s0 }
0x1c92   :  { %4044 = vrot.lane.b32.xlu1 %v11985_v47, %s11234_s0 }
0x1c96   :  { %4052 = vrot.lane.b32.xlu1 %v3702_v34, %s11232_s19 }
0x1d02   :  { %v3868_v1 = vpop.xlane.xlu0 %3867 }
0x1d03   :  { %v3872_v44 = vsub.f32 %v3864_v30, %v3868_v1 }
0x1d05   :  { %v3874_v45 = vmul.f32 1.442695, %v3872_v44 }
0x1d06   :  { %v3871_v37 = vpop.xlane.xlu1 %3870 }
0x1d07   :  { %10816 = vpow2.f32 %v3874_v45  ;;  %v3873_v48 = vsub.f32 %v3865_v42, %v3871_v37 }
0x1d09   :  { %v3876_v49 = vmul.f32 1.442695, %v3873_v48 }
0x1d0a   :  { %v3965_v50 = vpop.permute.xlu1 %3964 }
0x1d0b   :  { %10818 = vpow2.f32 %v3876_v49  ;;  %9893 = vmatpush3.msra.mxu1 %v3965_v50  ;;  %v9140_v50 = vld [vmem:[%s12684_s14 + $0x88] sm:$0xff] }
0x1d0e   :  { %v4043_v18 = vpop.permute.xlu1 %4042 }
0x1d0f   :  { %v4064_v21 = vsel %vm641_vm3, %v11943_v63, %v4043_v18  ;;  %v9159_v18 = vld [vmem:[%s12685_s28 + $0x108] sm:$0xff] }
0x1d11   :  { %v10817_v51 = vpop.eup %10816 }
0x1d12   :  { %v3878_v29 = vsel %vm429_vm5, %v10817_v51, 0.0  ;;  %v4045_v19 = vpop.permute.xlu1 %4044 }
0x1d13   :  { %3879 = vadd.xlane.f32.xlu0 %v3878_v29  ;;  %v4065_v28 = vsel %vm641_vm3, %v11945_v4, %v4045_v19  ;;  %v9176_v19 = vld [vmem:[%s12685_s28 + $0x190] sm:$0xff] }
0x1d15   :  { %v10819_v46 = vpop.eup %10818 }
0x1d16   :  { %v3881_v52 = vsel %vm429_vm5, %v10819_v46, 0.0  ;;  %v4053_v22 = vpop.permute.xlu1 %4052 }
0x1d17   :  { %3882 = vadd.xlane.f32.xlu0 %v3881_v52  ;;  %v4067_v34 = vsel %vm1995_vm10, %v4065_v28, %v4053_v22  ;;  %v9141_v52 = vld [vmem:[%s12684_s14 + $0x90] sm:$0xff]  ;;  %v9179_v28 = vld [vmem:[%s12685_s28 + $0x1a8] sm:$0xff] }
0x1d2d   :  { %3888 = vrot.lane.b32.xlu0 %v11887_v25, %s11235_s4  ;;  %v4072_v25 = vld [vmem:[#allocation3 + $0x48] sm:$0xff] }
0x1d2e   :  { %v10420_v61 = vpack.c.bf16 %v4072_v25, %v4071_v59  ;;  %v9148_v59 = vld [vmem:[%s12684_s14 + $0xc8] sm:$0xff]  ;;  %v9150_v25 = vld [vmem:[%s12684_s14 + $0xd8] sm:$0xff] }
0x1d2f   :  { %v10444_v5 = vpack.c.bf16 %v9150_v25, %v9148_v59  ;;  %v9186_v25 = vld [vmem:[%s12685_s28 + $0x1e0] sm:$0xff] }
0x1d31   :  { %4050 = vrot.lane.b32.xlu0 %v3626_v3, %s11232_s19  ;;  %s12695_s19 = sld [smem:[#allocation36_spill]] }
0x1da0   :  { %v3880_v47 = vpop.xlane.xlu0 %3879 }
0x1da1   :  { %10820 = vrcp.f32 %v3880_v47 }
0x1da4   :  { %v3883_v53 = vpop.xlane.xlu0 %3882 }
0x1da5   :  { %10822 = vrcp.f32 %v3883_v53  ;;  %v9144_v53 = vld [vmem:[%s12684_s14 + $0xa8] sm:$0xff] }
0x1da8   :  { %v3889_v55 = vpop.permute.xlu0 %3888 }
0x1da9   :  { %9888 = vmatpush3.msra.mxu0 %v3889_v55  ;;  %v9146_v55 = vld [vmem:[%s12684_s14 + $0xb8] sm:$0xff] }
0x1daa   :  { %10421 = vmatprep.subr.bf16.mxu0 %v10420_v61 }
0x1dab   :  { %v10821_v14 = vpop.eup %10820 }
0x1dac   :  { %v3885_v56 = vmul.f32 %v10821_v14, %v10817_v51  ;;  %v4051_v20 = vpop.permute.xlu0 %4050  ;;  %v9142_v51 = vld [vmem:[%s12684_s14 + $0x98] sm:$0xff]  ;;  %v10440_v14 = vpack.c.bf16 %v9146_v55, %v9144_v53  ;;  %v9184_v55 = vld [vmem:[%s12685_s28 + $0x1d0] sm:$0xff] }
0x1dad   :  { %v4066_v23 = vsel %vm1995_vm10, %v4064_v21, %v4051_v20  ;;  %v10436_v29 = vpack.c.bf16 %v9142_v51, %v9140_v50  ;;  %v9177_v20 = vld [vmem:[%s12685_s28 + $0x198] sm:$0xff]  ;;  %v9164_v50 = vld [vmem:[%s12685_s28 + $0x130] sm:$0xff] }
0x1dae   :  { %9890 = vmatmul.mubr.msk.f32.vlgmr.msra.gmra.mrb[40].mxu0 %vm429_vm5, %v3885_v56  ;;  %v9143_v56 = vld [vmem:[%s12684_s14 + $0xa0] sm:$0xff]  ;;  %v10456_v22 = vpack.c.bf16 %v9177_v20, %v9176_v19  ;;  %v9165_v51 = vld [vmem:[%s12685_s28 + $0x138] sm:$0xff] }
0x1daf   :  { %v10823_v57 = vpop.eup %10822  ;;  %10423 = vmatpush3.bf16.msra.mxu0 %v10420_v61  ;;  %10437 = vmatprep.subr.bf16.mxu1 %v10436_v29  ;;  %v9147_v61 = vld [vmem:[%s12684_s14 + $0xc0] sm:$0xff]  ;;  %v9195_v19 = vld [vmem:[%s12686_s30 + $0x58] sm:$0xff] }
0x1db0   :  { %v3887_v58 = vmul.f32 %v10823_v57, %v10819_v46  ;;  %10425 = vmatprep.subr.bf16.mxu0 %v10424_v8  ;;  %v9139_v46 = vld [vmem:[%s12684_s14 + $0x80] sm:$0xff]  ;;  %v9145_v57 = vld [vmem:[%s12684_s14 + $0xb0] sm:$0xff]  ;;  %v10446_v9 = vpack.c.bf16 %v9149_v0, %v9147_v61 }
0x1db1   :  { %v10438_v47 = vpack.c.bf16 %v9141_v52, %v9139_v46  ;;  %v9182_v29 = vld [vmem:[%s12685_s28 + $0x1c0] sm:$0xff]  ;;  %v9183_v46 = vld [vmem:[%s12685_s28 + $0x1c8] sm:$0xff] }
0x1db2   :  { %9895 = vmatmul.mubr.msk.f32.vlgmr.msra.gmra.mrb[46].mxu1 %vm429_vm5, %v3887_v58  ;;  %v10442_v58 = vpack.c.bf16 %v9145_v57, %v9143_v56  ;;  %v10468_v52 = vpack.c.bf16 %v9183_v46, %v9182_v29  ;;  %v9168_v57 = vld [vmem:[%s12685_s28 + $0x150] sm:$0xff]  ;;  %v9170_v0 = vld [vmem:[%s12685_s28 + $0x160] sm:$0xff] }
0x1db3   :  { %4296 = vmatprep.mubr.f32.mxu1 %v11227_v38  ;;  %10427 = vmatpush3.bf16.msra.mxu0 %v10424_v8  ;;  %v9152_v8 = vld [vmem:[%s12684_s14 + $0xe8] sm:$0xff] }
0x1db4   :  { %10429 = vmatprep.subr.bf16.mxu0 %v10428_v11  ;;  %10439 = vmatpush1.bf16.msra.mxu1 %v10438_v47  ;;  %v10448_v13 = vpack.c.bf16 %v9154_v10, %v9152_v8  ;;  %v9167_v47 = vld [vmem:[%s12685_s28 + $0x148] sm:$0xff]  ;;  %v9188_v10 = vld [vmem:[%s12685_s28 + $0x1f0] sm:$0xff] }
0x1db5   :  { %10441 = vmatprep.subr.bf16.mxu1 %v10440_v14  ;;  %v9185_v14 = vld [vmem:[%s12685_s28 + $0x1d8] sm:$0xff]  ;;  %v9171_v8 = vld [vmem:[%s12685_s28 + $0x168] sm:$0xff] }
0x1db6   :  { %v10472_v56 = vpack.c.bf16 %v9185_v14, %v9184_v55  ;;  %v9199_v55 = vld [vmem:[%s12686_s30 + $0x78] sm:$0xff] }
0x1db7   :  { %10431 = vmatpush3.bf16.msra.mxu0 %v10428_v11  ;;  %v9151_v11 = vld [vmem:[%s12684_s14 + $0xe0] sm:$0xff]  ;;  %s12697_s14 = sld [smem:[#allocation39_spill]] }
0x1db8   :  { %10433 = vmatprep.subr.bf16.mxu0 %v10432_v26  ;;  %10443 = vmatpush1.bf16.msra.mxu1 %v10442_v58  ;;  %v9169_v58 = vld [vmem:[%s12685_s28 + $0x158] sm:$0xff] }
0x1db9   :  { %10445 = vmatprep.subr.bf16.mxu1 %v10444_v5  ;;  %v10474_v59 = vpack.c.bf16 %v9169_v58, %v9168_v57  ;;  %v9187_v5 = vld [vmem:[%s12685_s28 + $0x1e8] sm:$0xff]  ;;  %v9191_v57 = vld [vmem:[%s12688_s21 + $0x1] ss:$0 sm:$0xff] }
0x1dba   :  { %v10476_v61 = vpack.c.bf16 %v9187_v5, %v9186_v25 }
0x1dbb   :  { %10435 = vmatpush3.bf16.msra.mxu0 %v10432_v26  ;;  %v10450_v26 = vpack.c.bf16 %v9153_v12, %v9151_v11  ;;  %v9189_v11 = vld [vmem:[%s12685_s28 + $0x1f8] sm:$0xff] }
0x1dbc   :  { %10447 = vmatpush1.bf16.msra.mxu1 %v10446_v9  ;;  %v10478_v9 = vpack.c.bf16 %v9171_v8, %v9170_v0  ;;  %v10480_v12 = vpack.c.bf16 %v9189_v11, %v9188_v10  ;;  %v4555_v10 = vld [vmem:[#allocation6 + $0x18] sm:$0xff] }
0x1dbd   :  { %10449 = vmatprep.subr.bf16.mxu1 %v10448_v13  ;;  %v9172_v13 = vld [vmem:[%s12685_s28 + $0x170] sm:$0xff] }
0x1dc0   :  { %10451 = vmatpush1.bf16.msra.mxu1 %v10450_v26  ;;  %v9173_v26 = vld [vmem:[%s12685_s28 + $0x178] sm:$0xff] }
0x1e81   :  { %v3960_v15 = vpop.f32.mrb[40].mxu0 }
0x1e82   :  { %4058 = vrot.lane.b32.xlu0 %v3960_v15, %s11230_s9  ;;  %v9891_v62 = vpop.f32.mrb[41].mxu0  ;;  %v9174_v15 = vld [vmem:[%s12685_s28 + $0x180] sm:$0xff] }
0x1e83   :  { %v9175_v62 = vld [vmem:[%s12685_s28 + $0x188] sm:$0xff] }
0x1e85   :  { %v4036_v16 = vpop.f32.mrb[46].mxu1 }
0x1e86   :  { %4060 = vrot.lane.b32.xlu1 %v4036_v16, %s11230_s9  ;;  %v9896_v17 = vpop.f32.mrb[47].mxu1  ;;  %v9158_v16 = vld [vmem:[%s12685_s28 + $0x100] sm:$0xff] }
0x1e87   :  { %v10452_v17 = vpack.c.bf16 %v9175_v62, %v9174_v15  ;;  %v10454_v21 = vpack.c.bf16 %v9159_v18, %v9158_v16  ;;  %v10482_v15 = vpack.c.bf16 %v9173_v26, %v9172_v13  ;;  %v9192_v62 = vld [vmem:[%s12686_s30 + $0x40] sm:$0xff]  ;;  %v9193_v16 = vld [vmem:[%s12686_s30 + $0x48] sm:$0xff] }
0x1e88   :  { %v10484_v18 = vpack.c.bf16 %v9193_v16, %v9192_v62  ;;  %v4650_v13 = vld [vmem:[%s12691_s13 + $0x8] sm:$0xff] }
0x1e89   :  { %10453 = vmatprep.subr.bf16.mxu0 %v10452_v17  ;;  %v9194_v17 = vld [vmem:[%s12686_s30 + $0x50] sm:$0xff] }
0x1e8a   :  { %v10488_v20 = vpack.c.bf16 %v9195_v19, %v9194_v17  ;;  %10485 = vmatprep.subr.bf16.mxu1 %v10484_v18 }
0x1ef4   :  { %v4059_v24 = vpop.permute.xlu0 %4058 }
0x1ef5   :  { %v4068_v3 = vsel %vm1998_vm11, %v4066_v23, %v4059_v24  ;;  %v9160_v23 = vld [vmem:[%s12685_s28 + $0x110] sm:$0xff]  ;;  %v9161_v24 = vld [vmem:[%s12685_s28 + $0x118] sm:$0xff] }
0x1ef6   :  { %9913 = vmatprep.mubr.msk.f32.mxu0 %vm499_vm0, %v4068_v3  ;;  %v9178_v3 = vld [vmem:[%s12685_s28 + $0x1a0] sm:$0xff] }
0x1ef8   :  { %v4061_v35 = vpop.permute.xlu1 %4060 }
0x1ef9   :  { %v4069_v6 = vsel %vm1998_vm11, %v4067_v34, %v4061_v35  ;;  %v10458_v34 = vpack.c.bf16 %v9161_v24, %v9160_v23  ;;  %v10460_v35 = vpack.c.bf16 %v9179_v28, %v9178_v3 }
0x1efa   :  { %9914 = vmatmul.mubr.msk.f32.vlgmr.msra.gmra.mrb[42].mxu0 %vm499_vm0, %v4069_v6  ;;  %v9162_v6 = vld [vmem:[%s12685_s28 + $0x120] sm:$0xff] }
0x1efb   :  { %10455 = vmatpush3.bf16.msra.mxu0 %v10454_v21  ;;  %v9155_v21 = vld [vmem:[%s12687_s2 + $0x2] sm:$0x3] }
0x1efc   :  { %10457 = vmatprep.subr.bf16.mxu0 %v10456_v22  ;;  %v4219_v22 = vrot.slane %v9155_v21, %v11564_v54  ;;  %v4223_v23 = vrot.slane %v9155_v21, %v11568_v60 }
0x1eff   :  { %10459 = vmatpush3.bf16.msra.mxu0 %v10458_v34 }
0x1f00   :  { %10461 = vmatprep.subr.bf16.mxu0 %v10460_v35 }
0x1fcd   :  { %v9915_v63 = vpop.f32.mrb[42].mxu0 }
0x1fce   :  { %v4165_v2 = vadd.f32 %v9915_v63, %v9136_v36  ;;  %v4159_v30 = vpop.f32.mrb[43].mxu0 }
0x1fcf   :  { %v4160_v7 = vadd.f32 %v9136_v36, %v4159_v30  ;;  %v9163_v36 = vld [vmem:[%s12685_s28 + $0x128] sm:$0xff] }
0x1fd0   :  { %v12056_v39 = vadd.f32 %v4165_v2, %v11848_v31  ;;  %v10462_v63 = vpack.c.bf16 %v9163_v36, %v9162_v6 }
0x1fd1   :  { %v12059_v41 = vadd.f32 %v4160_v7, %v11850_v32 }
0x1fd2   :  { %v4173_v4 = vsel %vm499_vm0, %v12056_v39, 0.0  ;;  %10463 = vmatpush3.bf16.msra.mxu0 %v10462_v63 }
0x1fd3   :  { %4174 = vadd.xlane.f32.xlu1 %v4173_v4  ;;  %v4170_v40 = vsel %vm499_vm0, %v12059_v41, 0.0 }
0x1fd4   :  { %4171 = vadd.xlane.f32.xlu0 %v4170_v40 }
0x2060   :  { %v4175_v42 = vpop.xlane.xlu1 %4174 }
0x2061   :  { %v4177_v43 = vmul.f32 0.015625, %v4175_v42  ;;  %v4172_v1 = vpop.xlane.xlu0 %4171 }
0x2062   :  { %v4176_v31 = vmul.f32 0.015625, %v4172_v1 }
0x2063   :  { %v12066_v44 = vsub.f32 %v12056_v39, %v4177_v43 }
0x2064   :  { %v12069_v32 = vsub.f32 %v12059_v41, %v4176_v31 }
0x2065   :  { %v4181_v48 = vmul.f32 %v12066_v44, %v12066_v44 }
0x2066   :  { %v4180_v45 = vmul.f32 %v12069_v32, %v12069_v32 }
0x2067   :  { %v4185_v49 = vsel %vm499_vm0, %v4181_v48, 0.0  ;;  %v9181_v48 = vld [vmem:[%s12685_s28 + $0x1b8] sm:$0xff] }
0x2068   :  { %v4182_v37 = vsel %vm499_vm0, %v4180_v45, 0.0 }
0x2069   :  { %4183 = vadd.xlane.f32.xlu0 %v4182_v37  ;;  %v9180_v37 = vld [vmem:[%s12685_s28 + $0x1b0] sm:$0xff] }
0x206d   :  { %4186 = vadd.xlane.f32.xlu0 %v4185_v49  ;;  %v10464_v49 = vpack.c.bf16 %v9181_v48, %v9180_v37 }
0x206f   :  { %10465 = vmatprep.subr.bf16.mxu0 %v10464_v49 }
0x20f6   :  { %v4184_v2 = vpop.xlane.xlu0 %4183 }
0x20f7   :  { %v4188_v30 = vmul.f32 0.015625, %v4184_v2 }
0x20f9   :  { %v4190_v7 = vadd.f32 1e-05, %v4188_v30 }
0x20fa   :  { %v4187_v4 = vpop.xlane.xlu0 %4186 }
0x20fb   :  { %10824 = vrsqrt.f32 %v4190_v7  ;;  %v4189_v40 = vmul.f32 0.015625, %v4187_v4 }
0x20fd   :  { %v4191_v42 = vadd.f32 1e-05, %v4189_v40 }
0x20ff   :  { %10826 = vrsqrt.f32 %v4191_v42 }
0x2105   :  { %v10825_v43 = vpop.eup %10824 }
0x2106   :  { %v4194_v1 = vmul.f32 %v10825_v43, %v12069_v32  ;;  %v10466_v32 = vpack.c.bf16 %v9165_v51, %v9164_v50 }
0x2108   :  { %9156 = vmatmul.mubr.msk.f32.vlgmr.msra.gmra.mrb[48].mxu1 %vm499_vm0, %v4194_v1  ;;  %10467 = vmatpush3.bf16.msra.mxu0 %v10466_v32 }
0x2109   :  { %v10827_v31 = vpop.eup %10826  ;;  %4302 = vmatprep.mubr.f32.mxu1 %v11227_v38  ;;  %10469 = vmatprep.subr.bf16.mxu0 %v10468_v52  ;;  %v9196_v52 = vld [vmem:[%s12686_s30 + $0x60] sm:$0xff] }
0x210a   :  { %v4195_v45 = vmul.f32 %v10827_v31, %v12066_v44  ;;  %v9166_v44 = vld [vmem:[%s12685_s28 + $0x140] sm:$0xff]  ;;  %10487 = vmatpush3.bf16.msra.mxu1 %v10484_v18  ;;  %s12698_s28 = sld [smem:[#allocation40_spill]] }
0x210b   :  { %v10470_v53 = vpack.c.bf16 %v9167_v47, %v9166_v44  ;;  %10489 = vmatprep.subr.bf16.mxu1 %v10488_v20  ;;  %v9197_v44 = vld [vmem:[%s12686_s30 + $0x68] sm:$0xff] }
0x210c   :  { %9157 = vmatmul.mubr.msk.f32.gmra.mrb[50].mxu1 %vm499_vm0, %v4195_v45  ;;  %v10492_v47 = vpack.c.bf16 %v9197_v44, %v9196_v52 }
0x210d   :  { %10471 = vmatpush3.bf16.msra.mxu0 %v10470_v53  ;;  %v9198_v53 = vld [vmem:[%s12686_s30 + $0x70] sm:$0xff] }
0x210e   :  { %10473 = vmatprep.subr.bf16.mxu0 %v10472_v56  ;;  %10491 = vmatpush3.bf16.msra.mxu1 %v10488_v20  ;;  %v10496_v14 = vpack.c.bf16 %v9199_v55, %v9198_v53 }
0x210f   :  { %10493 = vmatprep.subr.bf16.mxu1 %v10492_v47 }
0x2111   :  { %10475 = vmatpush3.bf16.msra.mxu0 %v10474_v59 }
0x2112   :  { %10477 = vmatprep.subr.bf16.mxu0 %v10476_v61  ;;  %10495 = vmatpush3.bf16.msra.mxu1 %v10492_v47 }
0x2113   :  { %10497 = vmatprep.subr.bf16.mxu1 %v10496_v14 }
0x2115   :  { %10479 = vmatpush3.bf16.msra.mxu0 %v10478_v9  ;;  %v4554_v9 = vld [vmem:[#allocation6 + $0x10] sm:$0xff] }
0x2116   :  { %10481 = vmatprep.subr.bf16.mxu0 %v10480_v12  ;;  %10499 = vmatpush3.bf16.msra.mxu1 %v10496_v14  ;;  %v10500_v11 = vpack.c.bf16 %v4555_v10, %v4554_v9  ;;  %v4649_v12 = vld [vmem:[%s12691_s13] sm:$0xff] }
0x2117   :  { %v10504_v26 = vpack.c.bf16 %v4650_v13, %v4649_v12 }
0x2118   :  { %10501 = vmatprep.subr.bf16.mxu1 %v10500_v11 }
0x2119   :  { %10483 = vmatpush3.bf16.msra.mxu0 %v10482_v15  ;;  %v9201_v15 = vld [vmem:[%s12689_s10 + $0x1] ss:$0 sm:$0xff] }
0x21db   :  { %v4298_v24 = vpop.f32.mrb[48].mxu1 }
0x21dc   :  { %v4299_v3 = vadd.f32 %v4298_v24, %v4219_v22  ;;  %v4300_v28 = vpop.f32.mrb[49].mxu1 }
0x21dd   :  { %v4301_v34 = vadd.f32 %v4300_v28, %v4223_v23  ;;  %v4651_v28 = vld [vmem:[%s12691_s13 + $0x10] sm:$0xff] }
0x21de   :  { %v4313_v35 = vmul.f32 0.70710677, %v4299_v3  ;;  %v4309_v1 = vmul.f32 0.5, %v4299_v3 }
0x21df   :  { %v4314_v6 = vmul.f32 0.70710677, %v4301_v34  ;;  %v4304_v36 = vpop.f32.mrb[50].mxu1  ;;  %v4310_v60 = vmul.f32 0.5, %v4301_v34  ;;  %v4652_v34 = vld [vmem:[%s12691_s13 + $0x18] sm:$0xff] }
0x21e0   :  { %10828 = verf.f32 %v4313_v35  ;;  %v4305_v63 = vadd.f32 %v4304_v36, %v4219_v22  ;;  %v4306_v2 = vpop.f32.mrb[51].mxu1 }
0x21e1   :  { %10830 = verf.f32 %v4314_v6  ;;  %v4307_v30 = vadd.f32 %v4306_v2, %v4223_v23  ;;  %v4653_v2 = vld [vmem:[%s12691_s13 + $0x20] sm:$0xff] }
0x21e2   :  { %v4315_v7 = vmul.f32 0.70710677, %v4305_v63  ;;  %v4311_v32 = vmul.f32 0.5, %v4305_v63  ;;  %v10508_v63 = vpack.c.bf16 %v4652_v34, %v4651_v28 }
0x21e3   :  { %v4316_v4 = vmul.f32 0.70710677, %v4307_v30  ;;  %v4312_v50 = vmul.f32 0.5, %v4307_v30  ;;  %v4654_v30 = vld [vmem:[%s12691_s13 + $0x28] sm:$0xff] }
0x21e4   :  { %10832 = verf.f32 %v4315_v7  ;;  %v10512_v7 = vpack.c.bf16 %v4654_v30, %v4653_v2 }
0x21e5   :  { %10834 = verf.f32 %v4316_v4  ;;  %v4655_v4 = vld [vmem:[%s12691_s13 + $0x30] sm:$0xff] }
0x21ea   :  { %v10829_v40 = vpop.eup %10828 }
0x21eb   :  { %v10831_v54 = vpop.eup %10830  ;;  %v4321_v42 = vadd.f32 1.0, %v10829_v40  ;;  %v4656_v40 = vld [vmem:[%s12691_s13 + $0x38] sm:$0xff] }
0x21ec   :  { %v4322_v43 = vadd.f32 1.0, %v10831_v54  ;;  %v10516_v54 = vpack.c.bf16 %v4656_v40, %v4655_v4 }
0x21ed   :  { %v4325_v48 = vmul.f32 %v4321_v42, %v4309_v1  ;;  %v9205_v42 = vld [vmem:[%s12690_s7 + $0x1] ss:$0 sm:$0xff] }
0x21ee   :  { %v10833_v31 = vpop.eup %10832  ;;  %v4326_v45 = vmul.f32 %v4322_v43, %v4310_v60 }
0x21ef   :  { %v10835_v37 = vpop.eup %10834  ;;  %v4323_v49 = vadd.f32 1.0, %v10833_v31 }
0x21f0   :  { %v4324_v51 = vadd.f32 1.0, %v10835_v37  ;;  %4434 = vmatprep.mubr.f32.mxu0 %v4326_v45 }
0x21f1   :  { %4435 = vmatmul.mubr.f32.vlgmr.msra.gmra.mrb[44].mxu0 %v4325_v48  ;;  %v4327_v46 = vmul.f32 %v4323_v49, %v4311_v32 }
0x21f2   :  { %v4328_v29 = vmul.f32 %v4324_v51, %v4312_v50  ;;  %v9208_v50 = vld [vmem:[#allocation8] ss:$0 sm:$0xff] }
0x21f4   :  { %4439 = vmatprep.mubr.f32.mxu0 %v4328_v29 }
0x21f5   :  { %4440 = vmatmul.mubr.f32.gmra.mrb[46].mxu0 %v4327_v46 }
0x22c4   :  { %v9491_v56 = vpop.f32.mrb[44].mxu0 }
0x22c5   :  { %v9492_v58 = vpop.f32.mrb[45].mxu0 }
0x22c6   :  { %v9493_v59 = vadd.f32 %v9492_v58, %v9491_v56 }
0x22c8   :  { %v4437_v25 = vadd.f32 %v9493_v59, %v9191_v57  ;;  %v9494_v5 = vpop.f32.mrb[46].mxu0 }
0x22c9   :  { %v9495_v61 = vpop.f32.mrb[47].mxu0 }
0x22ca   :  { %v9496_v0 = vadd.f32 %v9495_v61, %v9494_v5  ;;  %9932 = vmatprep.mubr.msk.f32.mxu1 %vm499_vm0, %v4437_v25  ;;  %v4645_v37 = vadd.f32 %v4437_v25, %v12059_v41 }
0x22cc   :  { %v4442_v8 = vadd.f32 %v9496_v0, %v9191_v57 }
0x22ce   :  { %9933 = vmatmul.mubr.msk.f32.vlgmr.msra.gmra.mrb[52].mxu1 %vm499_vm0, %v4442_v8  ;;  %v4646_v1 = vadd.f32 %v4442_v8, %v12056_v39 }
0x22cf   :  { %10503 = vmatpush3.bf16.msra.mxu1 %v10500_v11 }
0x22d0   :  { %10505 = vmatprep.subr.bf16.mxu1 %v10504_v26 }
0x23a1   :  { %v9934_v62 = vpop.f32.mrb[52].mxu1 }
0x23a2   :  { %v4540_v16 = vadd.f32 %v9934_v62, %v9201_v15  ;;  %v4534_v17 = vpop.f32.mrb[53].mxu1 }
0x23a3   :  { %v4535_v18 = vadd.f32 %v9201_v15, %v4534_v17  ;;  %v4783_v15 = vld [vmem:[#allocation9 + $0x8] sm:$0xff]  ;;  %v4785_v17 = vld [vmem:[#allocation9 + $0x18] sm:$0xff] }
0x23a4   :  { %v4546_v19 = vmul.f32 0.70710677, %v4540_v16  ;;  %v4544_v35 = vmul.f32 0.5, %v4540_v16  ;;  %v4784_v16 = vld [vmem:[#allocation9 + $0x10] sm:$0xff] }
0x23a5   :  { %v4545_v20 = vmul.f32 0.70710677, %v4535_v18  ;;  %v4543_v24 = vmul.f32 0.5, %v4535_v18  ;;  %v10524_v18 = vpack.c.bf16 %v4785_v17, %v4784_v16 }
0x23a6   :  { %10836 = verf.f32 %v4546_v19 }
0x23a7   :  { %10838 = verf.f32 %v4545_v20 }
0x23b0   :  { %v10837_v21 = vpop.eup %10836 }
0x23b1   :  { %v10839_v22 = vpop.eup %10838  ;;  %v4550_v23 = vadd.f32 1.0, %v10837_v21 }
0x23b2   :  { %v4549_v3 = vadd.f32 1.0, %v10839_v22 }
0x23b3   :  { %v4552_v36 = vmul.f32 %v4550_v23, %v4544_v35 }
0x23b4   :  { %v4551_v6 = vmul.f32 %v4549_v3, %v4543_v24 }
0x23b6   :  { %9939 = vmatprep.mubr.msk.f32.mxu1 %vm641_vm3, %v4551_v6  ;;  %v9211_v6 = vld [vmem:[%s12692_s17] ss:$0 sm:$0xff] }
0x23b7   :  { %9940 = vmatmul.mubr.msk.f32.vlgmr.msra.gmra.mrb[54].mxu1 %vm641_vm3, %v4552_v36 }
0x23b8   :  { %10507 = vmatpush3.bf16.msra.mxu1 %v10504_v26  ;;  %v4782_v26 = vld [vmem:[#allocation9] sm:$0xff] }
0x23b9   :  { %10509 = vmatprep.subr.bf16.mxu1 %v10508_v63  ;;  %v10520_v62 = vpack.c.bf16 %v4783_v15, %v4782_v26 }
0x23bb   :  { %10521 = vmatprep.subr.bf16.mxu0 %v10520_v62 }
0x23bc   :  { %10511 = vmatpush3.bf16.msra.mxu1 %v10508_v63  ;;  %10523 = vmatpush3.bf16.msra.mxu0 %v10520_v62 }
0x23bd   :  { %10513 = vmatprep.subr.bf16.mxu1 %v10512_v7  ;;  %10525 = vmatprep.subr.bf16.mxu0 %v10524_v18 }
0x23c0   :  { %10515 = vmatpush3.bf16.msra.mxu1 %v10512_v7  ;;  %10527 = vmatpush3.bf16.msra.mxu0 %v10524_v18 }
0x23c1   :  { %10517 = vmatprep.subr.bf16.mxu1 %v10516_v54  ;;  %9977 = vmatprep.subr.mxu0 %v11227_v38 }
0x23c4   :  { %10519 = vmatpush3.bf16.msra.mxu1 %v10516_v54 }
0x23c5   :  { %9972 = vmatprep.subr.mxu1 %v11227_v38 }
0x248a   :  { %v9941_v60 = vpop.f32.mrb[54].mxu1 }
0x248b   :  { %v4642_v43 = vadd.f32 %v9941_v60, %v9205_v42  ;;  %v4636_v31 = vpop.f32.mrb[55].mxu1 }
0x248c   :  { %v4637_v45 = vadd.f32 %v9205_v42, %v4636_v31 }
0x248d   :  { %v4648_v48 = vadd.f32 %v4646_v1, %v4642_v43 }
0x248e   :  { %v4647_v49 = vadd.f32 %v4645_v37, %v4637_v45 }
0x2490   :  { %9958 = vmatprep.mubr.msk.f32.mxu1 %vm499_vm0, %v4647_v49 }
0x2491   :  { %9959 = vmatmul.mubr.msk.f32.vlgmr.msra.gmra.mrb[56].mxu1 %vm499_vm0, %v4648_v48  ;;  %vm8994_vm0 = vcmask 58368  }
0x2492   :  { %9974 = vmatprep.mubr.msk.f32.mxu1 %vm11228_vm2, %v11227_v38 }
0x2564   :  { %v9960_v51 = vpop.f32.mrb[56].mxu1 }
0x2565   :  { %v4742_v32 = vadd.f32 %v9960_v51, %v9208_v50  ;;  %v4736_v29 = vpop.f32.mrb[57].mxu1 }
0x2566   :  { %v4737_v46 = vadd.f32 %v9208_v50, %v4736_v29 }
0x2567   :  { %v4748_v52 = vmul.f32 0.70710677, %v4742_v32  ;;  %v4746_v47 = vmul.f32 0.5, %v4742_v32 }
0x2568   :  { %v4747_v39 = vmul.f32 0.70710677, %v4737_v46  ;;  %v4745_v55 = vmul.f32 0.5, %v4737_v46 }
0x2569   :  { %10840 = verf.f32 %v4748_v52 }
0x256a   :  { %10842 = verf.f32 %v4747_v39 }
0x2573   :  { %v10841_v44 = vpop.eup %10840 }
0x2574   :  { %v10843_v41 = vpop.eup %10842  ;;  %v4752_v53 = vadd.f32 1.0, %v10841_v44 }
0x2575   :  { %v4751_v14 = vadd.f32 1.0, %v10843_v41 }
0x2576   :  { %v12163_v56 = vmul.f32 %v4752_v53, %v4746_v47 }
0x2577   :  { %v12165_v57 = vmul.f32 %v4751_v14, %v4745_v55 }
0x2578   :  { %v4758_v58 = vsel %vm1995_vm10, %v12163_v56, 0.0 }
0x2579   :  { %4759 = vadd.xlane.f32.xlu1 %v4758_v58  ;;  %v4755_v59 = vsel %vm1995_vm10, %v12165_v57, 0.0 }
0x257a   :  { %4756 = vadd.xlane.f32.xlu0 %v4755_v59 }
0x2606   :  { %v4760_v25 = vpop.xlane.xlu1 %4759 }
0x2607   :  { %v4763_v5 = vmul.f32 0.03125, %v4760_v25  ;;  %v4757_v61 = vpop.xlane.xlu0 %4756 }
0x2608   :  { %v4762_v0 = vmul.f32 0.03125, %v4757_v61 }
0x2609   :  { %v4765_v8 = vsub.f32 %v12163_v56, %v4763_v5 }
0x260a   :  { %v4764_v9 = vsub.f32 %v12165_v57, %v4762_v0 }
0x260b   :  { %v4767_v10 = vmul.f32 %v4765_v8, %v4765_v8 }
0x260c   :  { %v4766_v11 = vmul.f32 %v4764_v9, %v4764_v9 }
0x260d   :  { %v4771_v12 = vsel %vm1995_vm10, %v4767_v10, 0.0 }
0x260e   :  { %4772 = vadd.xlane.f32.xlu1 %v4771_v12  ;;  %v4768_v13 = vsel %vm1995_vm10, %v4766_v11, 0.0 }
0x260f   :  { %4769 = vadd.xlane.f32.xlu0 %v4768_v13 }
0x269b   :  { %v4773_v19 = vpop.xlane.xlu1 %4772 }
0x269c   :  { %v4775_v20 = vmul.f32 0.03125, %v4773_v19  ;;  %v4770_v21 = vpop.xlane.xlu0 %4769 }
0x269d   :  { %v4774_v22 = vmul.f32 0.03125, %v4770_v21 }
0x269e   :  { %v4777_v23 = vadd.f32 1e-05, %v4775_v20 }
0x269f   :  { %v4776_v24 = vadd.f32 1e-05, %v4774_v22 }
0x26a0   :  { %10844 = vrsqrt.f32 %v4777_v23 }
0x26a1   :  { %10846 = vrsqrt.f32 %v4776_v24 }
0x26aa   :  { %v10845_v3 = vpop.eup %10844 }
0x26ab   :  { %v10847_v28 = vpop.eup %10846  ;;  %v4781_v35 = vmul.f32 %v10845_v3, %v4765_v8 }
0x26ac   :  { %v4780_v34 = vmul.f32 %v10847_v28, %v4764_v9 }
0x26ae   :  { %9969 = vmatprep.mubr.msk.f32.mxu0 %vm1995_vm10, %v4780_v34 }
0x26af   :  { %9970 = vmatmul.mubr.msk.f32.vlgmr.msra.gmra.mrb[48].mxu0 %vm1995_vm10, %v4781_v35 }
0x26b0   :  { %9979 = vmatprep.mubr.msk.f32.mxu0 %vm11228_vm2, %v11227_v38 }
0x2782   :  { %v9971_v36 = vpop.f32.mrb[48].mxu0 }
0x2783   :  { %v12181_v63 = vadd.f32 %v9971_v36, %v9211_v6  ;;  %v4865_v2 = vpop.f32.mrb[49].mxu0 }
0x2784   :  { %v12183_v30 = vadd.f32 %v9211_v6, %v4865_v2 }
0x2785   :  { %4952 = vrot.lane.b32.xlu1 %v12181_v63, %s11233_s22 }
0x2786   :  { %4875 = vrot.lane.b32.xlu0 %v12183_v30, %s11233_s22 }
0x27f7   :  { %v4953_v7 = vpop.permute.xlu1 %4952 }
0x27f8   :  { %9978 = vmatpush3.xpose.msk.msra.mxu0 %vm429_vm5, %v4953_v7  ;;  %v4876_v4 = vpop.permute.xlu0 %4875 }
0x27f9   :  { %9973 = vmatpush3.xpose.msk.msra.mxu1 %vm429_vm5, %v4876_v4  ;;  %9987 = vmatprep.subr.mxu0 %v11227_v38 }
0x27fa   :  { %9982 = vmatprep.subr.mxu1 %v11227_v38 }
0x27fb   :  { %9980 = vmatmul.mubr.msk.f32.vlgmr.msra.gmra.mrb[50].mxu0 %vm429_vm5, %v12181_v63 }
0x27fc   :  { %9975 = vmatmul.mubr.msk.f32.vlgmr.msra.gmra.mrb[58].mxu1 %vm429_vm5, %v12183_v30  ;;  %9989 = vmatprep.mubr.msk.f32.mxu0 %vm11228_vm2, %v11227_v38 }
0x27fd   :  { %9984 = vmatprep.mubr.msk.f32.mxu1 %vm11228_vm2, %v11227_v38 }
0x28ce   :  { %v5024_v40 = vpop.f32.mrb[50].mxu0 }
0x28cf   :  { %v5029_v54 = vmul.f32 0.35355338, %v5024_v40  ;;  %v4947_v42 = vpop.f32.mrb[58].mxu1  ;;  %v9981_v60 = vpop.f32.mrb[51].mxu0 }
0x28d0   :  { %v5028_v43 = vmul.f32 0.35355338, %v4947_v42  ;;  %v9976_v1 = vpop.f32.mrb[59].mxu1 }
0x28d1   :  { %v5031_v31 = vadd.f32 %v5029_v54, %v11604_v27 }
0x28d2   :  { %v5030_v45 = vadd.f32 %v5028_v43, %v11608_v33 }
0x28d3   :  { %v5035_v37 = vsel %vm429_vm5, %v5031_v31, -inf }
0x28d4   :  { %5036 = vmax.xlane.f32.xlu0 %v5035_v37  ;;  %v5032_v48 = vsel %vm429_vm5, %v5030_v45, -inf }
0x28d5   :  { %5033 = vmax.xlane.f32.xlu1 %v5032_v48 }
0x28e6   :  { %5130 = vrot.lane.b32.xlu1 %v12181_v63, %s11229_s5 }
0x28ea   :  { %5054 = vrot.lane.b32.xlu0 %v12183_v30, %s11229_s5  ;;  %5208 = vrot.lane.b32.xlu1 %v12183_v30, %s11236_s11 }
0x28ee   :  { %5286 = vrot.lane.b32.xlu1 %v12181_v63, %s11236_s11 }
0x2961   :  { %v5037_v49 = vpop.xlane.xlu0 %5036 }
0x2962   :  { %v5039_v50 = vsub.f32 %v5031_v31, %v5037_v49  ;;  %v5034_v51 = vpop.xlane.xlu1 %5033 }
0x2963   :  { %v5038_v32 = vsub.f32 %v5030_v45, %v5034_v51 }
0x2964   :  { %v5042_v29 = vmul.f32 1.442695, %v5039_v50 }
0x2965   :  { %v5040_v46 = vmul.f32 1.442695, %v5038_v32  ;;  %v5055_v52 = vpop.permute.xlu0 %5054 }
0x2966   :  { %10848 = vpow2.f32 %v5042_v29  ;;  %v5131_v39 = vpop.permute.xlu1 %5130  ;;  %9983 = vmatpush3.msra.mxu1 %v5055_v52 }
0x2967   :  { %10850 = vpow2.f32 %v5040_v46  ;;  %9988 = vmatpush3.msra.mxu0 %v5131_v39  ;;  %9992 = vmatprep.subr.mxu1 %v11227_v38 }
0x2968   :  { %9997 = vmatprep.subr.mxu0 %v11227_v38 }
0x296a   :  { %v5209_v55 = vpop.permute.xlu1 %5208 }
0x296e   :  { %v5287_v14 = vpop.permute.xlu1 %5286 }
0x2970   :  { %v10849_v44 = vpop.eup %10848 }
0x2971   :  { %v10851_v41 = vpop.eup %10850  ;;  %v5047_v47 = vsel %vm429_vm5, %v10849_v44, 0.0 }
0x2972   :  { %5048 = vadd.xlane.f32.xlu1 %v5047_v47  ;;  %v5044_v53 = vsel %vm429_vm5, %v10851_v41, 0.0 }
0x2973   :  { %5045 = vadd.xlane.f32.xlu0 %v5044_v53 }
0x2983   :  { %5284 = vrot.lane.b32.xlu1 %v12181_v63, %s11237_s16 }
0x2989   :  { %5206 = vrot.lane.b32.xlu0 %v12183_v30, %s11237_s16 }
0x29ff   :  { %v5049_v58 = vpop.xlane.xlu1 %5048 }
0x2a00   :  { %10852 = vrcp.f32 %v5049_v58  ;;  %v5046_v59 = vpop.xlane.xlu0 %5045 }
0x2a01   :  { %10854 = vrcp.f32 %v5046_v59 }
0x2a03   :  { %v5285_v8 = vpop.permute.xlu1 %5284 }
0x2a04   :  { %v5207_v9 = vpop.permute.xlu0 %5206 }
0x2a0a   :  { %v10853_v25 = vpop.eup %10852 }
0x2a0b   :  { %v10855_v5 = vpop.eup %10854  ;;  %v5053_v61 = vmul.f32 %v10853_v25, %v10849_v44 }
0x2a0c   :  { %v5051_v0 = vmul.f32 %v10855_v5, %v10851_v41 }
0x2a0d   :  { %9990 = vmatmul.mubr.msk.f32.vlgmr.msra.gmra.mrb[52].mxu0 %vm429_vm5, %v5053_v61 }
0x2a0e   :  { %9998 = vmatpush3.xpose.msk.msra.mxu0 %vm429_vm5, %v5287_v14  ;;  %9985 = vmatmul.mubr.msk.f32.vlgmr.msra.gmra.mrb[60].mxu1 %vm429_vm5, %v5051_v0 }
0x2a0f   :  { %9993 = vmatpush3.xpose.msk.msra.mxu1 %vm429_vm5, %v5209_v55  ;;  %9999 = vmatprep.mubr.msk.f32.mxu0 %vm11228_vm2, %v11227_v38 }
0x2a10   :  { %9994 = vmatprep.mubr.msk.f32.mxu1 %vm11228_vm2, %v11227_v38  ;;  %10007 = vmatprep.subr.mxu0 %v11227_v38 }
0x2a11   :  { %10000 = vmatmul.mubr.msk.f32.vlgmr.msra.gmra.mrb[54].mxu0 %vm429_vm5, %v5285_v8  ;;  %10002 = vmatprep.subr.mxu1 %v11227_v38 }
0x2a12   :  { %9995 = vmatmul.mubr.msk.f32.vlgmr.msra.gmra.mrb[62].mxu1 %vm429_vm5, %v5207_v9  ;;  %10009 = vmatprep.mubr.msk.f32.mxu0 %vm11228_vm2, %v11227_v38 }
0x2a13   :  { %10004 = vmatprep.mubr.msk.f32.mxu1 %vm11228_vm2, %v11227_v38 }
0x2ae0   :  { %v12237_v10 = vpop.f32.mrb[52].mxu0 }
0x2ae1   :  { %v12239_v11 = vpop.f32.mrb[60].mxu1  ;;  %v9991_v12 = vpop.f32.mrb[53].mxu0 }
0x2ae2   :  { %v9986_v13 = vpop.f32.mrb[61].mxu1 }
0x2ae4   :  { %v5358_v26 = vpop.f32.mrb[54].mxu0 }
0x2ae5   :  { %v5363_v15 = vmul.f32 0.35355338, %v5358_v26  ;;  %v5280_v62 = vpop.f32.mrb[62].mxu1  ;;  %v10001_v16 = vpop.f32.mrb[55].mxu0 }
0x2ae6   :  { %v5362_v17 = vmul.f32 0.35355338, %v5280_v62  ;;  %v9996_v18 = vpop.f32.mrb[63].mxu1 }
0x2ae7   :  { %v5365_v19 = vadd.f32 %v5363_v15, %v11604_v27 }
0x2ae8   :  { %v5364_v20 = vadd.f32 %v5362_v17, %v11608_v33 }
0x2ae9   :  { %v5369_v21 = vsel %vm429_vm5, %v5365_v19, -inf }
0x2aea   :  { %5370 = vmax.xlane.f32.xlu1 %v5369_v21  ;;  %v5366_v22 = vsel %vm429_vm5, %v5364_v20, -inf }
0x2aeb   :  { %5367 = vmax.xlane.f32.xlu0 %v5366_v22 }
0x2afb   :  { %5464 = vrot.lane.b32.xlu1 %v12181_v63, %s11238_s20 }
0x2aff   :  { %5542 = vrot.lane.b32.xlu1 %v12183_v30, %s11235_s4 }
0x2b01   :  { %5388 = vrot.lane.b32.xlu0 %v12183_v30, %s11238_s20 }
0x2b03   :  { %5620 = vrot.lane.b32.xlu1 %v12181_v63, %s11235_s4 }
0x2b07   :  { %5618 = vrot.lane.b32.xlu1 %v12181_v63, %s11231_s3 }
0x2b77   :  { %v5371_v23 = vpop.xlane.xlu1 %5370 }
0x2b78   :  { %v5373_v24 = vsub.f32 %v5365_v19, %v5371_v23  ;;  %v5368_v3 = vpop.xlane.xlu0 %5367 }
0x2b79   :  { %v5372_v28 = vsub.f32 %v5364_v20, %v5368_v3 }
0x2b7a   :  { %v5376_v34 = vmul.f32 1.442695, %v5373_v24 }
0x2b7b   :  { %v5374_v35 = vmul.f32 1.442695, %v5372_v28  ;;  %v5465_v6 = vpop.permute.xlu1 %5464 }
0x2b7c   :  { %10856 = vpow2.f32 %v5376_v34  ;;  %10008 = vmatpush3.msra.mxu0 %v5465_v6  ;;  %v5389_v36 = vpop.permute.xlu0 %5388 }
0x2b7d   :  { %10003 = vmatpush3.msra.mxu1 %v5389_v36  ;;  %10017 = vmatprep.subr.mxu0 %v11227_v38  ;;  %10858 = vpow2.f32 %v5374_v35 }
0x2b7e   :  { %10012 = vmatprep.subr.mxu1 %v11227_v38 }
0x2b7f   :  { %v5543_v60 = vpop.permute.xlu1 %5542 }
0x2b83   :  { %v5621_v1 = vpop.permute.xlu1 %5620 }
0x2b86   :  { %v10857_v2 = vpop.eup %10856 }
0x2b87   :  { %v5381_v7 = vsel %vm429_vm5, %v10857_v2, 0.0  ;;  %v10859_v4 = vpop.eup %10858  ;;  %v5619_v48 = vpop.permute.xlu1 %5618 }
0x2b88   :  { %5382 = vadd.xlane.f32.xlu0 %v5381_v7  ;;  %v5378_v40 = vsel %vm429_vm5, %v10859_v4, 0.0 }
0x2b8c   :  { %5379 = vadd.xlane.f32.xlu0 %v5378_v40 }
0x2ba2   :  { %5540 = vrot.lane.b32.xlu0 %v12183_v30, %s11231_s3 }
0x2c15   :  { %v5383_v54 = vpop.xlane.xlu0 %5382 }
0x2c16   :  { %10860 = vrcp.f32 %v5383_v54 }
0x2c19   :  { %v5380_v42 = vpop.xlane.xlu0 %5379 }
0x2c1a   :  { %10862 = vrcp.f32 %v5380_v42 }
0x2c1d   :  { %v5541_v49 = vpop.permute.xlu0 %5540 }
0x2c20   :  { %v10861_v43 = vpop.eup %10860 }
0x2c21   :  { %v5387_v31 = vmul.f32 %v10861_v43, %v10857_v2 }
0x2c23   :  { %10010 = vmatmul.mubr.msk.f32.vlgmr.msra.gmra.mrb[56].mxu0 %vm429_vm5, %v5387_v31 }
0x2c24   :  { %v10863_v45 = vpop.eup %10862  ;;  %10018 = vmatpush3.xpose.msk.msra.mxu0 %vm429_vm5, %v5621_v1  ;;  %10019 = vmatprep.mubr.msk.f32.mxu0 %vm11228_vm2, %v11227_v38 }
0x2c25   :  { %v5385_v37 = vmul.f32 %v10863_v45, %v10859_v4  ;;  %10027 = vmatprep.subr.mxu0 %v11227_v38 }
0x2c27   :  { %10005 = vmatmul.mubr.msk.f32.vlgmr.msra.gmra.mrb[64].mxu1 %vm429_vm5, %v5385_v37  ;;  %10020 = vmatmul.mubr.msk.f32.vlgmr.msra.gmra.mrb[58].mxu0 %vm429_vm5, %v5619_v48 }
0x2c28   :  { %10013 = vmatpush3.xpose.msk.msra.mxu1 %vm429_vm5, %v5543_v60  ;;  %10014 = vmatprep.mubr.msk.f32.mxu1 %vm11228_vm2, %v11227_v38 }
0x2c29   :  { %10022 = vmatprep.subr.mxu1 %v11227_v38  ;;  %10029 = vmatprep.mubr.msk.f32.mxu0 %vm11228_vm2, %v11227_v38 }
0x2c2b   :  { %10015 = vmatmul.mubr.msk.f32.vlgmr.msra.gmra.mrb[66].mxu1 %vm429_vm5, %v5541_v49 }
0x2c2c   :  { %10024 = vmatprep.mubr.msk.f32.mxu1 %vm11228_vm2, %v11227_v38 }
0x2cf6   :  { %v12277_v50 = vpop.f32.mrb[56].mxu0 }
0x2cf7   :  { %v10011_v51 = vpop.f32.mrb[57].mxu0 }
0x2cfa   :  { %v12279_v32 = vpop.f32.mrb[64].mxu1  ;;  %v5692_v29 = vpop.f32.mrb[58].mxu0 }
0x2cfb   :  { %v5697_v46 = vmul.f32 0.35355338, %v5692_v29  ;;  %v10006_v52 = vpop.f32.mrb[65].mxu1  ;;  %v10021_v39 = vpop.f32.mrb[59].mxu0 }
0x2cfd   :  { %v5699_v44 = vadd.f32 %v5697_v46, %v11604_v27 }
0x2cfe   :  { %v5614_v41 = vpop.f32.mrb[66].mxu1 }
0x2cff   :  { %v5696_v47 = vmul.f32 0.35355338, %v5614_v41  ;;  %v10016_v53 = vpop.f32.mrb[67].mxu1  ;;  %v5703_v55 = vsel %vm429_vm5, %v5699_v44, -inf }
0x2d00   :  { %5704 = vmax.xlane.f32.xlu1 %v5703_v55 }
0x2d01   :  { %v5698_v14 = vadd.f32 %v5696_v47, %v11608_v33 }
0x2d03   :  { %v5700_v58 = vsel %vm429_vm5, %v5698_v14, -inf }
0x2d04   :  { %5701 = vmax.xlane.f32.xlu0 %v5700_v58  ;;  %v6240_v58 = vld [vmem:[#allocation11 + $0x8] sm:$0xff] }
0x2d11   :  { %5798 = vrot.lane.b32.xlu1 %v12181_v63, %s11230_s9 }
0x2d15   :  { %5876 = vrot.lane.b32.xlu1 %v12183_v30, %s11239_s27 }
0x2d19   :  { %5954 = vrot.lane.b32.xlu1 %v12181_v63, %s11239_s27 }
0x2d1a   :  { %5722 = vrot.lane.b32.xlu0 %v12183_v30, %s11230_s9 }
0x2d1d   :  { %5952 = vrot.lane.b32.xlu1 %v12181_v63, %s11240_s12 }
0x2d8d   :  { %v5705_v59 = vpop.xlane.xlu1 %5704 }
0x2d8e   :  { %v5707_v25 = vsub.f32 %v5699_v44, %v5705_v59 }
0x2d90   :  { %v5710_v5 = vmul.f32 1.442695, %v5707_v25  ;;  %v6242_v25 = vld [vmem:[#allocation11 + $0x18] sm:$0xff] }
0x2d91   :  { %v5799_v61 = vpop.permute.xlu1 %5798  ;;  %v5702_v0 = vpop.xlane.xlu0 %5701 }
0x2d92   :  { %10864 = vpow2.f32 %v5710_v5  ;;  %v5706_v8 = vsub.f32 %v5698_v14, %v5702_v0  ;;  %10028 = vmatpush3.msra.mxu0 %v5799_v61  ;;  %v6239_v14 = vld [vmem:[#allocation11] sm:$0xff] }
0x2d93   :  { %10037 = vmatprep.subr.mxu0 %v11227_v38  ;;  %v10528_v59 = vpack.c.bf16 %v6240_v58, %v6239_v14 }
0x2d94   :  { %v5708_v9 = vmul.f32 1.442695, %v5706_v8 }
0x2d95   :  { %v5723_v12 = vpop.permute.xlu0 %5722  ;;  %v5877_v18 = vpop.permute.xlu1 %5876 }
0x2d96   :  { %10866 = vpow2.f32 %v5708_v9  ;;  %10023 = vmatpush3.msra.mxu1 %v5723_v12 }
0x2d97   :  { %10032 = vmatprep.subr.mxu1 %v11227_v38 }
0x2d99   :  { %v5955_v20 = vpop.permute.xlu1 %5954 }
0x2d9c   :  { %v10865_v13 = vpop.eup %10864 }
0x2d9d   :  { %v5715_v26 = vsel %vm429_vm5, %v10865_v13, 0.0  ;;  %v5953_v24 = vpop.permute.xlu1 %5952 }
0x2d9e   :  { %5716 = vadd.xlane.f32.xlu0 %v5715_v26 }
0x2da0   :  { %v10867_v15 = vpop.eup %10866 }
0x2da1   :  { %v5712_v62 = vsel %vm429_vm5, %v10867_v15, 0.0 }
0x2da2   :  { %5713 = vadd.xlane.f32.xlu0 %v5712_v62 }
0x2db8   :  { %5874 = vrot.lane.b32.xlu0 %v12183_v30, %s11240_s12 }
0x2e2b   :  { %v5717_v16 = vpop.xlane.xlu0 %5716 }
0x2e2c   :  { %10868 = vrcp.f32 %v5717_v16 }
0x2e2f   :  { %v5714_v17 = vpop.xlane.xlu0 %5713 }
0x2e30   :  { %10870 = vrcp.f32 %v5714_v17 }
0x2e33   :  { %v5875_v3 = vpop.permute.xlu0 %5874 }
0x2e36   :  { %v10869_v19 = vpop.eup %10868 }
0x2e37   :  { %v5721_v21 = vmul.f32 %v10869_v19, %v10865_v13 }
0x2e39   :  { %10030 = vmatmul.mubr.msk.f32.vlgmr.msra.gmra.mrb[60].mxu0 %vm429_vm5, %v5721_v21 }
0x2e3a   :  { %v10871_v22 = vpop.eup %10870  ;;  %10038 = vmatpush3.xpose.msk.msra.mxu0 %vm429_vm5, %v5955_v20  ;;  %10039 = vmatprep.mubr.msk.f32.mxu0 %vm11228_vm2, %v11227_v38 }
0x2e3b   :  { %v5719_v23 = vmul.f32 %v10871_v22, %v10867_v15  ;;  %10047 = vmatprep.subr.mxu0 %v11227_v38 }
0x2e3d   :  { %10025 = vmatmul.mubr.msk.f32.vlgmr.msra.gmra.mrb[68].mxu1 %vm429_vm5, %v5719_v23  ;;  %10040 = vmatmul.mubr.msk.f32.vlgmr.msra.gmra.mrb[62].mxu0 %vm429_vm5, %v5953_v24  ;;  %v9238_v23 = vld [vmem:[%s12693_s18] ss:$0 sm:$0xff] }
0x2e3e   :  { %10033 = vmatpush3.xpose.msk.msra.mxu1 %vm429_vm5, %v5877_v18  ;;  %10034 = vmatprep.mubr.msk.f32.mxu1 %vm11228_vm2, %v11227_v38 }
0x2e3f   :  { %10042 = vmatprep.subr.mxu1 %v11227_v38  ;;  %10049 = vmatprep.mubr.msk.f32.mxu0 %vm11228_vm2, %v11227_v38 }
0x2e41   :  { %10035 = vmatmul.mubr.msk.f32.vlgmr.msra.gmra.mrb[70].mxu1 %vm429_vm5, %v5875_v3 }
0x2e42   :  { %10044 = vmatprep.mubr.msk.f32.mxu1 %vm11228_vm2, %v11227_v38 }
0x2f0c   :  { %v5870_v28 = vpop.f32.mrb[60].mxu0 }
0x2f0d   :  { %v10031_v34 = vpop.f32.mrb[61].mxu0 }
0x2f10   :  { %v5794_v35 = vpop.f32.mrb[68].mxu1  ;;  %v6026_v6 = vpop.f32.mrb[62].mxu0 }
0x2f11   :  { %v6031_v36 = vmul.f32 0.35355338, %v6026_v6  ;;  %v10026_v2 = vpop.f32.mrb[69].mxu1  ;;  %v10041_v7 = vpop.f32.mrb[63].mxu0 }
0x2f13   :  { %v6033_v4 = vadd.f32 %v6031_v36, %v11604_v27 }
0x2f14   :  { %v5948_v40 = vpop.f32.mrb[70].mxu1 }
0x2f15   :  { %v6030_v54 = vmul.f32 0.35355338, %v5948_v40  ;;  %v10036_v42 = vpop.f32.mrb[71].mxu1  ;;  %v6037_v60 = vsel %vm429_vm5, %v6033_v4, -inf }
0x2f16   :  { %6038 = vmax.xlane.f32.xlu1 %v6037_v60 }
0x2f17   :  { %v6032_v43 = vadd.f32 %v6030_v54, %v11608_v33 }
0x2f19   :  { %v6034_v1 = vsel %vm429_vm5, %v6032_v43, -inf }
0x2f1a   :  { %6035 = vmax.xlane.f32.xlu0 %v6034_v1  ;;  %v6360_v1 = vld [vmem:[#allocation12 + $0x8] sm:$0xff] }
0x2f27   :  { %6132 = vrot.lane.b32.xlu1 %v12181_v63, %s11241_s15 }
0x2f2b   :  { %6210 = vrot.lane.b32.xlu1 %v12279_v32, %s11219_s26 }
0x2f2f   :  { %6212 = vrot.lane.b32.xlu1 %v12277_v50, %s11219_s26 }
0x2f33   :  { %6220 = vrot.lane.b32.xlu1 %v5870_v28, %s11234_s0 }
0x2fa3   :  { %v6039_v31 = vpop.xlane.xlu1 %6038 }
0x2fa4   :  { %v6041_v45 = vsub.f32 %v6033_v4, %v6039_v31  ;;  %v6361_v31 = vld [vmem:[#allocation12 + $0x10] sm:$0xff] }
0x2fa6   :  { %v6044_v37 = vmul.f32 1.442695, %v6041_v45 }
0x2fa7   :  { %v6133_v48 = vpop.permute.xlu1 %6132  ;;  %v6036_v49 = vpop.xlane.xlu0 %6035 }
0x2fa8   :  { %10872 = vpow2.f32 %v6044_v37  ;;  %v6040_v51 = vsub.f32 %v6032_v43, %v6036_v49  ;;  %10048 = vmatpush3.msra.mxu0 %v6133_v48  ;;  %v6359_v43 = vld [vmem:[#allocation12] sm:$0xff]  ;;  %v6362_v37 = vld [vmem:[#allocation12 + $0x18] sm:$0xff] }
0x2fa9   :  { %v10536_v45 = vpack.c.bf16 %v6360_v1, %v6359_v43  ;;  %v10540_v48 = vpack.c.bf16 %v6362_v37, %v6361_v31  ;;  %v6461_v49 = vld [vmem:[%s12694_s23] sm:$0xff] }
0x2faa   :  { %v6042_v29 = vmul.f32 1.442695, %v6040_v51  ;;  %v6462_v51 = vld [vmem:[%s12694_s23 + $0x8] sm:$0xff]  ;;  %v6562_v43 = vld [vmem:[#allocation14 + $0x18] sm:$0xff] }
0x2fab   :  { %v6211_v12 = vpop.permute.xlu1 %6210  ;;  %10537 = vmatprep.subr.bf16.mxu0 %v10536_v45  ;;  %v9244_v31 = vld [vmem:[%s12696_s1] ss:$0 sm:$0xff] }
0x2fac   :  { %10874 = vpow2.f32 %v6042_v29  ;;  %v6232_v62 = vsel %vm429_vm5, %v12239_v11, %v6211_v12  ;;  %v6463_v29 = vld [vmem:[%s12694_s23 + $0x10] sm:$0xff] }
0x2faf   :  { %v6213_v13 = vpop.permute.xlu1 %6212 }
0x2fb0   :  { %v6233_v17 = vsel %vm429_vm5, %v12237_v10, %v6213_v13  ;;  %v6471_v13 = vld [vmem:[%s12694_s23 + $0x50] sm:$0xff] }
0x2fb2   :  { %v10873_v46 = vpop.eup %10872 }
0x2fb3   :  { %v6049_v63 = vsel %vm429_vm5, %v10873_v46, 0.0  ;;  %v6221_v26 = vpop.permute.xlu1 %6220 }
0x2fb4   :  { %6050 = vadd.xlane.f32.xlu0 %v6049_v63  ;;  %v6235_v20 = vsel %vm641_vm3, %v6233_v17, %v6221_v26  ;;  %v6464_v63 = vld [vmem:[%s12694_s23 + $0x18] sm:$0xff] }
0x2fb5   :  { %v6472_v26 = vld [vmem:[%s12694_s23 + $0x58] sm:$0xff] }
0x2fb6   :  { %v10875_v32 = vpop.eup %10874 }
0x2fb7   :  { %v6046_v52 = vsel %vm429_vm5, %v10875_v32, 0.0 }
0x2fb8   :  { %6047 = vadd.xlane.f32.xlu0 %v6046_v52  ;;  %v6465_v52 = vld [vmem:[%s12694_s23 + $0x20] sm:$0xff] }
0x2fce   :  { %6056 = vrot.lane.b32.xlu0 %v12183_v30, %s11241_s15  ;;  %v6241_v30 = vld [vmem:[#allocation11 + $0x10] sm:$0xff] }
0x2fcf   :  { %v10532_v5 = vpack.c.bf16 %v6242_v25, %v6241_v30 }
0x2fd2   :  { %6218 = vrot.lane.b32.xlu0 %v5794_v35, %s11234_s0 }
0x3041   :  { %v6051_v50 = vpop.xlane.xlu0 %6050 }
0x3042   :  { %10876 = vrcp.f32 %v6051_v50  ;;  %v6466_v50 = vld [vmem:[%s12694_s23 + $0x28] sm:$0xff] }
0x3045   :  { %v6048_v39 = vpop.xlane.xlu0 %6047 }
0x3046   :  { %10878 = vrcp.f32 %v6048_v39  ;;  %v10552_v39 = vpack.c.bf16 %v6466_v50, %v6465_v52 }
0x3049   :  { %v6057_v44 = vpop.permute.xlu0 %6056 }
0x304a   :  { %10043 = vmatpush3.msra.mxu1 %v6057_v44 }
0x304b   :  { %10529 = vmatprep.subr.bf16.mxu1 %v10528_v59 }
0x304c   :  { %v10877_v41 = vpop.eup %10876 }
0x304d   :  { %v6055_v47 = vmul.f32 %v10877_v41, %v10873_v46  ;;  %v6219_v15 = vpop.permute.xlu0 %6218  ;;  %v10544_v46 = vpack.c.bf16 %v6462_v51, %v6461_v49  ;;  %v6661_v51 = vld [vmem:[#allocation15] sm:$0xff] }
0x304e   :  { %v6234_v18 = vsel %vm641_vm3, %v6232_v62, %v6219_v15  ;;  %v10564_v15 = vpack.c.bf16 %v6472_v26, %v6471_v13  ;;  %v6473_v62 = vld [vmem:[%s12694_s23 + $0x60] sm:$0xff] }
0x304f   :  { %10050 = vmatmul.mubr.msk.f32.vlgmr.msra.gmra.mrb[64].mxu0 %vm429_vm5, %v6055_v47 }
0x3050   :  { %v10879_v53 = vpop.eup %10878  ;;  %10539 = vmatpush3.bf16.msra.mxu0 %v10536_v45 }
0x3051   :  { %v6053_v55 = vmul.f32 %v10879_v53, %v10875_v32  ;;  %10541 = vmatprep.subr.bf16.mxu0 %v10540_v48  ;;  %v10548_v32 = vpack.c.bf16 %v6464_v63, %v6463_v29  ;;  %v6662_v29 = vld [vmem:[#allocation15 + $0x8] sm:$0xff]  ;;  %v9245_v63 = vld [vmem:[%s12697_s14] ss:$0 sm:$0xff] }
0x3053   :  { %10045 = vmatmul.mubr.msk.f32.vlgmr.msra.gmra.mrb[72].mxu1 %vm429_vm5, %v6053_v55 }
0x3054   :  { %10531 = vmatpush3.bf16.msra.mxu1 %v10528_v59  ;;  %10543 = vmatpush3.bf16.msra.mxu0 %v10540_v48 }
0x3055   :  { %10533 = vmatprep.subr.bf16.mxu1 %v10532_v5 }
0x3058   :  { %10535 = vmatpush3.bf16.msra.mxu1 %v10532_v5  ;;  %v6467_v5 = vld [vmem:[%s12694_s23 + $0x30] sm:$0xff] }
0x3059   :  { %10545 = vmatprep.subr.bf16.mxu1 %v10544_v46 }
0x3122   :  { %v6204_v61 = vpop.f32.mrb[64].mxu0 }
0x3123   :  { %6228 = vrot.lane.b32.xlu1 %v6204_v61, %s11242_s24  ;;  %v10051_v0 = vpop.f32.mrb[65].mxu0  ;;  %v6468_v61 = vld [vmem:[%s12694_s23 + $0x38] sm:$0xff] }
0x3124   :  { %v10556_v0 = vpack.c.bf16 %v6468_v61, %v6467_v5  ;;  %v9248_v5 = vld [vmem:[%s12698_s28] ss:$0 sm:$0xff] }
0x3126   :  { %v6128_v8 = vpop.f32.mrb[72].mxu1 }
0x3127   :  { %6226 = vrot.lane.b32.xlu0 %v6128_v8, %s11242_s24  ;;  %v10046_v9 = vpop.f32.mrb[73].mxu1  ;;  %v6469_v8 = vld [vmem:[%s12694_s23 + $0x40] sm:$0xff] }
0x3128   :  { %v6470_v9 = vld [vmem:[%s12694_s23 + $0x48] sm:$0xff] }
0x3129   :  { %v10560_v12 = vpack.c.bf16 %v6470_v9, %v6469_v8 }
0x3195   :  { %v6229_v16 = vpop.permute.xlu1 %6228 }
0x3196   :  { %v6238_v22 = vsel %vm6236_vm12, %v6235_v20, %v6229_v16  ;;  %v6474_v16 = vld [vmem:[%s12694_s23 + $0x68] sm:$0xff] }
0x3197   :  { %v10568_v17 = vpack.c.bf16 %v6474_v16, %v6473_v62 }
0x3199   :  { %v6227_v19 = vpop.permute.xlu0 %6226 }
0x319a   :  { %v6237_v21 = vsel %vm6236_vm12, %v6234_v18, %v6227_v19  ;;  %v6475_v18 = vld [vmem:[%s12694_s23 + $0x70] sm:$0xff]  ;;  %v6476_v19 = vld [vmem:[%s12694_s23 + $0x78] sm:$0xff] }
0x319b   :  { %10060 = vmatprep.mubr.msk.f32.mxu1 %vm1995_vm10, %v6237_v21  ;;  %v10572_v20 = vpack.c.bf16 %v6476_v19, %v6475_v18  ;;  %v6559_v21 = vld [vmem:[#allocation14] sm:$0xff] }
0x319c   :  { %10061 = vmatmul.mubr.msk.f32.vlgmr.msra.gmra.mrb[74].mxu1 %vm1995_vm10, %v6238_v22  ;;  %v6560_v22 = vld [vmem:[#allocation14 + $0x8] sm:$0xff] }
0x319d   :  { %10547 = vmatpush3.bf16.msra.mxu1 %v10544_v46  ;;  %v10584_v46 = vpack.c.bf16 %v6662_v29, %v6661_v51 }
0x319e   :  { %10549 = vmatprep.subr.bf16.mxu1 %v10548_v32 }
0x31a1   :  { %10551 = vmatpush3.bf16.msra.mxu1 %v10548_v32 }
0x31a2   :  { %10553 = vmatprep.subr.bf16.mxu1 %v10552_v39 }
0x31a5   :  { %10555 = vmatpush3.bf16.msra.mxu1 %v10552_v39 }
0x31a6   :  { %10557 = vmatprep.subr.bf16.mxu1 %v10556_v0 }
0x31a9   :  { %10559 = vmatpush3.bf16.msra.mxu1 %v10556_v0 }
0x31aa   :  { %10561 = vmatprep.subr.bf16.mxu1 %v10560_v12 }
0x31ad   :  { %10563 = vmatpush3.bf16.msra.mxu1 %v10560_v12 }
0x31ae   :  { %10565 = vmatprep.subr.bf16.mxu1 %v10564_v15 }
0x31b1   :  { %10567 = vmatpush3.bf16.msra.mxu1 %v10564_v15 }
0x31b2   :  { %10569 = vmatprep.subr.bf16.mxu1 %v10568_v17 }
0x31b5   :  { %10571 = vmatpush3.bf16.msra.mxu1 %v10568_v17 }
0x31b6   :  { %10573 = vmatprep.subr.bf16.mxu1 %v10572_v20 }
0x31b9   :  { %10575 = vmatpush3.bf16.msra.mxu1 %v10572_v20 }
0x31ba   :  { %10153 = vmatprep.subr.mxu1 %v11227_v38 }
0x326f   :  { %v10062_v11 = vpop.f32.mrb[74].mxu1 }
0x3270   :  { %v6328_v24 = vadd.f32 %v10062_v11, %v9238_v23  ;;  %v6322_v3 = vpop.f32.mrb[75].mxu1  ;;  %v9241_v11 = vld [vmem:[%s12695_s19] ss:$0 sm:$0xff] }
0x3271   :  { %v6323_v28 = vadd.f32 %v9238_v23, %v6322_v3  ;;  %v10576_v23 = vpack.c.bf16 %v6560_v22, %v6559_v21 }
0x3272   :  { %v12349_v10 = vadd.f32 %v6328_v24, %v12163_v56 }
0x3273   :  { %v12352_v34 = vadd.f32 %v6323_v28, %v12165_v57  ;;  %10577 = vmatprep.subr.bf16.mxu0 %v10576_v23 }
0x3274   :  { %v6336_v35 = vsel %vm1995_vm10, %v12349_v10, 0.0 }
0x3275   :  { %6337 = vadd.xlane.f32.xlu1 %v6336_v35  ;;  %v6333_v6 = vsel %vm1995_vm10, %v12352_v34, 0.0 }
0x3276   :  { %6334 = vadd.xlane.f32.xlu0 %v6333_v6 }
0x3302   :  { %v6338_v36 = vpop.xlane.xlu1 %6337 }
0x3303   :  { %v6340_v2 = vmul.f32 0.03125, %v6338_v36  ;;  %v6335_v7 = vpop.xlane.xlu0 %6334 }
0x3304   :  { %v6339_v4 = vmul.f32 0.03125, %v6335_v7 }
0x3305   :  { %v6342_v40 = vsub.f32 %v12349_v10, %v6340_v2 }
0x3306   :  { %v6341_v56 = vsub.f32 %v12352_v34, %v6339_v4 }
0x3307   :  { %v6344_v42 = vmul.f32 %v6342_v40, %v6342_v40 }
0x3308   :  { %v6343_v54 = vmul.f32 %v6341_v56, %v6341_v56 }
0x3309   :  { %v6348_v60 = vsel %vm1995_vm10, %v6344_v42, 0.0 }
0x330a   :  { %v6345_v57 = vsel %vm1995_vm10, %v6343_v54, 0.0 }
0x330b   :  { %6346 = vadd.xlane.f32.xlu0 %v6345_v57 }
0x330f   :  { %6349 = vadd.xlane.f32.xlu0 %v6348_v60  ;;  %v6561_v60 = vld [vmem:[#allocation14 + $0x10] sm:$0xff] }
0x3310   :  { %v10580_v1 = vpack.c.bf16 %v6562_v43, %v6561_v60 }
0x3398   :  { %v6347_v44 = vpop.xlane.xlu0 %6346 }
0x3399   :  { %v6351_v41 = vmul.f32 0.03125, %v6347_v44 }
0x339b   :  { %v6353_v47 = vadd.f32 1e-05, %v6351_v41 }
0x339c   :  { %v6350_v53 = vpop.xlane.xlu0 %6349 }
0x339d   :  { %10880 = vrsqrt.f32 %v6353_v47  ;;  %v6352_v55 = vmul.f32 0.03125, %v6350_v53 }
0x339f   :  { %v6354_v14 = vadd.f32 1e-05, %v6352_v55 }
0x33a1   :  { %10882 = vrsqrt.f32 %v6354_v14 }
0x33a7   :  { %v10881_v58 = vpop.eup %10880 }
0x33a8   :  { %v6357_v59 = vmul.f32 %v10881_v58, %v6341_v56 }
0x33aa   :  { %10071 = vmatprep.mubr.msk.f32.mxu0 %vm1995_vm10, %v6357_v59 }
0x33ab   :  { %v10883_v30 = vpop.eup %10882 }
0x33ac   :  { %v6358_v25 = vmul.f32 %v10883_v30, %v6342_v40 }
0x33ae   :  { %10072 = vmatmul.mubr.msk.f32.vlgmr.msra.gmra.mrb[66].mxu0 %vm1995_vm10, %v6358_v25 }
0x33af   :  { %10579 = vmatpush3.bf16.msra.mxu0 %v10576_v23 }
0x33b0   :  { %10581 = vmatprep.subr.bf16.mxu0 %v10580_v1 }
0x33b3   :  { %10583 = vmatpush3.bf16.msra.mxu0 %v10580_v1  ;;  %v9252_v1 = vld [vmem:[%s12692_s17 + $0x1] ss:$0 sm:$0xff] }
0x33b4   :  { %10585 = vmatprep.subr.bf16.mxu0 %v10584_v46 }
0x3481   :  { %v10073_v24 = vpop.f32.mrb[66].mxu0 }
0x3482   :  { %v6448_v3 = vadd.f32 %v10073_v24, %v9241_v11  ;;  %v6442_v28 = vpop.f32.mrb[67].mxu0  ;;  %v6782_v24 = vld [vmem:[#allocation9 + $0x20] sm:$0xff] }
0x3483   :  { %v6443_v35 = vadd.f32 %v9241_v11, %v6442_v28  ;;  %v6784_v28 = vld [vmem:[#allocation9 + $0x30] sm:$0xff] }
0x3484   :  { %v6454_v6 = vmul.f32 0.70710677, %v6448_v3  ;;  %v6452_v54 = vmul.f32 0.5, %v6448_v3  ;;  %v6783_v3 = vld [vmem:[#allocation9 + $0x28] sm:$0xff] }
0x3485   :  { %v6453_v36 = vmul.f32 0.70710677, %v6443_v35  ;;  %v6451_v40 = vmul.f32 0.5, %v6443_v35  ;;  %v10588_v35 = vpack.c.bf16 %v6783_v3, %v6782_v24 }
0x3486   :  { %10884 = verf.f32 %v6454_v6  ;;  %v6785_v6 = vld [vmem:[#allocation9 + $0x38] sm:$0xff] }
0x3487   :  { %10886 = verf.f32 %v6453_v36  ;;  %v10592_v36 = vpack.c.bf16 %v6785_v6, %v6784_v28 }
0x3490   :  { %v10885_v2 = vpop.eup %10884 }
0x3491   :  { %v10887_v7 = vpop.eup %10886  ;;  %v6458_v4 = vadd.f32 1.0, %v10885_v2 }
0x3492   :  { %v6457_v56 = vadd.f32 1.0, %v10887_v7 }
0x3493   :  { %v6460_v42 = vmul.f32 %v6458_v4, %v6452_v54 }
0x3494   :  { %v6459_v57 = vmul.f32 %v6457_v56, %v6451_v40 }
0x3496   :  { %10106 = vmatprep.mubr.f32.mxu1 %v6459_v57 }
0x3497   :  { %10107 = vmatmul.mubr.f32.vlgmr.msra.gmra.mrb[76].mxu1 %v6460_v42 }
0x3498   :  { %10155 = vmatprep.mubr.msk.f32.mxu1 %vm11228_vm2, %v11227_v38 }
0x356a   :  { %v10108_v45 = vpop.f32.mrb[76].mxu1 }
0x356b   :  { %v6550_v37 = vpop.f32.mrb[77].mxu1  ;;  %v6556_v49 = vadd.f32 %v10108_v45, %v9244_v31 }
0x356c   :  { %v6551_v48 = vadd.f32 %v9244_v31, %v6550_v37 }
0x356d   :  { %v6752_v0 = vadd.f32 %v6556_v49, %v12349_v10 }
0x356e   :  { %10117 = vmatprep.mubr.msk.f32.mxu0 %vm1995_vm10, %v6551_v48  ;;  %v6751_v12 = vadd.f32 %v6551_v48, %v12352_v34 }
0x356f   :  { %10118 = vmatmul.mubr.msk.f32.vlgmr.msra.gmra.mrb[68].mxu0 %vm1995_vm10, %v6556_v49 }
0x3570   :  { %10587 = vmatpush3.bf16.msra.mxu0 %v10584_v46 }
0x3571   :  { %10589 = vmatprep.subr.bf16.mxu0 %v10588_v35 }
0x3642   :  { %v10119_v32 = vpop.f32.mrb[68].mxu0 }
0x3643   :  { %v6648_v52 = vadd.f32 %v10119_v32, %v9245_v63  ;;  %v6642_v50 = vpop.f32.mrb[69].mxu0 }
0x3644   :  { %v6643_v39 = vadd.f32 %v9245_v63, %v6642_v50 }
0x3645   :  { %v6654_v44 = vmul.f32 0.70710677, %v6648_v52  ;;  %v6652_v59 = vmul.f32 0.5, %v6648_v52 }
0x3646   :  { %v6653_v41 = vmul.f32 0.70710677, %v6643_v39  ;;  %v6651_v14 = vmul.f32 0.5, %v6643_v39 }
0x3647   :  { %10888 = verf.f32 %v6654_v44 }
0x3648   :  { %10890 = verf.f32 %v6653_v41 }
0x3651   :  { %v10889_v47 = vpop.eup %10888 }
0x3652   :  { %v10891_v53 = vpop.eup %10890  ;;  %v6658_v55 = vadd.f32 1.0, %v10889_v47 }
0x3653   :  { %v6657_v58 = vadd.f32 1.0, %v10891_v53 }
0x3654   :  { %v6660_v25 = vmul.f32 %v6658_v55, %v6652_v59 }
0x3655   :  { %v6659_v30 = vmul.f32 %v6657_v58, %v6651_v14 }
0x3657   :  { %10124 = vmatprep.mubr.msk.f32.mxu0 %vm641_vm3, %v6659_v30 }
0x3658   :  { %10125 = vmatmul.mubr.msk.f32.vlgmr.msra.gmra.mrb[70].mxu0 %vm641_vm3, %v6660_v25 }
0x3659   :  { %10591 = vmatpush3.bf16.msra.mxu0 %v10588_v35 }
0x365a   :  { %10593 = vmatprep.subr.bf16.mxu0 %v10592_v36 }
0x365d   :  { %10595 = vmatpush3.bf16.msra.mxu0 %v10592_v36 }
0x365e   :  { %10138 = vmatprep.subr.mxu0 %v11227_v38 }
0x372b   :  { %v10126_v61 = vpop.f32.mrb[70].mxu0 }
0x372c   :  { %v6748_v8 = vadd.f32 %v10126_v61, %v9248_v5  ;;  %v6742_v9 = vpop.f32.mrb[71].mxu0 }
0x372d   :  { %v6743_v13 = vadd.f32 %v9248_v5, %v6742_v9 }
0x372e   :  { %v12393_v26 = vadd.f32 %v6752_v0, %v6748_v8 }
0x372f   :  { %v12395_v15 = vadd.f32 %v6751_v12, %v6743_v13 }
0x3730   :  { %v6758_v62 = vsel %vm1995_vm10, %v12393_v26, 0.0 }
0x3731   :  { %6759 = vadd.xlane.f32.xlu1 %v6758_v62  ;;  %v6755_v16 = vsel %vm1995_vm10, %v12395_v15, 0.0 }
0x3732   :  { %6756 = vadd.xlane.f32.xlu0 %v6755_v16 }
0x37be   :  { %v6760_v17 = vpop.xlane.xlu1 %6759 }
0x37bf   :  { %v6762_v18 = vmul.f32 0.03125, %v6760_v17  ;;  %v6757_v10 = vpop.xlane.xlu0 %6756 }
0x37c0   :  { %v6761_v19 = vmul.f32 0.03125, %v6757_v10 }
0x37c1   :  { %v6764_v20 = vsub.f32 %v12393_v26, %v6762_v18 }
0x37c2   :  { %v6763_v34 = vsub.f32 %v12395_v15, %v6761_v19 }
0x37c3   :  { %v6766_v21 = vmul.f32 %v6764_v20, %v6764_v20 }
0x37c4   :  { %v6765_v22 = vmul.f32 %v6763_v34, %v6763_v34 }
0x37c5   :  { %v6770_v23 = vsel %vm1995_vm10, %v6766_v21, 0.0 }
0x37c6   :  { %6771 = vadd.xlane.f32.xlu1 %v6770_v23  ;;  %v6767_v11 = vsel %vm1995_vm10, %v6765_v22, 0.0 }
0x37c7   :  { %6768 = vadd.xlane.f32.xlu0 %v6767_v11 }
0x3853   :  { %v6772_v2 = vpop.xlane.xlu1 %6771 }
0x3854   :  { %v6774_v7 = vmul.f32 0.03125, %v6772_v2  ;;  %v6769_v4 = vpop.xlane.xlu0 %6768 }
0x3855   :  { %v6773_v40 = vmul.f32 0.03125, %v6769_v4 }
0x3856   :  { %v6776_v56 = vadd.f32 1e-05, %v6774_v7 }
0x3857   :  { %v6775_v54 = vadd.f32 1e-05, %v6773_v40 }
0x3858   :  { %10892 = vrsqrt.f32 %v6776_v56 }
0x3859   :  { %10894 = vrsqrt.f32 %v6775_v54 }
0x3862   :  { %v10893_v57 = vpop.eup %10892 }
0x3863   :  { %v10895_v42 = vpop.eup %10894  ;;  %v6780_v43 = vmul.f32 %v10893_v57, %v6764_v20 }
0x3864   :  { %v6779_v60 = vmul.f32 %v10895_v42, %v6763_v34 }
0x3866   :  { %10135 = vmatprep.mubr.msk.f32.mxu0 %vm1995_vm10, %v6779_v60 }
0x3867   :  { %10136 = vmatmul.mubr.msk.f32.vlgmr.msra.gmra.mrb[72].mxu0 %vm1995_vm10, %v6780_v43 }
0x3868   :  { %10140 = vmatprep.mubr.msk.f32.mxu0 %vm11228_vm2, %v11227_v38 }
0x393a   :  { %v10137_v31 = vpop.f32.mrb[72].mxu0 }
0x393b   :  { %v12411_v45 = vadd.f32 %v10137_v31, %v9252_v1  ;;  %v6866_v37 = vpop.f32.mrb[73].mxu0 }
0x393c   :  { %v12413_v48 = vadd.f32 %v9252_v1, %v6866_v37 }
0x393d   :  { %6953 = vrot.lane.b32.xlu1 %v12411_v45, %s11233_s22 }
0x393e   :  { %6876 = vrot.lane.b32.xlu0 %v12413_v48, %s11233_s22 }
0x39af   :  { %v6954_v51 = vpop.permute.xlu1 %6953 }
0x39b0   :  { %v6877_v49 = vpop.permute.xlu0 %6876 }
0x39b1   :  { %10139 = vmatpush3.xpose.msk.msra.mxu0 %vm429_vm5, %v6877_v49 }
0x39b2   :  { %10143 = vmatprep.subr.mxu0 %v11227_v38 }
0x39b4   :  { %10141 = vmatmul.mubr.msk.f32.vlgmr.msra.gmra.mrb[74].mxu0 %vm429_vm5, %v12413_v48 }
0x39b5   :  { %10144 = vmatpush3.xpose.msk.msra.mxu0 %vm429_vm5, %v6954_v51  ;;  %10145 = vmatprep.mubr.msk.f32.mxu0 %vm11228_vm2, %v11227_v38 }
0x39b6   :  { %10148 = vmatprep.subr.mxu0 %v11227_v38 }
0x39b8   :  { %10146 = vmatmul.mubr.msk.f32.vlgmr.msra.gmra.mrb[76].mxu0 %vm429_vm5, %v12411_v45 }
0x39b9   :  { %10150 = vmatprep.mubr.msk.f32.mxu0 %vm11228_vm2, %v11227_v38 }
0x3a87   :  { %v6948_v29 = vpop.f32.mrb[74].mxu0 }
0x3a88   :  { %v7029_v46 = vmul.f32 0.35355338, %v6948_v29  ;;  %v10142_v63 = vpop.f32.mrb[75].mxu0 }
0x3a8a   :  { %v7031_v32 = vadd.f32 %v7029_v46, %v11608_v33 }
0x3a8b   :  { %v7025_v52 = vpop.f32.mrb[76].mxu0 }
0x3a8c   :  { %v7030_v50 = vmul.f32 0.35355338, %v7025_v52  ;;  %v10147_v39 = vpop.f32.mrb[77].mxu0  ;;  %v7033_v44 = vsel %vm429_vm5, %v7031_v32, -inf }
0x3a8d   :  { %7034 = vmax.xlane.f32.xlu1 %v7033_v44 }
0x3a8e   :  { %v7032_v41 = vadd.f32 %v7030_v50, %v11604_v27 }
0x3a90   :  { %v7036_v47 = vsel %vm429_vm5, %v7032_v41, -inf }
0x3a91   :  { %7037 = vmax.xlane.f32.xlu0 %v7036_v47 }
0x3a9e   :  { %7131 = vrot.lane.b32.xlu1 %v12411_v45, %s11229_s5 }
0x3aa2   :  { %7209 = vrot.lane.b32.xlu1 %v12413_v48, %s11236_s11 }
0x3aa6   :  { %7287 = vrot.lane.b32.xlu1 %v12411_v45, %s11236_s11 }
0x3aa7   :  { %7055 = vrot.lane.b32.xlu0 %v12413_v48, %s11229_s5 }
0x3b1a   :  { %v7035_v53 = vpop.xlane.xlu1 %7034 }
0x3b1b   :  { %v7039_v55 = vsub.f32 %v7031_v32, %v7035_v53 }
0x3b1d   :  { %v7041_v14 = vmul.f32 1.442695, %v7039_v55 }
0x3b1e   :  { %v7132_v58 = vpop.permute.xlu1 %7131  ;;  %v7038_v59 = vpop.xlane.xlu0 %7037 }
0x3b1f   :  { %10896 = vpow2.f32 %v7041_v14  ;;  %v7040_v30 = vsub.f32 %v7032_v41, %v7038_v59  ;;  %10154 = vmatpush3.msra.mxu1 %v7132_v58 }
0x3b20   :  { %10163 = vmatprep.subr.mxu1 %v11227_v38 }
0x3b21   :  { %v7043_v25 = vmul.f32 1.442695, %v7040_v30 }
0x3b22   :  { %v7056_v5 = vpop.permute.xlu0 %7055  ;;  %v7210_v12 = vpop.permute.xlu1 %7209 }
0x3b23   :  { %10898 = vpow2.f32 %v7043_v25  ;;  %10149 = vmatpush3.msra.mxu0 %v7056_v5 }
0x3b24   :  { %10158 = vmatprep.subr.mxu0 %v11227_v38 }
0x3b26   :  { %v7288_v13 = vpop.permute.xlu1 %7287 }
0x3b29   :  { %v10897_v61 = vpop.eup %10896 }
0x3b2a   :  { %v7045_v0 = vsel %vm429_vm5, %v10897_v61, 0.0 }
0x3b2b   :  { %7046 = vadd.xlane.f32.xlu0 %v7045_v0 }
0x3b2d   :  { %v10899_v8 = vpop.eup %10898 }
0x3b2e   :  { %v7048_v9 = vsel %vm429_vm5, %v10899_v8, 0.0 }
0x3b2f   :  { %7049 = vadd.xlane.f32.xlu1 %v7048_v9 }
0x3b40   :  { %7285 = vrot.lane.b32.xlu1 %v12411_v45, %s11237_s16 }
0x3b41   :  { %7207 = vrot.lane.b32.xlu0 %v12413_v48, %s11237_s16 }
0x3bb8   :  { %v7047_v62 = vpop.xlane.xlu0 %7046 }
0x3bb9   :  { %10900 = vrcp.f32 %v7047_v62 }
0x3bbc   :  { %v7050_v16 = vpop.xlane.xlu1 %7049  ;;  %v7208_v20 = vpop.permute.xlu0 %7207 }
0x3bbd   :  { %10902 = vrcp.f32 %v7050_v16 }
0x3bc0   :  { %v7286_v34 = vpop.permute.xlu1 %7285 }
0x3bc3   :  { %v10901_v17 = vpop.eup %10900 }
0x3bc4   :  { %v7052_v18 = vmul.f32 %v10901_v17, %v10897_v61 }
0x3bc6   :  { %10151 = vmatmul.mubr.msk.f32.vlgmr.msra.gmra.mrb[78].mxu0 %vm429_vm5, %v7052_v18 }
0x3bc7   :  { %v10903_v10 = vpop.eup %10902  ;;  %10159 = vmatpush3.xpose.msk.msra.mxu0 %vm429_vm5, %v7210_v12  ;;  %10160 = vmatprep.mubr.msk.f32.mxu0 %vm11228_vm2, %v11227_v38 }
0x3bc8   :  { %v7054_v19 = vmul.f32 %v10903_v10, %v10899_v8  ;;  %10168 = vmatprep.subr.mxu0 %v11227_v38 }
0x3bca   :  { %10156 = vmatmul.mubr.msk.f32.vlgmr.msra.gmra.mrb[78].mxu1 %vm429_vm5, %v7054_v19  ;;  %10161 = vmatmul.mubr.msk.f32.vlgmr.msra.gmra.mrb[80].mxu0 %vm429_vm5, %v7208_v20 }
0x3bcb   :  { %10164 = vmatpush3.xpose.msk.msra.mxu1 %vm429_vm5, %v7288_v13  ;;  %10165 = vmatprep.mubr.msk.f32.mxu1 %vm11228_vm2, %v11227_v38 }
0x3bcc   :  { %10173 = vmatprep.subr.mxu1 %v11227_v38  ;;  %10170 = vmatprep.mubr.msk.f32.mxu0 %vm11228_vm2, %v11227_v38 }
0x3bce   :  { %10166 = vmatmul.mubr.msk.f32.vlgmr.msra.gmra.mrb[80].mxu1 %vm429_vm5, %v7286_v34 }
0x3bcf   :  { %10175 = vmatprep.mubr.msk.f32.mxu1 %vm11228_vm2, %v11227_v38 }
0x3c99   :  { %v12467_v21 = vpop.f32.mrb[78].mxu0 }
0x3c9a   :  { %v10152_v22 = vpop.f32.mrb[79].mxu0 }
0x3c9d   :  { %v12469_v23 = vpop.f32.mrb[78].mxu1  ;;  %v7281_v11 = vpop.f32.mrb[80].mxu0 }
0x3c9e   :  { %v7363_v24 = vmul.f32 0.35355338, %v7281_v11  ;;  %v10157_v3 = vpop.f32.mrb[79].mxu1  ;;  %v10162_v28 = vpop.f32.mrb[81].mxu0 }
0x3ca0   :  { %v7365_v35 = vadd.f32 %v7363_v24, %v11608_v33 }
0x3ca1   :  { %v7359_v6 = vpop.f32.mrb[80].mxu1 }
0x3ca2   :  { %v7364_v36 = vmul.f32 0.35355338, %v7359_v6  ;;  %v10167_v2 = vpop.f32.mrb[81].mxu1  ;;  %v7367_v7 = vsel %vm429_vm5, %v7365_v35, -inf }
0x3ca3   :  { %7368 = vmax.xlane.f32.xlu0 %v7367_v7 }
0x3ca4   :  { %v7366_v4 = vadd.f32 %v7364_v36, %v11604_v27 }
0x3ca6   :  { %v7370_v40 = vsel %vm429_vm5, %v7366_v4, -inf }
0x3ca7   :  { %7371 = vmax.xlane.f32.xlu1 %v7370_v40 }
0x3cb8   :  { %7465 = vrot.lane.b32.xlu1 %v12411_v45, %s11238_s20 }
0x3cb9   :  { %7389 = vrot.lane.b32.xlu0 %v12413_v48, %s11238_s20 }
0x3cbc   :  { %7543 = vrot.lane.b32.xlu1 %v12413_v48, %s11235_s4 }
0x3cc0   :  { %7621 = vrot.lane.b32.xlu1 %v12411_v45, %s11235_s4 }
0x3cc4   :  { %7619 = vrot.lane.b32.xlu1 %v12411_v45, %s11231_s3 }
0x3d30   :  { %v7369_v56 = vpop.xlane.xlu0 %7368 }
0x3d31   :  { %v7373_v54 = vsub.f32 %v7365_v35, %v7369_v56 }
0x3d33   :  { %v7375_v57 = vmul.f32 1.442695, %v7373_v54 }
0x3d34   :  { %v7372_v42 = vpop.xlane.xlu1 %7371  ;;  %v7390_v60 = vpop.permute.xlu0 %7389 }
0x3d35   :  { %10904 = vpow2.f32 %v7375_v57  ;;  %v7374_v43 = vsub.f32 %v7366_v4, %v7372_v42  ;;  %10169 = vmatpush3.msra.mxu0 %v7390_v60 }
0x3d36   :  { %10178 = vmatprep.subr.mxu0 %v11227_v38 }
0x3d37   :  { %v7377_v1 = vmul.f32 1.442695, %v7374_v43 }
0x3d38   :  { %v7466_v31 = vpop.permute.xlu1 %7465 }
0x3d39   :  { %10906 = vpow2.f32 %v7377_v1  ;;  %10174 = vmatpush3.msra.mxu1 %v7466_v31 }
0x3d3a   :  { %10183 = vmatprep.subr.mxu1 %v11227_v38 }
0x3d3c   :  { %v7544_v32 = vpop.permute.xlu1 %7543 }
0x3d3f   :  { %v10905_v37 = vpop.eup %10904 }
0x3d40   :  { %v7379_v49 = vsel %vm429_vm5, %v10905_v37, 0.0  ;;  %v7622_v44 = vpop.permute.xlu1 %7621 }
0x3d41   :  { %7380 = vadd.xlane.f32.xlu0 %v7379_v49 }
0x3d43   :  { %v10907_v51 = vpop.eup %10906 }
0x3d44   :  { %v7382_v29 = vsel %vm429_vm5, %v10907_v51, 0.0  ;;  %v7620_v53 = vpop.permute.xlu1 %7619 }
0x3d45   :  { %7383 = vadd.xlane.f32.xlu0 %v7382_v29 }
0x3d5b   :  { %7541 = vrot.lane.b32.xlu0 %v12413_v48, %s11231_s3 }
0x3dce   :  { %v7381_v46 = vpop.xlane.xlu0 %7380 }
0x3dcf   :  { %10908 = vrcp.f32 %v7381_v46 }
0x3dd2   :  { %v7384_v63 = vpop.xlane.xlu0 %7383 }
0x3dd3   :  { %10910 = vrcp.f32 %v7384_v63 }
0x3dd6   :  { %v7542_v47 = vpop.permute.xlu0 %7541 }
0x3dd9   :  { %v10909_v52 = vpop.eup %10908 }
0x3dda   :  { %v7386_v50 = vmul.f32 %v10909_v52, %v10905_v37 }
0x3ddc   :  { %10171 = vmatmul.mubr.msk.f32.vlgmr.msra.gmra.mrb[82].mxu0 %vm429_vm5, %v7386_v50 }
0x3ddd   :  { %v10911_v39 = vpop.eup %10910  ;;  %10179 = vmatpush3.xpose.msk.msra.mxu0 %vm429_vm5, %v7544_v32  ;;  %10180 = vmatprep.mubr.msk.f32.mxu0 %vm11228_vm2, %v11227_v38 }
0x3dde   :  { %v7388_v41 = vmul.f32 %v10911_v39, %v10907_v51  ;;  %10188 = vmatprep.subr.mxu0 %v11227_v38 }
0x3de0   :  { %10176 = vmatmul.mubr.msk.f32.vlgmr.msra.gmra.mrb[82].mxu1 %vm429_vm5, %v7388_v41  ;;  %10181 = vmatmul.mubr.msk.f32.vlgmr.msra.gmra.mrb[84].mxu0 %vm429_vm5, %v7542_v47 }
0x3de1   :  { %10184 = vmatpush3.xpose.msk.msra.mxu1 %vm429_vm5, %v7622_v44  ;;  %10185 = vmatprep.mubr.msk.f32.mxu1 %vm11228_vm2, %v11227_v38 }
0x3de2   :  { %10193 = vmatprep.subr.mxu1 %v11227_v38  ;;  %10190 = vmatprep.mubr.msk.f32.mxu0 %vm11228_vm2, %v11227_v38 }
0x3de4   :  { %10186 = vmatmul.mubr.msk.f32.vlgmr.msra.gmra.mrb[84].mxu1 %vm429_vm5, %v7620_v53 }
0x3de5   :  { %10195 = vmatprep.mubr.msk.f32.mxu1 %vm11228_vm2, %v11227_v38 }
0x3eaf   :  { %v12507_v55 = vpop.f32.mrb[82].mxu0 }
0x3eb0   :  { %v10172_v14 = vpop.f32.mrb[83].mxu0 }
0x3eb3   :  { %v12509_v58 = vpop.f32.mrb[82].mxu1  ;;  %v7615_v59 = vpop.f32.mrb[84].mxu0 }
0x3eb4   :  { %v7697_v30 = vmul.f32 0.35355338, %v7615_v59  ;;  %v10177_v25 = vpop.f32.mrb[83].mxu1  ;;  %v10182_v5 = vpop.f32.mrb[85].mxu0 }
0x3eb6   :  { %v7699_v61 = vadd.f32 %v7697_v30, %v11608_v33 }
0x3eb7   :  { %v7693_v0 = vpop.f32.mrb[84].mxu1 }
0x3eb8   :  { %v7698_v8 = vmul.f32 0.35355338, %v7693_v0  ;;  %v10187_v9 = vpop.f32.mrb[85].mxu1  ;;  %v7701_v12 = vsel %vm429_vm5, %v7699_v61, -inf }
0x3eb9   :  { %7702 = vmax.xlane.f32.xlu0 %v7701_v12  ;;  %v8240_v9 = vld [vmem:[#allocation11 + $0x20] sm:$0xff]  ;;  %v8241_v12 = vld [vmem:[#allocation11 + $0x28] sm:$0xff] }
0x3eba   :  { %v7700_v13 = vadd.f32 %v7698_v8, %v11604_v27 }
0x3ebc   :  { %v7704_v62 = vsel %vm429_vm5, %v7700_v13, -inf }
0x3ebd   :  { %7705 = vmax.xlane.f32.xlu1 %v7704_v62  ;;  %v8243_v62 = vld [vmem:[#allocation11 + $0x38] sm:$0xff] }
0x3ece   :  { %7799 = vrot.lane.b32.xlu1 %v12411_v45, %s11230_s9 }
0x3ecf   :  { %7723 = vrot.lane.b32.xlu0 %v12413_v48, %s11230_s9 }
0x3ed2   :  { %7877 = vrot.lane.b32.xlu1 %v12413_v48, %s11239_s27 }
0x3ed6   :  { %7955 = vrot.lane.b32.xlu1 %v12411_v45, %s11239_s27 }
0x3eda   :  { %7953 = vrot.lane.b32.xlu1 %v12411_v45, %s11240_s12 }
0x3f46   :  { %v7703_v16 = vpop.xlane.xlu0 %7702 }
0x3f47   :  { %v7707_v17 = vsub.f32 %v7699_v61, %v7703_v16 }
0x3f49   :  { %v7709_v18 = vmul.f32 1.442695, %v7707_v17 }
0x3f4a   :  { %v7706_v10 = vpop.xlane.xlu1 %7705  ;;  %v7724_v19 = vpop.permute.xlu0 %7723 }
0x3f4b   :  { %10912 = vpow2.f32 %v7709_v18  ;;  %v7708_v20 = vsub.f32 %v7700_v13, %v7706_v10  ;;  %10189 = vmatpush3.msra.mxu0 %v7724_v19  ;;  %v10596_v13 = vpack.c.bf16 %v8241_v12, %v8240_v9 }
0x3f4c   :  { %10198 = vmatprep.subr.mxu0 %v11227_v38 }
0x3f4d   :  { %v7711_v34 = vmul.f32 1.442695, %v7708_v20 }
0x3f4e   :  { %v7800_v22 = vpop.permute.xlu1 %7799 }
0x3f4f   :  { %10914 = vpow2.f32 %v7711_v34  ;;  %10194 = vmatpush3.msra.mxu1 %v7800_v22 }
0x3f50   :  { %10203 = vmatprep.subr.mxu1 %v11227_v38 }
0x3f52   :  { %v7878_v36 = vpop.permute.xlu1 %7877 }
0x3f55   :  { %v10913_v11 = vpop.eup %10912 }
0x3f56   :  { %v7713_v24 = vsel %vm429_vm5, %v10913_v11, 0.0  ;;  %v7956_v40 = vpop.permute.xlu1 %7955 }
0x3f57   :  { %7714 = vadd.xlane.f32.xlu0 %v7713_v24 }
0x3f59   :  { %v10915_v3 = vpop.eup %10914 }
0x3f5a   :  { %v7716_v28 = vsel %vm429_vm5, %v10915_v3, 0.0  ;;  %v7954_v57 = vpop.permute.xlu1 %7953 }
0x3f5b   :  { %7717 = vadd.xlane.f32.xlu0 %v7716_v28 }
0x3f71   :  { %7875 = vrot.lane.b32.xlu0 %v12413_v48, %s11240_s12 }
0x3fe4   :  { %v7715_v35 = vpop.xlane.xlu0 %7714 }
0x3fe5   :  { %10916 = vrcp.f32 %v7715_v35 }
0x3fe8   :  { %v7718_v6 = vpop.xlane.xlu0 %7717 }
0x3fe9   :  { %10918 = vrcp.f32 %v7718_v6 }
0x3fec   :  { %v7876_v54 = vpop.permute.xlu0 %7875 }
0x3fef   :  { %v10917_v2 = vpop.eup %10916 }
0x3ff0   :  { %v7720_v7 = vmul.f32 %v10917_v2, %v10913_v11 }
0x3ff2   :  { %10191 = vmatmul.mubr.msk.f32.vlgmr.msra.gmra.mrb[86].mxu0 %vm429_vm5, %v7720_v7 }
0x3ff3   :  { %v10919_v4 = vpop.eup %10918  ;;  %10199 = vmatpush3.xpose.msk.msra.mxu0 %vm429_vm5, %v7878_v36  ;;  %10200 = vmatprep.mubr.msk.f32.mxu0 %vm11228_vm2, %v11227_v38 }
0x3ff4   :  { %v7722_v56 = vmul.f32 %v10919_v4, %v10915_v3  ;;  %10208 = vmatprep.subr.mxu0 %v11227_v38  ;;  %v9280_v4 = vld [vmem:[%s12693_s18 + $0x1] ss:$0 sm:$0xff] }
0x3ff6   :  { %10196 = vmatmul.mubr.msk.f32.vlgmr.msra.gmra.mrb[86].mxu1 %vm429_vm5, %v7722_v56  ;;  %10201 = vmatmul.mubr.msk.f32.vlgmr.msra.gmra.mrb[88].mxu0 %vm429_vm5, %v7876_v54 }
0x3ff7   :  { %10204 = vmatpush3.xpose.msk.msra.mxu1 %vm429_vm5, %v7956_v40  ;;  %10205 = vmatprep.mubr.msk.f32.mxu1 %vm11228_vm2, %v11227_v38 }
0x3ff8   :  { %10213 = vmatprep.subr.mxu1 %v11227_v38  ;;  %10210 = vmatprep.mubr.msk.f32.mxu0 %vm11228_vm2, %v11227_v38 }
0x3ffa   :  { %10206 = vmatmul.mubr.msk.f32.vlgmr.msra.gmra.mrb[88].mxu1 %vm429_vm5, %v7954_v57 }
0x3ffb   :  { %10215 = vmatprep.mubr.msk.f32.mxu1 %vm11228_vm2, %v11227_v38 }
0x40c5   :  { %v7795_v42 = vpop.f32.mrb[86].mxu0 }
0x40c6   :  { %v10192_v60 = vpop.f32.mrb[87].mxu0 }
0x40c9   :  { %v7871_v43 = vpop.f32.mrb[86].mxu1  ;;  %v7949_v1 = vpop.f32.mrb[88].mxu0 }
0x40ca   :  { %v8031_v31 = vmul.f32 0.35355338, %v7949_v1  ;;  %v10197_v37 = vpop.f32.mrb[87].mxu1  ;;  %v10202_v49 = vpop.f32.mrb[89].mxu0 }
0x40cc   :  { %v8033_v51 = vadd.f32 %v8031_v31, %v11608_v33 }
0x40cd   :  { %v8027_v29 = vpop.f32.mrb[88].mxu1 }
0x40ce   :  { %v8032_v46 = vmul.f32 0.35355338, %v8027_v29  ;;  %v10207_v63 = vpop.f32.mrb[89].mxu1  ;;  %v8035_v32 = vsel %vm429_vm5, %v8033_v51, -inf }
0x40cf   :  { %8036 = vmax.xlane.f32.xlu0 %v8035_v32  ;;  %v8362_v63 = vld [vmem:[#allocation12 + $0x20] sm:$0xff]  ;;  %v8363_v32 = vld [vmem:[#allocation12 + $0x28] sm:$0xff] }
0x40d0   :  { %v8034_v52 = vadd.f32 %v8032_v46, %v11604_v27 }
0x40d2   :  { %v8038_v50 = vsel %vm429_vm5, %v8034_v52, -inf }
0x40d3   :  { %8039 = vmax.xlane.f32.xlu1 %v8038_v50  ;;  %v10604_v50 = vpack.c.bf16 %v8363_v32, %v8362_v63  ;;  %v9304_v63 = vld [vmem:[%s12696_s1 + $0x1] ss:$0 sm:$0xff] }
0x40e4   :  { %8133 = vrot.lane.b32.xlu1 %v12411_v45, %s11241_s15 }
0x40e8   :  { %8211 = vrot.lane.b32.xlu1 %v12507_v55, %s11219_s26 }
0x40ec   :  { %8213 = vrot.lane.b32.xlu1 %v12509_v58, %s11219_s26  ;;  %s12699_s26 = sld [smem:[#allocation41_spill]] }
0x40f0   :  { %8221 = vrot.lane.b32.xlu1 %v7871_v43, %s11234_s0 }
0x415c   :  { %v8037_v33 = vpop.xlane.xlu0 %8036 }
0x415d   :  { %v8041_v39 = vsub.f32 %v8033_v51, %v8037_v33  ;;  %v8365_v33 = vld [vmem:[#allocation12 + $0x38] sm:$0xff] }
0x415f   :  { %v8043_v44 = vmul.f32 1.442695, %v8041_v39 }
0x4160   :  { %v8040_v41 = vpop.xlane.xlu1 %8039 }
0x4161   :  { %10920 = vpow2.f32 %v8043_v44  ;;  %v8042_v27 = vsub.f32 %v8034_v52, %v8040_v41  ;;  %v8364_v52 = vld [vmem:[#allocation12 + $0x30] sm:$0xff]  ;;  %v9287_v44 = vld [vmem:[%s12694_s23 + $0x80] sm:$0xff]  ;;  %v9288_v41 = vld [vmem:[%s12694_s23 + $0x88] sm:$0xff] }
0x4162   :  { %v10608_v39 = vpack.c.bf16 %v8365_v33, %v8364_v52 }
0x4163   :  { %v8045_v47 = vmul.f32 1.442695, %v8042_v27  ;;  %v9289_v27 = vld [vmem:[%s12694_s23 + $0x90] sm:$0xff] }
0x4164   :  { %v8134_v53 = vpop.permute.xlu1 %8133 }
0x4165   :  { %10922 = vpow2.f32 %v8045_v47  ;;  %10214 = vmatpush3.msra.mxu1 %v8134_v53  ;;  %v10612_v47 = vpack.c.bf16 %v9288_v41, %v9287_v44  ;;  %v9290_v53 = vld [vmem:[%s12694_s23 + $0x98] sm:$0xff] }
0x4166   :  { %10605 = vmatprep.subr.bf16.mxu1 %v10604_v50  ;;  %v8671_v44 = vld [vmem:[#allocation15 + $0x18] sm:$0xff] }
0x4168   :  { %v8212_v20 = vpop.permute.xlu1 %8211 }
0x4169   :  { %v8233_v11 = vsel %vm429_vm5, %v12467_v21, %v8212_v20  ;;  %v9298_v20 = vld [vmem:[%s12694_s23 + $0xd8] sm:$0xff] }
0x416b   :  { %v10921_v14 = vpop.eup %10920 }
0x416c   :  { %v8047_v45 = vsel %vm429_vm5, %v10921_v14, 0.0  ;;  %v8214_v34 = vpop.permute.xlu1 %8213 }
0x416d   :  { %8048 = vadd.xlane.f32.xlu0 %v8047_v45  ;;  %v8234_v6 = vsel %vm429_vm5, %v12469_v23, %v8214_v34  ;;  %v9291_v45 = vld [vmem:[%s12694_s23 + $0xa0] sm:$0xff] }
0x416f   :  { %v10923_v55 = vpop.eup %10922 }
0x4170   :  { %v8050_v59 = vsel %vm429_vm5, %v10923_v55, 0.0  ;;  %v8222_v24 = vpop.permute.xlu1 %8221 }
0x4171   :  { %8051 = vadd.xlane.f32.xlu0 %v8050_v59  ;;  %v8236_v36 = vsel %vm641_vm3, %v8234_v6, %v8222_v24  ;;  %v8566_v6 = vld [vmem:[#allocation14 + $0x20] sm:$0xff] }
0x4187   :  { %8057 = vrot.lane.b32.xlu0 %v12413_v48, %s11241_s15  ;;  %v8242_v48 = vld [vmem:[#allocation11 + $0x30] sm:$0xff] }
0x4188   :  { %v10600_v16 = vpack.c.bf16 %v8243_v62, %v8242_v48  ;;  %v9293_v48 = vld [vmem:[%s12694_s23 + $0xb0] sm:$0xff]  ;;  %v9294_v62 = vld [vmem:[%s12694_s23 + $0xb8] sm:$0xff] }
0x418b   :  { %8219 = vrot.lane.b32.xlu0 %v7795_v42, %s11234_s0 }
0x41fa   :  { %v8049_v58 = vpop.xlane.xlu0 %8048 }
0x41fb   :  { %10924 = vrcp.f32 %v8049_v58 }
0x41fe   :  { %v8052_v30 = vpop.xlane.xlu0 %8051 }
0x41ff   :  { %10926 = vrcp.f32 %v8052_v30 }
0x4202   :  { %v8058_v25 = vpop.permute.xlu0 %8057 }
0x4203   :  { %10209 = vmatpush3.msra.mxu0 %v8058_v25 }
0x4204   :  { %10597 = vmatprep.subr.bf16.mxu0 %v10596_v13 }
0x4205   :  { %v10925_v5 = vpop.eup %10924 }
0x4206   :  { %v8054_v61 = vmul.f32 %v10925_v5, %v10921_v14  ;;  %v8220_v22 = vpop.permute.xlu0 %8219  ;;  %v10616_v14 = vpack.c.bf16 %v9290_v53, %v9289_v27  ;;  %v9306_v27 = vld [vmem:[%s12697_s14 + $0x1] ss:$0 sm:$0xff] }
0x4207   :  { %v8235_v3 = vsel %vm641_vm3, %v8233_v11, %v8220_v22  ;;  %v9299_v22 = vld [vmem:[%s12694_s23 + $0xe0] sm:$0xff]  ;;  %v9300_v11 = vld [vmem:[%s12694_s23 + $0xe8] sm:$0xff] }
0x4208   :  { %10211 = vmatmul.mubr.msk.f32.vlgmr.msra.gmra.mrb[90].mxu0 %vm429_vm5, %v8054_v61  ;;  %v10636_v24 = vpack.c.bf16 %v9300_v11, %v9299_v22 }
0x4209   :  { %v10927_v0 = vpop.eup %10926  ;;  %10599 = vmatpush3.bf16.msra.mxu0 %v10596_v13 }
0x420a   :  { %v8056_v8 = vmul.f32 %v10927_v0, %v10923_v55  ;;  %10601 = vmatprep.subr.bf16.mxu0 %v10600_v16  ;;  %v9292_v55 = vld [vmem:[%s12694_s23 + $0xa8] sm:$0xff] }
0x420b   :  { %v10620_v59 = vpack.c.bf16 %v9292_v55, %v9291_v45 }
0x420c   :  { %10216 = vmatmul.mubr.msk.f32.vlgmr.msra.gmra.mrb[90].mxu1 %vm429_vm5, %v8056_v8 }
0x420d   :  { %10603 = vmatpush3.bf16.msra.mxu0 %v10600_v16  ;;  %10607 = vmatpush3.bf16.msra.mxu1 %v10604_v50  ;;  %v10624_v16 = vpack.c.bf16 %v9294_v62, %v9293_v48 }
0x420e   :  { %10609 = vmatprep.subr.bf16.mxu1 %v10608_v39  ;;  %10613 = vmatprep.subr.bf16.mxu0 %v10612_v47 }
0x4211   :  { %10611 = vmatpush3.bf16.msra.mxu1 %v10608_v39  ;;  %v8670_v39 = vld [vmem:[#allocation15 + $0x10] sm:$0xff] }
0x4212   :  { %v10652_v41 = vpack.c.bf16 %v8671_v44, %v8670_v39 }
0x42db   :  { %v8129_v17 = vpop.f32.mrb[90].mxu0 }
0x42dc   :  { %8227 = vrot.lane.b32.xlu0 %v8129_v17, %s11242_s24  ;;  %v10212_v18 = vpop.f32.mrb[91].mxu0  ;;  %v9295_v17 = vld [vmem:[%s12694_s23 + $0xc0] sm:$0xff] }
0x42dd   :  { %v9296_v18 = vld [vmem:[%s12694_s23 + $0xc8] sm:$0xff] }
0x42df   :  { %v8205_v10 = vpop.f32.mrb[90].mxu1 }
0x42e0   :  { %8229 = vrot.lane.b32.xlu1 %v8205_v10, %s11242_s24  ;;  %v10217_v19 = vpop.f32.mrb[91].mxu1  ;;  %v10628_v10 = vpack.c.bf16 %v9296_v18, %v9295_v17 }
0x42e1   :  { %v9297_v19 = vld [vmem:[%s12694_s23 + $0xd0] sm:$0xff] }
0x42e2   :  { %v10632_v34 = vpack.c.bf16 %v9298_v20, %v9297_v19 }
0x434e   :  { %v8228_v28 = vpop.permute.xlu0 %8227 }
0x434f   :  { %v8237_v35 = vsel %vm6236_vm12, %v8235_v3, %v8228_v28  ;;  %v9301_v3 = vld [vmem:[%s12694_s23 + $0xf0] sm:$0xff]  ;;  %v9302_v28 = vld [vmem:[%s12694_s23 + $0xf8] sm:$0xff] }
0x4350   :  { %10226 = vmatprep.mubr.msk.f32.mxu0 %vm1995_vm10, %v8237_v35  ;;  %v10640_v35 = vpack.c.bf16 %v9302_v28, %v9301_v3 }
0x4352   :  { %v8230_v2 = vpop.permute.xlu1 %8229 }
0x4353   :  { %v8238_v7 = vsel %vm6236_vm12, %v8236_v36, %v8230_v2  ;;  %v8567_v36 = vld [vmem:[#allocation14 + $0x28] sm:$0xff] }
0x4354   :  { %10227 = vmatmul.mubr.msk.f32.vlgmr.msra.gmra.mrb[92].mxu0 %vm1995_vm10, %v8238_v7  ;;  %v10644_v2 = vpack.c.bf16 %v8567_v36, %v8566_v6  ;;  %v9284_v7 = vld [vmem:[%s12695_s19 + $0x1] ss:$0 sm:$0xff] }
0x4355   :  { %10615 = vmatpush3.bf16.msra.mxu0 %v10612_v47 }
0x4356   :  { %10617 = vmatprep.subr.bf16.mxu0 %v10616_v14  ;;  %10645 = vmatprep.subr.bf16.mxu1 %v10644_v2 }
0x4359   :  { %10619 = vmatpush3.bf16.msra.mxu0 %v10616_v14 }
0x435a   :  { %10621 = vmatprep.subr.bf16.mxu0 %v10620_v59 }
0x435d   :  { %10623 = vmatpush3.bf16.msra.mxu0 %v10620_v59 }
0x435e   :  { %10625 = vmatprep.subr.bf16.mxu0 %v10624_v16 }
0x4361   :  { %10627 = vmatpush3.bf16.msra.mxu0 %v10624_v16 }
0x4362   :  { %10629 = vmatprep.subr.bf16.mxu0 %v10628_v10 }
0x4365   :  { %10631 = vmatpush3.bf16.msra.mxu0 %v10628_v10  ;;  %v9313_v10 = vld [vmem:[#allocation17] ss:$0 sm:$0xff] }
0x4366   :  { %10633 = vmatprep.subr.bf16.mxu0 %v10632_v34 }
0x4369   :  { %10635 = vmatpush3.bf16.msra.mxu0 %v10632_v34 }
0x436a   :  { %10637 = vmatprep.subr.bf16.mxu0 %v10636_v24 }
0x436d   :  { %10639 = vmatpush3.bf16.msra.mxu0 %v10636_v24  ;;  %v11243_v24 = vmov 0  }
0x436e   :  { %10641 = vmatprep.subr.bf16.mxu0 %v10640_v35  ;;  %10727 = vset.pattern.permute.xlu1 %v11243_v24 }
0x436f   :  { %10726 = vset.pattern.permute.xlu0 %v11243_v24 }
0x4371   :  { %10643 = vmatpush3.bf16.msra.mxu0 %v10640_v35 }
0x4427   :  { %v10228_v21 = vpop.f32.mrb[92].mxu0 }
0x4428   :  { %v8330_v40 = vadd.f32 %v10228_v21, %v9280_v4  ;;  %v8324_v56 = vpop.f32.mrb[93].mxu0 }
0x4429   :  { %v8325_v54 = vadd.f32 %v9280_v4, %v8324_v56 }
0x442a   :  { %v12579_v57 = vadd.f32 %v8330_v40, %v12393_v26 }
0x442b   :  { %v12582_v42 = vadd.f32 %v8325_v54, %v12395_v15 }
0x442c   :  { %v8338_v23 = vsel %vm1995_vm10, %v12579_v57, 0.0 }
0x442d   :  { %8339 = vadd.xlane.f32.xlu1 %v8338_v23  ;;  %v8335_v60 = vsel %vm1995_vm10, %v12582_v42, 0.0 }
0x442e   :  { %8336 = vadd.xlane.f32.xlu0 %v8335_v60 }
0x44ba   :  { %v8340_v43 = vpop.xlane.xlu1 %8339 }
0x44bb   :  { %v8342_v1 = vmul.f32 0.03125, %v8340_v43  ;;  %v8337_v31 = vpop.xlane.xlu0 %8336 }
0x44bc   :  { %v8341_v37 = vmul.f32 0.03125, %v8337_v31 }
0x44bd   :  { %v8344_v49 = vsub.f32 %v12579_v57, %v8342_v1 }
0x44be   :  { %v8343_v26 = vsub.f32 %v12582_v42, %v8341_v37 }
0x44bf   :  { %v8346_v29 = vmul.f32 %v8344_v49, %v8344_v49 }
0x44c0   :  { %v8345_v51 = vmul.f32 %v8343_v26, %v8343_v26 }
0x44c1   :  { %v8350_v46 = vsel %vm1995_vm10, %v8346_v29, 0.0  ;;  %v8569_v29 = vld [vmem:[#allocation14 + $0x38] sm:$0xff] }
0x44c2   :  { %v8347_v15 = vsel %vm1995_vm10, %v8345_v51, 0.0 }
0x44c3   :  { %8348 = vadd.xlane.f32.xlu0 %v8347_v15  ;;  %v8568_v15 = vld [vmem:[#allocation14 + $0x30] sm:$0xff] }
0x44c7   :  { %8351 = vadd.xlane.f32.xlu0 %v8350_v46  ;;  %v10648_v46 = vpack.c.bf16 %v8569_v29, %v8568_v15 }
0x4550   :  { %v8349_v58 = vpop.xlane.xlu0 %8348 }
0x4551   :  { %v8353_v30 = vmul.f32 0.03125, %v8349_v58 }
0x4553   :  { %v8355_v25 = vadd.f32 1e-05, %v8353_v30 }
0x4554   :  { %v8352_v5 = vpop.xlane.xlu0 %8351 }
0x4555   :  { %10928 = vrsqrt.f32 %v8355_v25  ;;  %v8354_v61 = vmul.f32 0.03125, %v8352_v5 }
0x4557   :  { %v8356_v0 = vadd.f32 1e-05, %v8354_v61 }
0x4559   :  { %10930 = vrsqrt.f32 %v8356_v0 }
0x455f   :  { %v10929_v8 = vpop.eup %10928 }
0x4560   :  { %v8359_v9 = vmul.f32 %v10929_v8, %v8343_v26 }
0x4562   :  { %10237 = vmatprep.mubr.msk.f32.mxu1 %vm1995_vm10, %v8359_v9 }
0x4563   :  { %v10931_v12 = vpop.eup %10930 }
0x4564   :  { %v8360_v13 = vmul.f32 %v10931_v12, %v8344_v49  ;;  %v9310_v12 = vld [vmem:[%s12698_s28 + $0x1] ss:$0 sm:$0xff] }
0x4566   :  { %10238 = vmatmul.mubr.msk.f32.vlgmr.msra.gmra.mrb[92].mxu1 %vm1995_vm10, %v8360_v13 }
0x4567   :  { %10647 = vmatpush3.bf16.msra.mxu1 %v10644_v2 }
0x4568   :  { %10649 = vmatprep.subr.bf16.mxu1 %v10648_v46 }
0x456b   :  { %10651 = vmatpush3.bf16.msra.mxu1 %v10648_v46 }
0x456c   :  { %10653 = vmatprep.subr.bf16.mxu1 %v10652_v41 }
0x4639   :  { %v10239_v4 = vpop.f32.mrb[92].mxu1 }
0x463a   :  { %v8452_v21 = vadd.f32 %v10239_v4, %v9284_v7  ;;  %v8446_v40 = vpop.f32.mrb[93].mxu1 }
0x463b   :  { %v8447_v56 = vadd.f32 %v9284_v7, %v8446_v40 }
0x463c   :  { %v8458_v54 = vmul.f32 0.70710677, %v8452_v21  ;;  %v8456_v49 = vmul.f32 0.5, %v8452_v21 }
0x463d   :  { %v8457_v23 = vmul.f32 0.70710677, %v8447_v56  ;;  %v8455_v31 = vmul.f32 0.5, %v8447_v56 }
0x463e   :  { %10932 = verf.f32 %v8458_v54 }
0x463f   :  { %10934 = verf.f32 %v8457_v23 }
0x4648   :  { %v10933_v60 = vpop.eup %10932 }
0x4649   :  { %v10935_v43 = vpop.eup %10934  ;;  %v8462_v1 = vadd.f32 1.0, %v10933_v60 }
0x464a   :  { %v8461_v37 = vadd.f32 1.0, %v10935_v43 }
0x464b   :  { %v8464_v51 = vmul.f32 %v8462_v1, %v8456_v49 }
0x464c   :  { %v8463_v26 = vmul.f32 %v8461_v37, %v8455_v31 }
0x464e   :  { %10272 = vmatprep.mubr.f32.mxu0 %v8463_v26 }
0x464f   :  { %10273 = vmatmul.mubr.f32.vlgmr.msra.gmra.mrb[94].mxu0 %v8464_v51 }
0x4722   :  { %v10274_v32 = vpop.f32.mrb[94].mxu0 }
0x4723   :  { %v8556_v52 = vpop.f32.mrb[95].mxu0  ;;  %v8562_v33 = vadd.f32 %v10274_v32, %v9304_v63 }
0x4724   :  { %v8557_v50 = vadd.f32 %v9304_v63, %v8556_v52 }
0x4725   :  { %v8762_v48 = vadd.f32 %v8562_v33, %v12579_v57  ;;  %v9314_v57 = vld [vmem:[#allocation2] ss:$0 sm:$0xff] }
0x4726   :  { %10283 = vmatprep.mubr.msk.f32.mxu1 %vm1995_vm10, %v8557_v50  ;;  %v8761_v17 = vadd.f32 %v8557_v50, %v12582_v42 }
0x4727   :  { %10284 = vmatmul.mubr.msk.f32.vlgmr.msra.gmra.mrb[94].mxu1 %vm1995_vm10, %v8562_v33 }
0x4728   :  { %10655 = vmatpush3.bf16.msra.mxu1 %v10652_v41 }
0x47fa   :  { %v10285_v47 = vpop.f32.mrb[94].mxu1 }
0x47fb   :  { %v8656_v53 = vadd.f32 %v10285_v47, %v9306_v27  ;;  %v8650_v14 = vpop.f32.mrb[95].mxu1 }
0x47fc   :  { %v8651_v45 = vadd.f32 %v9306_v27, %v8650_v14 }
0x47fd   :  { %v8662_v55 = vmul.f32 0.70710677, %v8656_v53  ;;  %v8660_v0 = vmul.f32 0.5, %v8656_v53 }
0x47fe   :  { %v8661_v59 = vmul.f32 0.70710677, %v8651_v45  ;;  %v8659_v5 = vmul.f32 0.5, %v8651_v45 }
0x47ff   :  { %10936 = verf.f32 %v8662_v55 }
0x4800   :  { %10938 = verf.f32 %v8661_v59 }
0x4809   :  { %v10937_v58 = vpop.eup %10936 }
0x480a   :  { %v10939_v30 = vpop.eup %10938  ;;  %v8666_v25 = vadd.f32 1.0, %v10937_v58 }
0x480b   :  { %v8665_v61 = vadd.f32 1.0, %v10939_v30 }
0x480c   :  { %v8668_v9 = vmul.f32 %v8666_v25, %v8660_v0 }
0x480d   :  { %v8667_v8 = vmul.f32 %v8665_v61, %v8659_v5 }
0x480f   :  { %10290 = vmatprep.mubr.msk.f32.mxu1 %vm641_vm3, %v8667_v8 }
0x4810   :  { %10291 = vmatmul.mubr.msk.f32.vlgmr.msra.gmra.mrb[96].mxu1 %vm641_vm3, %v8668_v9 }
0x4811   :  { %10301 = vmatprep.mubr.msk.f32.mxu1 %vm11228_vm2, %v11227_v38 }
0x48e3   :  { %v10292_v13 = vpop.f32.mrb[96].mxu1 }
0x48e4   :  { %v8758_v62 = vadd.f32 %v10292_v13, %v9310_v12  ;;  %v8752_v16 = vpop.f32.mrb[97].mxu1 }
0x48e5   :  { %v8753_v18 = vadd.f32 %v9310_v12, %v8752_v16 }
0x48e6   :  { %v8764_v19 = vadd.f32 %v8762_v48, %v8758_v62 }
0x48e7   :  { %v12622_v20 = vadd.f32 %v8761_v17, %v8753_v18 }
0x48e8   :  { %v8773_v34 = vmul.f32 %v9313_v10, %v8764_v19 }
0x48e9   :  { %v8772_v22 = vmul.f32 %v9313_v10, %v12622_v20 }
0x48ea   :  { %v8777_v11 = vsel %vm1995_vm10, %v8773_v34, 0.0 }
0x48eb   :  { %8778 = vadd.xlane.f32.xlu1 %v8777_v11  ;;  %v8774_v38 = vsel %vm1995_vm10, %v8772_v22, 0.0 }
0x48ec   :  { %8775 = vadd.xlane.f32.xlu0 %v8774_v38 }
0x4978   :  { %v8779_v42 = vpop.xlane.xlu1 %8778 }
0x4979   :  { %v8788_v3 = vadd.f32 %v9314_v57, %v8779_v42  ;;  %v8776_v28 = vpop.xlane.xlu0 %8775 }
0x497a   :  { %v8787_v35 = vadd.f32 %v9314_v57, %v8776_v28 }
0x497b   :  { %v8797_v6 = vsel %vm8789_vm13, %v8788_v3, -inf }
0x497c   :  { %v8798_v36 = vrot.slane %v8797_v6, 4  ;;  %v8790_v2 = vsel %vm8789_vm13, %v8787_v35, -inf }
0x497d   :  { %v8791_v7 = vrot.slane %v8790_v2, 4 }
0x497e   :  { %v8799_v4 = vmax.f32 %v8797_v6, %v8798_v36 }
0x497f   :  { %v8792_v21 = vmax.f32 %v8790_v2, %v8791_v7 }
0x4980   :  { %v8800_v40 = vrot.slane %v8799_v4, 2 }
0x4981   :  { %v8793_v56 = vrot.slane %v8792_v21, 2 }
0x4982   :  { %v8801_v54 = vmax.f32 %v8799_v4, %v8800_v40  ;;  %v8907_v4 = vld [vmem:[%s11412_s29] sm:$0xff]  ;;  %v8909_v40 = vld [vmem:[%s11412_s29 + $0x10] sm:$0xff] }
0x4983   :  { %v8794_v23 = vmax.f32 %v8792_v21, %v8793_v56  ;;  %v8908_v21 = vld [vmem:[%s11412_s29 + $0x8] sm:$0xff]  ;;  %v11244_v56 = vmov 0.0|0.0  }
0x4984   :  { %v8802_v60 = vrot.slane %v8801_v54, 1  ;;  %10656 = vmatprep.subr.bf16.mxu1 %v11244_v56 }
0x4985   :  { %v8795_v43 = vrot.slane %v8794_v23, 1 }
0x4986   :  { %v8803_v1 = vmax.f32 %v8801_v54, %v8802_v60  ;;  %v10657_v54 = vpack.c.bf16 %v8908_v21, %v8907_v4 }
0x4987   :  { %v8796_v31 = vmax.f32 %v8794_v23, %v8795_v43  ;;  %v8910_v23 = vld [vmem:[%s11412_s29 + $0x18] sm:$0xff]  ;;  %s11245_s29 = smov [#allocation18]  }
0x4988   :  { %v8805_v37 = vsub.f32 %v8788_v3, %v8803_v1  ;;  %10658 = vmatpush3.bf16.msra.mxu1 %v10657_v54  ;;  %v10660_v60 = vpack.c.bf16 %v8910_v23, %v8909_v40  ;;  %s9002_s5 = sshll.u32 %s11245_s29, 4  ;;  %s9003_s5 = int_to_ptr.vmem [resolvable:$true] %s9002_s5 }
0x4989   :  { %v8804_v49 = vsub.f32 %v8787_v35, %v8796_v31  ;;  %10659 = vmatprep.subr.bf16.mxu1 %v11244_v56  ;;  %s11148_s9 = scalar_lea.vmem %s9003_s5, 32  ;;  %p11153_p3 = scmp.lt.s32.totalorder %s9003_s5, %s9003_s5 }
0x498a   :  { %v8808_v26 = vmul.f32 1.442695, %v8805_v37  ;;  %p11149_p2 = scmp.ne.s32.totalorder %s9003_s5, %s11148_s9  ;;  %p11154_p4 = scmp.lt.s32.totalorder %s11148_s9, %s11148_s9 }
0x498b   :  { %v8806_v51 = vmul.f32 1.442695, %v8804_v49 }
0x498c   :  { %10940 = vpow2.f32 %v8808_v26  ;;  %10661 = vmatpush3.bf16.msra.mxu1 %v10660_v60  ;;  %p11155_p5 = por %p11154_p4, %p11153_p3 }
0x498d   :  { %10942 = vpow2.f32 %v8806_v51  ;;  %v9315_v51 = vld [vmem:[%s12699_s26] ss:$0 sm:$0xff] }
0x498e   :  { %p11156_p6 = pnand %p11155_p5, %p11149_p2 }
0x4996   :  { %v10941_v15 = vpop.eup %10940 }
0x4997   :  { %v10943_v29 = vpop.eup %10942  ;;  %v8817_v46 = vsel %vm8789_vm13, %v10941_v15, 0.0 }
0x4998   :  { %v8818_v63 = vrot.slane %v8817_v46, 4  ;;  %v8810_v32 = vsel %vm8789_vm13, %v10943_v29, 0.0 }
0x4999   :  { %v8811_v52 = vrot.slane %v8810_v32, 4 }
0x499a   :  { %v8819_v50 = vadd.f32 %v8818_v63, %v8817_v46  ;;  %v9316_v63 = vld [vmem:[%s11407_s6] ss:$0 sm:$0xff] }
0x499b   :  { %v8812_v33 = vadd.f32 %v8811_v52, %v8810_v32 }
0x499c   :  { %v8820_v39 = vrot.slane %v8819_v50, 2 }
0x499d   :  { %v8813_v44 = vrot.slane %v8812_v33, 2 }
0x499e   :  { %v8821_v41 = vadd.f32 %v8820_v39, %v8819_v50  ;;  %v9317_v39 = vld [vmem:[%s11417_s25] ss:$0 sm:$0xff] }
0x499f   :  { %v8814_v27 = vadd.f32 %v8813_v44, %v8812_v33 }
0x49a0   :  { %v8822_v47 = vrot.slane %v8821_v41, 1 }
0x49a1   :  { %v8815_v53 = vrot.slane %v8814_v27, 1 }
0x49a2   :  { %v8823_v14 = vadd.f32 %v8822_v47, %v8821_v41 }
0x49a3   :  { %v8816_v45 = vadd.f32 %v8815_v53, %v8814_v27 }
0x49a4   :  { %10944 = vrcp.f32 %v8823_v14 }
0x49a5   :  { %10946 = vrcp.f32 %v8816_v45 }
0x49ae   :  { %v10945_v55 = vpop.eup %10944 }
0x49af   :  { %v10947_v59 = vpop.eup %10946  ;;  %v8827_v58 = vmul.f32 %v10945_v55, %v10941_v15 }
0x49b0   :  { %v8825_v30 = vmul.f32 %v10947_v59, %v10943_v29 }
0x49b1   :  { %8835 = vperm.xlu1 %10727, %v8827_v58  }
0x49b2   :  { %8830 = vperm.xlu0 %10726, %v8825_v30  }
0x4a30   :  { %v8836_v25 = vpop.permute.xlu1 %8835 }
0x4a31   :  { %v8839_v5 = vmul.f32 %v8836_v25, %v8764_v19  ;;  %v8831_v61 = vpop.permute.xlu0 %8830 }
0x4a32   :  { %v8838_v0 = vmul.f32 %v8831_v61, %v12622_v20 }
0x4a33   :  { %v8847_v8 = vsel %vm1995_vm10, %v8839_v5, 0.0 }
0x4a34   :  { %v8848_v9 = vrot.slane %v8847_v8, 4  ;;  %v8840_v12 = vsel %vm1995_vm10, %v8838_v0, 0.0 }
0x4a35   :  { %v8841_v13 = vrot.slane %v8840_v12, 4 }
0x4a36   :  { %v8849_v48 = vadd.f32 %v8848_v9, %v8847_v8 }
0x4a37   :  { %v8842_v62 = vadd.f32 %v8841_v13, %v8840_v12 }
0x4a38   :  { %v8850_v16 = vrot.slane %v8849_v48, 2 }
0x4a39   :  { %v8843_v17 = vrot.slane %v8842_v62, 2 }
0x4a3a   :  { %v8851_v18 = vadd.f32 %v8850_v16, %v8849_v48 }
0x4a3b   :  { %v8844_v10 = vadd.f32 %v8843_v17, %v8842_v62 }
0x4a3c   :  { %v8852_v34 = vrot.slane %v8851_v18, 1 }
0x4a3d   :  { %v8845_v22 = vrot.slane %v8844_v10, 1 }
0x4a3e   :  { %v8853_v11 = vadd.f32 %v8852_v34, %v8851_v18 }
0x4a3f   :  { %v8846_v19 = vadd.f32 %v8845_v22, %v8844_v10 }
0x4a41   :  { %v8859_v20 = vsel %vm8858_vm14, %v8853_v11, %v8846_v19 }
0x4a42   :  { %v8862_v38 = vsel %vm8861_vm15, %v8859_v20, 0.0 }
0x4a43   :  { %8863 = vadd.xlane.f32.xlu1 %v8862_v38 }
0x4ad0   :  { %v8864_v24 = vpop.xlane.xlu1 %8863 }
0x4ad1   :  { %v8865_v57 = vmul.f32 0.03125, %v8864_v24 }
0x4ad3   :  { %v8867_v42 = vrot.slane %v8865_v57, 1  ;;  %v8870_v3 = vsub.f32 %v8846_v19, %v8865_v57 }
0x4ad5   :  { %v8871_v28 = vsub.f32 %v8853_v11, %v8867_v42  ;;  %v8872_v6 = vmul.f32 %v8870_v3, %v8870_v3 }
0x4ad7   :  { %v8873_v35 = vmul.f32 %v8871_v28, %v8871_v28 }
0x4ad9   :  { %v8876_v36 = vrot.slane %v8873_v35, 7 }
0x4adb   :  { %v8877_v2 = vsel %vm8858_vm14, %v8876_v36, %v8872_v6 }
0x4adc   :  { %v8879_v7 = vsel %vm8861_vm15, %v8877_v2, 0.0 }
0x4add   :  { %8880 = vadd.xlane.f32.xlu0 %v8879_v7 }
0x4b6a   :  { %v8881_v43 = vpop.xlane.xlu0 %8880 }
0x4b6b   :  { %v8882_v1 = vmul.f32 0.03125, %v8881_v43 }
0x4b6d   :  { %v8883_v31 = vadd.f32 1e-05, %v8882_v1 }
0x4b6f   :  { %10948 = vrsqrt.f32 %v8883_v31 }
0x4b79   :  { %v10949_v37 = vpop.eup %10948 }
0x4b7a   :  { %v8886_v49 = vrot.slane %v10949_v37, 1  ;;  %v8889_v26 = vmul.f32 %v10949_v37, %v8870_v3 }
0x4b7c   :  { %v8890_v15 = vmul.f32 %v8886_v49, %v8871_v28  ;;  %v8897_v29 = vmul.f32 %v9315_v51, %v8889_v26 }
0x4b7e   :  { %v8898_v46 = vmul.f32 %v9315_v51, %v8890_v15  ;;  %v8905_v52 = vadd.f32 %v9316_v63, %v8897_v29 }
0x4b80   :  { %v8906_v32 = vadd.f32 %v9316_v63, %v8898_v46 }
0x4b82   :  { %v8920_v50 = vrot.slane %v8906_v32, 7 }
0x4b84   :  { %v8921_v33 = vsel %vm8858_vm14, %v8920_v50, %v8905_v52 }
0x4b85   :  { %10302 = vmatmul.mubr.msk.f32.vlgmr.msra.gmra.mrb[98].mxu1 %vm1995_vm10, %v8921_v33 }
0x4c58   :  { %v8990_v44 = vpop.f32.mrb[98].mxu1 }
0x4c59   :  { %v8991_v41 = vadd.f32 %v9317_v39, %v8990_v44  ;;  %v10303_v27 = vpop.f32.mrb[99].mxu1 }
0x4c5b   :  { %8995 = vst.msk [vmem:[#allocation18] sm:$0x3] %vm8994_vm0, %v8991_v41 }
0x4c5c   :  { %11159 = shalt.err (!%p11156_p6)
}
0x4c5d   :  { %s11160_s6 = scalar_lea.hbm %s11422_s8, 32 }
0x4c5e   :  { %p11161_p7 = scmp.ne.s32.totalorder %s11422_s8, %s11160_s6  ;;  %p11164_p8 = scmp.lt.u32.totalorder %s11160_s6, %s11422_s8 }
0x4c60   :  { %p11166_p9 = pnand %p11164_p8, %p11161_p7 }
0x4c62   :  { %11169 = shalt.err (!%p11166_p9)
}
0x4c63   :  { %9005 = dma.vmem_to_hbm [thread:$0]  %s9003_s5, 32, %s11422_s8, [#allocation5]  }
0x4c64   :  { %11180 = dma.done.wait [#allocation5], 32  }
0x4c65   :  { %11181 = vsyncadd [#allocation5], 4294967264 }
0x4c66   :  { %9009 = vsyncpa [#allocation4], 1 }
0x4c67   :  { %9010 = vsyncpa [#allocation7], 1 }
0x4c68   :  { %9011 = vsyncpa [#allocation10], 1 }
0x4c69   :  { %9012 = vsyncpa [#allocation13], 1 }
0x4c6a   :  { %9013 = vsyncpa [#allocation16], 1 }
0x4c6b   :  { %9014 = vsyncpa [#allocation5], 1 }

</bundles_post_ra>
